<compile_context>
chip_gen: v7x
topology: tpu7x:2x2x1
jax: 0.10.0
libtpu: 0.0.40
codegen_flags: <defaults>
</compile_context>

<pallas_src>
import functools

import jax
import jax.numpy as jnp
from jax.experimental import pallas as pl
from jax.experimental.pallas import tpu as pltpu

EMB_DIM = 7          # embedding_dim
NUM_CLASSES = 7      # num_classes
CONTEXT_SIZE = 1     # context_size
HIDDEN = 64          # hidden_dim
X_CHANNELS = 2       # channels of x (inferred by LazyConv2d in PyTorch)
OUT_CH = 2           # final conv output channels
H, W = 9, 7          # spatial size implied by the view(..., 9, 7) + cat
HW = H * W           # 63 pixels per image
EPS = 1e-5           # BatchNorm2d default eps
SQRT_HALF = 0.7071067811865476


def _erf(x):
    # Abramowitz & Stegun 7.1.26 polynomial erf, |err| < 1.5e-7.
    # TODO(synk): switch to lax.erf once a Mosaic lowering for erf_p is guaranteed.
    sgn = jnp.where(x >= 0.0, 1.0, -1.0)
    ax = jnp.abs(x)
    t = 1.0 / (1.0 + 0.3275911 * ax)
    poly = ((((1.061405429 * t - 1.453152027) * t + 1.421413741) * t
             - 0.284496736) * t + 0.254829592) * t
    return sgn * (1.0 - poly * jnp.exp(-ax * ax))


def _gelu_exact(x):
    # PyTorch nn.GELU() default = exact erf-based GELU.
    return 0.5 * x * (1.0 + _erf(x * SQRT_HALF))


# ------------------------------ fused kernel ---------------------------------

def fused_kernel(ctx_ref, x_ref, w1_ref, w2_ref, eb_ref, wcm_ref, wc3p_ref,
                 o_ref, *, batch, n_ctx, n_xc):
    f32 = jnp.float32
    cin = n_xc + n_ctx

    # ---- packed parameter views (plain VMEM ref slices) ----
    b1 = eb_ref[0:1, :]                                        # (1, 64)
    b2 = eb_ref[1:2, 0:9 * NUM_CLASSES]                        # (1, 63)
    wbase = 9 * cin
    wc2 = wcm_ref[:, wbase:wbase + HIDDEN]                     # (64, 64)
    bc1 = wcm_ref[:, wbase + HIDDEN + 0:wbase + HIDDEN + 1]    # (64, 1)
    gamma = wcm_ref[:, wbase + HIDDEN + 1:wbase + HIDDEN + 2]
    beta = wcm_ref[:, wbase + HIDDEN + 2:wbase + HIDDEN + 3]
    bc2 = wcm_ref[:, wbase + HIDDEN + 3:wbase + HIDDEN + 4]
    wc3 = wc3p_ref[:, 0:HIDDEN]                                # (2, 64)
    bc3 = wc3p_ref[:, HIDDEN:HIDDEN + 1]                       # (2, 1)

    # ---- embedding MLP: one context row (b, c) at a time -> (1, 63) ----
    def embed_row(r):
        h = jnp.dot(ctx_ref[r:r + 1, :], w1_ref[...],
                    preferred_element_type=f32) + b1
        h = jnp.maximum(h, 0.0)
        e = jnp.dot(h, w2_ref[...], preferred_element_type=f32) + b2
        return jnp.maximum(e, 0.0)

    # channel rows per image (channel-major: row = one input channel, 63 lanes)
    z_rows = []
    for b in range(batch):
        rows = [x_ref[b * n_xc + c:b * n_xc + c + 1, :] for c in range(n_xc)]
        rows += [embed_row(b * n_ctx + c) for c in range(n_ctx)]
        z_rows.append(rows)

    # ---- 3x3 conv (pad=1) as 9 shifted matmuls (in-kernel im2col) ----
    # per-pixel (i, j) row vectors from lane iotas (no integer div/mod needed)
    pcol = jax.lax.broadcasted_iota(jnp.int32, (1, HW), 1)
    irow = jnp.zeros((1, HW), jnp.int32)
    for k in range(1, H):
        irow = irow + (pcol >= k * W).astype(jnp.int32)
    jrow = pcol - W * irow
    dmat = (jax.lax.broadcasted_iota(jnp.int32, (HW, HW), 0)
            - jax.lax.broadcasted_iota(jnp.int32, (HW, HW), 1))  # src - dst pixel

    taps = [(di, dj) for di in (-1, 0, 1) for dj in (-1, 0, 1)]
    accs = [None] * batch
    for t, (di, dj) in enumerate(taps):
        s = di * W + dj
        # M_t[q, p] = 1 iff destination pixel p reads source pixel q = p + s and
        # (i+di, j+dj) stays inside the H x W image (zero padding otherwise).
        hitf = jnp.where(dmat == s, 1.0, 0.0).astype(f32)          # (63, 63)
        valid = ((irow + di >= 0) & (irow + di < H)
                 & (jrow + dj >= 0) & (jrow + dj < W))             # (1, 63)
        m = hitf * jnp.where(valid, 1.0, 0.0).astype(f32)          # (63, 63)

        wcols = [wcm_ref[:, t * cin + c:t * cin + c + 1] for c in range(cin)]
        for b in range(batch):
            # W_t @ z_b as a sum of (64,1)*(1,63) broadcasts (VPU), then one
            # (64,63)@(63,63) MXU matmul applies the tap shift + boundary mask.
            u = wcols[0] * z_rows[b][0]
            for c in range(1, cin):
                u = u + wcols[c] * z_rows[b][c]
            contrib = jnp.dot(u, m, preferred_element_type=f32)
            accs[b] = contrib if accs[b] is None else accs[b] + contrib

    conv = [accs[b] + bc1 for b in range(batch)]                   # (64, 63) each

    # ---- BatchNorm2d, training mode: biased batch stats over all B*H*W ----
    ssum = jnp.zeros((HIDDEN, 1), f32)
    ssq = jnp.zeros((HIDDEN, 1), f32)
    for b in range(batch):
        ssum = ssum + jnp.sum(conv[b], axis=1, keepdims=True)       # lane reduce
        ssq = ssq + jnp.sum(conv[b] * conv[b], axis=1, keepdims=True)
    inv_n = 1.0 / float(batch * HW)
    mean = ssum * inv_n
    var = jnp.maximum(ssq * inv_n - mean * mean, 0.0)
    scale = gamma * jax.lax.rsqrt(var + EPS)                        # (64, 1)
    shiftv = beta - mean * scale                                    # (64, 1)

    # ---- GELU + 1x1 convs (+ReLU), store directly in final row-major layout --
    for b in range(batch):
        g = _gelu_exact(conv[b] * scale + shiftv)                   # (64, 63)
        a1 = jnp.maximum(
            jnp.dot(wc2, g, preferred_element_type=f32) + bc2, 0.0)
        y = jnp.maximum(
            jnp.dot(wc3, a1, preferred_element_type=f32) + bc3, 0.0)  # (2, 63)
        o_ref[b * OUT_CH:(b + 1) * OUT_CH, :] = y


# ------------------------------ wrapper --------------------------------------

def _vmem_spec():
    return pl.BlockSpec(memory_space=pltpu.MemorySpace.VMEM)


def pack_params(params):
    """Pack the many small tensors into a few kernel inputs (fewer DMAs)."""
    cin = params["wc1"].shape[1]
    # conv1 weight (64, Cin, 3, 3) -> (64, 9*Cin), column = tap*Cin + channel.
    wc1p = params["wc1"].transpose(0, 2, 3, 1).reshape(HIDDEN, 9 * cin)
    colv = jnp.stack(
        [params["bc1"], params["gamma"], params["beta"], params["bc2"]], axis=1)
    wcm = jnp.concatenate([wc1p, params["wc2"], colv], axis=1)     # (64, 9*Cin+68)
    wc3p = jnp.concatenate([params["wc3"], params["bc3"][:, None]], axis=1)  # (2,65)
    eb = jnp.stack([params["b1"],
                    jnp.pad(params["b2"], (0, HIDDEN - 9 * NUM_CLASSES))])   # (2,64)
    return dict(w1=params["w1"], w2=params["w2"], eb=eb, wcm=wcm, wc3p=wc3p)


def conditional_ar_net(x, context, packed):
    """x: (B, X_CHANNELS, 9, 7) NCHW; context: (B, CONTEXT_SIZE, 45, EMB_DIM)."""
    B = x.shape[0]
    n_xc = x.shape[1]
    cs = context.shape[1]
    cin = n_xc + cs

    ctx_flat = context.reshape(B * cs, 45 * EMB_DIM)   # free reshape (Flatten(2))
    x_rows = x.reshape(B * n_xc, HW)                   # free reshape to channel rows

    kernel = functools.partial(fused_kernel, batch=B, n_ctx=cs, n_xc=n_xc)

    flops = 2 * (B * cs * (45 * EMB_DIM * HIDDEN + HIDDEN * 9 * NUM_CLASSES)
                 + B * 9 * (cin * HW + HW * HW) * HIDDEN
                 + B * HW * (HIDDEN * HIDDEN + HIDDEN * OUT_CH))
    bytes_accessed = 4 * (ctx_flat.size + x_rows.size + packed["w1"].size
                          + packed["w2"].size + packed["eb"].size
                          + packed["wcm"].size + packed["wc3p"].size
                          + B * OUT_CH * HW)

    out = pl.pallas_call(
        kernel,
        out_shape=jax.ShapeDtypeStruct((B * OUT_CH, HW), jnp.float32),
        in_specs=[_vmem_spec()] * 7,
        out_specs=_vmem_spec(),
        compiler_params=pltpu.CompilerParams(vmem_limit_bytes=8 * 1024 * 1024),
        cost_estimate=pl.CostEstimate(flops=flops,
                                      transcendentals=B * HIDDEN * HW,
                                      bytes_accessed=bytes_accessed),
    )(ctx_flat, x_rows, packed["w1"], packed["w2"], packed["eb"],
      packed["wcm"], packed["wc3p"])

    # rows are already ordered (b, out_channel); only free reshapes remain.
    return out.reshape(B, OUT_CH, H, W)


# --------------------------- params / reference ------------------------------

def init_params(key):
    ks = jax.random.split(key, 12)

    def u(k, shape, scale):
        return jax.random.uniform(k, shape, jnp.float32, -1.0, 1.0) * scale

    cin = X_CHANNELS + CONTEXT_SIZE
    return dict(
        w1=u(ks[0], (45 * EMB_DIM, HIDDEN), 0.05),
        b1=u(ks[1], (HIDDEN,), 0.05),
        w2=u(ks[2], (HIDDEN, 9 * NUM_CLASSES), 0.1),
        b2=u(ks[3], (9 * NUM_CLASSES,), 0.1),
        wc1=u(ks[4], (HIDDEN, cin, 3, 3), 0.2),    # conv1 weight, OIHW
        bc1=u(ks[5], (HIDDEN,), 0.1),
        gamma=1.0 + u(ks[6], (HIDDEN,), 0.1),
        beta=u(ks[7], (HIDDEN,), 0.1),
        wc2=u(ks[8], (HIDDEN, HIDDEN), 0.1),       # 1x1 conv, (out, in)
        bc2=u(ks[9], (HIDDEN,), 0.1),
        wc3=u(ks[10], (OUT_CH, HIDDEN), 0.2),      # 1x1 conv, (out, in)
        bc3=u(ks[11], (OUT_CH,), 0.1),
    )


def reference(x, context, params):
    """Pure-JAX reference matching the PyTorch forward (training-mode BN)."""
    B, cs = context.shape[0], context.shape[1]
    ctx = context.reshape(B, cs, -1)
    h = jax.nn.relu(jnp.einsum("bcf,fh->bch", ctx, params["w1"]) + params["b1"])
    h = jax.nn.relu(jnp.einsum("bch,ho->bco", h, params["w2"]) + params["b2"])
    ctx_img = h.reshape(B, cs, 9, NUM_CLASSES)
    z = jnp.concatenate([x, ctx_img], axis=1)
    y = jax.lax.conv_general_dilated(
        z, params["wc1"], (1, 1), ((1, 1), (1, 1)),
        dimension_numbers=("NCHW", "OIHW", "NCHW"))
    y = y + params["bc1"][None, :, None, None]
    mean = y.mean(axis=(0, 2, 3), keepdims=True)
    var = ((y - mean) ** 2).mean(axis=(0, 2, 3), keepdims=True)
    y = (y - mean) / jnp.sqrt(var + EPS)
    y = y * params["gamma"][None, :, None, None] + params["beta"][None, :, None, None]
    y = jax.nn.gelu(y, approximate=False)
    y = jax.nn.relu(jnp.einsum("bchw,oc->bohw", y, params["wc2"])
                    + params["bc2"][None, :, None, None])
    y = jax.nn.relu(jnp.einsum("bchw,oc->bohw", y, params["wc3"])
                    + params["bc3"][None, :, None, None])
    return y


if __name__ == "__main__":
    key = jax.random.PRNGKey(0)
    kx, kc, kp = jax.random.split(key, 3)
    B = 2
    x = jax.random.normal(kx, (B, X_CHANNELS, H, W), jnp.float32)
    context = jax.random.normal(kc, (B, CONTEXT_SIZE, 45, EMB_DIM), jnp.float32)
    params = init_params(kp)
    packed = pack_params(params)   # one-time packing -> fewer kernel inputs/DMAs

    out = jax.jit(conditional_ar_net)(x, context, packed)
    out = jax.block_until_ready(out)

    ref = reference(x, context, params)
    assert out.shape == (B, OUT_CH, H, W), out.shape
    err = float(jnp.max(jnp.abs(out - ref)))
    assert err < 1e-3, f"max abs error {err}"
    print("KERNEL_OK")
</pallas_src>

<mosaic_0001>
module attributes {stable_mosaic.version = 11 : i64} {
  func.func @fused_kernel(%arg0: memref<2x315xf32, #tpu.memory_space<vmem>>, %arg1: memref<4x63xf32, #tpu.memory_space<vmem>>, %arg2: memref<315x64xf32, #tpu.memory_space<vmem>>, %arg3: memref<64x63xf32, #tpu.memory_space<vmem>>, %arg4: memref<2x64xf32, #tpu.memory_space<vmem>>, %arg5: memref<64x95xf32, #tpu.memory_space<vmem>>, %arg6: memref<2x65xf32, #tpu.memory_space<vmem>>, %arg7: memref<4x63xf32, #tpu.memory_space<vmem>>) attributes {dimension_semantics = [], scalar_prefetch = 0 : i64, scratch_operands = 0 : i64, tpu.core_type = #tpu.core_type<tc>} {
    %c0 = arith.constant 0 : index
    %c0_0 = arith.constant 0 : index
    %0 = vector.load %arg4[%c0, %c0_0] : memref<2x64xf32, #tpu.memory_space<vmem>>, vector<1x64xf32>
    %c1 = arith.constant 1 : index
    %c0_1 = arith.constant 0 : index
    %1 = vector.load %arg4[%c1, %c0_1] : memref<2x64xf32, #tpu.memory_space<vmem>>, vector<1x63xf32>
    %c0_2 = arith.constant 0 : index
    %c27 = arith.constant 27 : index
    %2 = vector.load %arg5[%c0_2, %c27] : memref<64x95xf32, #tpu.memory_space<vmem>>, vector<64x64xf32>
    %c0_3 = arith.constant 0 : index
    %c91 = arith.constant 91 : index
    %3 = vector.load %arg5[%c0_3, %c91] : memref<64x95xf32, #tpu.memory_space<vmem>>, vector<64x1xf32>
    %c0_4 = arith.constant 0 : index
    %c92 = arith.constant 92 : index
    %4 = vector.load %arg5[%c0_4, %c92] : memref<64x95xf32, #tpu.memory_space<vmem>>, vector<64x1xf32>
    %c0_5 = arith.constant 0 : index
    %c93 = arith.constant 93 : index
    %5 = vector.load %arg5[%c0_5, %c93] : memref<64x95xf32, #tpu.memory_space<vmem>>, vector<64x1xf32>
    %c0_6 = arith.constant 0 : index
    %c94 = arith.constant 94 : index
    %6 = vector.load %arg5[%c0_6, %c94] : memref<64x95xf32, #tpu.memory_space<vmem>>, vector<64x1xf32>
    %c0_7 = arith.constant 0 : index
    %c0_8 = arith.constant 0 : index
    %7 = vector.load %arg6[%c0_7, %c0_8] : memref<2x65xf32, #tpu.memory_space<vmem>>, vector<2x64xf32>
    %c0_9 = arith.constant 0 : index
    %c64 = arith.constant 64 : index
    %8 = vector.load %arg6[%c0_9, %c64] : memref<2x65xf32, #tpu.memory_space<vmem>>, vector<2x1xf32>
    %c0_10 = arith.constant 0 : index
    %c0_11 = arith.constant 0 : index
    %9 = vector.load %arg1[%c0_10, %c0_11] : memref<4x63xf32, #tpu.memory_space<vmem>>, vector<1x63xf32>
    %c1_12 = arith.constant 1 : index
    %c0_13 = arith.constant 0 : index
    %10 = vector.load %arg1[%c1_12, %c0_13] : memref<4x63xf32, #tpu.memory_space<vmem>>, vector<1x63xf32>
    %c0_14 = arith.constant 0 : index
    %c0_15 = arith.constant 0 : index
    %11 = vector.load %arg0[%c0_14, %c0_15] : memref<2x315xf32, #tpu.memory_space<vmem>>, vector<1x315xf32>
    %c0_16 = arith.constant 0 : index
    %c0_17 = arith.constant 0 : index
    %12 = vector.load %arg2[%c0_16, %c0_17] : memref<315x64xf32, #tpu.memory_space<vmem>>, vector<315x64xf32>
    %cst = arith.constant dense<0.000000e+00> : vector<1x64xf32>
    %13 = tpu.matmul %11, %12, %cst {dimension_numbers = #tpu.dot_dimension_numbers<[1], [0], [0], [1], [0, 0, 1, 1], [], []>} : vector<1x315xf32>, vector<315x64xf32>, vector<1x64xf32> -> vector<1x64xf32>
    %14 = arith.addf %13, %0 : vector<1x64xf32>
    %cst_18 = arith.constant 0.000000e+00 : f32
    %15 = vector.broadcast %cst_18 : f32 to vector<1x64xf32>
    %16 = arith.maximumf %14, %15 : vector<1x64xf32>
    %c0_19 = arith.constant 0 : index
    %c0_20 = arith.constant 0 : index
    %17 = vector.load %arg3[%c0_19, %c0_20] : memref<64x63xf32, #tpu.memory_space<vmem>>, vector<64x63xf32>
    %cst_21 = arith.constant dense<0.000000e+00> : vector<1x63xf32>
    %18 = tpu.matmul %16, %17, %cst_21 {dimension_numbers = #tpu.dot_dimension_numbers<[1], [0], [0], [1], [0, 0, 1, 1], [], []>} : vector<1x64xf32>, vector<64x63xf32>, vector<1x63xf32> -> vector<1x63xf32>
    %19 = arith.addf %18, %1 : vector<1x63xf32>
    %cst_22 = arith.constant 0.000000e+00 : f32
    %20 = vector.broadcast %cst_22 : f32 to vector<1x63xf32>
    %21 = arith.maximumf %19, %20 : vector<1x63xf32>
    %c2 = arith.constant 2 : index
    %c0_23 = arith.constant 0 : index
    %22 = vector.load %arg1[%c2, %c0_23] : memref<4x63xf32, #tpu.memory_space<vmem>>, vector<1x63xf32>
    %c3 = arith.constant 3 : index
    %c0_24 = arith.constant 0 : index
    %23 = vector.load %arg1[%c3, %c0_24] : memref<4x63xf32, #tpu.memory_space<vmem>>, vector<1x63xf32>
    %c1_25 = arith.constant 1 : index
    %c0_26 = arith.constant 0 : index
    %24 = vector.load %arg0[%c1_25, %c0_26] : memref<2x315xf32, #tpu.memory_space<vmem>>, vector<1x315xf32>
    %c0_27 = arith.constant 0 : index
    %c0_28 = arith.constant 0 : index
    %25 = vector.load %arg2[%c0_27, %c0_28] : memref<315x64xf32, #tpu.memory_space<vmem>>, vector<315x64xf32>
    %cst_29 = arith.constant dense<0.000000e+00> : vector<1x64xf32>
    %26 = tpu.matmul %24, %25, %cst_29 {dimension_numbers = #tpu.dot_dimension_numbers<[1], [0], [0], [1], [0, 0, 1, 1], [], []>} : vector<1x315xf32>, vector<315x64xf32>, vector<1x64xf32> -> vector<1x64xf32>
    %27 = arith.addf %26, %0 : vector<1x64xf32>
    %cst_30 = arith.constant 0.000000e+00 : f32
    %28 = vector.broadcast %cst_30 : f32 to vector<1x64xf32>
    %29 = arith.maximumf %27, %28 : vector<1x64xf32>
    %c0_31 = arith.constant 0 : index
    %c0_32 = arith.constant 0 : index
    %30 = vector.load %arg3[%c0_31, %c0_32] : memref<64x63xf32, #tpu.memory_space<vmem>>, vector<64x63xf32>
    %cst_33 = arith.constant dense<0.000000e+00> : vector<1x63xf32>
    %31 = tpu.matmul %29, %30, %cst_33 {dimension_numbers = #tpu.dot_dimension_numbers<[1], [0], [0], [1], [0, 0, 1, 1], [], []>} : vector<1x64xf32>, vector<64x63xf32>, vector<1x63xf32> -> vector<1x63xf32>
    %32 = arith.addf %31, %1 : vector<1x63xf32>
    %cst_34 = arith.constant 0.000000e+00 : f32
    %33 = vector.broadcast %cst_34 : f32 to vector<1x63xf32>
    %34 = arith.maximumf %32, %33 : vector<1x63xf32>
    %35 = tpu.iota {dimensions = array<i32: 1>} : vector<1x63xi32>
    %c0_i32 = arith.constant 0 : i32
    %36 = vector.broadcast %c0_i32 : i32 to vector<1x63xi32>
    %c7_i32 = arith.constant 7 : i32
    %37 = vector.broadcast %c7_i32 : i32 to vector<1x63xi32>
    %38 = arith.cmpi sge, %35, %37 : vector<1x63xi32>
    %39 = arith.extui %38 : vector<1x63xi1> to vector<1x63xi32>
    %40 = arith.addi %36, %39 : vector<1x63xi32>
    %c14_i32 = arith.constant 14 : i32
    %41 = vector.broadcast %c14_i32 : i32 to vector<1x63xi32>
    %42 = arith.cmpi sge, %35, %41 : vector<1x63xi32>
    %43 = arith.extui %42 : vector<1x63xi1> to vector<1x63xi32>
    %44 = arith.addi %40, %43 : vector<1x63xi32>
    %c21_i32 = arith.constant 21 : i32
    %45 = vector.broadcast %c21_i32 : i32 to vector<1x63xi32>
    %46 = arith.cmpi sge, %35, %45 : vector<1x63xi32>
    %47 = arith.extui %46 : vector<1x63xi1> to vector<1x63xi32>
    %48 = arith.addi %44, %47 : vector<1x63xi32>
    %c28_i32 = arith.constant 28 : i32
    %49 = vector.broadcast %c28_i32 : i32 to vector<1x63xi32>
    %50 = arith.cmpi sge, %35, %49 : vector<1x63xi32>
    %51 = arith.extui %50 : vector<1x63xi1> to vector<1x63xi32>
    %52 = arith.addi %48, %51 : vector<1x63xi32>
    %c35_i32 = arith.constant 35 : i32
    %53 = vector.broadcast %c35_i32 : i32 to vector<1x63xi32>
    %54 = arith.cmpi sge, %35, %53 : vector<1x63xi32>
    %55 = arith.extui %54 : vector<1x63xi1> to vector<1x63xi32>
    %56 = arith.addi %52, %55 : vector<1x63xi32>
    %c42_i32 = arith.constant 42 : i32
    %57 = vector.broadcast %c42_i32 : i32 to vector<1x63xi32>
    %58 = arith.cmpi sge, %35, %57 : vector<1x63xi32>
    %59 = arith.extui %58 : vector<1x63xi1> to vector<1x63xi32>
    %60 = arith.addi %56, %59 : vector<1x63xi32>
    %c49_i32 = arith.constant 49 : i32
    %61 = vector.broadcast %c49_i32 : i32 to vector<1x63xi32>
    %62 = arith.cmpi sge, %35, %61 : vector<1x63xi32>
    %63 = arith.extui %62 : vector<1x63xi1> to vector<1x63xi32>
    %64 = arith.addi %60, %63 : vector<1x63xi32>
    %c56_i32 = arith.constant 56 : i32
    %65 = vector.broadcast %c56_i32 : i32 to vector<1x63xi32>
    %66 = arith.cmpi sge, %35, %65 : vector<1x63xi32>
    %67 = arith.extui %66 : vector<1x63xi1> to vector<1x63xi32>
    %68 = arith.addi %64, %67 : vector<1x63xi32>
    %c7_i32_35 = arith.constant 7 : i32
    %69 = vector.broadcast %c7_i32_35 : i32 to vector<1x63xi32>
    %70 = arith.muli %69, %68 : vector<1x63xi32>
    %71 = arith.subi %35, %70 : vector<1x63xi32>
    %72 = tpu.iota {dimensions = array<i32: 0>} : vector<63x63xi32>
    %73 = tpu.iota {dimensions = array<i32: 1>} : vector<63x63xi32>
    %74 = arith.subi %72, %73 : vector<63x63xi32>
    %c-8_i32 = arith.constant -8 : i32
    %75 = vector.broadcast %c-8_i32 : i32 to vector<63x63xi32>
    %76 = arith.cmpi eq, %74, %75 : vector<63x63xi32>
    %cst_36 = arith.constant 1.000000e+00 : f32
    %cst_37 = arith.constant 0.000000e+00 : f32
    %77 = vector.broadcast %cst_36 : f32 to vector<63x63xf32>
    %78 = vector.broadcast %cst_37 : f32 to vector<63x63xf32>
    %79 = arith.select %76, %77, %78 : vector<63x63xi1>, vector<63x63xf32>
    %c-1_i32 = arith.constant -1 : i32
    %80 = vector.broadcast %c-1_i32 : i32 to vector<1x63xi32>
    %81 = arith.addi %68, %80 : vector<1x63xi32>
    %c0_i32_38 = arith.constant 0 : i32
    %82 = vector.broadcast %c0_i32_38 : i32 to vector<1x63xi32>
    %83 = arith.cmpi sge, %81, %82 : vector<1x63xi32>
    %c-1_i32_39 = arith.constant -1 : i32
    %84 = vector.broadcast %c-1_i32_39 : i32 to vector<1x63xi32>
    %85 = arith.addi %68, %84 : vector<1x63xi32>
    %c9_i32 = arith.constant 9 : i32
    %86 = vector.broadcast %c9_i32 : i32 to vector<1x63xi32>
    %87 = arith.cmpi slt, %85, %86 : vector<1x63xi32>
    %88 = arith.andi %83, %87 : vector<1x63xi1>
    %c-1_i32_40 = arith.constant -1 : i32
    %89 = vector.broadcast %c-1_i32_40 : i32 to vector<1x63xi32>
    %90 = arith.addi %71, %89 : vector<1x63xi32>
    %c0_i32_41 = arith.constant 0 : i32
    %91 = vector.broadcast %c0_i32_41 : i32 to vector<1x63xi32>
    %92 = arith.cmpi sge, %90, %91 : vector<1x63xi32>
    %93 = arith.andi %88, %92 : vector<1x63xi1>
    %c-1_i32_42 = arith.constant -1 : i32
    %94 = vector.broadcast %c-1_i32_42 : i32 to vector<1x63xi32>
    %95 = arith.addi %71, %94 : vector<1x63xi32>
    %c7_i32_43 = arith.constant 7 : i32
    %96 = vector.broadcast %c7_i32_43 : i32 to vector<1x63xi32>
    %97 = arith.cmpi slt, %95, %96 : vector<1x63xi32>
    %98 = arith.andi %93, %97 : vector<1x63xi1>
    %cst_44 = arith.constant 1.000000e+00 : f32
    %cst_45 = arith.constant 0.000000e+00 : f32
    %99 = vector.broadcast %cst_44 : f32 to vector<1x63xf32>
    %100 = vector.broadcast %cst_45 : f32 to vector<1x63xf32>
    %101 = arith.select %98, %99, %100 : vector<1x63xi1>, vector<1x63xf32>
    %102 = vector.broadcast %101 : vector<1x63xf32> to vector<63x63xf32>
    %103 = arith.mulf %79, %102 : vector<63x63xf32>
    %c0_46 = arith.constant 0 : index
    %c0_47 = arith.constant 0 : index
    %104 = vector.load %arg5[%c0_46, %c0_47] : memref<64x95xf32, #tpu.memory_space<vmem>>, vector<64x1xf32>
    %c0_48 = arith.constant 0 : index
    %c1_49 = arith.constant 1 : index
    %105 = vector.load %arg5[%c0_48, %c1_49] : memref<64x95xf32, #tpu.memory_space<vmem>>, vector<64x1xf32>
    %c0_50 = arith.constant 0 : index
    %c2_51 = arith.constant 2 : index
    %106 = vector.load %arg5[%c0_50, %c2_51] : memref<64x95xf32, #tpu.memory_space<vmem>>, vector<64x1xf32>
    %107 = vector.broadcast %104 : vector<64x1xf32> to vector<64x63xf32>
    %108 = vector.broadcast %9 : vector<1x63xf32> to vector<64x63xf32>
    %109 = arith.mulf %107, %108 : vector<64x63xf32>
    %110 = vector.broadcast %105 : vector<64x1xf32> to vector<64x63xf32>
    %111 = vector.broadcast %10 : vector<1x63xf32> to vector<64x63xf32>
    %112 = arith.mulf %110, %111 : vector<64x63xf32>
    %113 = arith.addf %109, %112 : vector<64x63xf32>
    %114 = vector.broadcast %106 : vector<64x1xf32> to vector<64x63xf32>
    %115 = vector.broadcast %21 : vector<1x63xf32> to vector<64x63xf32>
    %116 = arith.mulf %114, %115 : vector<64x63xf32>
    %117 = arith.addf %113, %116 : vector<64x63xf32>
    %cst_52 = arith.constant dense<0.000000e+00> : vector<64x63xf32>
    %118 = tpu.matmul %117, %103, %cst_52 {dimension_numbers = #tpu.dot_dimension_numbers<[1], [0], [0], [1], [0, 0, 1, 1], [], []>} : vector<64x63xf32>, vector<63x63xf32>, vector<64x63xf32> -> vector<64x63xf32>
    %119 = vector.broadcast %104 : vector<64x1xf32> to vector<64x63xf32>
    %120 = vector.broadcast %22 : vector<1x63xf32> to vector<64x63xf32>
    %121 = arith.mulf %119, %120 : vector<64x63xf32>
    %122 = vector.broadcast %105 : vector<64x1xf32> to vector<64x63xf32>
    %123 = vector.broadcast %23 : vector<1x63xf32> to vector<64x63xf32>
    %124 = arith.mulf %122, %123 : vector<64x63xf32>
    %125 = arith.addf %121, %124 : vector<64x63xf32>
    %126 = vector.broadcast %106 : vector<64x1xf32> to vector<64x63xf32>
    %127 = vector.broadcast %34 : vector<1x63xf32> to vector<64x63xf32>
    %128 = arith.mulf %126, %127 : vector<64x63xf32>
    %129 = arith.addf %125, %128 : vector<64x63xf32>
    %cst_53 = arith.constant dense<0.000000e+00> : vector<64x63xf32>
    %130 = tpu.matmul %129, %103, %cst_53 {dimension_numbers = #tpu.dot_dimension_numbers<[1], [0], [0], [1], [0, 0, 1, 1], [], []>} : vector<64x63xf32>, vector<63x63xf32>, vector<64x63xf32> -> vector<64x63xf32>
    %c-7_i32 = arith.constant -7 : i32
    %131 = vector.broadcast %c-7_i32 : i32 to vector<63x63xi32>
    %132 = arith.cmpi eq, %74, %131 : vector<63x63xi32>
    %cst_54 = arith.constant 1.000000e+00 : f32
    %cst_55 = arith.constant 0.000000e+00 : f32
    %133 = vector.broadcast %cst_54 : f32 to vector<63x63xf32>
    %134 = vector.broadcast %cst_55 : f32 to vector<63x63xf32>
    %135 = arith.select %132, %133, %134 : vector<63x63xi1>, vector<63x63xf32>
    %c-1_i32_56 = arith.constant -1 : i32
    %136 = vector.broadcast %c-1_i32_56 : i32 to vector<1x63xi32>
    %137 = arith.addi %68, %136 : vector<1x63xi32>
    %c0_i32_57 = arith.constant 0 : i32
    %138 = vector.broadcast %c0_i32_57 : i32 to vector<1x63xi32>
    %139 = arith.cmpi sge, %137, %138 : vector<1x63xi32>
    %c-1_i32_58 = arith.constant -1 : i32
    %140 = vector.broadcast %c-1_i32_58 : i32 to vector<1x63xi32>
    %141 = arith.addi %68, %140 : vector<1x63xi32>
    %c9_i32_59 = arith.constant 9 : i32
    %142 = vector.broadcast %c9_i32_59 : i32 to vector<1x63xi32>
    %143 = arith.cmpi slt, %141, %142 : vector<1x63xi32>
    %144 = arith.andi %139, %143 : vector<1x63xi1>
    %c0_i32_60 = arith.constant 0 : i32
    %145 = vector.broadcast %c0_i32_60 : i32 to vector<1x63xi32>
    %146 = arith.addi %71, %145 : vector<1x63xi32>
    %c0_i32_61 = arith.constant 0 : i32
    %147 = vector.broadcast %c0_i32_61 : i32 to vector<1x63xi32>
    %148 = arith.cmpi sge, %146, %147 : vector<1x63xi32>
    %149 = arith.andi %144, %148 : vector<1x63xi1>
    %c0_i32_62 = arith.constant 0 : i32
    %150 = vector.broadcast %c0_i32_62 : i32 to vector<1x63xi32>
    %151 = arith.addi %71, %150 : vector<1x63xi32>
    %c7_i32_63 = arith.constant 7 : i32
    %152 = vector.broadcast %c7_i32_63 : i32 to vector<1x63xi32>
    %153 = arith.cmpi slt, %151, %152 : vector<1x63xi32>
    %154 = arith.andi %149, %153 : vector<1x63xi1>
    %cst_64 = arith.constant 1.000000e+00 : f32
    %cst_65 = arith.constant 0.000000e+00 : f32
    %155 = vector.broadcast %cst_64 : f32 to vector<1x63xf32>
    %156 = vector.broadcast %cst_65 : f32 to vector<1x63xf32>
    %157 = arith.select %154, %155, %156 : vector<1x63xi1>, vector<1x63xf32>
    %158 = vector.broadcast %157 : vector<1x63xf32> to vector<63x63xf32>
    %159 = arith.mulf %135, %158 : vector<63x63xf32>
    %c0_66 = arith.constant 0 : index
    %c3_67 = arith.constant 3 : index
    %160 = vector.load %arg5[%c0_66, %c3_67] : memref<64x95xf32, #tpu.memory_space<vmem>>, vector<64x1xf32>
    %c0_68 = arith.constant 0 : index
    %c4 = arith.constant 4 : index
    %161 = vector.load %arg5[%c0_68, %c4] : memref<64x95xf32, #tpu.memory_space<vmem>>, vector<64x1xf32>
    %c0_69 = arith.constant 0 : index
    %c5 = arith.constant 5 : index
    %162 = vector.load %arg5[%c0_69, %c5] : memref<64x95xf32, #tpu.memory_space<vmem>>, vector<64x1xf32>
    %163 = vector.broadcast %160 : vector<64x1xf32> to vector<64x63xf32>
    %164 = vector.broadcast %9 : vector<1x63xf32> to vector<64x63xf32>
    %165 = arith.mulf %163, %164 : vector<64x63xf32>
    %166 = vector.broadcast %161 : vector<64x1xf32> to vector<64x63xf32>
    %167 = vector.broadcast %10 : vector<1x63xf32> to vector<64x63xf32>
    %168 = arith.mulf %166, %167 : vector<64x63xf32>
    %169 = arith.addf %165, %168 : vector<64x63xf32>
    %170 = vector.broadcast %162 : vector<64x1xf32> to vector<64x63xf32>
    %171 = vector.broadcast %21 : vector<1x63xf32> to vector<64x63xf32>
    %172 = arith.mulf %170, %171 : vector<64x63xf32>
    %173 = arith.addf %169, %172 : vector<64x63xf32>
    %cst_70 = arith.constant dense<0.000000e+00> : vector<64x63xf32>
    %174 = tpu.matmul %173, %159, %cst_70 {dimension_numbers = #tpu.dot_dimension_numbers<[1], [0], [0], [1], [0, 0, 1, 1], [], []>} : vector<64x63xf32>, vector<63x63xf32>, vector<64x63xf32> -> vector<64x63xf32>
    %175 = arith.addf %118, %174 : vector<64x63xf32>
    %176 = vector.broadcast %160 : vector<64x1xf32> to vector<64x63xf32>
    %177 = vector.broadcast %22 : vector<1x63xf32> to vector<64x63xf32>
    %178 = arith.mulf %176, %177 : vector<64x63xf32>
    %179 = vector.broadcast %161 : vector<64x1xf32> to vector<64x63xf32>
    %180 = vector.broadcast %23 : vector<1x63xf32> to vector<64x63xf32>
    %181 = arith.mulf %179, %180 : vector<64x63xf32>
    %182 = arith.addf %178, %181 : vector<64x63xf32>
    %183 = vector.broadcast %162 : vector<64x1xf32> to vector<64x63xf32>
    %184 = vector.broadcast %34 : vector<1x63xf32> to vector<64x63xf32>
    %185 = arith.mulf %183, %184 : vector<64x63xf32>
    %186 = arith.addf %182, %185 : vector<64x63xf32>
    %cst_71 = arith.constant dense<0.000000e+00> : vector<64x63xf32>
    %187 = tpu.matmul %186, %159, %cst_71 {dimension_numbers = #tpu.dot_dimension_numbers<[1], [0], [0], [1], [0, 0, 1, 1], [], []>} : vector<64x63xf32>, vector<63x63xf32>, vector<64x63xf32> -> vector<64x63xf32>
    %188 = arith.addf %130, %187 : vector<64x63xf32>
    %c-6_i32 = arith.constant -6 : i32
    %189 = vector.broadcast %c-6_i32 : i32 to vector<63x63xi32>
    %190 = arith.cmpi eq, %74, %189 : vector<63x63xi32>
    %cst_72 = arith.constant 1.000000e+00 : f32
    %cst_73 = arith.constant 0.000000e+00 : f32
    %191 = vector.broadcast %cst_72 : f32 to vector<63x63xf32>
    %192 = vector.broadcast %cst_73 : f32 to vector<63x63xf32>
    %193 = arith.select %190, %191, %192 : vector<63x63xi1>, vector<63x63xf32>
    %c-1_i32_74 = arith.constant -1 : i32
    %194 = vector.broadcast %c-1_i32_74 : i32 to vector<1x63xi32>
    %195 = arith.addi %68, %194 : vector<1x63xi32>
    %c0_i32_75 = arith.constant 0 : i32
    %196 = vector.broadcast %c0_i32_75 : i32 to vector<1x63xi32>
    %197 = arith.cmpi sge, %195, %196 : vector<1x63xi32>
    %c-1_i32_76 = arith.constant -1 : i32
    %198 = vector.broadcast %c-1_i32_76 : i32 to vector<1x63xi32>
    %199 = arith.addi %68, %198 : vector<1x63xi32>
    %c9_i32_77 = arith.constant 9 : i32
    %200 = vector.broadcast %c9_i32_77 : i32 to vector<1x63xi32>
    %201 = arith.cmpi slt, %199, %200 : vector<1x63xi32>
    %202 = arith.andi %197, %201 : vector<1x63xi1>
    %c1_i32 = arith.constant 1 : i32
    %203 = vector.broadcast %c1_i32 : i32 to vector<1x63xi32>
    %204 = arith.addi %71, %203 : vector<1x63xi32>
    %c0_i32_78 = arith.constant 0 : i32
    %205 = vector.broadcast %c0_i32_78 : i32 to vector<1x63xi32>
    %206 = arith.cmpi sge, %204, %205 : vector<1x63xi32>
    %207 = arith.andi %202, %206 : vector<1x63xi1>
    %c1_i32_79 = arith.constant 1 : i32
    %208 = vector.broadcast %c1_i32_79 : i32 to vector<1x63xi32>
    %209 = arith.addi %71, %208 : vector<1x63xi32>
    %c7_i32_80 = arith.constant 7 : i32
    %210 = vector.broadcast %c7_i32_80 : i32 to vector<1x63xi32>
    %211 = arith.cmpi slt, %209, %210 : vector<1x63xi32>
    %212 = arith.andi %207, %211 : vector<1x63xi1>
    %cst_81 = arith.constant 1.000000e+00 : f32
    %cst_82 = arith.constant 0.000000e+00 : f32
    %213 = vector.broadcast %cst_81 : f32 to vector<1x63xf32>
    %214 = vector.broadcast %cst_82 : f32 to vector<1x63xf32>
    %215 = arith.select %212, %213, %214 : vector<1x63xi1>, vector<1x63xf32>
    %216 = vector.broadcast %215 : vector<1x63xf32> to vector<63x63xf32>
    %217 = arith.mulf %193, %216 : vector<63x63xf32>
    %c0_83 = arith.constant 0 : index
    %c6 = arith.constant 6 : index
    %218 = vector.load %arg5[%c0_83, %c6] : memref<64x95xf32, #tpu.memory_space<vmem>>, vector<64x1xf32>
    %c0_84 = arith.constant 0 : index
    %c7 = arith.constant 7 : index
    %219 = vector.load %arg5[%c0_84, %c7] : memref<64x95xf32, #tpu.memory_space<vmem>>, vector<64x1xf32>
    %c0_85 = arith.constant 0 : index
    %c8 = arith.constant 8 : index
    %220 = vector.load %arg5[%c0_85, %c8] : memref<64x95xf32, #tpu.memory_space<vmem>>, vector<64x1xf32>
    %221 = vector.broadcast %218 : vector<64x1xf32> to vector<64x63xf32>
    %222 = vector.broadcast %9 : vector<1x63xf32> to vector<64x63xf32>
    %223 = arith.mulf %221, %222 : vector<64x63xf32>
    %224 = vector.broadcast %219 : vector<64x1xf32> to vector<64x63xf32>
    %225 = vector.broadcast %10 : vector<1x63xf32> to vector<64x63xf32>
    %226 = arith.mulf %224, %225 : vector<64x63xf32>
    %227 = arith.addf %223, %226 : vector<64x63xf32>
    %228 = vector.broadcast %220 : vector<64x1xf32> to vector<64x63xf32>
    %229 = vector.broadcast %21 : vector<1x63xf32> to vector<64x63xf32>
    %230 = arith.mulf %228, %229 : vector<64x63xf32>
    %231 = arith.addf %227, %230 : vector<64x63xf32>
    %cst_86 = arith.constant dense<0.000000e+00> : vector<64x63xf32>
    %232 = tpu.matmul %231, %217, %cst_86 {dimension_numbers = #tpu.dot_dimension_numbers<[1], [0], [0], [1], [0, 0, 1, 1], [], []>} : vector<64x63xf32>, vector<63x63xf32>, vector<64x63xf32> -> vector<64x63xf32>
    %233 = arith.addf %175, %232 : vector<64x63xf32>
    %234 = vector.broadcast %218 : vector<64x1xf32> to vector<64x63xf32>
    %235 = vector.broadcast %22 : vector<1x63xf32> to vector<64x63xf32>
    %236 = arith.mulf %234, %235 : vector<64x63xf32>
    %237 = vector.broadcast %219 : vector<64x1xf32> to vector<64x63xf32>
    %238 = vector.broadcast %23 : vector<1x63xf32> to vector<64x63xf32>
    %239 = arith.mulf %237, %238 : vector<64x63xf32>
    %240 = arith.addf %236, %239 : vector<64x63xf32>
    %241 = vector.broadcast %220 : vector<64x1xf32> to vector<64x63xf32>
    %242 = vector.broadcast %34 : vector<1x63xf32> to vector<64x63xf32>
    %243 = arith.mulf %241, %242 : vector<64x63xf32>
    %244 = arith.addf %240, %243 : vector<64x63xf32>
    %cst_87 = arith.constant dense<0.000000e+00> : vector<64x63xf32>
    %245 = tpu.matmul %244, %217, %cst_87 {dimension_numbers = #tpu.dot_dimension_numbers<[1], [0], [0], [1], [0, 0, 1, 1], [], []>} : vector<64x63xf32>, vector<63x63xf32>, vector<64x63xf32> -> vector<64x63xf32>
    %246 = arith.addf %188, %245 : vector<64x63xf32>
    %c-1_i32_88 = arith.constant -1 : i32
    %247 = vector.broadcast %c-1_i32_88 : i32 to vector<63x63xi32>
    %248 = arith.cmpi eq, %74, %247 : vector<63x63xi32>
    %cst_89 = arith.constant 1.000000e+00 : f32
    %cst_90 = arith.constant 0.000000e+00 : f32
    %249 = vector.broadcast %cst_89 : f32 to vector<63x63xf32>
    %250 = vector.broadcast %cst_90 : f32 to vector<63x63xf32>
    %251 = arith.select %248, %249, %250 : vector<63x63xi1>, vector<63x63xf32>
    %c0_i32_91 = arith.constant 0 : i32
    %252 = vector.broadcast %c0_i32_91 : i32 to vector<1x63xi32>
    %253 = arith.addi %68, %252 : vector<1x63xi32>
    %c0_i32_92 = arith.constant 0 : i32
    %254 = vector.broadcast %c0_i32_92 : i32 to vector<1x63xi32>
    %255 = arith.cmpi sge, %253, %254 : vector<1x63xi32>
    %c0_i32_93 = arith.constant 0 : i32
    %256 = vector.broadcast %c0_i32_93 : i32 to vector<1x63xi32>
    %257 = arith.addi %68, %256 : vector<1x63xi32>
    %c9_i32_94 = arith.constant 9 : i32
    %258 = vector.broadcast %c9_i32_94 : i32 to vector<1x63xi32>
    %259 = arith.cmpi slt, %257, %258 : vector<1x63xi32>
    %260 = arith.andi %255, %259 : vector<1x63xi1>
    %c-1_i32_95 = arith.constant -1 : i32
    %261 = vector.broadcast %c-1_i32_95 : i32 to vector<1x63xi32>
    %262 = arith.addi %71, %261 : vector<1x63xi32>
    %c0_i32_96 = arith.constant 0 : i32
    %263 = vector.broadcast %c0_i32_96 : i32 to vector<1x63xi32>
    %264 = arith.cmpi sge, %262, %263 : vector<1x63xi32>
    %265 = arith.andi %260, %264 : vector<1x63xi1>
    %c-1_i32_97 = arith.constant -1 : i32
    %266 = vector.broadcast %c-1_i32_97 : i32 to vector<1x63xi32>
    %267 = arith.addi %71, %266 : vector<1x63xi32>
    %c7_i32_98 = arith.constant 7 : i32
    %268 = vector.broadcast %c7_i32_98 : i32 to vector<1x63xi32>
    %269 = arith.cmpi slt, %267, %268 : vector<1x63xi32>
    %270 = arith.andi %265, %269 : vector<1x63xi1>
    %cst_99 = arith.constant 1.000000e+00 : f32
    %cst_100 = arith.constant 0.000000e+00 : f32
    %271 = vector.broadcast %cst_99 : f32 to vector<1x63xf32>
    %272 = vector.broadcast %cst_100 : f32 to vector<1x63xf32>
    %273 = arith.select %270, %271, %272 : vector<1x63xi1>, vector<1x63xf32>
    %274 = vector.broadcast %273 : vector<1x63xf32> to vector<63x63xf32>
    %275 = arith.mulf %251, %274 : vector<63x63xf32>
    %c0_101 = arith.constant 0 : index
    %c9 = arith.constant 9 : index
    %276 = vector.load %arg5[%c0_101, %c9] : memref<64x95xf32, #tpu.memory_space<vmem>>, vector<64x1xf32>
    %c0_102 = arith.constant 0 : index
    %c10 = arith.constant 10 : index
    %277 = vector.load %arg5[%c0_102, %c10] : memref<64x95xf32, #tpu.memory_space<vmem>>, vector<64x1xf32>
    %c0_103 = arith.constant 0 : index
    %c11 = arith.constant 11 : index
    %278 = vector.load %arg5[%c0_103, %c11] : memref<64x95xf32, #tpu.memory_space<vmem>>, vector<64x1xf32>
    %279 = vector.broadcast %276 : vector<64x1xf32> to vector<64x63xf32>
    %280 = vector.broadcast %9 : vector<1x63xf32> to vector<64x63xf32>
    %281 = arith.mulf %279, %280 : vector<64x63xf32>
    %282 = vector.broadcast %277 : vector<64x1xf32> to vector<64x63xf32>
    %283 = vector.broadcast %10 : vector<1x63xf32> to vector<64x63xf32>
    %284 = arith.mulf %282, %283 : vector<64x63xf32>
    %285 = arith.addf %281, %284 : vector<64x63xf32>
    %286 = vector.broadcast %278 : vector<64x1xf32> to vector<64x63xf32>
    %287 = vector.broadcast %21 : vector<1x63xf32> to vector<64x63xf32>
    %288 = arith.mulf %286, %287 : vector<64x63xf32>
    %289 = arith.addf %285, %288 : vector<64x63xf32>
    %cst_104 = arith.constant dense<0.000000e+00> : vector<64x63xf32>
    %290 = tpu.matmul %289, %275, %cst_104 {dimension_numbers = #tpu.dot_dimension_numbers<[1], [0], [0], [1], [0, 0, 1, 1], [], []>} : vector<64x63xf32>, vector<63x63xf32>, vector<64x63xf32> -> vector<64x63xf32>
    %291 = arith.addf %233, %290 : vector<64x63xf32>
    %292 = vector.broadcast %276 : vector<64x1xf32> to vector<64x63xf32>
    %293 = vector.broadcast %22 : vector<1x63xf32> to vector<64x63xf32>
    %294 = arith.mulf %292, %293 : vector<64x63xf32>
    %295 = vector.broadcast %277 : vector<64x1xf32> to vector<64x63xf32>
    %296 = vector.broadcast %23 : vector<1x63xf32> to vector<64x63xf32>
    %297 = arith.mulf %295, %296 : vector<64x63xf32>
    %298 = arith.addf %294, %297 : vector<64x63xf32>
    %299 = vector.broadcast %278 : vector<64x1xf32> to vector<64x63xf32>
    %300 = vector.broadcast %34 : vector<1x63xf32> to vector<64x63xf32>
    %301 = arith.mulf %299, %300 : vector<64x63xf32>
    %302 = arith.addf %298, %301 : vector<64x63xf32>
    %cst_105 = arith.constant dense<0.000000e+00> : vector<64x63xf32>
    %303 = tpu.matmul %302, %275, %cst_105 {dimension_numbers = #tpu.dot_dimension_numbers<[1], [0], [0], [1], [0, 0, 1, 1], [], []>} : vector<64x63xf32>, vector<63x63xf32>, vector<64x63xf32> -> vector<64x63xf32>
    %304 = arith.addf %246, %303 : vector<64x63xf32>
    %c0_i32_106 = arith.constant 0 : i32
    %305 = vector.broadcast %c0_i32_106 : i32 to vector<63x63xi32>
    %306 = arith.cmpi eq, %74, %305 : vector<63x63xi32>
    %cst_107 = arith.constant 1.000000e+00 : f32
    %cst_108 = arith.constant 0.000000e+00 : f32
    %307 = vector.broadcast %cst_107 : f32 to vector<63x63xf32>
    %308 = vector.broadcast %cst_108 : f32 to vector<63x63xf32>
    %309 = arith.select %306, %307, %308 : vector<63x63xi1>, vector<63x63xf32>
    %c0_i32_109 = arith.constant 0 : i32
    %310 = vector.broadcast %c0_i32_109 : i32 to vector<1x63xi32>
    %311 = arith.addi %68, %310 : vector<1x63xi32>
    %c0_i32_110 = arith.constant 0 : i32
    %312 = vector.broadcast %c0_i32_110 : i32 to vector<1x63xi32>
    %313 = arith.cmpi sge, %311, %312 : vector<1x63xi32>
    %c0_i32_111 = arith.constant 0 : i32
    %314 = vector.broadcast %c0_i32_111 : i32 to vector<1x63xi32>
    %315 = arith.addi %68, %314 : vector<1x63xi32>
    %c9_i32_112 = arith.constant 9 : i32
    %316 = vector.broadcast %c9_i32_112 : i32 to vector<1x63xi32>
    %317 = arith.cmpi slt, %315, %316 : vector<1x63xi32>
    %318 = arith.andi %313, %317 : vector<1x63xi1>
    %c0_i32_113 = arith.constant 0 : i32
    %319 = vector.broadcast %c0_i32_113 : i32 to vector<1x63xi32>
    %320 = arith.addi %71, %319 : vector<1x63xi32>
    %c0_i32_114 = arith.constant 0 : i32
    %321 = vector.broadcast %c0_i32_114 : i32 to vector<1x63xi32>
    %322 = arith.cmpi sge, %320, %321 : vector<1x63xi32>
    %323 = arith.andi %318, %322 : vector<1x63xi1>
    %c0_i32_115 = arith.constant 0 : i32
    %324 = vector.broadcast %c0_i32_115 : i32 to vector<1x63xi32>
    %325 = arith.addi %71, %324 : vector<1x63xi32>
    %c7_i32_116 = arith.constant 7 : i32
    %326 = vector.broadcast %c7_i32_116 : i32 to vector<1x63xi32>
    %327 = arith.cmpi slt, %325, %326 : vector<1x63xi32>
    %328 = arith.andi %323, %327 : vector<1x63xi1>
    %cst_117 = arith.constant 1.000000e+00 : f32
    %cst_118 = arith.constant 0.000000e+00 : f32
    %329 = vector.broadcast %cst_117 : f32 to vector<1x63xf32>
    %330 = vector.broadcast %cst_118 : f32 to vector<1x63xf32>
    %331 = arith.select %328, %329, %330 : vector<1x63xi1>, vector<1x63xf32>
    %332 = vector.broadcast %331 : vector<1x63xf32> to vector<63x63xf32>
    %333 = arith.mulf %309, %332 : vector<63x63xf32>
    %c0_119 = arith.constant 0 : index
    %c12 = arith.constant 12 : index
    %334 = vector.load %arg5[%c0_119, %c12] : memref<64x95xf32, #tpu.memory_space<vmem>>, vector<64x1xf32>
    %c0_120 = arith.constant 0 : index
    %c13 = arith.constant 13 : index
    %335 = vector.load %arg5[%c0_120, %c13] : memref<64x95xf32, #tpu.memory_space<vmem>>, vector<64x1xf32>
    %c0_121 = arith.constant 0 : index
    %c14 = arith.constant 14 : index
    %336 = vector.load %arg5[%c0_121, %c14] : memref<64x95xf32, #tpu.memory_space<vmem>>, vector<64x1xf32>
    %337 = vector.broadcast %334 : vector<64x1xf32> to vector<64x63xf32>
    %338 = vector.broadcast %9 : vector<1x63xf32> to vector<64x63xf32>
    %339 = arith.mulf %337, %338 : vector<64x63xf32>
    %340 = vector.broadcast %335 : vector<64x1xf32> to vector<64x63xf32>
    %341 = vector.broadcast %10 : vector<1x63xf32> to vector<64x63xf32>
    %342 = arith.mulf %340, %341 : vector<64x63xf32>
    %343 = arith.addf %339, %342 : vector<64x63xf32>
    %344 = vector.broadcast %336 : vector<64x1xf32> to vector<64x63xf32>
    %345 = vector.broadcast %21 : vector<1x63xf32> to vector<64x63xf32>
    %346 = arith.mulf %344, %345 : vector<64x63xf32>
    %347 = arith.addf %343, %346 : vector<64x63xf32>
    %cst_122 = arith.constant dense<0.000000e+00> : vector<64x63xf32>
    %348 = tpu.matmul %347, %333, %cst_122 {dimension_numbers = #tpu.dot_dimension_numbers<[1], [0], [0], [1], [0, 0, 1, 1], [], []>} : vector<64x63xf32>, vector<63x63xf32>, vector<64x63xf32> -> vector<64x63xf32>
    %349 = arith.addf %291, %348 : vector<64x63xf32>
    %350 = vector.broadcast %334 : vector<64x1xf32> to vector<64x63xf32>
    %351 = vector.broadcast %22 : vector<1x63xf32> to vector<64x63xf32>
    %352 = arith.mulf %350, %351 : vector<64x63xf32>
    %353 = vector.broadcast %335 : vector<64x1xf32> to vector<64x63xf32>
    %354 = vector.broadcast %23 : vector<1x63xf32> to vector<64x63xf32>
    %355 = arith.mulf %353, %354 : vector<64x63xf32>
    %356 = arith.addf %352, %355 : vector<64x63xf32>
    %357 = vector.broadcast %336 : vector<64x1xf32> to vector<64x63xf32>
    %358 = vector.broadcast %34 : vector<1x63xf32> to vector<64x63xf32>
    %359 = arith.mulf %357, %358 : vector<64x63xf32>
    %360 = arith.addf %356, %359 : vector<64x63xf32>
    %cst_123 = arith.constant dense<0.000000e+00> : vector<64x63xf32>
    %361 = tpu.matmul %360, %333, %cst_123 {dimension_numbers = #tpu.dot_dimension_numbers<[1], [0], [0], [1], [0, 0, 1, 1], [], []>} : vector<64x63xf32>, vector<63x63xf32>, vector<64x63xf32> -> vector<64x63xf32>
    %362 = arith.addf %304, %361 : vector<64x63xf32>
    %c1_i32_124 = arith.constant 1 : i32
    %363 = vector.broadcast %c1_i32_124 : i32 to vector<63x63xi32>
    %364 = arith.cmpi eq, %74, %363 : vector<63x63xi32>
    %cst_125 = arith.constant 1.000000e+00 : f32
    %cst_126 = arith.constant 0.000000e+00 : f32
    %365 = vector.broadcast %cst_125 : f32 to vector<63x63xf32>
    %366 = vector.broadcast %cst_126 : f32 to vector<63x63xf32>
    %367 = arith.select %364, %365, %366 : vector<63x63xi1>, vector<63x63xf32>
    %c0_i32_127 = arith.constant 0 : i32
    %368 = vector.broadcast %c0_i32_127 : i32 to vector<1x63xi32>
    %369 = arith.addi %68, %368 : vector<1x63xi32>
    %c0_i32_128 = arith.constant 0 : i32
    %370 = vector.broadcast %c0_i32_128 : i32 to vector<1x63xi32>
    %371 = arith.cmpi sge, %369, %370 : vector<1x63xi32>
    %c0_i32_129 = arith.constant 0 : i32
    %372 = vector.broadcast %c0_i32_129 : i32 to vector<1x63xi32>
    %373 = arith.addi %68, %372 : vector<1x63xi32>
    %c9_i32_130 = arith.constant 9 : i32
    %374 = vector.broadcast %c9_i32_130 : i32 to vector<1x63xi32>
    %375 = arith.cmpi slt, %373, %374 : vector<1x63xi32>
    %376 = arith.andi %371, %375 : vector<1x63xi1>
    %c1_i32_131 = arith.constant 1 : i32
    %377 = vector.broadcast %c1_i32_131 : i32 to vector<1x63xi32>
    %378 = arith.addi %71, %377 : vector<1x63xi32>
    %c0_i32_132 = arith.constant 0 : i32
    %379 = vector.broadcast %c0_i32_132 : i32 to vector<1x63xi32>
    %380 = arith.cmpi sge, %378, %379 : vector<1x63xi32>
    %381 = arith.andi %376, %380 : vector<1x63xi1>
    %c1_i32_133 = arith.constant 1 : i32
    %382 = vector.broadcast %c1_i32_133 : i32 to vector<1x63xi32>
    %383 = arith.addi %71, %382 : vector<1x63xi32>
    %c7_i32_134 = arith.constant 7 : i32
    %384 = vector.broadcast %c7_i32_134 : i32 to vector<1x63xi32>
    %385 = arith.cmpi slt, %383, %384 : vector<1x63xi32>
    %386 = arith.andi %381, %385 : vector<1x63xi1>
    %cst_135 = arith.constant 1.000000e+00 : f32
    %cst_136 = arith.constant 0.000000e+00 : f32
    %387 = vector.broadcast %cst_135 : f32 to vector<1x63xf32>
    %388 = vector.broadcast %cst_136 : f32 to vector<1x63xf32>
    %389 = arith.select %386, %387, %388 : vector<1x63xi1>, vector<1x63xf32>
    %390 = vector.broadcast %389 : vector<1x63xf32> to vector<63x63xf32>
    %391 = arith.mulf %367, %390 : vector<63x63xf32>
    %c0_137 = arith.constant 0 : index
    %c15 = arith.constant 15 : index
    %392 = vector.load %arg5[%c0_137, %c15] : memref<64x95xf32, #tpu.memory_space<vmem>>, vector<64x1xf32>
    %c0_138 = arith.constant 0 : index
    %c16 = arith.constant 16 : index
    %393 = vector.load %arg5[%c0_138, %c16] : memref<64x95xf32, #tpu.memory_space<vmem>>, vector<64x1xf32>
    %c0_139 = arith.constant 0 : index
    %c17 = arith.constant 17 : index
    %394 = vector.load %arg5[%c0_139, %c17] : memref<64x95xf32, #tpu.memory_space<vmem>>, vector<64x1xf32>
    %395 = vector.broadcast %392 : vector<64x1xf32> to vector<64x63xf32>
    %396 = vector.broadcast %9 : vector<1x63xf32> to vector<64x63xf32>
    %397 = arith.mulf %395, %396 : vector<64x63xf32>
    %398 = vector.broadcast %393 : vector<64x1xf32> to vector<64x63xf32>
    %399 = vector.broadcast %10 : vector<1x63xf32> to vector<64x63xf32>
    %400 = arith.mulf %398, %399 : vector<64x63xf32>
    %401 = arith.addf %397, %400 : vector<64x63xf32>
    %402 = vector.broadcast %394 : vector<64x1xf32> to vector<64x63xf32>
    %403 = vector.broadcast %21 : vector<1x63xf32> to vector<64x63xf32>
    %404 = arith.mulf %402, %403 : vector<64x63xf32>
    %405 = arith.addf %401, %404 : vector<64x63xf32>
    %cst_140 = arith.constant dense<0.000000e+00> : vector<64x63xf32>
    %406 = tpu.matmul %405, %391, %cst_140 {dimension_numbers = #tpu.dot_dimension_numbers<[1], [0], [0], [1], [0, 0, 1, 1], [], []>} : vector<64x63xf32>, vector<63x63xf32>, vector<64x63xf32> -> vector<64x63xf32>
    %407 = arith.addf %349, %406 : vector<64x63xf32>
    %408 = vector.broadcast %392 : vector<64x1xf32> to vector<64x63xf32>
    %409 = vector.broadcast %22 : vector<1x63xf32> to vector<64x63xf32>
    %410 = arith.mulf %408, %409 : vector<64x63xf32>
    %411 = vector.broadcast %393 : vector<64x1xf32> to vector<64x63xf32>
    %412 = vector.broadcast %23 : vector<1x63xf32> to vector<64x63xf32>
    %413 = arith.mulf %411, %412 : vector<64x63xf32>
    %414 = arith.addf %410, %413 : vector<64x63xf32>
    %415 = vector.broadcast %394 : vector<64x1xf32> to vector<64x63xf32>
    %416 = vector.broadcast %34 : vector<1x63xf32> to vector<64x63xf32>
    %417 = arith.mulf %415, %416 : vector<64x63xf32>
    %418 = arith.addf %414, %417 : vector<64x63xf32>
    %cst_141 = arith.constant dense<0.000000e+00> : vector<64x63xf32>
    %419 = tpu.matmul %418, %391, %cst_141 {dimension_numbers = #tpu.dot_dimension_numbers<[1], [0], [0], [1], [0, 0, 1, 1], [], []>} : vector<64x63xf32>, vector<63x63xf32>, vector<64x63xf32> -> vector<64x63xf32>
    %420 = arith.addf %362, %419 : vector<64x63xf32>
    %c6_i32 = arith.constant 6 : i32
    %421 = vector.broadcast %c6_i32 : i32 to vector<63x63xi32>
    %422 = arith.cmpi eq, %74, %421 : vector<63x63xi32>
    %cst_142 = arith.constant 1.000000e+00 : f32
    %cst_143 = arith.constant 0.000000e+00 : f32
    %423 = vector.broadcast %cst_142 : f32 to vector<63x63xf32>
    %424 = vector.broadcast %cst_143 : f32 to vector<63x63xf32>
    %425 = arith.select %422, %423, %424 : vector<63x63xi1>, vector<63x63xf32>
    %c1_i32_144 = arith.constant 1 : i32
    %426 = vector.broadcast %c1_i32_144 : i32 to vector<1x63xi32>
    %427 = arith.addi %68, %426 : vector<1x63xi32>
    %c0_i32_145 = arith.constant 0 : i32
    %428 = vector.broadcast %c0_i32_145 : i32 to vector<1x63xi32>
    %429 = arith.cmpi sge, %427, %428 : vector<1x63xi32>
    %c1_i32_146 = arith.constant 1 : i32
    %430 = vector.broadcast %c1_i32_146 : i32 to vector<1x63xi32>
    %431 = arith.addi %68, %430 : vector<1x63xi32>
    %c9_i32_147 = arith.constant 9 : i32
    %432 = vector.broadcast %c9_i32_147 : i32 to vector<1x63xi32>
    %433 = arith.cmpi slt, %431, %432 : vector<1x63xi32>
    %434 = arith.andi %429, %433 : vector<1x63xi1>
    %c-1_i32_148 = arith.constant -1 : i32
    %435 = vector.broadcast %c-1_i32_148 : i32 to vector<1x63xi32>
    %436 = arith.addi %71, %435 : vector<1x63xi32>
    %c0_i32_149 = arith.constant 0 : i32
    %437 = vector.broadcast %c0_i32_149 : i32 to vector<1x63xi32>
    %438 = arith.cmpi sge, %436, %437 : vector<1x63xi32>
    %439 = arith.andi %434, %438 : vector<1x63xi1>
    %c-1_i32_150 = arith.constant -1 : i32
    %440 = vector.broadcast %c-1_i32_150 : i32 to vector<1x63xi32>
    %441 = arith.addi %71, %440 : vector<1x63xi32>
    %c7_i32_151 = arith.constant 7 : i32
    %442 = vector.broadcast %c7_i32_151 : i32 to vector<1x63xi32>
    %443 = arith.cmpi slt, %441, %442 : vector<1x63xi32>
    %444 = arith.andi %439, %443 : vector<1x63xi1>
    %cst_152 = arith.constant 1.000000e+00 : f32
    %cst_153 = arith.constant 0.000000e+00 : f32
    %445 = vector.broadcast %cst_152 : f32 to vector<1x63xf32>
    %446 = vector.broadcast %cst_153 : f32 to vector<1x63xf32>
    %447 = arith.select %444, %445, %446 : vector<1x63xi1>, vector<1x63xf32>
    %448 = vector.broadcast %447 : vector<1x63xf32> to vector<63x63xf32>
    %449 = arith.mulf %425, %448 : vector<63x63xf32>
    %c0_154 = arith.constant 0 : index
    %c18 = arith.constant 18 : index
    %450 = vector.load %arg5[%c0_154, %c18] : memref<64x95xf32, #tpu.memory_space<vmem>>, vector<64x1xf32>
    %c0_155 = arith.constant 0 : index
    %c19 = arith.constant 19 : index
    %451 = vector.load %arg5[%c0_155, %c19] : memref<64x95xf32, #tpu.memory_space<vmem>>, vector<64x1xf32>
    %c0_156 = arith.constant 0 : index
    %c20 = arith.constant 20 : index
    %452 = vector.load %arg5[%c0_156, %c20] : memref<64x95xf32, #tpu.memory_space<vmem>>, vector<64x1xf32>
    %453 = vector.broadcast %450 : vector<64x1xf32> to vector<64x63xf32>
    %454 = vector.broadcast %9 : vector<1x63xf32> to vector<64x63xf32>
    %455 = arith.mulf %453, %454 : vector<64x63xf32>
    %456 = vector.broadcast %451 : vector<64x1xf32> to vector<64x63xf32>
    %457 = vector.broadcast %10 : vector<1x63xf32> to vector<64x63xf32>
    %458 = arith.mulf %456, %457 : vector<64x63xf32>
    %459 = arith.addf %455, %458 : vector<64x63xf32>
    %460 = vector.broadcast %452 : vector<64x1xf32> to vector<64x63xf32>
    %461 = vector.broadcast %21 : vector<1x63xf32> to vector<64x63xf32>
    %462 = arith.mulf %460, %461 : vector<64x63xf32>
    %463 = arith.addf %459, %462 : vector<64x63xf32>
    %cst_157 = arith.constant dense<0.000000e+00> : vector<64x63xf32>
    %464 = tpu.matmul %463, %449, %cst_157 {dimension_numbers = #tpu.dot_dimension_numbers<[1], [0], [0], [1], [0, 0, 1, 1], [], []>} : vector<64x63xf32>, vector<63x63xf32>, vector<64x63xf32> -> vector<64x63xf32>
    %465 = arith.addf %407, %464 : vector<64x63xf32>
    %466 = vector.broadcast %450 : vector<64x1xf32> to vector<64x63xf32>
    %467 = vector.broadcast %22 : vector<1x63xf32> to vector<64x63xf32>
    %468 = arith.mulf %466, %467 : vector<64x63xf32>
    %469 = vector.broadcast %451 : vector<64x1xf32> to vector<64x63xf32>
    %470 = vector.broadcast %23 : vector<1x63xf32> to vector<64x63xf32>
    %471 = arith.mulf %469, %470 : vector<64x63xf32>
    %472 = arith.addf %468, %471 : vector<64x63xf32>
    %473 = vector.broadcast %452 : vector<64x1xf32> to vector<64x63xf32>
    %474 = vector.broadcast %34 : vector<1x63xf32> to vector<64x63xf32>
    %475 = arith.mulf %473, %474 : vector<64x63xf32>
    %476 = arith.addf %472, %475 : vector<64x63xf32>
    %cst_158 = arith.constant dense<0.000000e+00> : vector<64x63xf32>
    %477 = tpu.matmul %476, %449, %cst_158 {dimension_numbers = #tpu.dot_dimension_numbers<[1], [0], [0], [1], [0, 0, 1, 1], [], []>} : vector<64x63xf32>, vector<63x63xf32>, vector<64x63xf32> -> vector<64x63xf32>
    %478 = arith.addf %420, %477 : vector<64x63xf32>
    %c7_i32_159 = arith.constant 7 : i32
    %479 = vector.broadcast %c7_i32_159 : i32 to vector<63x63xi32>
    %480 = arith.cmpi eq, %74, %479 : vector<63x63xi32>
    %cst_160 = arith.constant 1.000000e+00 : f32
    %cst_161 = arith.constant 0.000000e+00 : f32
    %481 = vector.broadcast %cst_160 : f32 to vector<63x63xf32>
    %482 = vector.broadcast %cst_161 : f32 to vector<63x63xf32>
    %483 = arith.select %480, %481, %482 : vector<63x63xi1>, vector<63x63xf32>
    %c1_i32_162 = arith.constant 1 : i32
    %484 = vector.broadcast %c1_i32_162 : i32 to vector<1x63xi32>
    %485 = arith.addi %68, %484 : vector<1x63xi32>
    %c0_i32_163 = arith.constant 0 : i32
    %486 = vector.broadcast %c0_i32_163 : i32 to vector<1x63xi32>
    %487 = arith.cmpi sge, %485, %486 : vector<1x63xi32>
    %c1_i32_164 = arith.constant 1 : i32
    %488 = vector.broadcast %c1_i32_164 : i32 to vector<1x63xi32>
    %489 = arith.addi %68, %488 : vector<1x63xi32>
    %c9_i32_165 = arith.constant 9 : i32
    %490 = vector.broadcast %c9_i32_165 : i32 to vector<1x63xi32>
    %491 = arith.cmpi slt, %489, %490 : vector<1x63xi32>
    %492 = arith.andi %487, %491 : vector<1x63xi1>
    %c0_i32_166 = arith.constant 0 : i32
    %493 = vector.broadcast %c0_i32_166 : i32 to vector<1x63xi32>
    %494 = arith.addi %71, %493 : vector<1x63xi32>
    %c0_i32_167 = arith.constant 0 : i32
    %495 = vector.broadcast %c0_i32_167 : i32 to vector<1x63xi32>
    %496 = arith.cmpi sge, %494, %495 : vector<1x63xi32>
    %497 = arith.andi %492, %496 : vector<1x63xi1>
    %c0_i32_168 = arith.constant 0 : i32
    %498 = vector.broadcast %c0_i32_168 : i32 to vector<1x63xi32>
    %499 = arith.addi %71, %498 : vector<1x63xi32>
    %c7_i32_169 = arith.constant 7 : i32
    %500 = vector.broadcast %c7_i32_169 : i32 to vector<1x63xi32>
    %501 = arith.cmpi slt, %499, %500 : vector<1x63xi32>
    %502 = arith.andi %497, %501 : vector<1x63xi1>
    %cst_170 = arith.constant 1.000000e+00 : f32
    %cst_171 = arith.constant 0.000000e+00 : f32
    %503 = vector.broadcast %cst_170 : f32 to vector<1x63xf32>
    %504 = vector.broadcast %cst_171 : f32 to vector<1x63xf32>
    %505 = arith.select %502, %503, %504 : vector<1x63xi1>, vector<1x63xf32>
    %506 = vector.broadcast %505 : vector<1x63xf32> to vector<63x63xf32>
    %507 = arith.mulf %483, %506 : vector<63x63xf32>
    %c0_172 = arith.constant 0 : index
    %c21 = arith.constant 21 : index
    %508 = vector.load %arg5[%c0_172, %c21] : memref<64x95xf32, #tpu.memory_space<vmem>>, vector<64x1xf32>
    %c0_173 = arith.constant 0 : index
    %c22 = arith.constant 22 : index
    %509 = vector.load %arg5[%c0_173, %c22] : memref<64x95xf32, #tpu.memory_space<vmem>>, vector<64x1xf32>
    %c0_174 = arith.constant 0 : index
    %c23 = arith.constant 23 : index
    %510 = vector.load %arg5[%c0_174, %c23] : memref<64x95xf32, #tpu.memory_space<vmem>>, vector<64x1xf32>
    %511 = vector.broadcast %508 : vector<64x1xf32> to vector<64x63xf32>
    %512 = vector.broadcast %9 : vector<1x63xf32> to vector<64x63xf32>
    %513 = arith.mulf %511, %512 : vector<64x63xf32>
    %514 = vector.broadcast %509 : vector<64x1xf32> to vector<64x63xf32>
    %515 = vector.broadcast %10 : vector<1x63xf32> to vector<64x63xf32>
    %516 = arith.mulf %514, %515 : vector<64x63xf32>
    %517 = arith.addf %513, %516 : vector<64x63xf32>
    %518 = vector.broadcast %510 : vector<64x1xf32> to vector<64x63xf32>
    %519 = vector.broadcast %21 : vector<1x63xf32> to vector<64x63xf32>
    %520 = arith.mulf %518, %519 : vector<64x63xf32>
    %521 = arith.addf %517, %520 : vector<64x63xf32>
    %cst_175 = arith.constant dense<0.000000e+00> : vector<64x63xf32>
    %522 = tpu.matmul %521, %507, %cst_175 {dimension_numbers = #tpu.dot_dimension_numbers<[1], [0], [0], [1], [0, 0, 1, 1], [], []>} : vector<64x63xf32>, vector<63x63xf32>, vector<64x63xf32> -> vector<64x63xf32>
    %523 = arith.addf %465, %522 : vector<64x63xf32>
    %524 = vector.broadcast %508 : vector<64x1xf32> to vector<64x63xf32>
    %525 = vector.broadcast %22 : vector<1x63xf32> to vector<64x63xf32>
    %526 = arith.mulf %524, %525 : vector<64x63xf32>
    %527 = vector.broadcast %509 : vector<64x1xf32> to vector<64x63xf32>
    %528 = vector.broadcast %23 : vector<1x63xf32> to vector<64x63xf32>
    %529 = arith.mulf %527, %528 : vector<64x63xf32>
    %530 = arith.addf %526, %529 : vector<64x63xf32>
    %531 = vector.broadcast %510 : vector<64x1xf32> to vector<64x63xf32>
    %532 = vector.broadcast %34 : vector<1x63xf32> to vector<64x63xf32>
    %533 = arith.mulf %531, %532 : vector<64x63xf32>
    %534 = arith.addf %530, %533 : vector<64x63xf32>
    %cst_176 = arith.constant dense<0.000000e+00> : vector<64x63xf32>
    %535 = tpu.matmul %534, %507, %cst_176 {dimension_numbers = #tpu.dot_dimension_numbers<[1], [0], [0], [1], [0, 0, 1, 1], [], []>} : vector<64x63xf32>, vector<63x63xf32>, vector<64x63xf32> -> vector<64x63xf32>
    %536 = arith.addf %478, %535 : vector<64x63xf32>
    %c8_i32 = arith.constant 8 : i32
    %537 = vector.broadcast %c8_i32 : i32 to vector<63x63xi32>
    %538 = arith.cmpi eq, %74, %537 : vector<63x63xi32>
    %cst_177 = arith.constant 1.000000e+00 : f32
    %cst_178 = arith.constant 0.000000e+00 : f32
    %539 = vector.broadcast %cst_177 : f32 to vector<63x63xf32>
    %540 = vector.broadcast %cst_178 : f32 to vector<63x63xf32>
    %541 = arith.select %538, %539, %540 : vector<63x63xi1>, vector<63x63xf32>
    %c1_i32_179 = arith.constant 1 : i32
    %542 = vector.broadcast %c1_i32_179 : i32 to vector<1x63xi32>
    %543 = arith.addi %68, %542 : vector<1x63xi32>
    %c0_i32_180 = arith.constant 0 : i32
    %544 = vector.broadcast %c0_i32_180 : i32 to vector<1x63xi32>
    %545 = arith.cmpi sge, %543, %544 : vector<1x63xi32>
    %c1_i32_181 = arith.constant 1 : i32
    %546 = vector.broadcast %c1_i32_181 : i32 to vector<1x63xi32>
    %547 = arith.addi %68, %546 : vector<1x63xi32>
    %c9_i32_182 = arith.constant 9 : i32
    %548 = vector.broadcast %c9_i32_182 : i32 to vector<1x63xi32>
    %549 = arith.cmpi slt, %547, %548 : vector<1x63xi32>
    %550 = arith.andi %545, %549 : vector<1x63xi1>
    %c1_i32_183 = arith.constant 1 : i32
    %551 = vector.broadcast %c1_i32_183 : i32 to vector<1x63xi32>
    %552 = arith.addi %71, %551 : vector<1x63xi32>
    %c0_i32_184 = arith.constant 0 : i32
    %553 = vector.broadcast %c0_i32_184 : i32 to vector<1x63xi32>
    %554 = arith.cmpi sge, %552, %553 : vector<1x63xi32>
    %555 = arith.andi %550, %554 : vector<1x63xi1>
    %c1_i32_185 = arith.constant 1 : i32
    %556 = vector.broadcast %c1_i32_185 : i32 to vector<1x63xi32>
    %557 = arith.addi %71, %556 : vector<1x63xi32>
    %c7_i32_186 = arith.constant 7 : i32
    %558 = vector.broadcast %c7_i32_186 : i32 to vector<1x63xi32>
    %559 = arith.cmpi slt, %557, %558 : vector<1x63xi32>
    %560 = arith.andi %555, %559 : vector<1x63xi1>
    %cst_187 = arith.constant 1.000000e+00 : f32
    %cst_188 = arith.constant 0.000000e+00 : f32
    %561 = vector.broadcast %cst_187 : f32 to vector<1x63xf32>
    %562 = vector.broadcast %cst_188 : f32 to vector<1x63xf32>
    %563 = arith.select %560, %561, %562 : vector<1x63xi1>, vector<1x63xf32>
    %564 = vector.broadcast %563 : vector<1x63xf32> to vector<63x63xf32>
    %565 = arith.mulf %541, %564 : vector<63x63xf32>
    %c0_189 = arith.constant 0 : index
    %c24 = arith.constant 24 : index
    %566 = vector.load %arg5[%c0_189, %c24] : memref<64x95xf32, #tpu.memory_space<vmem>>, vector<64x1xf32>
    %c0_190 = arith.constant 0 : index
    %c25 = arith.constant 25 : index
    %567 = vector.load %arg5[%c0_190, %c25] : memref<64x95xf32, #tpu.memory_space<vmem>>, vector<64x1xf32>
    %c0_191 = arith.constant 0 : index
    %c26 = arith.constant 26 : index
    %568 = vector.load %arg5[%c0_191, %c26] : memref<64x95xf32, #tpu.memory_space<vmem>>, vector<64x1xf32>
    %569 = vector.broadcast %566 : vector<64x1xf32> to vector<64x63xf32>
    %570 = vector.broadcast %9 : vector<1x63xf32> to vector<64x63xf32>
    %571 = arith.mulf %569, %570 : vector<64x63xf32>
    %572 = vector.broadcast %567 : vector<64x1xf32> to vector<64x63xf32>
    %573 = vector.broadcast %10 : vector<1x63xf32> to vector<64x63xf32>
    %574 = arith.mulf %572, %573 : vector<64x63xf32>
    %575 = arith.addf %571, %574 : vector<64x63xf32>
    %576 = vector.broadcast %568 : vector<64x1xf32> to vector<64x63xf32>
    %577 = vector.broadcast %21 : vector<1x63xf32> to vector<64x63xf32>
    %578 = arith.mulf %576, %577 : vector<64x63xf32>
    %579 = arith.addf %575, %578 : vector<64x63xf32>
    %cst_192 = arith.constant dense<0.000000e+00> : vector<64x63xf32>
    %580 = tpu.matmul %579, %565, %cst_192 {dimension_numbers = #tpu.dot_dimension_numbers<[1], [0], [0], [1], [0, 0, 1, 1], [], []>} : vector<64x63xf32>, vector<63x63xf32>, vector<64x63xf32> -> vector<64x63xf32>
    %581 = arith.addf %523, %580 : vector<64x63xf32>
    %582 = vector.broadcast %566 : vector<64x1xf32> to vector<64x63xf32>
    %583 = vector.broadcast %22 : vector<1x63xf32> to vector<64x63xf32>
    %584 = arith.mulf %582, %583 : vector<64x63xf32>
    %585 = vector.broadcast %567 : vector<64x1xf32> to vector<64x63xf32>
    %586 = vector.broadcast %23 : vector<1x63xf32> to vector<64x63xf32>
    %587 = arith.mulf %585, %586 : vector<64x63xf32>
    %588 = arith.addf %584, %587 : vector<64x63xf32>
    %589 = vector.broadcast %568 : vector<64x1xf32> to vector<64x63xf32>
    %590 = vector.broadcast %34 : vector<1x63xf32> to vector<64x63xf32>
    %591 = arith.mulf %589, %590 : vector<64x63xf32>
    %592 = arith.addf %588, %591 : vector<64x63xf32>
    %cst_193 = arith.constant dense<0.000000e+00> : vector<64x63xf32>
    %593 = tpu.matmul %592, %565, %cst_193 {dimension_numbers = #tpu.dot_dimension_numbers<[1], [0], [0], [1], [0, 0, 1, 1], [], []>} : vector<64x63xf32>, vector<63x63xf32>, vector<64x63xf32> -> vector<64x63xf32>
    %594 = arith.addf %536, %593 : vector<64x63xf32>
    %595 = vector.broadcast %3 : vector<64x1xf32> to vector<64x63xf32>
    %596 = arith.addf %581, %595 : vector<64x63xf32>
    %597 = vector.broadcast %3 : vector<64x1xf32> to vector<64x63xf32>
    %598 = arith.addf %594, %597 : vector<64x63xf32>
    %cst_194 = arith.constant 0.000000e+00 : f32
    %599 = vector.broadcast %cst_194 : f32 to vector<64x1xf32>
    %cst_195 = arith.constant 0.000000e+00 : f32
    %600 = vector.broadcast %cst_195 : f32 to vector<64x1xf32>
    %cst_196 = arith.constant dense<0.000000e+00> : vector<64xf32>
    %601 = vector.multi_reduction <add>, %596, %cst_196 [1] : vector<64x63xf32> to vector<64xf32>
    %602 = vector.shape_cast %601 : vector<64xf32> to vector<64x1xf32>
    %603 = arith.addf %599, %602 : vector<64x1xf32>
    %604 = arith.mulf %596, %596 : vector<64x63xf32>
    %cst_197 = arith.constant dense<0.000000e+00> : vector<64xf32>
    %605 = vector.multi_reduction <add>, %604, %cst_197 [1] : vector<64x63xf32> to vector<64xf32>
    %606 = vector.shape_cast %605 : vector<64xf32> to vector<64x1xf32>
    %607 = arith.addf %600, %606 : vector<64x1xf32>
    %cst_198 = arith.constant dense<0.000000e+00> : vector<64xf32>
    %608 = vector.multi_reduction <add>, %598, %cst_198 [1] : vector<64x63xf32> to vector<64xf32>
    %609 = vector.shape_cast %608 : vector<64xf32> to vector<64x1xf32>
    %610 = arith.addf %603, %609 : vector<64x1xf32>
    %611 = arith.mulf %598, %598 : vector<64x63xf32>
    %cst_199 = arith.constant dense<0.000000e+00> : vector<64xf32>
    %612 = vector.multi_reduction <add>, %611, %cst_199 [1] : vector<64x63xf32> to vector<64xf32>
    %613 = vector.shape_cast %612 : vector<64xf32> to vector<64x1xf32>
    %614 = arith.addf %607, %613 : vector<64x1xf32>
    %cst_200 = arith.constant 0.00793650839 : f32
    %615 = vector.broadcast %cst_200 : f32 to vector<64x1xf32>
    %616 = arith.mulf %610, %615 : vector<64x1xf32>
    %cst_201 = arith.constant 0.00793650839 : f32
    %617 = vector.broadcast %cst_201 : f32 to vector<64x1xf32>
    %618 = arith.mulf %614, %617 : vector<64x1xf32>
    %619 = arith.mulf %616, %616 : vector<64x1xf32>
    %620 = arith.subf %618, %619 : vector<64x1xf32>
    %cst_202 = arith.constant 0.000000e+00 : f32
    %621 = vector.broadcast %cst_202 : f32 to vector<64x1xf32>
    %622 = arith.maximumf %620, %621 : vector<64x1xf32>
    %cst_203 = arith.constant 9.99999974E-6 : f32
    %623 = vector.broadcast %cst_203 : f32 to vector<64x1xf32>
    %624 = arith.addf %622, %623 : vector<64x1xf32>
    %625 = math.rsqrt %624 : vector<64x1xf32>
    %626 = arith.mulf %4, %625 : vector<64x1xf32>
    %627 = arith.mulf %616, %626 : vector<64x1xf32>
    %628 = arith.subf %5, %627 : vector<64x1xf32>
    %629 = vector.broadcast %626 : vector<64x1xf32> to vector<64x63xf32>
    %630 = arith.mulf %596, %629 : vector<64x63xf32>
    %631 = vector.broadcast %628 : vector<64x1xf32> to vector<64x63xf32>
    %632 = arith.addf %630, %631 : vector<64x63xf32>
    %cst_204 = arith.constant 5.000000e-01 : f32
    %633 = vector.broadcast %cst_204 : f32 to vector<64x63xf32>
    %634 = arith.mulf %633, %632 : vector<64x63xf32>
    %cst_205 = arith.constant 0.707106769 : f32
    %635 = vector.broadcast %cst_205 : f32 to vector<64x63xf32>
    %636 = arith.mulf %632, %635 : vector<64x63xf32>
    %cst_206 = arith.constant 0.000000e+00 : f32
    %637 = vector.broadcast %cst_206 : f32 to vector<64x63xf32>
    %638 = arith.cmpf oge, %636, %637 : vector<64x63xf32>
    %cst_207 = arith.constant 1.000000e+00 : f32
    %cst_208 = arith.constant -1.000000e+00 : f32
    %639 = vector.broadcast %cst_207 : f32 to vector<64x63xf32>
    %640 = vector.broadcast %cst_208 : f32 to vector<64x63xf32>
    %641 = arith.select %638, %639, %640 : vector<64x63xi1>, vector<64x63xf32>
    %642 = math.absf %636 : vector<64x63xf32>
    %cst_209 = arith.constant 0.327591091 : f32
    %643 = vector.broadcast %cst_209 : f32 to vector<64x63xf32>
    %644 = arith.mulf %643, %642 : vector<64x63xf32>
    %cst_210 = arith.constant 1.000000e+00 : f32
    %645 = vector.broadcast %cst_210 : f32 to vector<64x63xf32>
    %646 = arith.addf %645, %644 : vector<64x63xf32>
    %cst_211 = arith.constant 1.000000e+00 : f32
    %647 = vector.broadcast %cst_211 : f32 to vector<64x63xf32>
    %648 = arith.divf %647, %646 : vector<64x63xf32>
    %cst_212 = arith.constant 1.06140542 : f32
    %649 = vector.broadcast %cst_212 : f32 to vector<64x63xf32>
    %650 = arith.mulf %649, %648 : vector<64x63xf32>
    %cst_213 = arith.constant 1.45315206 : f32
    %651 = vector.broadcast %cst_213 : f32 to vector<64x63xf32>
    %652 = arith.subf %650, %651 : vector<64x63xf32>
    %653 = arith.mulf %652, %648 : vector<64x63xf32>
    %cst_214 = arith.constant 1.42141378 : f32
    %654 = vector.broadcast %cst_214 : f32 to vector<64x63xf32>
    %655 = arith.addf %653, %654 : vector<64x63xf32>
    %656 = arith.mulf %655, %648 : vector<64x63xf32>
    %cst_215 = arith.constant 0.284496725 : f32
    %657 = vector.broadcast %cst_215 : f32 to vector<64x63xf32>
    %658 = arith.subf %656, %657 : vector<64x63xf32>
    %659 = arith.mulf %658, %648 : vector<64x63xf32>
    %cst_216 = arith.constant 0.254829586 : f32
    %660 = vector.broadcast %cst_216 : f32 to vector<64x63xf32>
    %661 = arith.addf %659, %660 : vector<64x63xf32>
    %662 = arith.mulf %661, %648 : vector<64x63xf32>
    %cst_217 = arith.constant 0.000000e+00 : f32
    %663 = vector.broadcast %cst_217 : f32 to vector<64x63xf32>
    %664 = arith.subf %663, %642 : vector<64x63xf32>
    %665 = arith.mulf %664, %642 : vector<64x63xf32>
    %666 = math.exp %665 : vector<64x63xf32>
    %667 = arith.mulf %662, %666 : vector<64x63xf32>
    %cst_218 = arith.constant 1.000000e+00 : f32
    %668 = vector.broadcast %cst_218 : f32 to vector<64x63xf32>
    %669 = arith.subf %668, %667 : vector<64x63xf32>
    %670 = arith.mulf %641, %669 : vector<64x63xf32>
    %cst_219 = arith.constant 1.000000e+00 : f32
    %671 = vector.broadcast %cst_219 : f32 to vector<64x63xf32>
    %672 = arith.addf %671, %670 : vector<64x63xf32>
    %673 = arith.mulf %634, %672 : vector<64x63xf32>
    %cst_220 = arith.constant dense<0.000000e+00> : vector<64x63xf32>
    %674 = tpu.matmul %2, %673, %cst_220 {dimension_numbers = #tpu.dot_dimension_numbers<[1], [0], [0], [1], [0, 0, 1, 1], [], []>} : vector<64x64xf32>, vector<64x63xf32>, vector<64x63xf32> -> vector<64x63xf32>
    %675 = vector.broadcast %6 : vector<64x1xf32> to vector<64x63xf32>
    %676 = arith.addf %674, %675 : vector<64x63xf32>
    %cst_221 = arith.constant 0.000000e+00 : f32
    %677 = vector.broadcast %cst_221 : f32 to vector<64x63xf32>
    %678 = arith.maximumf %676, %677 : vector<64x63xf32>
    %cst_222 = arith.constant dense<0.000000e+00> : vector<2x63xf32>
    %679 = tpu.matmul %7, %678, %cst_222 {dimension_numbers = #tpu.dot_dimension_numbers<[1], [0], [0], [1], [0, 0, 1, 1], [], []>} : vector<2x64xf32>, vector<64x63xf32>, vector<2x63xf32> -> vector<2x63xf32>
    %680 = vector.broadcast %8 : vector<2x1xf32> to vector<2x63xf32>
    %681 = arith.addf %679, %680 : vector<2x63xf32>
    %cst_223 = arith.constant 0.000000e+00 : f32
    %682 = vector.broadcast %cst_223 : f32 to vector<2x63xf32>
    %683 = arith.maximumf %681, %682 : vector<2x63xf32>
    %c0_224 = arith.constant 0 : index
    %c0_225 = arith.constant 0 : index
    %684 = vector.load %arg7[%c0_224, %c0_225] : memref<4x63xf32, #tpu.memory_space<vmem>>, vector<2x63xf32>
    tpu.vector_store %arg7[%c0_224, %c0_225], %683 {strides = array<i32>} : memref<4x63xf32, #tpu.memory_space<vmem>>, vector<2x63xf32>,
    %685 = vector.broadcast %626 : vector<64x1xf32> to vector<64x63xf32>
    %686 = arith.mulf %598, %685 : vector<64x63xf32>
    %687 = vector.broadcast %628 : vector<64x1xf32> to vector<64x63xf32>
    %688 = arith.addf %686, %687 : vector<64x63xf32>
    %cst_226 = arith.constant 5.000000e-01 : f32
    %689 = vector.broadcast %cst_226 : f32 to vector<64x63xf32>
    %690 = arith.mulf %689, %688 : vector<64x63xf32>
    %cst_227 = arith.constant 0.707106769 : f32
    %691 = vector.broadcast %cst_227 : f32 to vector<64x63xf32>
    %692 = arith.mulf %688, %691 : vector<64x63xf32>
    %cst_228 = arith.constant 0.000000e+00 : f32
    %693 = vector.broadcast %cst_228 : f32 to vector<64x63xf32>
    %694 = arith.cmpf oge, %692, %693 : vector<64x63xf32>
    %cst_229 = arith.constant 1.000000e+00 : f32
    %cst_230 = arith.constant -1.000000e+00 : f32
    %695 = vector.broadcast %cst_229 : f32 to vector<64x63xf32>
    %696 = vector.broadcast %cst_230 : f32 to vector<64x63xf32>
    %697 = arith.select %694, %695, %696 : vector<64x63xi1>, vector<64x63xf32>
    %698 = math.absf %692 : vector<64x63xf32>
    %cst_231 = arith.constant 0.327591091 : f32
    %699 = vector.broadcast %cst_231 : f32 to vector<64x63xf32>
    %700 = arith.mulf %699, %698 : vector<64x63xf32>
    %cst_232 = arith.constant 1.000000e+00 : f32
    %701 = vector.broadcast %cst_232 : f32 to vector<64x63xf32>
    %702 = arith.addf %701, %700 : vector<64x63xf32>
    %cst_233 = arith.constant 1.000000e+00 : f32
    %703 = vector.broadcast %cst_233 : f32 to vector<64x63xf32>
    %704 = arith.divf %703, %702 : vector<64x63xf32>
    %cst_234 = arith.constant 1.06140542 : f32
    %705 = vector.broadcast %cst_234 : f32 to vector<64x63xf32>
    %706 = arith.mulf %705, %704 : vector<64x63xf32>
    %cst_235 = arith.constant 1.45315206 : f32
    %707 = vector.broadcast %cst_235 : f32 to vector<64x63xf32>
    %708 = arith.subf %706, %707 : vector<64x63xf32>
    %709 = arith.mulf %708, %704 : vector<64x63xf32>
    %cst_236 = arith.constant 1.42141378 : f32
    %710 = vector.broadcast %cst_236 : f32 to vector<64x63xf32>
    %711 = arith.addf %709, %710 : vector<64x63xf32>
    %712 = arith.mulf %711, %704 : vector<64x63xf32>
    %cst_237 = arith.constant 0.284496725 : f32
    %713 = vector.broadcast %cst_237 : f32 to vector<64x63xf32>
    %714 = arith.subf %712, %713 : vector<64x63xf32>
    %715 = arith.mulf %714, %704 : vector<64x63xf32>
    %cst_238 = arith.constant 0.254829586 : f32
    %716 = vector.broadcast %cst_238 : f32 to vector<64x63xf32>
    %717 = arith.addf %715, %716 : vector<64x63xf32>
    %718 = arith.mulf %717, %704 : vector<64x63xf32>
    %cst_239 = arith.constant 0.000000e+00 : f32
    %719 = vector.broadcast %cst_239 : f32 to vector<64x63xf32>
    %720 = arith.subf %719, %698 : vector<64x63xf32>
    %721 = arith.mulf %720, %698 : vector<64x63xf32>
    %722 = math.exp %721 : vector<64x63xf32>
    %723 = arith.mulf %718, %722 : vector<64x63xf32>
    %cst_240 = arith.constant 1.000000e+00 : f32
    %724 = vector.broadcast %cst_240 : f32 to vector<64x63xf32>
    %725 = arith.subf %724, %723 : vector<64x63xf32>
    %726 = arith.mulf %697, %725 : vector<64x63xf32>
    %cst_241 = arith.constant 1.000000e+00 : f32
    %727 = vector.broadcast %cst_241 : f32 to vector<64x63xf32>
    %728 = arith.addf %727, %726 : vector<64x63xf32>
    %729 = arith.mulf %690, %728 : vector<64x63xf32>
    %cst_242 = arith.constant dense<0.000000e+00> : vector<64x63xf32>
    %730 = tpu.matmul %2, %729, %cst_242 {dimension_numbers = #tpu.dot_dimension_numbers<[1], [0], [0], [1], [0, 0, 1, 1], [], []>} : vector<64x64xf32>, vector<64x63xf32>, vector<64x63xf32> -> vector<64x63xf32>
    %731 = vector.broadcast %6 : vector<64x1xf32> to vector<64x63xf32>
    %732 = arith.addf %730, %731 : vector<64x63xf32>
    %cst_243 = arith.constant 0.000000e+00 : f32
    %733 = vector.broadcast %cst_243 : f32 to vector<64x63xf32>
    %734 = arith.maximumf %732, %733 : vector<64x63xf32>
    %cst_244 = arith.constant dense<0.000000e+00> : vector<2x63xf32>
    %735 = tpu.matmul %7, %734, %cst_244 {dimension_numbers = #tpu.dot_dimension_numbers<[1], [0], [0], [1], [0, 0, 1, 1], [], []>} : vector<2x64xf32>, vector<64x63xf32>, vector<2x63xf32> -> vector<2x63xf32>
    %736 = vector.broadcast %8 : vector<2x1xf32> to vector<2x63xf32>
    %737 = arith.addf %735, %736 : vector<2x63xf32>
    %cst_245 = arith.constant 0.000000e+00 : f32
    %738 = vector.broadcast %cst_245 : f32 to vector<2x63xf32>
    %739 = arith.maximumf %737, %738 : vector<2x63xf32>
    %c2_246 = arith.constant 2 : index
    %c0_247 = arith.constant 0 : index
    %740 = vector.load %arg7[%c2_246, %c0_247] : memref<4x63xf32, #tpu.memory_space<vmem>>, vector<2x63xf32>
    tpu.vector_store %arg7[%c2_246, %c0_247], %739 {strides = array<i32>} : memref<4x63xf32, #tpu.memory_space<vmem>>, vector<2x63xf32>,
    return
  }
}

</mosaic_0001>

<bundles_post_ra>
// kernel: conditional_ar_net.1
= control target key start
LH: loop header
LB: loop body
LE: loop exit
PB: predicated region body
PF: predicated region fallthrough
CT: control target
= control target key end

     0   :  { %v8497_v0 = vmov 3   ;;  %v12559_v4 = vmov 0.0|0.0   ;;  %v8499_v9 = vmov 4   ;;  %vm8500_vm0 = vmmov 0   ;;  %s8530_s8 = smov 1   ;;  %s8532_s21 = smov 101   ;;  %s12533_s5 = inlined_call_operand.vmem [shape: f32[64,95], index: 5, kind: input, shape index: {}]   ;;  %s12534_s2 = inlined_call_operand.vmem [shape: f32[315,64], index: 2, kind: input, shape index: {}]   ;;  %s12535_s0 = inlined_call_operand.vmem [shape: f32[2,315], index: 0, kind: input, shape index: {}]   ;;  %s12536_s3 = inlined_call_operand.vmem [shape: f32[64,63], index: 3, kind: input, shape index: {}]   ;;  %s12537_s4 = inlined_call_operand.vmem [shape: f32[2,64], index: 4, kind: input, shape index: {}]   ;;  %s12538_s1 = inlined_call_operand.vmem [shape: f32[4,63], index: 1, kind: input, shape index: {}]   ;;  %s12539_s6 = inlined_call_operand.vmem [shape: f32[2,65], index: 6, kind: input, shape index: {}]   ;;  %s12540_s7 = inlined_call_operand.vmem [shape: f32[4,63], index: 7, kind: output, shape index: {}]  }
   0x1   :  { %8245 = vset.pattern.permute.xlu1 %v8497_v0  ;;  %v8580_v1 = vld [vmem:[%s12533_s5 + $0x8] sm:$0xff]  ;;  %v56_v2 = vld [vmem:[%s12534_s2 + $0x80] sm:$0xff]  ;;  %7614 = vmatprep.subr.bf16.mxu1 %v12559_v4  ;;  %v58_v8 = vld [vmem:[%s12534_s2 + $0x90] sm:$0xff]  ;;  %v12557_v14 = vmov 0.0   ;;  %v12551_v19 = vlaneseq  ;;  %v8502_v33 = vmov 5   ;;  %vm98_vm1 = vcmask 1042432  }
   0x2   :  { %v57_v3 = vld [vmem:[%s12534_s2 + $0x88] sm:$0xff]  ;;  %882 = vperm.xlu1 %8245, %v8580_v1   ;;  %v40_v6 = vld [vmem:[%s12534_s2] sm:$0xff]  ;;  %8243 = vset.pattern.permute.xlu0 %v8499_v9  ;;  %v59_v11 = vld [vmem:[%s12534_s2 + $0x98] sm:$0xff]  ;;  %vm8503_vm2 = vmmov 1   ;;  %vm95_vm4 = vcmask 482304   ;;  %vm251_vm5 = vcmask 523264  }
   0x3   :  { %v8590_v5 = vpack.c.bf16 %v57_v3, %v56_v2  ;;  %v41_v7 = vld [vmem:[%s12534_s2 + $0x8] sm:$0xff]  ;;  %v42_v12 = vld [vmem:[%s12534_s2 + $0x10] sm:$0xff]  ;;  %v43_v13 = vld [vmem:[%s12534_s2 + $0x18] sm:$0xff]  ;;  %6924 = vmatprep.mubr.msk.f32.mxu1 %vm8500_vm0, %v12557_v14  ;;  %v8616_v15 = vpack.c.bf16 %v59_v11, %v58_v8  ;;  %v8651_v26 = vshrl.u32 %v12551_v19, 7 }
   0x4   :  { %v8602_v10 = vpack.c.bf16 %v41_v7, %v40_v6  ;;  %v8621_v16 = vld [vmem:[%s12533_s5] sm:$0xff]  ;;  %v61_v18 = vld [vmem:[%s12534_s2 + $0xa8] sm:$0xff]  ;;  %v8630_v20 = vpack.c.bf16 %v43_v13, %v42_v12  ;;  %v62_v24 = vld [vmem:[%s12534_s2 + $0xb0] sm:$0xff] }
   0x5   :  { %7583 = vmatprep.subr.bf16.mxu0 %v8590_v5  ;;  %v60_v17 = vld [vmem:[%s12534_s2 + $0xa0] sm:$0xff]  ;;  %918 = vperm.xlu0 %8243, %v8621_v16   ;;  %v45_v23 = vld [vmem:[%s12534_s2 + $0x28] sm:$0xff]  ;;  %v63_v25 = vld [vmem:[%s12534_s2 + $0xb8] sm:$0xff]  ;;  %v87_v39 = vsub.s32 1, %v8651_v26  ;;  %v12556_v12 = vsub.s32 2, %v8651_v26 }
   0x6   :  { %7585 = vmatpush3.bf16.msra.mxu0 %v8602_v10  ;;  %8246 = vset.pattern.permute.xlu1 %v8499_v9  ;;  %v8635_v21 = vpack.c.bf16 %v61_v18, %v60_v17  ;;  %v44_v22 = vld [vmem:[%s12534_s2 + $0x20] sm:$0xff]  ;;  %v46_v28 = vld [vmem:[%s12534_s2 + $0x30] sm:$0xff]  ;;  %v8661_v29 = vpack.c.bf16 %v63_v25, %v62_v24  ;;  %v47_v30 = vld [vmem:[%s12534_s2 + $0x38] sm:$0xff] }
   0x7   :  { %7587 = vmatprep.subr.bf16.mxu0 %v8616_v15  ;;  %922 = vperm.xlu1 %8246, %v8580_v1   ;;  %v8654_v27 = vpack.c.bf16 %v45_v23, %v44_v22  ;;  %v72_v31 = vld [vmem:[%s12534_s2 + $0x100] sm:$0xff]  ;;  %v73_v32 = vld [vmem:[%s12534_s2 + $0x108] sm:$0xff]  ;;  %v74_v37 = vld [vmem:[%s12534_s2 + $0x110] sm:$0xff]  ;;  %v8696_v41 = vpack.c.bf16 %v47_v30, %v46_v28  ;;  %v8825_v28 = vsub.s32 0, %v8651_v26 }
   0x8   :  { %v64_v34 = vld [vmem:[%s12534_s2 + $0xc0] sm:$0xff]  ;;  %v65_v35 = vld [vmem:[%s12534_s2 + $0xc8] sm:$0xff]  ;;  %v8680_v36 = vpack.c.bf16 %v73_v32, %v72_v31  ;;  %v75_v38 = vld [vmem:[%s12534_s2 + $0x118] sm:$0xff] }
   0x9   :  { %8244 = vset.pattern.permute.xlu0 %v8497_v0  ;;  %v8694_v40 = vld [vmem:[%s12533_s5 + $0x10] sm:$0xff]  ;;  %v8700_v42 = vpack.c.bf16 %v65_v35, %v64_v34  ;;  %v48_v43 = vld [vmem:[%s12534_s2 + $0x40] sm:$0xff]  ;;  %v49_v44 = vld [vmem:[%s12534_s2 + $0x48] sm:$0xff]  ;;  %v8714_v46 = vpack.c.bf16 %v75_v38, %v74_v37  ;;  %12880 = vst [vmem:[#allocation2_spill] sm:$0xff] %v8825_v28 }
   0xa   :  { %7589 = vmatpush3.bf16.msra.mxu0 %v8630_v20  ;;  %878 = vperm.xlu0 %8244, %v8621_v16   ;;  %v8711_v45 = vld [vmem:[%s12533_s5 + $0x18] sm:$0xff]  ;;  %v66_v47 = vld [vmem:[%s12534_s2 + $0xd0] sm:$0xff]  ;;  %v8725_v49 = vld [vmem:[%s12535_s0] ss:$2 sm:$0x7]  ;;  %v8740_v53 = vpack.c.bf16 %v49_v44, %v48_v43 }
   0xb   :  { %7591 = vmatprep.subr.bf16.mxu0 %v8635_v21  ;;  %8247 = vset.pattern.permute.xlu1 %v8502_v33  ;;  %v67_v48 = vld [vmem:[%s12534_s2 + $0xd8] sm:$0xff]  ;;  %v76_v50 = vld [vmem:[%s12534_s2 + $0x120] sm:$0xff]  ;;  %v77_v51 = vld [vmem:[%s12534_s2 + $0x128] sm:$0xff]  ;;  %v88_v52 = vrot.slane %v8725_v49, %v87_v39  ;;  %v92_v25 = vrot.slane %v8725_v49, %v12556_v12  ;;  %v84_v31 = vrot.slane %v8725_v49, %v8825_v28  ;;  %v12561_v49 = vmov 11  }
   0xc   :  { %966 = vperm.xlu1 %8247, %v8621_v16   ;;  %7616 = vmatpush3.bf16.msra.mxu1 %v8680_v36  ;;  %v8743_v54 = vpack.c.bf16 %v67_v48, %v66_v47  ;;  %v50_v55 = vld [vmem:[%s12534_s2 + $0x50] sm:$0xff]  ;;  %v51_v56 = vld [vmem:[%s12534_s2 + $0x58] sm:$0xff]  ;;  %v68_v57 = vld [vmem:[%s12534_s2 + $0xe0] sm:$0xff]  ;;  %v8759_v59 = vpack.c.bf16 %v77_v51, %v76_v50 }
   0xd   :  { %7617 = vmatprep.subr.bf16.mxu1 %v12559_v4  ;;  %v69_v58 = vld [vmem:[%s12534_s2 + $0xe8] sm:$0xff]  ;;  %166 = vmatprep.mubr.f32.mxu0 %v88_v52  ;;  %v78_v61 = vld [vmem:[%s12534_s2 + $0x130] sm:$0xff]  ;;  %v79_v62 = vld [vmem:[%s12534_s2 + $0x138] sm:$0x7]  ;;  %v8775_v63 = vpack.c.bf16 %v51_v56, %v50_v55  ;;  %v12554_v56 = vmov 12  }
   0xe   :  { %7593 = vmatpush3.bf16.msra.mxu0 %v8654_v27  ;;  %890 = vperm.xlu0 %8244, %v8711_v45   ;;  %v8764_v60 = vld [vmem:[%s12533_s5 + $0x28] sm:$0xff]  ;;  %v8780_v2 = vld [vmem:[%s12533_s5 + $0x38] sm:$0xff]  ;;  %v8784_v3 = vpack.c.bf16 %v69_v58, %v68_v57  ;;  %v52_v6 = vld [vmem:[%s12534_s2 + $0x60] sm:$0xff]  ;;  %v8800_v13 = vpack.c.bf16 %v79_v62, %v78_v61  ;;  %v8512_v57 = vmov 7  }
   0xf   :  { %7595 = vmatprep.subr.bf16.mxu0 %v8661_v29  ;;  %v53_v7 = vld [vmem:[%s12534_s2 + $0x68] sm:$0xff]  ;;  %v70_v8 = vld [vmem:[%s12534_s2 + $0xf0] sm:$0xff]  ;;  %v71_v11 = vld [vmem:[%s12534_s2 + $0xf8] sm:$0xff] }
  0x10   :  { %8248 = vset.pattern.permute.xlu1 %v8497_v0  ;;  %7619 = vmatpush3.bf16.msra.mxu1 %v8714_v46  ;;  %vm8804_vm3 = vmpackc.low %vm98_vm1, %vm8503_vm2  ;;  %v7608_v18 = vpack.c.bf16 %v53_v7, %v52_v6  ;;  %v7610_v22 = vpack.c.bf16 %v71_v11, %v70_v8  ;;  %v54_v23 = vld [vmem:[%s12534_s2 + $0x70] sm:$0xff]  ;;  %v55_v24 = vld [vmem:[%s12534_s2 + $0x78] sm:$0xff]  ;;  %v12545_v8 = vmov 15  }
  0x11   :  { %886 = vperm.xlu1 %8248, %v8694_v40   ;;  %7620 = vmatprep.subr.bf16.mxu1 %v12559_v4  ;;  %v7612_v30 = vpack.c.bf16 %v55_v24, %v54_v23  ;;  %v8840_v32 = vld [vmem:[%s12533_s5 + $0x20] sm:$0xff]  ;;  %v245_v34 = vld [vmem:[%s12536_s3 + $0x10] sm:$0xff]  ;;  %v246_v35 = vld [vmem:[%s12536_s3 + $0x18] sm:$0xff] }
  0x12   :  { %7597 = vmatpush3.bf16.msra.mxu0 %v8696_v41  ;;  %898 = vperm.xlu0 %8244, %v8764_v60   ;;  %v8931_v37 = vpack.c.bf16 %v246_v35, %v245_v34  ;;  %v247_v38 = vld [vmem:[%s12536_s3 + $0x20] sm:$0xff]  ;;  %v249_v43 = vld [vmem:[%s12536_s3 + $0x30] sm:$0xff]  ;;  %v250_v44 = vld [vmem:[%s12536_s3 + $0x38] sm:$0xff] }
  0x13   :  { %7599 = vmatprep.subr.bf16.mxu0 %v8700_v42  ;;  %v8956_v47 = vpack.c.bf16 %v250_v44, %v249_v43  ;;  %v8972_v50 = vld [vmem:[%s12535_s0 + $0x1] ss:$2 sm:$0x7] }
  0x14   :  { %7622 = vmatpush3.bf16.msra.mxu1 %v8759_v59  ;;  %v334_v51 = vrot.slane %v8972_v50, %v8825_v28 }
  0x15   :  { %8249 = vset.pattern.permute.xlu1 %v8499_v9  ;;  %7623 = vmatprep.subr.bf16.mxu1 %v12559_v4 }
  0x16   :  { %7601 = vmatpush3.bf16.msra.mxu0 %v8740_v53  ;;  %926 = vperm.xlu1 %8249, %v8694_v40  }
  0x17   :  { %7603 = vmatprep.subr.bf16.mxu0 %v8743_v54  ;;  %906 = vperm.xlu0 %8244, %v8780_v2  }
  0x18   :  { %7626 = vmatpush3.bf16.msk.msra.mxu1 %vm8804_vm3, %v8800_v13 }
  0x19   :  { %7627 = vmatprep.subr.bf16.mxu1 %v12559_v4 }
  0x1a   :  { %7605 = vmatpush3.bf16.msra.mxu0 %v8775_v63  ;;  %930 = vperm.xlu1 %8249, %v8711_v45  }
  0x1b   :  { %7607 = vmatprep.subr.bf16.mxu0 %v8784_v3  ;;  %8256 = vset.pattern.permute.xlu0 %v8502_v33 }
  0x1c   :  { %970 = vperm.xlu0 %8256, %v8580_v1   ;;  %6925 = vmatmul.mubr.msk.f32.vlgmr.msra.gmra.mrb[0].mxu1 %vm95_vm4, %v92_v25 }
  0x1d   :  { %6943 = vmatprep.mubr.msk.f32.mxu1 %vm8500_vm0, %v12557_v14 }
  0x1e   :  { %7609 = vmatpush3.bf16.msra.mxu0 %v7608_v18  ;;  %8250 = vset.pattern.permute.xlu1 %v8502_v33 }
  0x1f   :  { %7611 = vmatprep.subr.bf16.mxu0 %v7610_v22  ;;  %974 = vperm.xlu1 %8250, %v8694_v40  }
  0x20   :  { %978 = vperm.xlu0 %8256, %v8711_v45  }
  0x22   :  { %7613 = vmatpush3.bf16.msra.mxu0 %v7612_v30 }
  0x23   :  { %7640 = vmatprep.subr.bf16.mxu0 %v8590_v5  ;;  %8251 = vset.pattern.permute.xlu1 %v8497_v0  ;;  %v12549_v5 = vmov 0  }
  0x24   :  { %894 = vperm.xlu1 %8251, %v8840_v32   ;;  %986 = vperm.xlu0 %8256, %v8764_v60  }
  0x25   :  { %167 = vmatmul.mubr.f32.vlgmr.msra.gmra.mrb[0].mxu0 %v84_v31 }
  0x26   :  { %7642 = vmatpush3.bf16.msra.mxu0 %v8602_v10  ;;  %v8866_v10 = vld [vmem:[%s12533_s5 + $0x30] sm:$0xff] }
  0x27   :  { %7644 = vmatprep.subr.bf16.mxu0 %v8616_v15  ;;  %v8505_v15 = vmov 2  }
  0x28   :  { %8252 = vset.pattern.permute.xlu1 %v8499_v9  ;;  %994 = vperm.xlu0 %8256, %v8780_v2  }
  0x29   :  { %934 = vperm.xlu1 %8252, %v8840_v32  }
  0x2a   :  { %7646 = vmatpush3.bf16.msra.mxu0 %v8630_v20  ;;  %v8508_v20 = vmov 8  }
  0x2b   :  { %7648 = vmatprep.subr.bf16.mxu0 %v8635_v21  ;;  %v243_v21 = vld [vmem:[%s12536_s3] sm:$0xff] }
  0x2c   :  { %8260 = vset.pattern.permute.xlu0 %v12549_v5 }
  0x2d   :  { %938 = vperm.xlu1 %8252, %v8764_v60   ;;  %647 = vperm.xlu0 %8260, %v8580_v1  }
  0x2e   :  { %7650 = vmatpush3.bf16.msra.mxu0 %v8654_v27  ;;  %v244_v27 = vld [vmem:[%s12536_s3 + $0x8] sm:$0xff] }
  0x2f   :  { %7652 = vmatprep.subr.bf16.mxu0 %v8661_v29  ;;  %v8918_v29 = vpack.c.bf16 %v244_v27, %v243_v21 }
  0x31   :  { %8253 = vset.pattern.permute.xlu1 %v8502_v33  ;;  %657 = vperm.xlu0 %8260, %v8711_v45  }
  0x32   :  { %982 = vperm.xlu1 %8253, %v8840_v32   ;;  %7654 = vmatpush3.bf16.msra.mxu0 %v8696_v41  ;;  %v248_v41 = vld [vmem:[%s12536_s3 + $0x28] sm:$0xff] }
  0x33   :  { %7656 = vmatprep.subr.bf16.mxu0 %v8700_v42  ;;  %7629 = vmatpush3.bf16.msra.mxu1 %v8918_v29  ;;  %v8944_v42 = vpack.c.bf16 %v248_v41, %v247_v38 }
  0x34   :  { %7630 = vmatprep.subr.bf16.mxu1 %v12559_v4 }
  0x35   :  { %667 = vperm.xlu0 %8260, %v8764_v60  }
  0x36   :  { %8254 = vset.pattern.permute.xlu1 %v8497_v0  ;;  %7658 = vmatpush3.bf16.msra.mxu0 %v8740_v53  ;;  %v8506_v0 = vmov 1   ;;  %v338_v53 = vrot.slane %v8972_v50, %v87_v39 }
  0x37   :  { %902 = vperm.xlu1 %8254, %v8866_v10   ;;  %7660 = vmatprep.subr.bf16.mxu0 %v8743_v54 }
  0x38   :  { %7632 = vmatpush3.bf16.msra.mxu1 %v8931_v37  ;;  %411 = vmatprep.mubr.f32.mxu0 %v338_v53 }
  0x39   :  { %677 = vperm.xlu0 %8260, %v8780_v2   ;;  %7633 = vmatprep.subr.bf16.mxu1 %v12559_v4 }
  0x3a   :  { %7662 = vmatpush3.bf16.msra.mxu0 %v8775_v63  ;;  %v12547_v63 = vmov 14  }
  0x3b   :  { %8255 = vset.pattern.permute.xlu1 %v8499_v9  ;;  %7664 = vmatprep.subr.bf16.mxu0 %v8784_v3  ;;  %v8507_v9 = vmov 6  }
  0x3c   :  { %942 = vperm.xlu1 %8255, %v8866_v10   ;;  %7635 = vmatpush3.bf16.msra.mxu1 %v8944_v42 }
  0x3d   :  { %8270 = vset.pattern.permute.xlu0 %v8505_v15  ;;  %7636 = vmatprep.subr.bf16.mxu1 %v12559_v4 }
  0x3e   :  { %749 = vperm.xlu0 %8270, %v8580_v1   ;;  %7666 = vmatpush3.bf16.msra.mxu0 %v7608_v18 }
  0x3f   :  { %7668 = vmatprep.subr.bf16.mxu0 %v7610_v22 }
  0x40   :  { %946 = vperm.xlu1 %8255, %v8780_v2   ;;  %7638 = vmatpush3.bf16.msra.mxu1 %v8956_v47 }
  0x41   :  { %7671 = vmatprep.subr.bf16.mxu1 %v12559_v4 }
  0x42   :  { %757 = vperm.xlu0 %8270, %v8711_v45   ;;  %7670 = vmatpush3.bf16.msra.mxu0 %v7612_v30 }
  0x44   :  { %8257 = vset.pattern.permute.xlu1 %v8502_v33  ;;  %v12567_v33 = vmov 9  }
  0x45   :  { %990 = vperm.xlu1 %8257, %v8866_v10   ;;  %412 = vmatmul.mubr.f32.vlgmr.msra.gmra.mrb[2].mxu0 %v334_v51 }
  0x46   :  { %765 = vperm.xlu0 %8270, %v8764_v60  }
  0x49   :  { %8258 = vset.pattern.permute.xlu1 %v12549_v5 }
  0x4a   :  { %642 = vperm.xlu1 %8258, %v8621_v16   ;;  %773 = vperm.xlu0 %8270, %v8780_v2  }
  0x4e   :  { %8259 = vset.pattern.permute.xlu1 %v8506_v0  ;;  %8274 = vset.pattern.permute.xlu0 %v8507_v9 }
  0x4f   :  { %693 = vperm.xlu1 %8259, %v8621_v16   ;;  %1612 = vperm.xlu0 %8274, %v8580_v1  }
  0x53   :  { %697 = vperm.xlu1 %8259, %v8580_v1   ;;  %1620 = vperm.xlu0 %8274, %v8711_v45  }
  0x57   :  { %8261 = vset.pattern.permute.xlu1 %v8505_v15  ;;  %1628 = vperm.xlu0 %8274, %v8764_v60  }
  0x58   :  { %745 = vperm.xlu1 %8261, %v8621_v16  }
  0x5b   :  { %1636 = vperm.xlu0 %8274, %v8780_v2  }
  0x5c   :  { %8262 = vset.pattern.permute.xlu1 %v12549_v5 }
  0x5d   :  { %652 = vperm.xlu1 %8262, %v8694_v40  }
  0x5f   :  { %8284 = vset.pattern.permute.xlu0 %v8508_v20 }
  0x60   :  { %1700 = vperm.xlu0 %8284, %v8580_v1  }
  0x61   :  { %8263 = vset.pattern.permute.xlu1 %v8506_v0 }
  0x62   :  { %701 = vperm.xlu1 %8263, %v8694_v40  }
  0x64   :  { %1708 = vperm.xlu0 %8284, %v8711_v45  }
  0x66   :  { %705 = vperm.xlu1 %8263, %v8711_v45  }
  0x68   :  { %1716 = vperm.xlu0 %8284, %v8764_v60  }
  0x6a   :  { %8264 = vset.pattern.permute.xlu1 %v8505_v15 }
  0x6b   :  { %753 = vperm.xlu1 %8264, %v8694_v40  }
  0x6c   :  { %1724 = vperm.xlu0 %8284, %v8780_v2  }
  0x6f   :  { %8265 = vset.pattern.permute.xlu1 %v12549_v5 }
  0x70   :  { %662 = vperm.xlu1 %8265, %v8840_v32   ;;  %8288 = vset.pattern.permute.xlu0 %v12567_v33 }
  0x71   :  { %2095 = vperm.xlu0 %8288, %v8580_v1  }
  0x74   :  { %8266 = vset.pattern.permute.xlu1 %v8506_v0 }
  0x75   :  { %709 = vperm.xlu1 %8266, %v8840_v32   ;;  %2103 = vperm.xlu0 %8288, %v8711_v45  }
  0x79   :  { %713 = vperm.xlu1 %8266, %v8764_v60   ;;  %2111 = vperm.xlu0 %8288, %v8764_v60  }
  0x7d   :  { %8267 = vset.pattern.permute.xlu1 %v8505_v15  ;;  %2119 = vperm.xlu0 %8288, %v8780_v2  }
  0x7e   :  { %761 = vperm.xlu1 %8267, %v8840_v32  }
  0x81   :  { %v8963_v48 = vpop.permute.xlu1 %882  ;;  %8298 = vset.pattern.permute.xlu0 %v12561_v49 }
  0x82   :  { %12881 = vst [vmem:[#allocation3_spill] sm:$0xff] %v8963_v48  ;;  %8268 = vset.pattern.permute.xlu1 %v12549_v5  ;;  %2183 = vperm.xlu0 %8298, %v8580_v1  }
  0x83   :  { %672 = vperm.xlu1 %8268, %v8866_v10  }
  0x84   :  { %v9028_v11 = vpop.permute.xlu0 %918 }
  0x85   :  { %12892 = vst [vmem:[#allocation14_spill] sm:$0xff] %v9028_v11 }
  0x86   :  { %v8977_v52 = vpop.permute.xlu1 %922  ;;  %2191 = vperm.xlu0 %8298, %v8711_v45  }
  0x87   :  { %8269 = vset.pattern.permute.xlu1 %v8506_v0  ;;  %12882 = vst [vmem:[#allocation4_spill] sm:$0xff] %v8977_v52 }
  0x88   :  { %717 = vperm.xlu1 %8269, %v8866_v10  }
  0x89   :  { %v9039_v23 = vpop.permute.xlu0 %878 }
  0x8a   :  { %2199 = vperm.xlu0 %8298, %v8764_v60   ;;  %12895 = vst [vmem:[#allocation17_spill] sm:$0xff] %v9039_v23 }
  0x8b   :  { %v8984_v54 = vpop.permute.xlu1 %966 }
  0x8c   :  { %12883 = vst [vmem:[#allocation5_spill] sm:$0xff] %v8984_v54  ;;  %721 = vperm.xlu1 %8269, %v8780_v2   ;;  %v595_v54 = vadd.s32 40, %v8651_v26 }
  0x8d   :  { %v9046_v25 = vpop.permute.xlu0 %890 }
  0x8e   :  { %2207 = vperm.xlu0 %8298, %v8780_v2   ;;  %12897 = vst [vmem:[#allocation19_spill] sm:$0xff] %v9046_v25 }
  0x90   :  { %8271 = vset.pattern.permute.xlu1 %v8505_v15  ;;  %v8990_v55 = vpop.permute.xlu1 %886  ;;  %v12543_v15 = vmov 17  }
  0x91   :  { %12884 = vst [vmem:[#allocation6_spill] sm:$0xff] %v8990_v55  ;;  %769 = vperm.xlu1 %8271, %v8866_v10   ;;  %v9052_v31 = vpop.permute.xlu0 %898 }
  0x92   :  { %8302 = vset.pattern.permute.xlu0 %v12554_v56  ;;  %12899 = vst [vmem:[#allocation21_spill] sm:$0xff] %v9052_v31 }
  0x93   :  { %2575 = vperm.xlu0 %8302, %v8580_v1  }
  0x95   :  { %8272 = vset.pattern.permute.xlu1 %v8507_v9  ;;  %v8996_v39 = vpop.permute.xlu1 %926 }
  0x96   :  { %12885 = vst [vmem:[#allocation7_spill] sm:$0xff] %v8996_v39  ;;  %1608 = vperm.xlu1 %8272, %v8621_v16   ;;  %v9060_v21 = vpop.permute.xlu0 %906 }
  0x97   :  { %2583 = vperm.xlu0 %8302, %v8711_v45   ;;  %12901 = vst [vmem:[#allocation23_spill] sm:$0xff] %v9060_v21 }
  0x99   :  { %v9000_v58 = vpop.permute.xlu1 %930 }
  0x9a   :  { %8273 = vset.pattern.permute.xlu1 %v8512_v57  ;;  %12886 = vst [vmem:[#allocation8_spill] sm:$0xff] %v9000_v58 }
  0x9b   :  { %1648 = vperm.xlu1 %8273, %v8621_v16   ;;  %2591 = vperm.xlu0 %8302, %v8764_v60   ;;  %v9068_v34 = vpop.permute.xlu0 %970 }
  0x9c   :  { %12903 = vst [vmem:[#allocation25_spill] sm:$0xff] %v9068_v34 }
  0x9e   :  { %v9004_v61 = vpop.permute.xlu1 %974 }
  0x9f   :  { %12887 = vst [vmem:[#allocation9_spill] sm:$0xff] %v9004_v61  ;;  %1652 = vperm.xlu1 %8273, %v8580_v1   ;;  %2599 = vperm.xlu0 %8302, %v8780_v2   ;;  %v9074_v38 = vpop.permute.xlu0 %978 }
  0xa0   :  { %12905 = vst [vmem:[#allocation27_spill] sm:$0xff] %v9074_v38  ;;  %v12953_v38 = vmov 14  }
  0xa3   :  { %8275 = vset.pattern.permute.xlu1 %v8508_v20  ;;  %v9009_v62 = vpop.permute.xlu1 %894  ;;  %8312 = vset.pattern.permute.xlu0 %v12547_v63  ;;  %v9081_v43 = vpop.permute.xlu0 %986 }
  0xa4   :  { %12888 = vst [vmem:[#allocation10_spill] sm:$0xff] %v9009_v62  ;;  %1696 = vperm.xlu1 %8275, %v8621_v16   ;;  %2663 = vperm.xlu0 %8312, %v8580_v1   ;;  %12907 = vst [vmem:[#allocation29_spill] sm:$0xff] %v9081_v43 }
  0xa7   :  { %v9092_v53 = vpop.permute.xlu0 %994 }
  0xa8   :  { %8276 = vset.pattern.permute.xlu1 %v8507_v9  ;;  %v9015_v3 = vpop.permute.xlu1 %934  ;;  %2671 = vperm.xlu0 %8312, %v8711_v45   ;;  %12910 = vst [vmem:[#allocation32_spill] sm:$0xff] %v9092_v53 }
  0xa9   :  { %12889 = vst [vmem:[#allocation11_spill] sm:$0xff] %v9015_v3  ;;  %1616 = vperm.xlu1 %8276, %v8694_v40  }
  0xac   :  { %v9019_v6 = vpop.permute.xlu1 %938  ;;  %2679 = vperm.xlu0 %8312, %v8764_v60  }
  0xad   :  { %8277 = vset.pattern.permute.xlu1 %v8512_v57  ;;  %12890 = vst [vmem:[#allocation12_spill] sm:$0xff] %v9019_v6 }
  0xae   :  { %1656 = vperm.xlu1 %8277, %v8694_v40  }
  0xb0   :  { %2687 = vperm.xlu0 %8312, %v8780_v2  }
  0xb1   :  { %v9023_v7 = vpop.permute.xlu1 %982 }
  0xb2   :  { %12891 = vst [vmem:[#allocation13_spill] sm:$0xff] %v9023_v7  ;;  %1660 = vperm.xlu1 %8277, %v8711_v45  }
  0xb4   :  { %8316 = vset.pattern.permute.xlu0 %v12545_v8 }
  0xb5   :  { %3055 = vperm.xlu0 %8316, %v8580_v1  }
  0xb6   :  { %8278 = vset.pattern.permute.xlu1 %v8508_v20  ;;  %v9031_v18 = vpop.permute.xlu1 %902 }
  0xb7   :  { %12893 = vst [vmem:[#allocation15_spill] sm:$0xff] %v9031_v18  ;;  %1704 = vperm.xlu1 %8278, %v8694_v40  }
  0xb9   :  { %3063 = vperm.xlu0 %8316, %v8711_v45  }
  0xbb   :  { %8279 = vset.pattern.permute.xlu1 %v8507_v9  ;;  %v9037_v22 = vpop.permute.xlu1 %942 }
  0xbc   :  { %12894 = vst [vmem:[#allocation16_spill] sm:$0xff] %v9037_v22  ;;  %1624 = vperm.xlu1 %8279, %v8840_v32  }
  0xbd   :  { %3071 = vperm.xlu0 %8316, %v8764_v60  }
  0xbf   :  { %v9043_v24 = vpop.permute.xlu1 %946 }
  0xc0   :  { %8280 = vset.pattern.permute.xlu1 %v8512_v57  ;;  %12896 = vst [vmem:[#allocation18_spill] sm:$0xff] %v9043_v24 }
  0xc1   :  { %1664 = vperm.xlu1 %8280, %v8840_v32   ;;  %3079 = vperm.xlu0 %8316, %v8780_v2  }
  0xc4   :  { %v9049_v30 = vpop.permute.xlu1 %990 }
  0xc5   :  { %12898 = vst [vmem:[#allocation20_spill] sm:$0xff] %v9049_v30  ;;  %1668 = vperm.xlu1 %8280, %v8764_v60   ;;  %8326 = vset.pattern.permute.xlu0 %v12543_v15  ;;  %v12552_v15 = vmov 20  }
  0xc6   :  { %3143 = vperm.xlu0 %8326, %v8580_v1  }
  0xc9   :  { %8281 = vset.pattern.permute.xlu1 %v8508_v20  ;;  %v9057_v0 = vpop.permute.xlu1 %642 }
  0xca   :  { %12900 = vst [vmem:[#allocation22_spill] sm:$0xff] %v9057_v0  ;;  %1712 = vperm.xlu1 %8281, %v8840_v32   ;;  %3151 = vperm.xlu0 %8326, %v8711_v45  }
  0xce   :  { %8282 = vset.pattern.permute.xlu1 %v8507_v9  ;;  %v9064_v27 = vpop.permute.xlu1 %693  ;;  %3159 = vperm.xlu0 %8326, %v8764_v60   ;;  %v12541_v9 = vmov 18  }
  0xcf   :  { %12902 = vst [vmem:[#allocation24_spill] sm:$0xff] %v9064_v27  ;;  %1632 = vperm.xlu1 %8282, %v8866_v10  }
  0xd2   :  { %v9070_v35 = vpop.permute.xlu1 %697  ;;  %3167 = vperm.xlu0 %8326, %v8780_v2  }
  0xd3   :  { %8283 = vset.pattern.permute.xlu1 %v8512_v57  ;;  %12904 = vst [vmem:[#allocation26_spill] sm:$0xff] %v9070_v35  ;;  %v12563_v57 = vmov 10  }
  0xd4   :  { %1672 = vperm.xlu1 %8283, %v8866_v10  }
  0xd6   :  { %8330 = vset.pattern.permute.xlu0 %v12541_v9  ;;  %v9100_v9 = vpop.permute.xlu0 %647 }
  0xd7   :  { %v9076_v41 = vpop.permute.xlu1 %745  ;;  %3539 = vperm.xlu0 %8330, %v8580_v1   ;;  %12912 = vst [vmem:[#allocation34_spill] sm:$0xff] %v9100_v9 }
  0xd8   :  { %12906 = vst [vmem:[#allocation28_spill] sm:$0xff] %v9076_v41  ;;  %1676 = vperm.xlu1 %8283, %v8780_v2   ;;  %v12572_v41 = vmov 21  }
  0xda   :  { %v9108_v63 = vpop.permute.xlu0 %657 }
  0xdb   :  { %3547 = vperm.xlu0 %8330, %v8711_v45   ;;  %12914 = vst [vmem:[#allocation36_spill] sm:$0xff] %v9108_v63 }
  0xdc   :  { %8285 = vset.pattern.permute.xlu1 %v8508_v20  ;;  %v9084_v44 = vpop.permute.xlu1 %652 }
  0xdd   :  { %12908 = vst [vmem:[#allocation30_spill] sm:$0xff] %v9084_v44  ;;  %1720 = vperm.xlu1 %8285, %v8866_v10  }
  0xde   :  { %v9115_v56 = vpop.permute.xlu0 %667 }
  0xdf   :  { %3555 = vperm.xlu0 %8330, %v8764_v60   ;;  %12916 = vst [vmem:[#allocation38_spill] sm:$0xff] %v9115_v56 }
  0xe1   :  { %8286 = vset.pattern.permute.xlu1 %v12567_v33  ;;  %v9090_v51 = vpop.permute.xlu1 %701 }
  0xe2   :  { %12909 = vst [vmem:[#allocation31_spill] sm:$0xff] %v9090_v51  ;;  %2091 = vperm.xlu1 %8286, %v8621_v16  }
  0xe3   :  { %3563 = vperm.xlu0 %8330, %v8780_v2  }
  0xe5   :  { %v9097_v20 = vpop.permute.xlu1 %705 }
  0xe6   :  { %8287 = vset.pattern.permute.xlu1 %v12563_v57  ;;  %12911 = vst [vmem:[#allocation33_spill] sm:$0xff] %v9097_v20 }
  0xe7   :  { %2131 = vperm.xlu1 %8287, %v8621_v16   ;;  %8340 = vset.pattern.permute.xlu0 %v12552_v15 }
  0xe8   :  { %3627 = vperm.xlu0 %8340, %v8580_v1  }
  0xea   :  { %v9104_v8 = vpop.permute.xlu1 %753 }
  0xeb   :  { %12913 = vst [vmem:[#allocation35_spill] sm:$0xff] %v9104_v8  ;;  %2135 = vperm.xlu1 %8287, %v8580_v1   ;;  %v12919_v8 = vmov 10  }
  0xec   :  { %3635 = vperm.xlu0 %8340, %v8711_v45  }
  0xef   :  { %8289 = vset.pattern.permute.xlu1 %v12561_v49  ;;  %v9111_v5 = vpop.permute.xlu1 %662  ;;  %v238_v19 = vpop.f32.mrb[0].mxu1  ;;  %v9125_v49 = vld [vmem:[%s12537_s4] sm:$0x1] }
  0xf0   :  { %12915 = vst [vmem:[#allocation37_spill] sm:$0xff] %v9111_v5  ;;  %2179 = vperm.xlu1 %8289, %v8621_v16   ;;  %3643 = vperm.xlu0 %8340, %v8764_v60   ;;  %v6926_v15 = vpop.f32.mrb[1].mxu1  ;;  %12918 = vst [vmem:[#allocation40_spill] sm:$0xff] %v9125_v49 }
  0xf4   :  { %8290 = vset.pattern.permute.xlu1 %v12567_v33  ;;  %v9118_v12 = vpop.permute.xlu1 %709  ;;  %3651 = vperm.xlu0 %8340, %v8780_v2   ;;  %v9131_v33 = vpop.permute.xlu0 %677 }
  0xf5   :  { %12917 = vst [vmem:[#allocation39_spill] sm:$0xff] %v9118_v12  ;;  %2099 = vperm.xlu1 %8290, %v8694_v40   ;;  %12921 = vst [vmem:[#allocation42_spill] sm:$0xff] %v9131_v33 }
  0xf8   :  { %v6496_v14 = vpop.f32.mrb[0].mxu0  ;;  %v9128_v15 = vpop.permute.xlu1 %713  ;;  %8344 = vset.pattern.permute.xlu0 %v12572_v41  ;;  %v12924_v41 = vmov 11  }
  0xf9   :  { %v6497_v4 = vpop.f32.mrb[1].mxu0  ;;  %8291 = vset.pattern.permute.xlu1 %v12919_v8  ;;  %12920 = vst [vmem:[#allocation41_spill] sm:$0xff] %v9128_v15  ;;  %4019 = vperm.xlu0 %8344, %v8580_v1  }
  0xfa   :  { %v6498_v57 = vadd.f32 %v6497_v4, %v6496_v14  ;;  %2139 = vperm.xlu1 %8291, %v8694_v40   ;;  %v9140_v14 = vpop.permute.xlu0 %749 }
  0xfb   :  { %12923 = vst [vmem:[#allocation44_spill] sm:$0xff] %v9140_v14 }
  0xfc   :  { %v169_v53 = vadd.f32 %v6498_v57, %v9125_v49  ;;  %v12929_v57 = vmov 9  }
  0xfd   :  { %v9136_v43 = vpop.permute.xlu1 %761  ;;  %4027 = vperm.xlu0 %8344, %v8711_v45  }
  0xfe   :  { %v239_v30 = vadd.f32 %v238_v19, %v169_v53  ;;  %12922 = vst [vmem:[#allocation43_spill] sm:$0xff] %v9136_v43  ;;  %2143 = vperm.xlu1 %8291, %v8711_v45   ;;  %v12926_v19 = vmov 0.0|0.0   ;;  %v12927_v53 = vmov 0.0  }
 0x100   :  { %v242_v4 = vmax.f32 %v239_v30, 0.0  ;;  %v9152_v30 = vpop.permute.xlu0 %757 }
 0x101   :  { %4035 = vperm.xlu0 %8344, %v8764_v60   ;;  %12928 = vst [vmem:[#allocation46_spill] sm:$0xff] %v9152_v30  ;;  %v12933_v30 = vsub.s32 2, %v8651_v26 }
 0x102   :  { %6944 = vmatmul.mubr.msk.f32.vlgmr.msra.gmra.mrb[2].mxu1 %vm251_vm5, %v242_v4  ;;  %8292 = vset.pattern.permute.xlu1 %v12924_v41  ;;  %v9145_v7 = vpop.permute.xlu1 %672 }
 0x103   :  { %7673 = vmatpush3.bf16.msra.mxu1 %v8680_v36  ;;  %12925 = vst [vmem:[#allocation45_spill] sm:$0xff] %v9145_v7  ;;  %2187 = vperm.xlu1 %8292, %v8694_v40   ;;  %v342_v14 = vrot.slane %v8972_v50, %v12933_v30 }
 0x104   :  { %7674 = vmatprep.subr.bf16.mxu1 %v12926_v19  ;;  %6962 = vmatprep.mubr.msk.f32.mxu1 %vm8500_vm0, %v12927_v53  ;;  %v9163_v4 = vpop.permute.xlu0 %765 }
 0x105   :  { %4043 = vperm.xlu0 %8344, %v8780_v2   ;;  %12931 = vst [vmem:[#allocation48_spill] sm:$0xff] %v9163_v4 }
 0x107   :  { %7676 = vmatpush3.bf16.msra.mxu1 %v8714_v46  ;;  %8293 = vset.pattern.permute.xlu1 %v12929_v57  ;;  %v9157_v36 = vpop.permute.xlu1 %717  ;;  %v12578_v46 = vmov 23  }
 0x108   :  { %7677 = vmatprep.subr.bf16.mxu1 %v12926_v19  ;;  %12930 = vst [vmem:[#allocation47_spill] sm:$0xff] %v9157_v36  ;;  %2107 = vperm.xlu1 %8293, %v8840_v32  }
 0x109   :  { %8354 = vset.pattern.permute.xlu0 %v12578_v46  ;;  %v9182_v46 = vpop.permute.xlu0 %773 }
 0x10a   :  { %4107 = vperm.xlu0 %8354, %v8580_v1   ;;  %12935 = vst [vmem:[#allocation51_spill] sm:$0xff] %v9182_v46 }
 0x10b   :  { %7679 = vmatpush3.bf16.msra.mxu1 %v8759_v59  ;;  %v9166_v43 = vpop.permute.xlu1 %721 }
 0x10c   :  { %7680 = vmatprep.subr.bf16.mxu1 %v12926_v19  ;;  %8294 = vset.pattern.permute.xlu1 %v12919_v8  ;;  %12932 = vst [vmem:[#allocation49_spill] sm:$0xff] %v9166_v43 }
 0x10d   :  { %2147 = vperm.xlu1 %8294, %v8840_v32   ;;  %v9195_v17 = vpop.permute.xlu0 %1612 }
 0x10e   :  { %4115 = vperm.xlu0 %8354, %v8711_v45   ;;  %12937 = vst [vmem:[#allocation53_spill] sm:$0xff] %v9195_v17 }
 0x10f   :  { %7683 = vmatpush3.bf16.msk.msra.mxu1 %vm8804_vm3, %v8800_v13 }
 0x110   :  { %7684 = vmatprep.subr.bf16.mxu1 %v12926_v19  ;;  %v9178_v59 = vpop.permute.xlu1 %769 }
 0x111   :  { %12934 = vst [vmem:[#allocation50_spill] sm:$0xff] %v9178_v59  ;;  %2151 = vperm.xlu1 %8294, %v8764_v60   ;;  %v9205_v50 = vpop.permute.xlu0 %1620  ;;  %v12592_v59 = vmov 13  }
 0x112   :  { %6963 = vmatmul.mubr.msk.f32.vlgmr.msra.gmra.mrb[4].mxu1 %vm95_vm4, %v342_v14  ;;  %4123 = vperm.xlu0 %8354, %v8764_v60   ;;  %12939 = vst [vmem:[#allocation55_spill] sm:$0xff] %v9205_v50  ;;  %v12580_v14 = vmov 24  }
 0x113   :  { %7686 = vmatpush3.bf16.msra.mxu1 %v8918_v29  ;;  %6981 = vmatprep.mubr.msk.f32.mxu1 %vm8500_vm0, %v12927_v53 }
 0x114   :  { %7687 = vmatprep.subr.bf16.mxu1 %v12926_v19 }
 0x115   :  { %8295 = vset.pattern.permute.xlu1 %v12924_v41  ;;  %v9190_v13 = vpop.permute.xlu1 %1608 }
 0x116   :  { %12936 = vst [vmem:[#allocation52_spill] sm:$0xff] %v9190_v13  ;;  %2195 = vperm.xlu1 %8295, %v8840_v32   ;;  %4131 = vperm.xlu0 %8354, %v8780_v2  }
 0x117   :  { %7689 = vmatpush3.bf16.msra.mxu1 %v8931_v37 }
 0x118   :  { %7690 = vmatprep.subr.bf16.mxu1 %v12926_v19 }
 0x11a   :  { %8296 = vset.pattern.permute.xlu1 %v12929_v57  ;;  %v9199_v29 = vpop.permute.xlu1 %1648  ;;  %8358 = vset.pattern.permute.xlu0 %v12580_v14 }
 0x11b   :  { %12938 = vst [vmem:[#allocation54_spill] sm:$0xff] %v9199_v29  ;;  %2115 = vperm.xlu1 %8296, %v8866_v10   ;;  %7692 = vmatpush3.bf16.msra.mxu1 %v8944_v42  ;;  %v9217_v42 = vpop.permute.xlu0 %1628 }
 0x11c   :  { %7693 = vmatprep.subr.bf16.mxu1 %v12926_v19  ;;  %4499 = vperm.xlu0 %8358, %v8580_v1   ;;  %12942 = vst [vmem:[#allocation58_spill] sm:$0xff] %v9217_v42  ;;  %v12587_v19 = vmov 26  }
 0x11e   :  { %v9209_v37 = vpop.permute.xlu1 %1652 }
 0x11f   :  { %8297 = vset.pattern.permute.xlu1 %v12919_v8  ;;  %12940 = vst [vmem:[#allocation56_spill] sm:$0xff] %v9209_v37  ;;  %7695 = vmatpush3.bf16.msra.mxu1 %v8956_v47  ;;  %v9225_v57 = vpop.permute.xlu0 %1636  ;;  %v12945_v47 = vmov 12  }
 0x120   :  { %2155 = vperm.xlu1 %8297, %v8866_v10   ;;  %4507 = vperm.xlu0 %8358, %v8711_v45   ;;  %12944 = vst [vmem:[#allocation60_spill] sm:$0xff] %v9225_v57 }
 0x123   :  { %v9214_v30 = vpop.permute.xlu1 %1696 }
 0x124   :  { %12941 = vst [vmem:[#allocation57_spill] sm:$0xff] %v9214_v30  ;;  %2159 = vperm.xlu1 %8297, %v8780_v2   ;;  %4515 = vperm.xlu0 %8358, %v8764_v60   ;;  %v9233_v30 = vpop.permute.xlu0 %1700 }
 0x125   :  { %12947 = vst [vmem:[#allocation62_spill] sm:$0xff] %v9233_v30 }
 0x128   :  { %8299 = vset.pattern.permute.xlu1 %v12924_v41  ;;  %v9222_v8 = vpop.permute.xlu1 %1616  ;;  %4523 = vperm.xlu0 %8358, %v8780_v2   ;;  %v12948_v41 = vlaneseq }
 0x129   :  { %12943 = vst [vmem:[#allocation59_spill] sm:$0xff] %v9222_v8  ;;  %2203 = vperm.xlu1 %8299, %v8866_v10  }
 0x12a   :  { %v9237_v46 = vand.u32 127, %v12948_v41 }
 0x12c   :  { %8368 = vset.pattern.permute.xlu0 %v12587_v19  ;;  %vm564_vm6 = vcmp.ge.s32.totalorder %v9237_v46, 7  ;;  %vm566_vm7 = vcmp.ge.s32.totalorder %v9237_v46, 14  ;;  %v9246_v19 = vpop.permute.xlu0 %1708  ;;  %vm569_vm8 = vcmp.ge.s32.totalorder %v9237_v46, 21  ;;  %vm572_vm9 = vcmp.ge.s32.totalorder %v9237_v46, 28 }
 0x12d   :  { %8300 = vset.pattern.permute.xlu1 %v12945_v47  ;;  %v9229_v14 = vpop.permute.xlu1 %1656  ;;  %4587 = vperm.xlu0 %8368, %v8580_v1   ;;  %12950 = vst [vmem:[#allocation64_spill] sm:$0xff] %v9246_v19  ;;  %vm575_vm10 = vcmp.ge.s32.totalorder %v9237_v46, 35  ;;  %vm578_vm11 = vcmp.ge.s32.totalorder %v9237_v46, 42  ;;  %vm581_vm12 = vcmp.ge.s32.totalorder %v9237_v46, 49  ;;  %vm584_vm13 = vcmp.ge.s32.totalorder %v9237_v46, 56 }
 0x12e   :  { %12946 = vst [vmem:[#allocation61_spill] sm:$0xff] %v9229_v14  ;;  %2571 = vperm.xlu1 %8300, %v8621_v16   ;;  %v12952_v14 = vmov 0  }
 0x12f   :  { %v565_v41 = vsel %vm564_vm6, 1, %v12952_v14  ;;  %v567_v8 = vsel %vm566_vm7, 1, %v12952_v14  ;;  %v573_v19 = vsel %vm572_vm9, 1, %v12952_v14 }
 0x131   :  { %v9240_v4 = vpop.permute.xlu1 %1660  ;;  %4595 = vperm.xlu0 %8368, %v8711_v45  }
 0x132   :  { %8301 = vset.pattern.permute.xlu1 %v12592_v59  ;;  %12949 = vst [vmem:[#allocation63_spill] sm:$0xff] %v9240_v4  ;;  %v568_v59 = vadd.s32 %v567_v8, %v565_v41  ;;  %v570_v4 = vsel %vm569_vm8, 1, %v12952_v14  ;;  %v576_v8 = vsel %vm575_vm10, 1, %v12952_v14 }
 0x133   :  { %2611 = vperm.xlu1 %8301, %v8621_v16  }
 0x134   :  { %v571_v37 = vadd.s32 %v570_v4, %v568_v59  ;;  %v579_v59 = vsel %vm578_vm11, 1, %v12952_v14 }
 0x135   :  { %4603 = vperm.xlu0 %8368, %v8764_v60  }
 0x136   :  { %v9248_v30 = vpop.permute.xlu1 %1704  ;;  %v574_v61 = vadd.s32 %v573_v19, %v571_v37  ;;  %v582_v37 = vsel %vm581_vm12, 1, %v12952_v14 }
 0x137   :  { %12951 = vst [vmem:[#allocation65_spill] sm:$0xff] %v9248_v30  ;;  %2615 = vperm.xlu1 %8301, %v8580_v1   ;;  %v9262_v1 = vpop.permute.xlu0 %1716 }
 0x138   :  { %12955 = vst [vmem:[#allocation67_spill] sm:$0xff] %v9262_v1  ;;  %v577_v4 = vadd.s32 %v576_v8, %v574_v61  ;;  %v585_v61 = vsel %vm584_vm13, 1, %v12952_v14  ;;  %v12958_v1 = vmov 13  }
 0x139   :  { %4611 = vperm.xlu0 %8368, %v8780_v2  }
 0x13a   :  { %v580_v41 = vadd.s32 %v579_v59, %v577_v4 }
 0x13b   :  { %8303 = vset.pattern.permute.xlu1 %v12953_v38  ;;  %v9259_v30 = vpop.permute.xlu1 %1624 }
 0x13c   :  { %12954 = vst [vmem:[#allocation66_spill] sm:$0xff] %v9259_v30  ;;  %2659 = vperm.xlu1 %8303, %v8621_v16   ;;  %v583_v16 = vadd.s32 %v582_v37, %v580_v41  ;;  %v591_v41 = vadd.s32 8, %v8651_v26  ;;  %v9293_v37 = vsub.s32 %v8651_v26, %v9237_v46 }
 0x13e   :  { %v9277_v8 = vadd.s32 %v585_v61, %v583_v16  ;;  %12961 = vst [vmem:[#allocation72_spill] sm:$0xff] %v9293_v37  ;;  %v9296_v16 = vsub.s32 %v591_v41, %v9237_v46  ;;  %v12963_v61 = vmov 0  ;;  %vm848_vm7 = vcmp.eq.s32.totalorder %v9293_v37, 4294967289 }
 0x140   :  { %8304 = vset.pattern.permute.xlu1 %v12945_v47  ;;  %v9271_v19 = vpop.permute.xlu1 %1664  ;;  %12957 = vst [vmem:[#allocation69_spill] sm:$0xff] %v9277_v8  ;;  %v587_v59 = vmul.u32 7, %v9277_v8  ;;  %12962 = vst [vmem:[#allocation73_spill] sm:$0xff] %v9296_v16  ;;  %vm849_vm8 = vcmp.eq.s32.totalorder %v9296_v16, 4294967289 }
 0x141   :  { %12956 = vst [vmem:[#allocation68_spill] sm:$0xff] %v9271_v19  ;;  %2579 = vperm.xlu1 %8304, %v8694_v40   ;;  %v622_v19 = vadd.s32 4294967295, %v9277_v8 }
 0x142   :  { %v9286_v30 = vsub.s32 %v9237_v46, %v587_v59  ;;  %v857_v59 = vsel %vm849_vm8, 1.0, %v12927_v53 }
 0x143   :  { %vm623_vm14 = vcmp.ge.s32.totalorder %v622_v19, 0  ;;  %vm624_vm15 = vcmp.lt.s32.totalorder %v622_v19, 9  ;;  %v856_v19 = vsel %vm848_vm7, 1.0, %v12927_v53 }
 0x144   :  { %v9280_v4 = vpop.permute.xlu1 %1668  ;;  %vm9298_vm1 = vmand %vm623_vm14, %vm624_vm15  ;;  %vm864_vm3 = vcmp.ge.s32.totalorder %v9286_v30, 0  ;;  %vm866_vm6 = vcmp.lt.s32.totalorder %v9286_v30, 7  ;;  %vm1038_vm14 = vcmask 1046528  }
 0x145   :  { %8305 = vset.pattern.permute.xlu1 %v12958_v1  ;;  %12959 = vst [vmem:[#allocation70_spill] sm:$0xff] %v9280_v4  ;;  %v12964_v61 = vsel %vm9298_vm1, 4294967295, %v12963_v61  ;;  %vm865_vm4 = vmand %vm9298_vm1, %vm864_vm3 }
 0x146   :  { %2619 = vperm.xlu1 %8305, %v8694_v40   ;;  %12965 = vst [vmem:[#allocation74_spill] sm:$0xff] %v12964_v61  ;;  %vm867_vm9 = vmand %vm865_vm4, %vm866_vm6 }
 0x147   :  { %vm9402_vm7 = vmpackc.low %vm1038_vm14, %vm8503_vm2 }
 0x149   :  { %v9289_v14 = vpop.permute.xlu1 %1712 }
 0x14a   :  { %12960 = vst [vmem:[#allocation71_spill] sm:$0xff] %v9289_v14  ;;  %2623 = vperm.xlu1 %8305, %v8711_v45   ;;  %v9316_v45 = vsel %vm867_vm9, 1.0, %v12927_v53 }
 0x14b   :  { %v869_v41 = vmul.f32 %v9316_v45, %v856_v19  ;;  %v870_v14 = vmul.f32 %v9316_v45, %v857_v59  ;;  %v592_v19 = vadd.s32 16, %v8651_v26  ;;  %v593_v59 = vadd.s32 24, %v8651_v26 }
 0x14d   :  { %v9324_v8 = vpack.c.bf16 %v870_v14, %v869_v41  ;;  %v9340_v14 = vsub.s32 %v592_v19, %v9237_v46  ;;  %v9343_v41 = vsub.s32 %v593_v59, %v9237_v46 }
 0x14e   :  { %8306 = vset.pattern.permute.xlu1 %v12953_v38  ;;  %v9321_v4 = vpop.permute.xlu1 %1632 }
 0x14f   :  { %12966 = vst [vmem:[#allocation75_spill] sm:$0xff] %v9321_v4  ;;  %2667 = vperm.xlu1 %8306, %v8694_v40   ;;  %12967 = vst [vmem:[#allocation76_spill] sm:$0xff] %v9324_v8  ;;  %7697 = vmatprep.subr.bf16.mxu0 %v9324_v8  ;;  %vm850_vm10 = vcmp.eq.s32.totalorder %v9340_v14, 4294967289  ;;  %vm851_vm11 = vcmp.eq.s32.totalorder %v9343_v41, 4294967289  ;;  %vm609_vm14 = vcmp.eq.s32.totalorder %v9343_v41, 4294967288 }
 0x150   :  { %7733 = vmatprep.subr.bf16.mxu1 %v9324_v8  ;;  %7699 = vmatpush3.bf16.msra.mxu0 %v9324_v8  ;;  %v858_v4 = vsel %vm850_vm10, 1.0, %v12927_v53  ;;  %v859_v8 = vsel %vm851_vm11, 1.0, %v12927_v53  ;;  %vm606_vm10 = vcmp.eq.s32.totalorder %v9293_v37, 4294967288  ;;  %vm607_vm11 = vcmp.eq.s32.totalorder %v9296_v16, 4294967288 }
 0x151   :  { %v872_v19 = vmul.f32 %v9316_v45, %v859_v8  ;;  %v9368_v8 = vsub.s32 %v595_v54, %v9237_v46 }
 0x153   :  { %8307 = vset.pattern.permute.xlu1 %v12945_v47  ;;  %v9330_v29 = vpop.permute.xlu1 %1672  ;;  %vm853_vm13 = vcmp.eq.s32.totalorder %v9368_v8, 4294967289 }
 0x154   :  { %12968 = vst [vmem:[#allocation77_spill] sm:$0xff] %v9330_v29  ;;  %2587 = vperm.xlu1 %8307, %v8840_v32  }
 0x157   :  { %v9336_v40 = vpop.permute.xlu1 %1676 }
 0x158   :  { %8308 = vset.pattern.permute.xlu1 %v12958_v1  ;;  %12969 = vst [vmem:[#allocation78_spill] sm:$0xff] %v9336_v40  ;;  %v871_v40 = vmul.f32 %v9316_v45, %v858_v4 }
 0x159   :  { %2627 = vperm.xlu1 %8308, %v8840_v32  }
 0x15a   :  { %v9354_v49 = vpack.c.bf16 %v872_v19, %v871_v40  ;;  %v596_v19 = vadd.s32 48, %v8651_v26 }
 0x15c   :  { %v9347_v29 = vpop.permute.xlu1 %1720  ;;  %12971 = vst [vmem:[#allocation80_spill] sm:$0xff] %v9354_v49  ;;  %7701 = vmatprep.subr.bf16.mxu0 %v9354_v49 }
 0x15d   :  { %12970 = vst [vmem:[#allocation79_spill] sm:$0xff] %v9347_v29  ;;  %2631 = vperm.xlu1 %8308, %v8764_v60   ;;  %v594_v29 = vadd.s32 32, %v8651_v26  ;;  %7703 = vmatpush3.bf16.msra.mxu0 %v9354_v49  ;;  %v9383_v49 = vsub.s32 %v596_v19, %v9237_v46 }
 0x15f   :  { %v9365_v60 = vsub.s32 %v594_v29, %v9237_v46  ;;  %v597_v29 = vadd.s32 56, %v8651_v26  ;;  %12974 = vst [vmem:[#allocation83_spill] sm:$0xff] %v9383_v49  ;;  %vm854_vm15 = vcmp.eq.s32.totalorder %v9383_v49, 4294967289  ;;  %v9395_v26 = vadd.s32 4294967295, %v9286_v30 }
 0x161   :  { %8309 = vset.pattern.permute.xlu1 %v12953_v38  ;;  %v9357_v59 = vpop.permute.xlu1 %2091  ;;  %vm852_vm12 = vcmp.eq.s32.totalorder %v9365_v60, 4294967289  ;;  %12978 = vst [vmem:[#allocation87_spill] sm:$0xff] %v9395_v26  ;;  %vm627_vm8 = vcmp.ge.s32.totalorder %v9395_v26, 0  ;;  %vm629_vm2 = vcmp.lt.s32.totalorder %v9395_v26, 7 }
 0x162   :  { %12972 = vst [vmem:[#allocation81_spill] sm:$0xff] %v9357_v59  ;;  %2675 = vperm.xlu1 %8309, %v8840_v32   ;;  %v860_v40 = vsel %vm852_vm12, 1.0, %v12927_v53  ;;  %v861_v32 = vsel %vm853_vm13, 1.0, %v12927_v53  ;;  %vm628_vm9 = vmand %vm9298_vm1, %vm627_vm8  ;;  %vm608_vm13 = vcmp.eq.s32.totalorder %v9340_v14, 4294967288 }
 0x163   :  { %v873_v54 = vmul.f32 %v9316_v45, %v860_v40  ;;  %v874_v59 = vmul.f32 %v9316_v45, %v861_v32  ;;  %v862_v40 = vsel %vm854_vm15, 1.0, %v12927_v53  ;;  %vm630_vm12 = vmand %vm628_vm9, %vm629_vm2  ;;  %vm610_vm15 = vcmp.eq.s32.totalorder %v9365_v60, 4294967288 }
 0x164   :  { %v875_v32 = vmul.f32 %v9316_v45, %v862_v40  ;;  %v9427_v40 = vsel %vm630_vm12, 1.0, %v12927_v53 }
 0x165   :  { %12984 = vst [vmem:[#allocation91_spill] sm:$0xff] %v9427_v40 }
 0x166   :  { %8310 = vset.pattern.permute.xlu1 %v12945_v47  ;;  %v9373_v4 = vpop.permute.xlu1 %2131  ;;  %v9386_v47 = vsub.s32 %v597_v29, %v9237_v46 }
 0x167   :  { %12973 = vst [vmem:[#allocation82_spill] sm:$0xff] %v9373_v4  ;;  %2595 = vperm.xlu1 %8310, %v8866_v10   ;;  %v9388_v4 = vpack.c.bf16 %v874_v59, %v873_v54  ;;  %v12979_v59 = vmov 0  ;;  %v615_v54 = vsel %vm607_vm11, 1.0, %v12927_v53 }
 0x168   :  { %12975 = vst [vmem:[#allocation84_spill] sm:$0xff] %v9386_v47  ;;  %vm855_vm4 = vcmp.eq.s32.totalorder %v9386_v47, 4294967289  ;;  %v12980_v59 = vsel %vm9402_vm7, 4294967295, %v12979_v59 }
 0x169   :  { %12976 = vst [vmem:[#allocation85_spill] sm:$0xff] %v9388_v4  ;;  %7705 = vmatprep.subr.bf16.mxu0 %v9388_v4  ;;  %v863_v46 = vsel %vm855_vm4, 1.0, %v12927_v53  ;;  %12981 = vst [vmem:[#allocation88_spill] sm:$0xff] %v12980_v59  ;;  %vm611_vm4 = vcmp.eq.s32.totalorder %v9368_v8, 4294967288 }
 0x16a   :  { %v9390_v13 = vpop.permute.xlu1 %2135  ;;  %7707 = vmatpush3.bf16.msra.mxu0 %v9388_v4  ;;  %v876_v19 = vmul.f32 %v9316_v45, %v863_v46  ;;  %v614_v45 = vsel %vm606_vm10, 1.0, %v12927_v53 }
 0x16b   :  { %12977 = vst [vmem:[#allocation86_spill] sm:$0xff] %v9390_v13  ;;  %8311 = vset.pattern.permute.xlu1 %v12958_v1  ;;  %v632_v46 = vmul.f32 %v9427_v40, %v614_v45  ;;  %v12988_v45 = vmov 15  }
 0x16c   :  { %2635 = vperm.xlu1 %8311, %v8866_v10   ;;  %v9416_v1 = vpack.c.bf16 %v876_v19, %v875_v32  ;;  %v633_v32 = vmul.f32 %v9427_v40, %v615_v54  ;;  %v6549_v19 = vpop.f32.mrb[2].mxu0 }
 0x16e   :  { %12982 = vst [vmem:[#allocation89_spill] sm:$0xff] %v9416_v1  ;;  %7710 = vmatprep.subr.msk.bf16.mxu0 %vm9402_vm7, %v9416_v1  ;;  %v9438_v13 = vpack.c.bf16 %v633_v32, %v632_v46  ;;  %v9464_v32 = vld [vmem:[%s12533_s5 + $0x8] sm:$0xff] }
 0x16f   :  { %v9422_v29 = vpop.permute.xlu1 %2179  ;;  %7713 = vmatpush3.bf16.msk.msra.mxu0 %vm9402_vm7, %v9416_v1  ;;  %v9453_v1 = vld [vmem:[%s12533_s5] sm:$0xff]  ;;  %12993 = vst [vmem:[#allocation99_spill] sm:$0xff] %v9464_v32 }
 0x170   :  { %12983 = vst [vmem:[#allocation90_spill] sm:$0xff] %v9422_v29  ;;  %2639 = vperm.xlu1 %8311, %v8780_v2   ;;  %v6550_v29 = vpop.f32.mrb[3].mxu0  ;;  %12985 = vst [vmem:[#allocation92_spill] sm:$0xff] %v9438_v13  ;;  %7715 = vmatprep.subr.bf16.mxu0 %v9438_v13 }
 0x171   :  { %v9440_v4 = vadd.f32 %v6550_v29, %v6549_v19  ;;  %12990 = vst [vmem:[#allocation96_spill] sm:$0xff] %v9453_v1  ;;  %v12994_v19 = vmov 17  }
 0x173   :  { %12986 = vst [vmem:[#allocation93_spill] sm:$0xff] %v9440_v4 }
 0x174   :  { %8313 = vset.pattern.permute.xlu1 %v12953_v38  ;;  %v9443_v2 = vpop.permute.xlu1 %2099  ;;  %v8524_v38 = vmov 16  }
 0x175   :  { %12987 = vst [vmem:[#allocation94_spill] sm:$0xff] %v9443_v2  ;;  %2683 = vperm.xlu1 %8313, %v8866_v10  }
 0x179   :  { %8314 = vset.pattern.permute.xlu1 %v12988_v45  ;;  %v9448_v54 = vpop.permute.xlu1 %2139 }
 0x17a   :  { %12989 = vst [vmem:[#allocation95_spill] sm:$0xff] %v9448_v54  ;;  %3051 = vperm.xlu1 %8314, %v9453_v1  }
 0x17d   :  { %v9456_v29 = vpop.permute.xlu1 %2143 }
 0x17e   :  { %12991 = vst [vmem:[#allocation97_spill] sm:$0xff] %v9456_v29  ;;  %8315 = vset.pattern.permute.xlu1 %v8524_v38 }
 0x17f   :  { %3091 = vperm.xlu1 %8315, %v9453_v1  }
 0x182   :  { %v9459_v46 = vpop.permute.xlu1 %2187 }
 0x183   :  { %12992 = vst [vmem:[#allocation98_spill] sm:$0xff] %v9459_v46  ;;  %3095 = vperm.xlu1 %8315, %v9464_v32   ;;  %v9477_v46 = vld [vmem:[%s12533_s5 + $0x10] sm:$0xff] }
 0x184   :  { %12997 = vst [vmem:[#allocation102_spill] sm:$0xff] %v9477_v46 }
 0x187   :  { %8317 = vset.pattern.permute.xlu1 %v12994_v19  ;;  %v9468_v54 = vpop.permute.xlu1 %2107 }
 0x188   :  { %12995 = vst [vmem:[#allocation100_spill] sm:$0xff] %v9468_v54  ;;  %3139 = vperm.xlu1 %8317, %v9453_v1   ;;  %v9485_v54 = vpop.permute.xlu0 %1724 }
 0x189   :  { %13000 = vst [vmem:[#allocation105_spill] sm:$0xff] %v9485_v54  ;;  %v9505_v54 = vld [vmem:[%s12533_s5 + $0x20] sm:$0xff] }
 0x18a   :  { %13004 = vst [vmem:[#allocation109_spill] sm:$0xff] %v9505_v54 }
 0x18c   :  { %8318 = vset.pattern.permute.xlu1 %v12988_v45  ;;  %v9472_v29 = vpop.permute.xlu1 %2147 }
 0x18d   :  { %12996 = vst [vmem:[#allocation101_spill] sm:$0xff] %v9472_v29  ;;  %3059 = vperm.xlu1 %8318, %v9477_v46   ;;  %v9490_v29 = vld [vmem:[%s12533_s5 + $0x18] sm:$0xff] }
 0x190   :  { %v9480_v2 = vpop.permute.xlu1 %2151 }
 0x191   :  { %12998 = vst [vmem:[#allocation103_spill] sm:$0xff] %v9480_v2  ;;  %8319 = vset.pattern.permute.xlu1 %v8524_v38  ;;  %v9497_v2 = vpop.permute.xlu0 %2095 }
 0x192   :  { %3099 = vperm.xlu1 %8319, %v9477_v46   ;;  %13002 = vst [vmem:[#allocation107_spill] sm:$0xff] %v9497_v2 }
 0x195   :  { %v9483_v26 = vpop.permute.xlu1 %2195  ;;  %v9508_v13 = vpop.permute.xlu0 %2103 }
 0x196   :  { %12999 = vst [vmem:[#allocation104_spill] sm:$0xff] %v9483_v26  ;;  %3103 = vperm.xlu1 %8319, %v9490_v29   ;;  %13005 = vst [vmem:[#allocation110_spill] sm:$0xff] %v9508_v13 }
 0x19a   :  { %8320 = vset.pattern.permute.xlu1 %v12994_v19  ;;  %v9494_v59 = vpop.permute.xlu1 %2115 }
 0x19b   :  { %13001 = vst [vmem:[#allocation106_spill] sm:$0xff] %v9494_v59  ;;  %3147 = vperm.xlu1 %8320, %v9477_v46   ;;  %v9513_v59 = vpop.permute.xlu0 %2111 }
 0x19c   :  { %13007 = vst [vmem:[#allocation112_spill] sm:$0xff] %v9513_v59 }
 0x19f   :  { %8321 = vset.pattern.permute.xlu1 %v12988_v45  ;;  %v9500_v26 = vpop.permute.xlu1 %2155  ;;  %v9526_v47 = vpop.permute.xlu0 %2119 }
 0x1a0   :  { %13003 = vst [vmem:[#allocation108_spill] sm:$0xff] %v9500_v26  ;;  %3067 = vperm.xlu1 %8321, %v9505_v54   ;;  %v9520_v26 = vld [vmem:[%s12533_s5 + $0x28] sm:$0xff]  ;;  %13011 = vst [vmem:[#allocation116_spill] sm:$0xff] %v9526_v47 }
 0x1a1   :  { %13009 = vst [vmem:[#allocation114_spill] sm:$0xff] %v9520_v26 }
 0x1a3   :  { %v9510_v16 = vpop.permute.xlu1 %2159 }
 0x1a4   :  { %13006 = vst [vmem:[#allocation111_spill] sm:$0xff] %v9510_v16  ;;  %8322 = vset.pattern.permute.xlu1 %v8524_v38 }
 0x1a5   :  { %3107 = vperm.xlu1 %8322, %v9505_v54  }
 0x1a8   :  { %v9515_v37 = vpop.permute.xlu1 %2203 }
 0x1a9   :  { %13008 = vst [vmem:[#allocation113_spill] sm:$0xff] %v9515_v37  ;;  %3111 = vperm.xlu1 %8322, %v9520_v26   ;;  %v9533_v37 = vpop.permute.xlu0 %2183 }
 0x1aa   :  { %13013 = vst [vmem:[#allocation118_spill] sm:$0xff] %v9533_v37 }
 0x1ad   :  { %8323 = vset.pattern.permute.xlu1 %v12994_v19  ;;  %v9524_v61 = vpop.permute.xlu1 %2571  ;;  %v9538_v26 = vpop.permute.xlu0 %2191 }
 0x1ae   :  { %13010 = vst [vmem:[#allocation115_spill] sm:$0xff] %v9524_v61  ;;  %3155 = vperm.xlu1 %8323, %v9505_v54   ;;  %13015 = vst [vmem:[#allocation120_spill] sm:$0xff] %v9538_v26  ;;  %v9545_v54 = vld [vmem:[%s12533_s5 + $0x38] sm:$0xff] }
 0x1af   :  { %13017 = vst [vmem:[#allocation122_spill] sm:$0xff] %v9545_v54 }
 0x1b2   :  { %8324 = vset.pattern.permute.xlu1 %v12988_v45  ;;  %v9530_v16 = vpop.permute.xlu1 %2611  ;;  %v9548_v45 = vpop.permute.xlu0 %2199 }
 0x1b3   :  { %13012 = vst [vmem:[#allocation117_spill] sm:$0xff] %v9530_v16  ;;  %3075 = vperm.xlu1 %8324, %v8866_v10   ;;  %13018 = vst [vmem:[#allocation123_spill] sm:$0xff] %v9548_v45 }
 0x1b6   :  { %v9535_v49 = vpop.permute.xlu1 %2615 }
 0x1b7   :  { %13014 = vst [vmem:[#allocation119_spill] sm:$0xff] %v9535_v49  ;;  %8325 = vset.pattern.permute.xlu1 %v8524_v38  ;;  %v13021_v38 = vmov 18   ;;  %v9562_v49 = vpop.permute.xlu0 %2207 }
 0x1b8   :  { %3115 = vperm.xlu1 %8325, %v8866_v10   ;;  %v9556_v10 = vld [vmem:[%s12533_s5 + $0x30] sm:$0xff]  ;;  %13023 = vst [vmem:[#allocation127_spill] sm:$0xff] %v9562_v49 }
 0x1b9   :  { %13020 = vst [vmem:[#allocation125_spill] sm:$0xff] %v9556_v10 }
 0x1bb   :  { %v9540_v61 = vpop.permute.xlu1 %2659 }
 0x1bc   :  { %13016 = vst [vmem:[#allocation121_spill] sm:$0xff] %v9540_v61  ;;  %3119 = vperm.xlu1 %8325, %v9545_v54  }
 0x1c0   :  { %8327 = vset.pattern.permute.xlu1 %v12994_v19  ;;  %v9551_v16 = vpop.permute.xlu1 %2579  ;;  %v12669_v19 = vmov 19  }
 0x1c1   :  { %13019 = vst [vmem:[#allocation124_spill] sm:$0xff] %v9551_v16  ;;  %3163 = vperm.xlu1 %8327, %v9556_v10   ;;  %v9569_v16 = vpop.permute.xlu0 %2575 }
 0x1c2   :  { %13025 = vst [vmem:[#allocation129_spill] sm:$0xff] %v9569_v16  ;;  %v13033_v16 = vmov 19  }
 0x1c5   :  { %8328 = vset.pattern.permute.xlu1 %v13021_v38  ;;  %v9560_v61 = vpop.permute.xlu1 %2619  ;;  %v9574_v37 = vpop.permute.xlu0 %2583 }
 0x1c6   :  { %13022 = vst [vmem:[#allocation126_spill] sm:$0xff] %v9560_v61  ;;  %3535 = vperm.xlu1 %8328, %v9453_v1   ;;  %13027 = vst [vmem:[#allocation131_spill] sm:$0xff] %v9574_v37  ;;  %v13028_v61 = vmov 20  }
 0x1c9   :  { %v9565_v45 = vpop.permute.xlu1 %2623 }
 0x1ca   :  { %13024 = vst [vmem:[#allocation128_spill] sm:$0xff] %v9565_v45  ;;  %8329 = vset.pattern.permute.xlu1 %v12669_v19  ;;  %v9583_v19 = vld [vmem:[%s12538_s1] ss:$0 sm:$0xff] }
 0x1cb   :  { %3575 = vperm.xlu1 %8329, %v9453_v1   ;;  %v911_v37 = vmul.f32 %v9583_v19, %v8990_v55  ;;  %v913_v4 = vmul.f32 %v9583_v19, %v9009_v62  ;;  %v27_v55 = vld [vmem:[%s12537_s4 + $0x1] sm:$0x1] }
 0x1ce   :  { %v9571_v26 = vpop.permute.xlu1 %2667 }
 0x1cf   :  { %13026 = vst [vmem:[#allocation130_spill] sm:$0xff] %v9571_v26  ;;  %3579 = vperm.xlu1 %8329, %v9464_v32   ;;  %v9588_v26 = vld [vmem:[%s12538_s1 + $0x1] ss:$0 sm:$0xff]  ;;  %v9590_v32 = vpop.permute.xlu0 %2591 }
 0x1d0   :  { %13030 = vst [vmem:[#allocation133_spill] sm:$0xff] %v9590_v32  ;;  %v951_v32 = vmul.f32 %v9588_v26, %v8996_v39  ;;  %v954_v39 = vmul.f32 %v9588_v26, %v9019_v6  ;;  %v684_v6 = vmul.f32 %v9583_v19, %v9057_v0  ;;  %v13053_v0 = vld [vmem:[#allocation54_spill] sm:$0xff] }
 0x1d2   :  { %v9640_v40 = vadd.f32 %v951_v32, %v911_v37  ;;  %v687_v37 = vmul.f32 %v9583_v19, %v9108_v63  ;;  %v9671_v32 = vmul.f32 %v9583_v19, %v9195_v17  ;;  %v13046_v63 = vmov 18  }
 0x1d3   :  { %8331 = vset.pattern.permute.xlu1 %v13028_v61  ;;  %v9577_v49 = vpop.permute.xlu1 %2587 }
 0x1d4   :  { %13029 = vst [vmem:[#allocation132_spill] sm:$0xff] %v9577_v49  ;;  %3623 = vperm.xlu1 %8331, %v9453_v1   ;;  %v910_v49 = vmul.f32 %v9583_v19, %v8963_v48  ;;  %v950_v1 = vmul.f32 %v9588_v26, %v8977_v52  ;;  %v952_v48 = vmul.f32 %v9588_v26, %v9000_v58 }
 0x1d5   :  { %v321_v45 = vpop.f32.mrb[2].mxu1  ;;  %v953_v52 = vmul.f32 %v9588_v26, %v9015_v3  ;;  %v915_v58 = vmul.f32 %v9583_v19, %v9031_v18  ;;  %v955_v3 = vmul.f32 %v9588_v26, %v9037_v22 }
 0x1d6   :  { %v6945_v54 = vpop.f32.mrb[3].mxu1  ;;  %v9638_v18 = vadd.f32 %v950_v1, %v910_v49  ;;  %v322_v22 = vadd.f32 %v321_v45, %v27_v55  ;;  %v729_v49 = vmul.f32 %v9588_v26, %v9070_v35  ;;  %v689_v55 = vmul.f32 %v9583_v19, %v9115_v56 }
 0x1d7   :  { %v949_v54 = vmul.f32 %v9588_v26, %v9028_v11  ;;  %v912_v11 = vmul.f32 %v9583_v19, %v9046_v25  ;;  %v916_v25 = vmul.f32 %v9583_v19, %v9060_v21  ;;  %v9649_v34 = vadd.f32 %v953_v52, %v913_v4 }
 0x1d8   :  { %8332 = vset.pattern.permute.xlu1 %v13021_v38  ;;  %v9593_v10 = vpop.permute.xlu1 %2627  ;;  %v956_v38 = vmul.f32 %v9588_v26, %v9043_v24  ;;  %v731_v45 = vmul.f32 %v9588_v26, %v9097_v20  ;;  %v618_v20 = vsel %vm610_vm15, 1.0, %v12927_v53  ;;  %v619_v35 = vsel %vm611_vm4, 1.0, %v12927_v53 }
 0x1d9   :  { %13031 = vst [vmem:[#allocation134_spill] sm:$0xff] %v9593_v10  ;;  %3543 = vperm.xlu1 %8332, %v9477_v46   ;;  %v909_v10 = vmul.f32 %v9583_v19, %v9039_v23  ;;  %v914_v23 = vmul.f32 %v9583_v19, %v9052_v31  ;;  %v728_v31 = vmul.f32 %v9588_v26, %v9064_v27 }
 0x1da   :  { %v9647_v24 = vadd.f32 %v952_v48, %v912_v11  ;;  %v685_v27 = vmul.f32 %v9583_v19, %v9100_v9  ;;  %v691_v48 = vmul.f32 %v9583_v19, %v9131_v33  ;;  %v9663_v11 = vadd.f32 %v955_v3, %v915_v58  ;;  %v13050_v9 = vld [vmem:[#allocation109_spill] sm:$0xff] }
 0x1db   :  { %v9642_v21 = vadd.f32 %v949_v54, %v909_v10  ;;  %v9655_v1 = vadd.f32 %v954_v39, %v914_v23  ;;  %v9665_v52 = vadd.f32 %v956_v38, %v916_v25  ;;  %v9667_v4 = vadd.f32 %v728_v31, %v684_v6 }
 0x1dc   :  { %v9627_v62 = vpop.permute.xlu1 %2631  ;;  %v686_v39 = vmul.f32 %v9583_v19, %v9084_v44  ;;  %v730_v23 = vmul.f32 %v9588_v26, %v9090_v51  ;;  %v325_v10 = vmax.f32 %v322_v22, 0.0  ;;  %v9682_v3 = vadd.f32 %v729_v49, %v685_v27 }
 0x1dd   :  { %13032 = vst [vmem:[#allocation135_spill] sm:$0xff] %v9627_v62  ;;  %8333 = vset.pattern.permute.xlu1 %v13033_v16  ;;  %v9644_v62 = vpop.permute.xlu0 %2599  ;;  %v688_v6 = vmul.f32 %v9583_v19, %v9111_v5  ;;  %v9688_v25 = vmul.f32 %v9583_v19, %v9205_v50  ;;  %v9692_v31 = vmul.f32 %v9583_v19, %v9217_v42 }
 0x1de   :  { %13034 = vst [vmem:[#allocation136_spill] sm:$0xff] %v9644_v62  ;;  %3583 = vperm.xlu1 %8333, %v9477_v46   ;;  %v732_v22 = vmul.f32 %v9588_v26, %v9118_v12  ;;  %v733_v38 = vmul.f32 %v9588_v26, %v9128_v15  ;;  %v9704_v54 = vmul.f32 %v9583_v19, %v9225_v57 }
 0x1df   :  { %v690_v49 = vmul.f32 %v9583_v19, %v9145_v7  ;;  %v734_v42 = vmul.f32 %v9588_v26, %v9157_v36  ;;  %v735_v50 = vmul.f32 %v9588_v26, %v9166_v43  ;;  %v9712_v33 = vadd.f32 %v730_v23, %v686_v39 }
 0x1e0   :  { %v9714_v15 = vadd.f32 %v731_v45, %v687_v37  ;;  %v9717_v56 = vrot.slane %v325_v10, %v8825_v28  ;;  %v9723_v7 = vadd.s32 1, %v9286_v30  ;;  %v9727_v36 = vmul.f32 %v9583_v19, %v9497_v2 }
 0x1e1   :  { %v9679_v58 = vpop.permute.xlu1 %2675  ;;  %v616_v37 = vsel %vm608_vm13, 1.0, %v12927_v53  ;;  %v617_v39 = vsel %vm609_vm14, 1.0, %v12927_v53  ;;  %v9736_v23 = vadd.f32 %v732_v22, %v688_v6  ;;  %v9738_v45 = vadd.f32 %v733_v38, %v689_v55  ;;  %v13040_v55 = vld [vmem:[#allocation25_spill] sm:$0xff]  ;;  %v13041_v38 = vld [vmem:[#allocation91_spill] sm:$0xff] }
 0x1e2   :  { %13035 = vst [vmem:[#allocation137_spill] sm:$0xff] %v9679_v58  ;;  %3587 = vperm.xlu1 %8333, %v9490_v29   ;;  %v9698_v29 = vpop.permute.xlu0 %2663  ;;  %13038 = vst [vmem:[#allocation140_spill] sm:$0xff] %v9723_v7  ;;  %v9742_v10 = vmul.f32 %v9583_v19, %v9513_v59  ;;  %v9745_v2 = vadd.f32 %v734_v42, %v690_v49  ;;  %v9751_v43 = vmul.f32 %v9583_v19, %v9526_v47  ;;  %v13042_v42 = vld [vmem:[#allocation52_spill] sm:$0xff]  ;;  %v13045_v47 = vld [vmem:[#allocation5_spill] sm:$0xff]  ;;  %vm1013_vm14 = vcmask 515072  }
 0x1e3   :  { %13036 = vst [vmem:[#allocation138_spill] sm:$0xff] %v9698_v29  ;;  %v998_v22 = vmul.f32 %v13040_v55, %v9717_v56  ;;  %v634_v59 = vmul.f32 %v13041_v38, %v616_v37  ;;  %v635_v12 = vmul.f32 %v13041_v38, %v617_v39  ;;  %vm1594_vm9 = vcmp.ge.s32.totalorder %v9723_v7, 0  ;;  %v13048_v37 = vld [vmem:[#allocation40_spill] sm:$0xff]  ;;  %v13049_v39 = vld [vmem:[#allocation93_spill] sm:$0xff]  ;;  %v13054_v55 = vld [vmem:[#allocation131_spill] sm:$0xff] }
 0x1e4   :  { %v997_v5 = vmul.f32 %v13045_v47, %v9717_v56  ;;  %v414_v44 = vadd.f32 %v13049_v39, %v13048_v37  ;;  %v1679_v47 = vmul.f32 %v9588_v26, %v13053_v0  ;;  %v9783_v28 = vmul.f32 %v9583_v19, %v13054_v55  ;;  %vm9791_vm12 = vmand %vm9298_vm1, %vm1594_vm9 }
 0x1e5   :  { %v483_v27 = vpop.f32.mrb[4].mxu1  ;;  %vm1596_vm13 = vcmp.lt.s32.totalorder %v9723_v7, 7  ;;  %v1006_v58 = vadd.f32 %v998_v22, %v9638_v18  ;;  %v9797_v0 = vpack.c.bf16 %v635_v12, %v634_v59  ;;  %v636_v55 = vmul.f32 %v13041_v38, %v618_v20  ;;  %v13064_v12 = vld [vmem:[#allocation72_spill] sm:$0xff]  ;;  %v13065_v20 = vld [vmem:[#allocation73_spill] sm:$0xff] }
 0x1e6   :  { %v6964_v17 = vpop.f32.mrb[5].mxu1  ;;  %8334 = vset.pattern.permute.xlu1 %v13028_v61  ;;  %v9720_v57 = vpop.permute.xlu1 %2595  ;;  %13055 = vst [vmem:[#allocation40_spill] sm:$0xff] %v9783_v28  ;;  %v484_v22 = vadd.f32 %v483_v27, %v414_v44  ;;  %vm1577_vm1 = vcmp.eq.s32.totalorder %v13064_v12, 4294967290  ;;  %vm1578_vm15 = vcmp.eq.s32.totalorder %v13065_v20, 4294967290  ;;  %vm9817_vm4 = vmand %vm9791_vm12, %vm1596_vm13  ;;  %v13070_v44 = vld [vmem:[#allocation13_spill] sm:$0xff] }
 0x1e7   :  { %13037 = vst [vmem:[#allocation139_spill] sm:$0xff] %v9720_v57  ;;  %v9731_v17 = vmul.f32 %v9583_v19, %v9508_v13  ;;  %3631 = vperm.xlu1 %8334, %v9477_v46   ;;  %v9747_v13 = vadd.f32 %v735_v50, %v691_v48  ;;  %v9754_v6 = vpop.permute.xlu0 %2671  ;;  %v1639_v50 = vmul.f32 %v9583_v19, %v13042_v42  ;;  %v13043_v48 = vld [vmem:[#allocation129_spill] sm:$0xff]  ;;  %v13051_v42 = vld [vmem:[#allocation83_spill] sm:$0xff]  ;;  %13060 = vst [vmem:[#allocation93_spill] sm:$0xff] %v9797_v0 }
 0x1e8   :  { %13039 = vst [vmem:[#allocation141_spill] sm:$0xff] %v9754_v6  ;;  %v9765_v49 = vmul.f32 %v9583_v19, %v13043_v48  ;;  %vm612_vm10 = vcmp.eq.s32.totalorder %v13051_v42, 4294967288  ;;  %v13052_v48 = vld [vmem:[#allocation84_spill] sm:$0xff]  ;;  %v1005_v6 = vadd.f32 %v997_v5, %v9642_v21  ;;  %v13063_v46 = vld [vmem:[#allocation27_spill] sm:$0xff]  ;;  %v1001_v27 = vmul.f32 %v13070_v44, %v9717_v56 }
 0x1e9   :  { %vm613_vm11 = vcmp.eq.s32.totalorder %v13052_v48, 4294967288  ;;  %v620_v28 = vsel %vm612_vm10, 1.0, %v12927_v53  ;;  %v1000_v18 = vmul.f32 %v13063_v46, %v9717_v56  ;;  %v9821_v21 = vadd.f32 %v1679_v47, %v1639_v50 }
 0x1ea   :  { %13044 = vst [vmem:[#allocation91_spill] sm:$0xff] %v9765_v49  ;;  %v621_v37 = vsel %vm613_vm11, 1.0, %v12927_v53  ;;  %7000 = vmatprep.mubr.msk.f32.mxu0 %vm1013_vm14, %v1005_v6  ;;  %v638_v47 = vmul.f32 %v13041_v38, %v620_v28  ;;  %v9850_v28 = vsel %vm9817_vm4, 1.0, %v12927_v53  ;;  %vm1579_vm10 = vcmp.eq.s32.totalorder %v9340_v14, 4294967290 }
 0x1eb   :  { %8335 = vset.pattern.permute.xlu1 %v13046_v63  ;;  %v9771_v51 = vpop.permute.xlu1 %2635  ;;  %v9806_v29 = vpop.permute.xlu0 %2679  ;;  %7001 = vmatmul.mubr.msk.f32.vlgmr.msra.gmra.mrb[4].mxu0 %vm1013_vm14, %v1006_v58  ;;  %v639_v50 = vmul.f32 %v13041_v38, %v621_v37  ;;  %v13074_v58 = vld [vmem:[#allocation29_spill] sm:$0xff]  ;;  %v1008_v6 = vadd.f32 %v1000_v18, %v9647_v24  ;;  %vm1580_vm11 = vcmp.eq.s32.totalorder %v9343_v41, 4294967290  ;;  %v13079_v18 = vld [vmem:[#allocation76_spill] sm:$0xff]  ;;  %vm1582_vm4 = vcmp.eq.s32.totalorder %v9368_v8, 4294967290 }
 0x1ec   :  { %13047 = vst [vmem:[#allocation142_spill] sm:$0xff] %v9771_v51  ;;  %3551 = vperm.xlu1 %8335, %v13050_v9   ;;  %v13056_v51 = vld [vmem:[#allocation9_spill] sm:$0xff]  ;;  %13062 = vst [vmem:[#allocation83_spill] sm:$0xff] %v9806_v29  ;;  %v13071_v29 = vld [vmem:[#allocation56_spill] sm:$0xff] }
 0x1ed   :  { %v999_v57 = vmul.f32 %v13056_v51, %v9717_v56  ;;  %v637_v51 = vmul.f32 %v13041_v38, %v619_v35  ;;  %v13068_v35 = vld [vmem:[#allocation133_spill] sm:$0xff]  ;;  %v1680_v39 = vmul.f32 %v9588_v26, %v13071_v29  ;;  %v1009_v29 = vadd.f32 %v1001_v27, %v9649_v34 }
 0x1ee   :  { %v9825_v59 = vmul.f32 %v9583_v19, %v13068_v35  ;;  %v13072_v35 = vld [vmem:[#allocation92_spill] sm:$0xff]  ;;  %v13076_v38 = vld [vmem:[#allocation61_spill] sm:$0xff]  ;;  %v1587_v34 = vsel %vm1579_vm10, 1.0, %v12927_v53  ;;  %v1588_v27 = vsel %vm1580_vm11, 1.0, %v12927_v53  ;;  %vm1583_vm11 = vcmp.eq.s32.totalorder %v13051_v42, 4294967290 }
 0x1ef   :  { %v9804_v49 = vpop.permute.xlu1 %2639  ;;  %v1007_v46 = vadd.f32 %v999_v57, %v9640_v40  ;;  %7717 = vmatpush3.bf16.msra.mxu0 %v13072_v35  ;;  %v9839_v44 = vpack.c.bf16 %v637_v51, %v636_v55  ;;  %v1585_v57 = vsel %vm1577_vm1, 1.0, %v12927_v53  ;;  %v1586_v40 = vsel %vm1578_vm15, 1.0, %v12927_v53  ;;  %v13075_v51 = vld [vmem:[#allocation59_spill] sm:$0xff] }
 0x1f0   :  { %13061 = vst [vmem:[#allocation109_spill] sm:$0xff] %v9804_v49  ;;  %8336 = vset.pattern.permute.xlu1 %v13033_v16  ;;  %13069 = vst [vmem:[#allocation84_spill] sm:$0xff] %v9825_v59  ;;  %v487_v49 = vmax.f32 %v484_v22, 0.0  ;;  %7719 = vmatprep.subr.bf16.mxu0 %v9797_v0  ;;  %v1641_v55 = vmul.f32 %v9583_v19, %v13075_v51  ;;  %v1681_v37 = vmul.f32 %v9588_v26, %v13076_v38  ;;  %v13077_v22 = vld [vmem:[#allocation20_spill] sm:$0xff]  ;;  %v13082_v38 = vld [vmem:[#allocation114_spill] sm:$0xff] }
 0x1f1   :  { %3591 = vperm.xlu1 %8336, %v13050_v9   ;;  %7003 = vmatprep.mubr.msk.f32.mxu0 %vm1013_vm14, %v1007_v46  ;;  %13073 = vst [vmem:[#allocation74_spill] sm:$0xff] %v9839_v44  ;;  %v1002_v46 = vmul.f32 %v13074_v58, %v9717_v56  ;;  %v1003_v5 = vmul.f32 %v13077_v22, %v9717_v56  ;;  %vm1581_vm15 = vcmp.eq.s32.totalorder %v9365_v60, 4294967290 }
 0x1f2   :  { %6982 = vmatmul.mubr.msk.f32.vlgmr.msra.gmra.mrb[6].mxu1 %vm251_vm5, %v487_v49  ;;  %v9869_v49 = vpop.permute.xlu0 %2687  ;;  %7004 = vmatmul.mubr.msk.f32.gmra.mrb[6].mxu0 %vm1013_vm14, %v1008_v6  ;;  %v9872_v58 = vpack.c.bf16 %v639_v50, %v638_v47  ;;  %v1599_v51 = vmul.f32 %v9850_v28, %v1585_v57  ;;  %v1600_v59 = vmul.f32 %v9850_v28, %v1586_v40  ;;  %v13083_v47 = vld [vmem:[#allocation69_spill] sm:$0xff]  ;;  %v13084_v50 = vld [vmem:[#allocation32_spill] sm:$0xff] }
 0x1f3   :  { %7735 = vmatpush3.bf16.msra.mxu1 %v13079_v18  ;;  %13080 = vst [vmem:[#allocation73_spill] sm:$0xff] %v9869_v49  ;;  %7006 = vmatprep.mubr.msk.f32.mxu0 %vm1013_vm14, %v1009_v29  ;;  %vm2076_vm12 = vcmp.ge.s32.totalorder %v13083_v47, 0  ;;  %vm2077_vm1 = vcmp.lt.s32.totalorder %v13083_v47, 9  ;;  %v1004_v57 = vmul.f32 %v13084_v50, %v9717_v56  ;;  %v1010_v40 = vadd.f32 %v1002_v46, %v9655_v1  ;;  %v13085_v29 = vld [vmem:[#allocation63_spill] sm:$0xff]  ;;  %v13087_v18 = vld [vmem:[#allocation28_spill] sm:$0xff] }
 0x1f4   :  { %v9866_v24 = vpop.permute.xlu1 %2683  ;;  %13081 = vst [vmem:[#allocation76_spill] sm:$0xff] %v9872_v58  ;;  %7721 = vmatpush3.bf16.msra.mxu0 %v9797_v0  ;;  %v1682_v6 = vmul.f32 %v9588_v26, %v13085_v29  ;;  %v780_v22 = vmul.f32 %v9717_v56, %v13087_v18  ;;  %v1011_v50 = vadd.f32 %v1003_v5, %v9663_v11  ;;  %v13088_v1 = vld [vmem:[#allocation80_spill] sm:$0xff]  ;;  %vm9918_vm10 = vmand %vm2076_vm12, %vm2077_vm1  ;;  %vm1584_vm12 = vcmp.eq.s32.totalorder %v13052_v48, 4294967290 }
 0x1f5   :  { %13078 = vst [vmem:[#allocation72_spill] sm:$0xff] %v9866_v24  ;;  %3595 = vperm.xlu1 %8336, %v13082_v38   ;;  %7723 = vmatprep.subr.bf16.mxu0 %v9839_v44  ;;  %v9897_v38 = vmul.f32 %v9583_v19, %v9644_v62  ;;  %v9906_v46 = vadd.f32 %v1680_v39, %v9671_v32  ;;  %v13096_v62 = vld [vmem:[#allocation35_spill] sm:$0xff]  ;;  %vm9957_vm1 = vmand %vm9918_vm10, %vm627_vm8  ;;  %v13102_v18 = vld [vmem:[#allocation68_spill] sm:$0xff] }
 0x1f6   :  { %7737 = vmatprep.subr.bf16.mxu1 %v13088_v1  ;;  %v9908_v49 = vadd.f32 %v1681_v37, %v1641_v55  ;;  %7007 = vmatmul.mubr.msk.f32.gmra.mrb[8].mxu0 %vm1013_vm14, %v1010_v40  ;;  %v9911_v29 = vpack.c.bf16 %v1600_v59, %v1599_v51  ;;  %v1601_v32 = vmul.f32 %v9850_v28, %v1587_v34  ;;  %v1589_v59 = vsel %vm1581_vm15, 1.0, %v12927_v53  ;;  %v9932_v55 = vpop.permute.xlu0 %3055  ;;  %v13093_v37 = vld [vmem:[#allocation44_spill] sm:$0xff] }
 0x1f7   :  { %13086 = vst [vmem:[#allocation114_spill] sm:$0xff] %v9897_v38  ;;  %7009 = vmatprep.mubr.msk.f32.mxu0 %vm1013_vm14, %v1011_v50  ;;  %v1602_v39 = vmul.f32 %v9850_v28, %v1588_v27  ;;  %v1590_v51 = vsel %vm1582_vm4, 1.0, %v12927_v53  ;;  %13092 = vst [vmem:[#allocation80_spill] sm:$0xff] %v9932_v55  ;;  %v781_v5 = vmul.f32 %v9717_v56, %v13093_v37  ;;  %7739 = vmatpush3.bf16.msra.mxu1 %v13088_v1 }
 0x1f8   :  { %13089 = vst [vmem:[#allocation69_spill] sm:$0xff] %v9911_v29  ;;  %7725 = vmatpush3.bf16.msra.mxu0 %v9839_v44  ;;  %v1012_v50 = vadd.f32 %v1004_v57, %v9665_v52  ;;  %v9944_v34 = vadd.f32 %v1682_v6, %v9688_v25  ;;  %v9948_v27 = vmul.f32 %v9583_v19, %v9932_v55  ;;  %v13100_v25 = vld [vmem:[#allocation66_spill] sm:$0xff]  ;;  %vm2060_vm15 = vcmp.eq.s32.totalorder %v13064_v12, 4294967295 }
 0x1f9   :  { %v9902_v0 = vpop.permute.xlu1 %3051  ;;  %8337 = vset.pattern.permute.xlu1 %v13028_v61  ;;  %7728 = vmatprep.subr.msk.bf16.mxu0 %vm9402_vm7, %v9872_v58  ;;  %v782_v52 = vmul.f32 %v9717_v56, %v13096_v62  ;;  %v788_v57 = vadd.f32 %v780_v22, %v9667_v4  ;;  %v1643_v6 = vmul.f32 %v9583_v19, %v13100_v25  ;;  %v13101_v22 = vld [vmem:[#allocation85_spill] sm:$0xff]  ;;  %vm2061_vm4 = vcmp.eq.s32.totalorder %v13065_v20, 4294967295 }
 0x1fa   :  { %3639 = vperm.xlu1 %8337, %v13050_v9   ;;  %13095 = vst [vmem:[#allocation88_spill] sm:$0xff] %v9948_v27  ;;  %7010 = vmatmul.mubr.msk.f32.gmra.mrb[10].mxu0 %vm1013_vm14, %v1012_v50  ;;  %v1603_v55 = vmul.f32 %v9850_v28, %v1589_v59  ;;  %v1604_v62 = vmul.f32 %v9850_v28, %v1590_v51  ;;  %v1591_v59 = vsel %vm1583_vm11, 1.0, %v12927_v53  ;;  %v1592_v51 = vsel %vm1584_vm12, 1.0, %v12927_v53  ;;  %v13104_v50 = vld [vmem:[#allocation46_spill] sm:$0xff]  ;;  %vm9995_vm11 = vmand %vm9957_vm1, %vm629_vm2 }
 0x1fb   :  { %7741 = vmatprep.subr.bf16.mxu1 %v13101_v22  ;;  %v1683_v44 = vmul.f32 %v9588_v26, %v13102_v18  ;;  %7028 = vmatprep.mubr.msk.f32.mxu0 %vm1013_vm14, %v788_v57  ;;  %v9976_v1 = vpack.c.bf16 %v1602_v39, %v1601_v32  ;;  %v783_v25 = vmul.f32 %v9717_v56, %v13104_v50  ;;  %v13107_v39 = vld [vmem:[#allocation70_spill] sm:$0xff]  ;;  %v13109_v50 = vld [vmem:[#allocation125_spill] sm:$0xff]  ;;  %vm2062_vm12 = vcmp.eq.s32.totalorder %v9340_v14, 4294967295 }
 0x1fc   :  { %7731 = vmatpush3.bf16.msk.msra.mxu0 %vm9402_vm7, %v9872_v58  ;;  %v789_v18 = vadd.f32 %v781_v5, %v9682_v3  ;;  %v1684_v57 = vmul.f32 %v9588_v26, %v13107_v39  ;;  %v13108_v3 = vld [vmem:[#allocation43_spill] sm:$0xff]  ;;  %7743 = vmatpush3.bf16.msra.mxu1 %v13101_v22  ;;  %v10009_v9 = vpack.c.bf16 %v1604_v62, %v1603_v55  ;;  %v13113_v39 = vld [vmem:[#allocation89_spill] sm:$0xff]  ;;  %v2069_v62 = vsel %vm2061_vm4, 1.0, %v12927_v53 }
 0x1fd   :  { %13103 = vst [vmem:[#allocation87_spill] sm:$0xff] %v9976_v1  ;;  %7769 = vmatprep.subr.bf16.mxu0 %v9911_v29  ;;  %v784_v5 = vmul.f32 %v9717_v56, %v13108_v3  ;;  %v13110_v58 = vld [vmem:[#allocation75_spill] sm:$0xff]  ;;  %v1605_v38 = vmul.f32 %v9850_v28, %v1591_v59  ;;  %7746 = vmatprep.subr.msk.bf16.mxu1 %vm9402_vm7, %v13113_v39  ;;  %v10029_v55 = vsel %vm9995_vm11, 1.0, %v12927_v53  ;;  %vm2063_vm1 = vcmp.eq.s32.totalorder %v9343_v41, 4294967295 }
 0x1fe   :  { %v9967_v4 = vpop.permute.xlu1 %3091  ;;  %8338 = vset.pattern.permute.xlu1 %v13046_v63  ;;  %v790_v63 = vadd.f32 %v782_v52, %v9712_v33  ;;  %v1645_v27 = vmul.f32 %v9583_v19, %v13110_v58  ;;  %13111 = vst [vmem:[#allocation85_spill] sm:$0xff] %v10009_v9  ;;  %v1606_v33 = vmul.f32 %v9850_v28, %v1592_v51  ;;  %v13114_v52 = vld [vmem:[#allocation48_spill] sm:$0xff]  ;;  %v13115_v28 = vld [vmem:[#allocation77_spill] sm:$0xff]  ;;  %vm2065_vm4 = vcmp.eq.s32.totalorder %v9368_v8, 4294967295 }
 0x1ff   :  { %3559 = vperm.xlu1 %8338, %v13109_v50   ;;  %7029 = vmatmul.mubr.msk.f32.vlgmr.msra.gmra.mrb[4].mxu0 %vm1013_vm14, %v789_v18  ;;  %v2068_v18 = vsel %vm2060_vm15, 1.0, %v12927_v53  ;;  %v785_v22 = vmul.f32 %v9717_v56, %v13114_v52  ;;  %v791_v59 = vadd.f32 %v783_v25, %v9714_v15  ;;  %v1685_v51 = vmul.f32 %v9588_v26, %v13115_v28  ;;  %v13117_v52 = vld [vmem:[#allocation78_spill] sm:$0xff] }
 0x200   :  { %7031 = vmatprep.mubr.msk.f32.mxu0 %vm1013_vm14, %v790_v63  ;;  %7771 = vmatpush3.bf16.msra.mxu0 %v9911_v29  ;;  %v13116_v63 = vld [vmem:[#allocation50_spill] sm:$0xff]  ;;  %v792_v32 = vadd.f32 %v784_v5, %v9736_v23  ;;  %v10046_v15 = vadd.f32 %v1683_v44, %v1643_v6  ;;  %v10049_v25 = vadd.f32 %v1684_v57, %v9692_v31  ;;  %v2070_v31 = vsel %vm2062_vm12, 1.0, %v12927_v53  ;;  %v13118_v6 = vld [vmem:[#allocation51_spill] sm:$0xff]  ;;  %vm10113_vm12 = vmand %vm9918_vm10, %vm864_vm3 }
 0x201   :  { %7773 = vmatprep.subr.bf16.mxu0 %v9976_v1  ;;  %v786_v58 = vmul.f32 %v9717_v56, %v13116_v63  ;;  %7749 = vmatpush3.bf16.msk.msra.mxu1 %vm9402_vm7, %v13113_v39  ;;  %v1686_v3 = vmul.f32 %v9588_v26, %v13117_v52  ;;  %v2083_v23 = vmul.f32 %v10029_v55, %v2069_v62  ;;  %v2071_v44 = vsel %vm2063_vm1, 1.0, %v12927_v53  ;;  %v13124_v28 = vld [vmem:[#allocation82_spill] sm:$0xff] }
 0x202   :  { %v10012_v24 = vpop.permute.xlu1 %3095  ;;  %v787_v39 = vmul.f32 %v9717_v56, %v13118_v6  ;;  %v793_v57 = vadd.f32 %v785_v22, %v9738_v45  ;;  %v10069_v5 = vpack.c.bf16 %v1606_v33, %v1605_v38  ;;  %vm2064_vm15 = vcmp.eq.s32.totalorder %v9365_v60, 4294967295  ;;  %7751 = vmatprep.subr.bf16.mxu1 %v13072_v35  ;;  %v13122_v22 = vld [vmem:[#allocation122_spill] sm:$0xff] }
 0x203   :  { %13112 = vst [vmem:[#allocation125_spill] sm:$0xff] %v10012_v24  ;;  %8339 = vset.pattern.permute.xlu1 %v13033_v16  ;;  %7032 = vmatmul.mubr.msk.f32.gmra.mrb[6].mxu0 %vm1013_vm14, %v791_v59  ;;  %v2082_v16 = vmul.f32 %v10029_v55, %v2068_v18  ;;  %v10075_v62 = vadd.f32 %v1685_v51, %v1645_v27  ;;  %v13121_v59 = vld [vmem:[#allocation57_spill] sm:$0xff]  ;;  %vm2066_vm11 = vcmp.eq.s32.totalorder %v13051_v42, 4294967295  ;;  %vm2067_vm1 = vcmp.eq.s32.totalorder %v13052_v48, 4294967295 }
 0x204   :  { %3599 = vperm.xlu1 %8339, %v13109_v50   ;;  %7034 = vmatprep.mubr.msk.f32.mxu0 %vm1013_vm14, %v792_v32  ;;  %13119 = vst [vmem:[#allocation89_spill] sm:$0xff] %v10069_v5  ;;  %v1727_v32 = vmul.f32 %v13121_v59, %v9717_v56  ;;  %v794_v52 = vadd.f32 %v786_v58, %v9745_v2  ;;  %v13123_v27 = vld [vmem:[#allocation81_spill] sm:$0xff]  ;;  %v13126_v58 = vld [vmem:[#allocation62_spill] sm:$0xff] }
 0x205   :  { %7775 = vmatpush3.bf16.msra.mxu0 %v9976_v1  ;;  %v10082_v45 = vadd.f32 %v1686_v3, %v9704_v54  ;;  %v2084_v38 = vmul.f32 %v10029_v55, %v2070_v31  ;;  %v2085_v33 = vmul.f32 %v10029_v55, %v2071_v44  ;;  %v2122_v51 = vmul.f32 %v9583_v19, %v13123_v27 }
 0x206   :  { %7777 = vmatprep.subr.bf16.mxu0 %v10009_v9  ;;  %v2162_v59 = vmul.f32 %v9588_v26, %v13124_v28  ;;  %v10094_v2 = vpack.c.bf16 %v2083_v23, %v2082_v16  ;;  %v2072_v54 = vsel %vm2064_vm15, 1.0, %v12927_v53  ;;  %v1728_v3 = vmul.f32 %v13126_v58, %v9717_v56  ;;  %v13130_v23 = vld [vmem:[#allocation86_spill] sm:$0xff]  ;;  %v13133_v58 = vld [vmem:[#allocation95_spill] sm:$0xff] }
 0x207   :  { %v10071_v18 = vpop.permute.xlu1 %3139  ;;  %7035 = vmatmul.mubr.msk.f32.gmra.mrb[8].mxu0 %vm1013_vm14, %v793_v57  ;;  %v795_v31 = vadd.f32 %v787_v39, %v9747_v13  ;;  %v2073_v44 = vsel %vm2065_vm4, 1.0, %v12927_v53  ;;  %v2163_v13 = vmul.f32 %v9588_v26, %v13130_v23  ;;  %v13131_v39 = vld [vmem:[#allocation65_spill] sm:$0xff]  ;;  %v13132_v28 = vld [vmem:[#allocation94_spill] sm:$0xff]  ;;  %v10128_v6 = vpack.c.bf16 %v2085_v33, %v2084_v38  ;;  %vm10145_vm4 = vmand %vm10113_vm12, %vm866_vm6  ;;  %v10168_v23 = vpop.permute.xlu0 %3063 }
 0x208   :  { %13120 = vst [vmem:[#allocation143_spill] sm:$0xff] %v10071_v18  ;;  %3603 = vperm.xlu1 %8339, %v13122_v22   ;;  %7037 = vmatprep.mubr.msk.f32.mxu0 %vm1013_vm14, %v794_v52  ;;  %13125 = vst [vmem:[#allocation122_spill] sm:$0xff] %v10094_v2  ;;  %v1729_v57 = vmul.f32 %v13131_v39, %v9717_v56  ;;  %v1735_v22 = vadd.f32 %v1727_v32, %v9821_v21  ;;  %vm2543_vm15 = vcmp.eq.s32.totalorder %v13064_v12, 0  ;;  %v13137_v38 = vld [vmem:[#allocation64_spill] sm:$0xff]  ;;  %v13141_v39 = vld [vmem:[#allocation97_spill] sm:$0xff] }
 0x209   :  { %7779 = vmatpush3.bf16.msra.mxu0 %v10009_v9  ;;  %v2124_v27 = vmul.f32 %v9583_v19, %v13132_v28  ;;  %v2164_v9 = vmul.f32 %v9588_v26, %v13133_v58  ;;  %13134 = vst [vmem:[#allocation145_spill] sm:$0xff] %v10128_v6  ;;  %v2086_v21 = vmul.f32 %v10029_v55, %v2072_v54  ;;  %v2074_v58 = vsel %vm2066_vm11, 1.0, %v12927_v53 }
 0x20a   :  { %7782 = vmatprep.subr.msk.bf16.mxu0 %vm9402_vm7, %v10069_v5  ;;  %v2087_v32 = vmul.f32 %v10029_v55, %v2073_v44  ;;  %v1730_v33 = vmul.f32 %v13137_v38, %v9717_v56  ;;  %v1736_v54 = vadd.f32 %v1728_v3, %v9906_v46  ;;  %vm2544_vm11 = vcmp.eq.s32.totalorder %v13065_v20, 0  ;;  %13140 = vst [vmem:[#allocation147_spill] sm:$0xff] %v10168_v23 }
 0x20b   :  { %7038 = vmatmul.mubr.msk.f32.gmra.mrb[10].mxu0 %vm1013_vm14, %v795_v31  ;;  %v2075_v31 = vsel %vm2067_vm1, 1.0, %v12927_v53  ;;  %v10158_v44 = vadd.f32 %v2162_v59, %v2122_v51  ;;  %v10161_v16 = vadd.f32 %v2163_v13, %v9727_v36  ;;  %v1737_v46 = vadd.f32 %v1729_v57, %v9908_v49  ;;  %v13142_v49 = vld [vmem:[#allocation100_spill] sm:$0xff]  ;;  %v13143_v57 = vld [vmem:[#allocation67_spill] sm:$0xff] }
 0x20c   :  { %v10107_v52 = vpop.permute.xlu1 %3059  ;;  %8341 = vset.pattern.permute.xlu1 %v13028_v61  ;;  %7112 = vmatprep.mubr.msk.f32.mxu0 %vm1013_vm14, %v1735_v22  ;;  %v13138_v22 = vld [vmem:[#allocation71_spill] sm:$0xff]  ;;  %v10170_v38 = vadd.f32 %v2164_v9, %v2124_v27  ;;  %v2551_v36 = vsel %vm2543_vm15, 1.0, %v12927_v53  ;;  %v10181_v59 = vsel %vm10145_vm4, 1.0, %v12927_v53  ;;  %v2126_v51 = vmul.f32 %v9583_v19, %v13142_v49 }
 0x20d   :  { %13127 = vst [vmem:[#allocation144_spill] sm:$0xff] %v10107_v52  ;;  %7785 = vmatpush3.bf16.msk.msra.mxu0 %vm9402_vm7, %v10069_v5  ;;  %3647 = vperm.xlu1 %8341, %v13109_v50   ;;  %v1731_v28 = vmul.f32 %v13138_v22, %v9717_v56  ;;  %v2165_v50 = vmul.f32 %v9588_v26, %v13141_v39  ;;  %v2552_v13 = vsel %vm2544_vm11, 1.0, %v12927_v53  ;;  %v13146_v39 = vld [vmem:[#allocation101_spill] sm:$0xff]  ;;  %v13148_v5 = vld [vmem:[#allocation96_spill] sm:$0xff]  ;;  %vm2545_vm12 = vcmp.eq.s32.totalorder %v9340_v14, 0 }
 0x20e   :  { %7805 = vmatprep.subr.bf16.mxu0 %v10094_v2  ;;  %v2088_v9 = vmul.f32 %v10029_v55, %v2074_v58  ;;  %v2089_v27 = vmul.f32 %v10029_v55, %v2075_v31  ;;  %v1732_v61 = vmul.f32 %v13143_v57, %v9717_v56  ;;  %v10196_v49 = vpack.c.bf16 %v2087_v32, %v2086_v21  ;;  %v13147_v55 = vld [vmem:[#allocation79_spill] sm:$0xff] }
 0x20f   :  { %v2166_v58 = vmul.f32 %v9588_v26, %v13146_v39  ;;  %v1733_v31 = vmul.f32 %v13147_v55, %v9717_v56  ;;  %v1739_v22 = vadd.f32 %v1731_v28, %v10046_v15  ;;  %vm2546_vm1 = vcmp.eq.s32.totalorder %v9343_v41, 0  ;;  %v13149_v21 = vld [vmem:[#allocation103_spill] sm:$0xff] }
 0x210   :  { %7113 = vmatmul.mubr.msk.f32.vlgmr.msra.gmra.mrb[4].mxu0 %vm1013_vm14, %v1736_v54  ;;  %v1738_v54 = vadd.f32 %v1730_v33, %v9944_v34  ;;  %13144 = vst [vmem:[#allocation148_spill] sm:$0xff] %v10196_v49  ;;  %v2563_v34 = vmul.f32 %v10181_v59, %v2552_v13  ;;  %v2167_v32 = vmul.f32 %v9588_v26, %v13149_v21  ;;  %v13150_v33 = vld [vmem:[#allocation106_spill] sm:$0xff]  ;;  %v13153_v13 = vld [vmem:[#allocation105_spill] sm:$0xff]  ;;  %vm2547_vm15 = vcmp.eq.s32.totalorder %v9365_v60, 0 }
 0x211   :  { %v10166_v3 = vpop.permute.xlu1 %3099  ;;  %7115 = vmatprep.mubr.msk.f32.mxu0 %vm1013_vm14, %v1737_v46  ;;  %7807 = vmatpush3.bf16.msra.mxu0 %v10094_v2  ;;  %v13145_v46 = vmov 21   ;;  %v2562_v2 = vmul.f32 %v10181_v59, %v2551_v36  ;;  %v2128_v28 = vmul.f32 %v9583_v19, %v13150_v33  ;;  %v10218_v15 = vpack.c.bf16 %v2089_v27, %v2088_v9  ;;  %v10220_v36 = vpop.permute.xlu0 %3071  ;;  %v13154_v33 = vld [vmem:[#allocation90_spill] sm:$0xff] }
 0x212   :  { %13139 = vst [vmem:[#allocation146_spill] sm:$0xff] %v10166_v3  ;;  %7809 = vmatprep.subr.bf16.mxu0 %v10128_v6  ;;  %8342 = vset.pattern.permute.xlu1 %v13145_v46  ;;  %13152 = vst [vmem:[#allocation149_spill] sm:$0xff] %v10220_v36  ;;  %v1740_v39 = vadd.f32 %v1732_v61, %v10049_v25  ;;  %vm2548_vm4 = vcmp.eq.s32.totalorder %v9368_v8, 0  ;;  %v1741_v21 = vadd.f32 %v1733_v31, %v10075_v62  ;;  %v12754_v55 = vmov 22   ;;  %v13156_v61 = vld [vmem:[#allocation111_spill] sm:$0xff] }
 0x213   :  { %4015 = vperm.xlu1 %8342, %v13148_v5   ;;  %13151 = vst [vmem:[#allocation96_spill] sm:$0xff] %v10218_v15  ;;  %v2553_v9 = vsel %vm2545_vm12, 1.0, %v12927_v53  ;;  %v2554_v27 = vsel %vm2546_vm1, 1.0, %v12927_v53  ;;  %v10239_v63 = vpack.c.bf16 %v2563_v34, %v2562_v2  ;;  %v2555_v62 = vsel %vm2547_vm15, 1.0, %v12927_v53  ;;  %vm10266_vm1 = vmand %vm9918_vm10, %vm1594_vm9 }
 0x214   :  { %7116 = vmatmul.mubr.msk.f32.gmra.mrb[6].mxu0 %vm1013_vm14, %v1738_v54  ;;  %v1734_v54 = vmul.f32 %v13153_v13, %v9717_v56  ;;  %v13155_v13 = vld [vmem:[#allocation108_spill] sm:$0xff]  ;;  %v2556_v31 = vsel %vm2548_vm4, 1.0, %v12927_v53  ;;  %vm2549_vm11 = vcmp.eq.s32.totalorder %v13051_v42, 0  ;;  %vm2550_vm12 = vcmp.eq.s32.totalorder %v13052_v48, 0  ;;  %vm3040_vm4 = vmand %vm10266_vm1, %vm1596_vm13 }
 0x215   :  { %v10206_v57 = vpop.permute.xlu1 %3103  ;;  %7118 = vmatprep.mubr.msk.f32.mxu0 %vm1013_vm14, %v1739_v22  ;;  %7811 = vmatpush3.bf16.msra.mxu0 %v10128_v6  ;;  %v2210_v22 = vmul.f32 %v13154_v33, %v9717_v56  ;;  %v2168_v25 = vmul.f32 %v9588_v26, %v13155_v13  ;;  %v2169_v6 = vmul.f32 %v9588_v26, %v13156_v61  ;;  %v2558_v11 = vsel %vm2550_vm12, 1.0, %v12927_v53 }
 0x216   :  { %7813 = vmatprep.subr.bf16.mxu0 %v10196_v49  ;;  %13157 = vst [vmem:[#allocation150_spill] sm:$0xff] %v10239_v63  ;;  %v1742_v34 = vadd.f32 %v1734_v54, %v10082_v45  ;;  %v2565_v61 = vmul.f32 %v10181_v59, %v2554_v27  ;;  %v2173_v13 = vadd.f32 %v2165_v50, %v9731_v17  ;;  %v10270_v54 = vpop.permute.xlu0 %3079  ;;  %vm3023_vm10 = vcmp.eq.s32.totalorder %v13064_v12, 1 }
 0x217   :  { %8343 = vset.pattern.permute.xlu1 %v12754_v55  ;;  %v2174_v33 = vadd.f32 %v2166_v58, %v2126_v51  ;;  %v2218_v29 = vadd.f32 %v2210_v22, %v10158_v44  ;;  %13162 = vst [vmem:[#allocation151_spill] sm:$0xff] %v10270_v54  ;;  %v2566_v17 = vmul.f32 %v10181_v59, %v2555_v62  ;;  %v13163_v51 = vld [vmem:[#allocation99_spill] sm:$0xff]  ;;  %v2557_v44 = vsel %vm2549_vm11, 1.0, %v12927_v53  ;;  %v13164_v62 = vld [vmem:[#allocation120_spill] sm:$0xff] }
 0x218   :  { %7119 = vmatmul.mubr.msk.f32.gmra.mrb[8].mxu0 %vm1013_vm14, %v1740_v39  ;;  %4055 = vperm.xlu1 %8343, %v13148_v5   ;;  %v13158_v39 = vld [vmem:[#allocation118_spill] sm:$0xff]  ;;  %v2567_v50 = vmul.f32 %v10181_v59, %v2556_v31  ;;  %v2175_v58 = vadd.f32 %v2167_v32, %v9742_v10  ;;  %v2176_v22 = vadd.f32 %v2168_v25, %v2128_v28  ;;  %vm3024_vm15 = vcmp.eq.s32.totalorder %v13065_v20, 1 }
 0x219   :  { %7121 = vmatprep.mubr.msk.f32.mxu0 %vm1013_vm14, %v1741_v21  ;;  %7815 = vmatpush3.bf16.msra.mxu0 %v10196_v49  ;;  %v2211_v2 = vmul.f32 %v13158_v39, %v9717_v56  ;;  %v2564_v21 = vmul.f32 %v10181_v59, %v2553_v9  ;;  %v13159_v49 = vld [vmem:[#allocation98_spill] sm:$0xff]  ;;  %v10292_v27 = vadd.f32 %v2169_v6, %v9751_v43  ;;  %vm3025_vm11 = vcmp.eq.s32.totalorder %v9340_v14, 1 }
 0x21a   :  { %v10246_v55 = vpop.permute.xlu1 %3147  ;;  %7818 = vmatprep.subr.msk.bf16.mxu0 %vm9402_vm7, %v10218_v15  ;;  %v2212_v1 = vmul.f32 %v13159_v49, %v9717_v56  ;;  %v2213_v31 = vmul.f32 %v13164_v62, %v9717_v56  ;;  %v2568_v6 = vmul.f32 %v10181_v59, %v2557_v44  ;;  %v2569_v25 = vmul.f32 %v10181_v59, %v2558_v11  ;;  %v10329_v45 = vpop.permute.xlu0 %3143  ;;  %v13171_v11 = vld [vmem:[#allocation117_spill] sm:$0xff]  ;;  %v13178_v49 = vld [vmem:[#allocation102_spill] sm:$0xff] }
 0x21b   :  { %v2219_v10 = vadd.f32 %v2211_v2, %v10161_v16  ;;  %v10298_v32 = vpack.c.bf16 %v2565_v61, %v2564_v21  ;;  %v10312_v61 = vpack.c.bf16 %v2567_v50, %v2566_v17  ;;  %v13169_v2 = vmov 23   ;;  %v13170_v17 = vld [vmem:[#allocation123_spill] sm:$0xff] }
 0x21c   :  { %7122 = vmatmul.mubr.msk.f32.gmra.mrb[10].mxu0 %vm1013_vm14, %v1742_v34  ;;  %4059 = vperm.xlu1 %8343, %v13163_v51   ;;  %v2220_v43 = vadd.f32 %v2212_v1, %v10170_v38  ;;  %v13167_v34 = vld [vmem:[#allocation115_spill] sm:$0xff]  ;;  %v3031_v21 = vsel %vm3023_vm10, 1.0, %v12927_v53  ;;  %v3032_v1 = vsel %vm3024_vm15, 1.0, %v12927_v53  ;;  %v10324_v38 = vsel %vm3040_vm4, 1.0, %v12927_v53 }
 0x21d   :  { %7821 = vmatpush3.bf16.msk.msra.mxu0 %vm9402_vm7, %v10218_v15  ;;  %7168 = vmatprep.mubr.msk.f32.mxu0 %vm1013_vm14, %v2218_v29  ;;  %13165 = vst [vmem:[#allocation99_spill] sm:$0xff] %v10298_v32  ;;  %v13166_v29 = vld [vmem:[#allocation104_spill] sm:$0xff]  ;;  %v2602_v16 = vmul.f32 %v9583_v19, %v13167_v34  ;;  %13168 = vst [vmem:[#allocation152_spill] sm:$0xff] %v10312_v61  ;;  %vm3026_vm12 = vcmp.eq.s32.totalorder %v9343_v41, 1  ;;  %v3519_v59 = vadd.s32 1, %v13083_v47  ;;  %vm3027_vm1 = vcmp.eq.s32.totalorder %v9365_v60, 1 }
 0x21e   :  { %7841 = vmatprep.subr.bf16.mxu0 %v10239_v63  ;;  %v2214_v28 = vmul.f32 %v13166_v29, %v9717_v56  ;;  %v2215_v50 = vmul.f32 %v13170_v17, %v9717_v56  ;;  %v2221_v51 = vadd.f32 %v2213_v31, %v2173_v13  ;;  %vm3028_vm10 = vcmp.eq.s32.totalorder %v9368_v8, 1  ;;  %v13172_v47 = vld [vmem:[#allocation113_spill] sm:$0xff] }
 0x21f   :  { %v10287_v9 = vpop.permute.xlu1 %3067  ;;  %v10343_v29 = vpack.c.bf16 %v2569_v25, %v2568_v6  ;;  %v3042_v13 = vmul.f32 %v10324_v38, %v3031_v21  ;;  %v3033_v31 = vsel %vm3025_vm11, 1.0, %v12927_v53  ;;  %vm3520_vm15 = vcmp.ge.s32.totalorder %v3519_v59, 0  ;;  %v13174_v6 = vld [vmem:[#allocation119_spill] sm:$0xff] }
 0x220   :  { %7169 = vmatmul.mubr.msk.f32.vlgmr.msra.gmra.mrb[4].mxu0 %vm1013_vm14, %v2219_v10  ;;  %8345 = vset.pattern.permute.xlu1 %v13169_v2  ;;  %v2642_v10 = vmul.f32 %v9588_v26, %v13171_v11  ;;  %v2222_v34 = vadd.f32 %v2214_v28, %v2174_v33  ;;  %v3034_v11 = vsel %vm3026_vm12, 1.0, %v12927_v53  ;;  %v3035_v33 = vsel %vm3027_vm1, 1.0, %v12927_v53  ;;  %v13175_v21 = vld [vmem:[#allocation127_spill] sm:$0xff] }
 0x221   :  { %7171 = vmatprep.mubr.msk.f32.mxu0 %vm1013_vm14, %v2220_v43  ;;  %7843 = vmatpush3.bf16.msra.mxu0 %v10239_v63  ;;  %v2216_v43 = vmul.f32 %v13172_v47, %v9717_v56  ;;  %13173 = vst [vmem:[#allocation153_spill] sm:$0xff] %v10343_v29  ;;  %v3036_v28 = vsel %vm3028_vm10, 1.0, %v12927_v53  ;;  %vm3521_vm4 = vcmp.lt.s32.totalorder %v3519_v59, 9  ;;  %v2643_v25 = vmul.f32 %v9588_v26, %v13174_v6  ;;  %v13177_v47 = vld [vmem:[#allocation121_spill] sm:$0xff]  ;;  %v10371_v6 = vpop.permute.xlu0 %3151  ;;  %v13186_v59 = vld [vmem:[#allocation130_spill] sm:$0xff] }
 0x222   :  { %7845 = vmatprep.subr.bf16.mxu0 %v10298_v32  ;;  %4103 = vperm.xlu1 %8345, %v13148_v5   ;;  %v3043_v5 = vmul.f32 %v10324_v38, %v3032_v1  ;;  %v2217_v1 = vmul.f32 %v13175_v21, %v9717_v56  ;;  %v3044_v63 = vmul.f32 %v10324_v38, %v3033_v31  ;;  %v13179_v21 = vld [vmem:[#allocation124_spill] sm:$0xff]  ;;  %vm10382_vm11 = vmand %vm3520_vm15, %vm3521_vm4  ;;  %vm3029_vm12 = vcmp.eq.s32.totalorder %v13051_v42, 1 }
 0x223   :  { %v2224_v17 = vadd.f32 %v2216_v43, %v2176_v22  ;;  %v3045_v62 = vmul.f32 %v10324_v38, %v3034_v11  ;;  %v3046_v39 = vmul.f32 %v10324_v38, %v3035_v33  ;;  %v3047_v22 = vmul.f32 %v10324_v38, %v3036_v28  ;;  %v13183_v43 = vld [vmem:[#allocation128_spill] sm:$0xff]  ;;  %v13185_v33 = vld [vmem:[#allocation138_spill] sm:$0xff]  ;;  %vm10412_vm10 = vmand %vm10382_vm11, %vm627_vm8 }
 0x224   :  { %v10335_v44 = vpop.permute.xlu1 %3107  ;;  %7172 = vmatmul.mubr.msk.f32.gmra.mrb[6].mxu0 %vm1013_vm14, %v2221_v51  ;;  %v2223_v51 = vadd.f32 %v2215_v50, %v2175_v58  ;;  %v2604_v58 = vmul.f32 %v9583_v19, %v13179_v21  ;;  %v13180_v50 = vld [vmem:[#allocation126_spill] sm:$0xff]  ;;  %v2645_v31 = vmul.f32 %v9588_v26, %v13183_v43  ;;  %v2691_v28 = vmul.f32 %v13185_v33, %v9717_v56  ;;  %vm10453_vm4 = vmand %vm10412_vm10, %vm629_vm2 }
 0x225   :  { %7174 = vmatprep.mubr.msk.f32.mxu0 %vm1013_vm14, %v2222_v34  ;;  %7847 = vmatpush3.bf16.msra.mxu0 %v10298_v32  ;;  %v2690_v32 = vmul.f32 %v13177_v47, %v9717_v56  ;;  %v2644_v15 = vmul.f32 %v9588_v26, %v13180_v50  ;;  %v10390_v50 = vpack.c.bf16 %v3043_v5, %v3042_v13  ;;  %vm3030_vm1 = vcmp.eq.s32.totalorder %v13052_v48, 1  ;;  %v13189_v43 = vld [vmem:[#allocation134_spill] sm:$0xff] }
 0x226   :  { %7849 = vmatprep.subr.bf16.mxu0 %v10312_v61  ;;  %8346 = vset.pattern.permute.xlu1 %v13145_v46  ;;  %v2225_v21 = vadd.f32 %v2217_v1, %v10292_v27  ;;  %v2646_v33 = vmul.f32 %v9588_v26, %v13189_v43  ;;  %v13190_v47 = vmov 22   ;;  %vm3503_vm8 = vcmp.eq.s32.totalorder %v13064_v12, 6 }
 0x227   :  { %4023 = vperm.xlu1 %8346, %v13178_v49   ;;  %v2650_v49 = vadd.f32 %v2642_v10, %v2602_v16  ;;  %13184 = vst [vmem:[#allocation102_spill] sm:$0xff] %v10390_v50  ;;  %v13187_v16 = vld [vmem:[#allocation91_spill] sm:$0xff]  ;;  %v13188_v10 = vld [vmem:[#allocation132_spill] sm:$0xff]  ;;  %v2652_v1 = vadd.f32 %v2644_v15, %v2604_v58  ;;  %vm3504_vm15 = vcmp.eq.s32.totalorder %v13065_v20, 6  ;;  %vm3505_vm2 = vcmp.eq.s32.totalorder %v9340_v14, 6 }
 0x228   :  { %v10364_v34 = vpop.permute.xlu1 %3111  ;;  %7175 = vmatmul.mubr.msk.f32.gmra.mrb[8].mxu0 %vm1013_vm14, %v2223_v51  ;;  %v2692_v51 = vmul.f32 %v13186_v59, %v9717_v56  ;;  %v2606_v13 = vmul.f32 %v9583_v19, %v13188_v10  ;;  %v13194_v15 = vld [vmem:[#allocation40_spill] sm:$0xff]  ;;  %v13200_v59 = vld [vmem:[#allocation137_spill] sm:$0xff]  ;;  %vm3508_vm10 = vcmp.eq.s32.totalorder %v9368_v8, 6 }
 0x229   :  { %13176 = vst [vmem:[#allocation154_spill] sm:$0xff] %v10364_v34  ;;  %7177 = vmatprep.mubr.msk.f32.mxu0 %vm1013_vm14, %v2224_v17  ;;  %7851 = vmatpush3.bf16.msra.mxu0 %v10312_v61  ;;  %v2651_v17 = vadd.f32 %v2643_v25, %v13187_v16  ;;  %v2698_v5 = vadd.f32 %v2690_v32, %v2650_v49  ;;  %v10424_v32 = vld [vmem:[%s12533_s5 + $0x10] sm:$0xff]  ;;  %v3037_v49 = vsel %vm3029_vm12, 1.0, %v12927_v53  ;;  %v13201_v61 = vld [vmem:[#allocation139_spill] sm:$0xff]  ;;  %vm3506_vm12 = vcmp.eq.s32.totalorder %v9343_v41, 6 }
 0x22a   :  { %7854 = vmatprep.subr.msk.bf16.mxu0 %vm9402_vm7, %v10343_v29  ;;  %v10417_v25 = vpack.c.bf16 %v3045_v62, %v3044_v63  ;;  %v10419_v16 = vpack.c.bf16 %v3047_v22, %v3046_v39  ;;  %v2653_v58 = vadd.f32 %v2645_v31, %v13194_v15  ;;  %v3038_v39 = vsel %vm3030_vm1, 1.0, %v12927_v53  ;;  %v10443_v62 = vpop.permute.xlu0 %3159  ;;  %v13197_v22 = vld [vmem:[#allocation141_spill] sm:$0xff] }
 0x22b   :  { %8347 = vset.pattern.permute.xlu1 %v13190_v47  ;;  %13196 = vst [vmem:[#allocation40_spill] sm:$0xff] %v10443_v62  ;;  %v2693_v31 = vmul.f32 %v13197_v22, %v9717_v56  ;;  %v2699_v15 = vadd.f32 %v2691_v28, %v2651_v17  ;;  %v2700_v10 = vadd.f32 %v2692_v51, %v2652_v1  ;;  %v13202_v51 = vld [vmem:[#allocation142_spill] sm:$0xff]  ;;  %v10469_v1 = vld [vmem:[%s12533_s5 + $0x18] sm:$0xff]  ;;  %v13207_v22 = vld [vmem:[#allocation72_spill] sm:$0xff]  ;;  %vm3507_vm1 = vcmp.eq.s32.totalorder %v9365_v60, 6 }
 0x22c   :  { %7178 = vmatmul.mubr.msk.f32.gmra.mrb[10].mxu0 %vm1013_vm14, %v2225_v21  ;;  %4063 = vperm.xlu1 %8347, %v10424_v32   ;;  %v13195_v21 = vld [vmem:[#allocation135_spill] sm:$0xff]  ;;  %v2608_v28 = vmul.f32 %v9583_v19, %v13201_v61  ;;  %v2648_v17 = vmul.f32 %v9588_v26, %v13202_v51  ;;  %v3048_v37 = vmul.f32 %v10324_v38, %v3037_v49  ;;  %v13205_v49 = vld [vmem:[#allocation109_spill] sm:$0xff] }
 0x22d   :  { %v10430_v43 = vpop.permute.xlu1 %3155  ;;  %v2647_v63 = vmul.f32 %v9588_v26, %v13195_v21  ;;  %7857 = vmatpush3.bf16.msk.msra.mxu0 %vm9402_vm7, %v10343_v29  ;;  %7224 = vmatprep.mubr.msk.f32.mxu0 %vm1013_vm14, %v2698_v5  ;;  %v2654_v21 = vadd.f32 %v2646_v33, %v2606_v13  ;;  %v2694_v29 = vmul.f32 %v13200_v59, %v9717_v56  ;;  %v3511_v13 = vsel %vm3503_vm8, 1.0, %v12927_v53 }
 0x22e   :  { %13193 = vst [vmem:[#allocation91_spill] sm:$0xff] %v10430_v43  ;;  %7877 = vmatprep.subr.bf16.mxu0 %v10390_v50  ;;  %v3049_v27 = vmul.f32 %v10324_v38, %v3038_v39  ;;  %v2649_v38 = vmul.f32 %v9588_v26, %v13205_v49  ;;  %v10486_v39 = vsel %vm10453_vm4, 1.0, %v12927_v53  ;;  %v3082_v61 = vmul.f32 %v9583_v19, %v9902_v0  ;;  %v13206_v49 = vld [vmem:[#allocation83_spill] sm:$0xff]  ;;  %v10501_v7 = vpop.permute.xlu0 %3167  ;;  %vm10610_vm4 = vmand %vm10382_vm11, %vm864_vm3 }
 0x22f   :  { %v2695_v5 = vmul.f32 %v13206_v49, %v9717_v56  ;;  %v2702_v59 = vadd.f32 %v2694_v29, %v2654_v21  ;;  %v2696_v35 = vmul.f32 %v13207_v22, %v9717_v56  ;;  %v3526_v19 = vmul.f32 %v10486_v39, %v3511_v13  ;;  %v13209_v21 = vld [vmem:[#allocation114_spill] sm:$0xff] }
 0x230   :  { %7225 = vmatmul.mubr.msk.f32.vlgmr.msra.gmra.mrb[4].mxu0 %vm1013_vm14, %v2699_v15  ;;  %4067 = vperm.xlu1 %8347, %v10469_v1   ;;  %v13204_v15 = vld [vmem:[#allocation84_spill] sm:$0xff]  ;;  %v3514_v29 = vsel %vm3506_vm12, 1.0, %v12927_v53  ;;  %v10524_v13 = vld [vmem:[%s12538_s1 + $0x1] ss:$0 sm:$0xff]  ;;  %vm3509_vm8 = vcmp.eq.s32.totalorder %v13051_v42, 6  ;;  %vm3987_vm3 = vcmp.eq.s32.totalorder %v13064_v12, 7  ;;  %vm10641_vm12 = vmand %vm10610_vm4, %vm866_vm6 }
 0x231   :  { %v2655_v51 = vadd.f32 %v2647_v63, %v13204_v15  ;;  %7227 = vmatprep.mubr.msk.f32.mxu0 %vm1013_vm14, %v2700_v10  ;;  %7879 = vmatpush3.bf16.msra.mxu0 %v10390_v50  ;;  %v3122_v63 = vmul.f32 %v9588_v26, %v9967_v4  ;;  %v2701_v15 = vadd.f32 %v2693_v31, %v2653_v58  ;;  %v3512_v10 = vsel %vm3504_vm15, 1.0, %v12927_v53 }
 0x232   :  { %v10472_v33 = vpop.permute.xlu1 %3075  ;;  %7881 = vmatprep.subr.bf16.mxu0 %v10417_v25  ;;  %v2656_v50 = vadd.f32 %v2648_v17, %v2608_v28  ;;  %13208 = vst [vmem:[#allocation84_spill] sm:$0xff] %v10501_v7  ;;  %v10504_v26 = vpack.c.bf16 %v3049_v27, %v3048_v37  ;;  %v3513_v58 = vsel %vm3505_vm2, 1.0, %v12927_v53  ;;  %v2657_v31 = vadd.f32 %v2649_v38, %v13209_v21 }
 0x233   :  { %13203 = vst [vmem:[#allocation155_spill] sm:$0xff] %v10472_v33  ;;  %v2703_v28 = vadd.f32 %v2695_v5, %v2655_v51  ;;  %v3527_v37 = vmul.f32 %v10486_v39, %v3512_v10  ;;  %v3130_v27 = vadd.f32 %v3122_v63, %v3082_v61  ;;  %v3123_v38 = vmul.f32 %v10524_v13, %v10012_v24  ;;  %v13211_v51 = vld [vmem:[#allocation73_spill] sm:$0xff] }
 0x234   :  { %7228 = vmatmul.mubr.msk.f32.gmra.mrb[6].mxu0 %vm1013_vm14, %v2701_v15  ;;  %8348 = vset.pattern.permute.xlu1 %v13169_v2  ;;  %v2697_v61 = vmul.f32 %v13211_v51, %v9717_v56  ;;  %v2704_v63 = vadd.f32 %v2696_v35, %v2656_v50  ;;  %v10538_v15 = vld [vmem:[%s12538_s1] ss:$0 sm:$0xff]  ;;  %v3124_v5 = vmul.f32 %v10524_v13, %v10166_v3  ;;  %v10558_v3 = vpop.permute.xlu0 %3539  ;;  %vm3510_vm15 = vcmp.eq.s32.totalorder %v13052_v48, 6 }
 0x235   :  { %7230 = vmatprep.mubr.msk.f32.mxu0 %vm1013_vm14, %v2702_v59  ;;  %7883 = vmatpush3.bf16.msra.mxu0 %v10417_v25  ;;  %v3170_v59 = vmul.f32 %v10071_v18, %v9717_v56  ;;  %v3084_v10 = vmul.f32 %v10538_v15, %v10107_v52  ;;  %v3528_v21 = vmul.f32 %v10486_v39, %v3513_v58  ;;  %v13215_v58 = vld [vmem:[#allocation88_spill] sm:$0xff]  ;;  %vm3988_vm2 = vcmp.eq.s32.totalorder %v13065_v20, 7 }
 0x236   :  { %7885 = vmatprep.subr.bf16.mxu0 %v10419_v16  ;;  %4111 = vperm.xlu1 %8348, %v10424_v32   ;;  %v3529_v24 = vmul.f32 %v10486_v39, %v3514_v29  ;;  %v3085_v35 = vmul.f32 %v10538_v15, %v10168_v23  ;;  %v2705_v50 = vadd.f32 %v2697_v61, %v2657_v31  ;;  %vm3989_vm6 = vcmp.eq.s32.totalorder %v9340_v14, 7 }
 0x237   :  { %v10517_v17 = vpop.permute.xlu1 %3115  ;;  %v10553_v52 = vpack.c.bf16 %v3527_v37, %v3526_v19  ;;  %13214 = vst [vmem:[#allocation156_spill] sm:$0xff] %v10558_v3  ;;  %v3131_v29 = vadd.f32 %v3123_v38, %v13215_v58  ;;  %v3178_v51 = vadd.f32 %v3170_v59, %v3130_v27  ;;  %v3125_v23 = vmul.f32 %v10524_v13, %v10206_v57  ;;  %v10579_v59 = vld [vmem:[%s12533_s5 + $0x20] sm:$0xff] }
 0x238   :  { %13210 = vst [vmem:[#allocation83_spill] sm:$0xff] %v10517_v17  ;;  %7231 = vmatmul.mubr.msk.f32.gmra.mrb[8].mxu0 %vm1013_vm14, %v2703_v28  ;;  %v3515_v28 = vsel %vm3507_vm1, 1.0, %v12927_v53  ;;  %v3516_v19 = vsel %vm3508_vm10, 1.0, %v12927_v53  ;;  %v3132_v31 = vadd.f32 %v3124_v5, %v3084_v10  ;;  %v3172_v37 = vmul.f32 %v10246_v55, %v9717_v56 }
 0x239   :  { %7233 = vmatprep.mubr.msk.f32.mxu0 %vm1013_vm14, %v2704_v63  ;;  %7887 = vmatpush3.bf16.msra.mxu0 %v10419_v16  ;;  %13213 = vst [vmem:[#allocation114_spill] sm:$0xff] %v10553_v52  ;;  %v3086_v27 = vmul.f32 %v10538_v15, %v10287_v9  ;;  %v3126_v38 = vmul.f32 %v10524_v13, %v10335_v44  ;;  %vm3990_vm1 = vcmp.eq.s32.totalorder %v9343_v41, 7  ;;  %vm3991_vm10 = vcmp.eq.s32.totalorder %v9365_v60, 7 }
 0x23a   :  { %7890 = vmatprep.subr.msk.bf16.mxu0 %vm9402_vm7, %v10504_v26  ;;  %8349 = vset.pattern.permute.xlu1 %v13145_v46  ;;  %v3087_v61 = vmul.f32 %v10538_v15, %v10220_v36  ;;  %v3171_v63 = vmul.f32 %v10329_v45, %v9717_v56  ;;  %v10587_v10 = vpack.c.bf16 %v3529_v24, %v3528_v21  ;;  %vm3994_vm4 = vcmp.eq.s32.totalorder %v13052_v48, 7 }
 0x23b   :  { %v10551_v18 = vpop.permute.xlu1 %3119  ;;  %4031 = vperm.xlu1 %8349, %v10579_v59   ;;  %v3530_v5 = vmul.f32 %v10486_v39, %v3515_v28  ;;  %v3088_v58 = vmul.f32 %v10538_v15, %v10472_v33  ;;  %v3128_v36 = vmul.f32 %v10524_v13, %v10517_v17  ;;  %v3133_v21 = vadd.f32 %v3125_v23, %v3085_v35 }
 0x23c   :  { %13212 = vst [vmem:[#allocation72_spill] sm:$0xff] %v10551_v18  ;;  %7234 = vmatmul.mubr.msk.f32.gmra.mrb[10].mxu0 %vm1013_vm14, %v2705_v50  ;;  %13216 = vst [vmem:[#allocation88_spill] sm:$0xff] %v10587_v10  ;;  %v3179_v24 = vadd.f32 %v3171_v63, %v3131_v29  ;;  %v3127_v50 = vmul.f32 %v10524_v13, %v10364_v34  ;;  %v3180_v33 = vadd.f32 %v3172_v37, %v3132_v31  ;;  %v10619_v63 = vpop.permute.xlu0 %3547 }
 0x23d   :  { %7893 = vmatpush3.bf16.msk.msra.mxu0 %vm9402_vm7, %v10504_v26  ;;  %7280 = vmatprep.mubr.msk.f32.mxu0 %vm1013_vm14, %v3178_v51  ;;  %v3531_v51 = vmul.f32 %v10486_v39, %v3516_v19  ;;  %v3134_v29 = vadd.f32 %v3126_v38, %v3086_v27  ;;  %v3174_v23 = vmul.f32 %v10430_v43, %v9717_v56  ;;  %v3517_v31 = vsel %vm3509_vm8, 1.0, %v12927_v53 }
 0x23e   :  { %7913 = vmatprep.subr.bf16.mxu0 %v10553_v52  ;;  %v3089_v35 = vmul.f32 %v10538_v15, %v10270_v54  ;;  %13220 = vst [vmem:[#allocation158_spill] sm:$0xff] %v10619_v63  ;;  %v3173_v19 = vmul.f32 %v10371_v6, %v9717_v56  ;;  %v3518_v37 = vsel %vm3510_vm15, 1.0, %v12927_v53  ;;  %v3136_v27 = vadd.f32 %v3128_v36, %v3088_v58 }
 0x23f   :  { %8350 = vset.pattern.permute.xlu1 %v13190_v47  ;;  %v3135_v54 = vadd.f32 %v3127_v50, %v3087_v61  ;;  %v3129_v36 = vmul.f32 %v10524_v13, %v10551_v18  ;;  %v10648_v58 = vpack.c.bf16 %v3531_v51, %v3530_v5  ;;  %v3532_v30 = vmul.f32 %v10486_v39, %v3517_v31  ;;  %v10660_v61 = vld [vmem:[%s12533_s5 + $0x28] sm:$0xff] }
 0x240   :  { %v10602_v28 = vpop.permute.xlu1 %3163  ;;  %7281 = vmatmul.mubr.msk.f32.vlgmr.msra.gmra.mrb[4].mxu0 %vm1013_vm14, %v3179_v24  ;;  %4071 = vperm.xlu1 %8350, %v10579_v59   ;;  %v3533_v17 = vmul.f32 %v10486_v39, %v3518_v37  ;;  %v3175_v43 = vmul.f32 %v10443_v62, %v9717_v56  ;;  %v3995_v5 = vsel %vm3987_vm3, 1.0, %v12927_v53  ;;  %v3996_v39 = vsel %vm3988_vm2, 1.0, %v12927_v53  ;;  %v10676_v51 = vpop.permute.xlu0 %3555  ;;  %vm4483_vm3 = vmand %vm10382_vm11, %vm1594_vm9  ;;  %v13298_v18 = vld [vmem:[#allocation23_spill] sm:$0xff] }
 0x241   :  { %13217 = vst [vmem:[#allocation157_spill] sm:$0xff] %v10602_v28  ;;  %7283 = vmatprep.mubr.msk.f32.mxu0 %vm1013_vm14, %v3180_v33  ;;  %v3176_v38 = vmul.f32 %v10602_v28, %v9717_v56  ;;  %7915 = vmatpush3.bf16.msra.mxu0 %v10553_v52  ;;  %v3181_v33 = vadd.f32 %v3173_v19, %v3133_v21  ;;  %13223 = vst [vmem:[#allocation159_spill] sm:$0xff] %v10648_v58  ;;  %v10672_v21 = vsel %vm10641_vm12, 1.0, %v12927_v53  ;;  %v13299_v52 = vld [vmem:[#allocation27_spill] sm:$0xff] }
 0x242   :  { %7917 = vmatprep.subr.bf16.mxu0 %v10587_v10  ;;  %v3182_v28 = vadd.f32 %v3174_v23, %v3134_v29  ;;  %13225 = vst [vmem:[#allocation161_spill] sm:$0xff] %v10676_v51  ;;  %v3183_v29 = vadd.f32 %v3175_v43, %v3135_v54  ;;  %v3137_v23 = vadd.f32 %v3129_v36, %v3089_v35  ;;  %vm3992_vm8 = vcmp.eq.s32.totalorder %v9368_v8, 7  ;;  %vm4484_vm12 = vmand %vm4483_vm3, %vm1596_vm13 }
 0x243   :  { %v3184_v50 = vadd.f32 %v3176_v38, %v3136_v27  ;;  %v10679_v12 = vpack.c.bf16 %v3533_v17, %v3532_v30  ;;  %v4006_v19 = vmul.f32 %v10672_v21, %v3995_v5  ;;  %v4007_v31 = vmul.f32 %v10672_v21, %v3996_v39  ;;  %v10716_v30 = vld [vmem:[%s12533_s5 + $0x30] sm:$0xff] }
 0x244   :  { %7284 = vmatmul.mubr.msk.f32.gmra.mrb[6].mxu0 %vm1013_vm14, %v3181_v33  ;;  %4075 = vperm.xlu1 %8350, %v10660_v61   ;;  %v3177_v37 = vmul.f32 %v10501_v7, %v9717_v56  ;;  %v10699_v35 = vpop.permute.xlu0 %3563  ;;  %v3567_v33 = vmul.f32 %v10538_v15, %v10558_v3  ;;  %v3997_v17 = vsel %vm3989_vm6, 1.0, %v12927_v53  ;;  %v3998_v5 = vsel %vm3990_vm1, 1.0, %v12927_v53 }
 0x245   :  { %v10650_v34 = vpop.permute.xlu1 %3535  ;;  %7286 = vmatprep.mubr.msk.f32.mxu0 %vm1013_vm14, %v3182_v28  ;;  %7919 = vmatpush3.bf16.msra.mxu0 %v10587_v10  ;;  %13226 = vst [vmem:[#allocation162_spill] sm:$0xff] %v10679_v12  ;;  %v10695_v43 = vpack.c.bf16 %v4007_v31, %v4006_v19  ;;  %13229 = vst [vmem:[#allocation165_spill] sm:$0xff] %v10699_v35  ;;  %vm3993_vm15 = vcmp.eq.s32.totalorder %v13051_v42, 7  ;;  %vm4468_vm2 = vcmp.eq.s32.totalorder %v13065_v20, 8  ;;  %vm4469_vm9 = vcmp.eq.s32.totalorder %v9340_v14, 8 }
 0x246   :  { %13224 = vst [vmem:[#allocation160_spill] sm:$0xff] %v10650_v34  ;;  %7921 = vmatprep.subr.bf16.mxu0 %v10648_v58  ;;  %v3185_v54 = vadd.f32 %v3177_v37, %v3137_v23  ;;  %v3566_v27 = vmul.f32 %v10538_v15, %v10650_v34  ;;  %v4009_v23 = vmul.f32 %v10672_v21, %v3998_v5  ;;  %v3999_v37 = vsel %vm3991_vm10, 1.0, %v12927_v53 }
 0x247   :  { %13228 = vst [vmem:[#allocation164_spill] sm:$0xff] %v10695_v43  ;;  %vm4470_vm13 = vcmp.eq.s32.totalorder %v9343_v41, 8  ;;  %v4477_v14 = vsel %vm4469_vm9, 1.0, %v12927_v53  ;;  %vm4471_vm11 = vcmp.eq.s32.totalorder %v9365_v60, 8  ;;  %vm4472_vm6 = vcmp.eq.s32.totalorder %v9368_v8, 8 }
 0x248   :  { %7287 = vmatmul.mubr.msk.f32.gmra.mrb[8].mxu0 %vm1013_vm14, %v3183_v29  ;;  %8351 = vset.pattern.permute.xlu1 %v13169_v2  ;;  %v4008_v29 = vmul.f32 %v10672_v21, %v3997_v17  ;;  %v10731_v19 = vpop.permute.xlu0 %3627  ;;  %v4478_v41 = vsel %vm4470_vm13, 1.0, %v12927_v53  ;;  %vm4473_vm1 = vcmp.eq.s32.totalorder %v13051_v42, 8  ;;  %vm4474_vm10 = vcmp.eq.s32.totalorder %v13052_v48, 8 }
 0x249   :  { %7289 = vmatprep.mubr.msk.f32.mxu0 %vm1013_vm14, %v3184_v50  ;;  %4119 = vperm.xlu1 %8351, %v10579_v59   ;;  %13232 = vst [vmem:[#allocation168_spill] sm:$0xff] %v10731_v19 }
 0x24a   :  { %v10687_v28 = vpop.permute.xlu1 %3575  ;;  %7923 = vmatpush3.bf16.msra.mxu0 %v10648_v58 }
 0x24b   :  { %13227 = vst [vmem:[#allocation163_spill] sm:$0xff] %v10687_v28  ;;  %7926 = vmatprep.subr.msk.bf16.mxu0 %vm9402_vm7, %v10679_v12  ;;  %v3606_v38 = vmul.f32 %v10524_v13, %v10687_v28 }
 0x24c   :  { %7290 = vmatmul.mubr.msk.f32.gmra.mrb[10].mxu0 %vm1013_vm14, %v3185_v54  ;;  %v4000_v54 = vsel %vm3992_vm8, 1.0, %v12927_v53 }
 0x24d   :  { %8352 = vset.pattern.permute.xlu1 %v13145_v46  ;;  %v3614_v46 = vadd.f32 %v3606_v38, %v3566_v27  ;;  %v3655_v27 = vmul.f32 %v10731_v19, %v9717_v56  ;;  %v4011_v17 = vmul.f32 %v10672_v21, %v4000_v54  ;;  %v4002_v19 = vsel %vm3994_vm4, 1.0, %v12927_v53 }
 0x24e   :  { %v10706_v24 = vpop.permute.xlu1 %3579  ;;  %4039 = vperm.xlu1 %8352, %v10716_v30   ;;  %7929 = vmatpush3.bf16.msk.msra.mxu0 %vm9402_vm7, %v10679_v12  ;;  %v4001_v12 = vsel %vm3993_vm15, 1.0, %v12927_v53 }
 0x24f   :  { %13230 = vst [vmem:[#allocation166_spill] sm:$0xff] %v10706_v24  ;;  %v3607_v36 = vmul.f32 %v10524_v13, %v10706_v24  ;;  %7949 = vmatprep.subr.bf16.mxu0 %v10695_v43  ;;  %v10755_v24 = vld [vmem:[%s12533_s5 + $0x38] sm:$0xff] }
 0x251   :  { %v3615_v39 = vadd.f32 %v3607_v36, %v3567_v33  ;;  %v10743_v36 = vpack.c.bf16 %v4009_v23, %v4008_v29  ;;  %v4013_v29 = vmul.f32 %v10672_v21, %v4002_v19 }
 0x252   :  { %8353 = vset.pattern.permute.xlu1 %v13190_v47  ;;  %v4010_v47 = vmul.f32 %v10672_v21, %v3999_v37 }
 0x253   :  { %v10727_v50 = vpop.permute.xlu1 %3623  ;;  %4079 = vperm.xlu1 %8353, %v10716_v30   ;;  %v3663_v33 = vadd.f32 %v3655_v27, %v3615_v39  ;;  %13233 = vst [vmem:[#allocation169_spill] sm:$0xff] %v10743_v36  ;;  %v4012_v39 = vmul.f32 %v10672_v21, %v4001_v12  ;;  %v13239_v21 = vmov 24   ;;  %v10788_v27 = vld [vmem:[%s12533_s5] sm:$0xff] }
 0x254   :  { %13231 = vst [vmem:[#allocation167_spill] sm:$0xff] %v10727_v50  ;;  %v3654_v31 = vmul.f32 %v10727_v50, %v9717_v56 }
 0x256   :  { %v3662_v38 = vadd.f32 %v3654_v31, %v3614_v46  ;;  %v10761_v46 = vpack.c.bf16 %v4011_v17, %v4010_v47  ;;  %v10771_v31 = vpack.c.bf16 %v4013_v29, %v4012_v39  ;;  %v10799_v17 = vpop.permute.xlu0 %3635  ;;  %v12795_v39 = vmov 25  }
 0x257   :  { %4083 = vperm.xlu1 %8353, %v10755_v24   ;;  %13241 = vst [vmem:[#allocation176_spill] sm:$0xff] %v10799_v17 }
 0x258   :  { %7336 = vmatprep.mubr.msk.f32.mxu0 %vm1013_vm14, %v3662_v38  ;;  %v10748_v5 = vpop.permute.xlu1 %3543  ;;  %13235 = vst [vmem:[#allocation171_spill] sm:$0xff] %v10761_v46  ;;  %13237 = vst [vmem:[#allocation173_spill] sm:$0xff] %v10771_v31 }
 0x259   :  { %13234 = vst [vmem:[#allocation170_spill] sm:$0xff] %v10748_v5  ;;  %7337 = vmatmul.mubr.msk.f32.vlgmr.msra.gmra.mrb[4].mxu0 %vm1013_vm14, %v3663_v33  ;;  %v3568_v37 = vmul.f32 %v10538_v15, %v10748_v5 }
 0x25a   :  { %7951 = vmatpush3.bf16.msra.mxu0 %v10695_v43 }
 0x25b   :  { %7953 = vmatprep.subr.bf16.mxu0 %v10743_v36  ;;  %8355 = vset.pattern.permute.xlu1 %v13169_v2  ;;  %v3569_v2 = vmul.f32 %v10538_v15, %v10619_v63  ;;  %v13291_v63 = vld [vmem:[#allocation8_spill] sm:$0xff] }
 0x25c   :  { %4127 = vperm.xlu1 %8355, %v10716_v30  }
 0x25d   :  { %v10766_v23 = vpop.permute.xlu1 %3583 }
 0x25e   :  { %13236 = vst [vmem:[#allocation172_spill] sm:$0xff] %v10766_v23  ;;  %7955 = vmatpush3.bf16.msra.mxu0 %v10743_v36  ;;  %v3608_v12 = vmul.f32 %v10524_v13, %v10766_v23  ;;  %v13246_v36 = vmov 25   ;;  %v13293_v23 = vld [vmem:[#allocation11_spill] sm:$0xff] }
 0x25f   :  { %7957 = vmatprep.subr.bf16.mxu0 %v10761_v46 }
 0x260   :  { %8356 = vset.pattern.permute.xlu1 %v13239_v21  ;;  %v3616_v38 = vadd.f32 %v3608_v12, %v3568_v37 }
 0x261   :  { %v10777_v54 = vpop.permute.xlu1 %3587  ;;  %4495 = vperm.xlu1 %8356, %v10788_v27  }
 0x262   :  { %13238 = vst [vmem:[#allocation174_spill] sm:$0xff] %v10777_v54  ;;  %v3609_v19 = vmul.f32 %v10524_v13, %v10777_v54  ;;  %7959 = vmatpush3.bf16.msra.mxu0 %v10761_v46  ;;  %v3657_v46 = vmul.f32 %v10799_v17, %v9717_v56 }
 0x263   :  { %7962 = vmatprep.subr.msk.bf16.mxu0 %vm9402_vm7, %v10771_v31 }
 0x264   :  { %v3617_v33 = vadd.f32 %v3609_v19, %v3569_v2  ;;  %v10813_v19 = vld [vmem:[%s12533_s5 + $0x8] sm:$0xff] }
 0x265   :  { %8357 = vset.pattern.permute.xlu1 %v12795_v39  ;;  %v13243_v39 = vmov 26  }
 0x266   :  { %v10794_v47 = vpop.permute.xlu1 %3631  ;;  %7965 = vmatpush3.bf16.msk.msra.mxu0 %vm9402_vm7, %v10771_v31  ;;  %4535 = vperm.xlu1 %8357, %v10788_v27   ;;  %v3665_v12 = vadd.f32 %v3657_v46, %v3617_v33 }
 0x267   :  { %13240 = vst [vmem:[#allocation175_spill] sm:$0xff] %v10794_v47  ;;  %v3656_v29 = vmul.f32 %v10794_v47, %v9717_v56  ;;  %v13292_v47 = vld [vmem:[#allocation10_spill] sm:$0xff] }
 0x269   :  { %v3664_v37 = vadd.f32 %v3656_v29, %v3616_v38  ;;  %v3571_v29 = vmul.f32 %v10538_v15, %v10676_v51 }
 0x26a   :  { %4539 = vperm.xlu1 %8357, %v10813_v19  }
 0x26b   :  { %7339 = vmatprep.mubr.msk.f32.mxu0 %vm1013_vm14, %v3664_v37  ;;  %v10808_v2 = vpop.permute.xlu1 %3551 }
 0x26c   :  { %13242 = vst [vmem:[#allocation177_spill] sm:$0xff] %v10808_v2  ;;  %7340 = vmatmul.mubr.msk.f32.gmra.mrb[6].mxu0 %vm1013_vm14, %v3665_v12  ;;  %v3570_v38 = vmul.f32 %v10538_v15, %v10808_v2  ;;  %v10837_v2 = vpop.permute.xlu0 %3643 }
 0x26d   :  { %13248 = vst [vmem:[#allocation181_spill] sm:$0xff] %v10837_v2  ;;  %v3659_v54 = vmul.f32 %v10837_v2, %v9717_v56 }
 0x26e   :  { %8359 = vset.pattern.permute.xlu1 %v13243_v39 }
 0x26f   :  { %4583 = vperm.xlu1 %8359, %v10788_v27  }
 0x270   :  { %v10819_v31 = vpop.permute.xlu1 %3591 }
 0x271   :  { %13244 = vst [vmem:[#allocation178_spill] sm:$0xff] %v10819_v31  ;;  %v3610_v33 = vmul.f32 %v10524_v13, %v10819_v31 }
 0x273   :  { %8360 = vset.pattern.permute.xlu1 %v13239_v21  ;;  %v3618_v12 = vadd.f32 %v3610_v33, %v3570_v38 }
 0x274   :  { %v10822_v46 = vpop.permute.xlu1 %3595  ;;  %4503 = vperm.xlu1 %8360, %v10424_v32  }
 0x275   :  { %13245 = vst [vmem:[#allocation179_spill] sm:$0xff] %v10822_v46  ;;  %v3611_v37 = vmul.f32 %v10524_v13, %v10822_v46 }
 0x277   :  { %v3619_v43 = vadd.f32 %v3611_v37, %v3571_v29 }
 0x278   :  { %8361 = vset.pattern.permute.xlu1 %v13246_v36 }
 0x279   :  { %4543 = vperm.xlu1 %8361, %v10424_v32   ;;  %v10835_v17 = vpop.permute.xlu1 %3639  ;;  %v3667_v46 = vadd.f32 %v3659_v54, %v3619_v43  ;;  %v10863_v54 = vpop.permute.xlu0 %3651 }
 0x27a   :  { %13247 = vst [vmem:[#allocation180_spill] sm:$0xff] %v10835_v17  ;;  %v3658_v31 = vmul.f32 %v10835_v17, %v9717_v56  ;;  %13252 = vst [vmem:[#allocation183_spill] sm:$0xff] %v10863_v54 }
 0x27c   :  { %v3666_v51 = vadd.f32 %v3658_v31, %v3618_v12  ;;  %v10861_v31 = vsel %vm4484_vm12, 1.0, %v12927_v53  ;;  %v3573_v12 = vmul.f32 %v10538_v15, %v10699_v35 }
 0x27d   :  { %4547 = vperm.xlu1 %8361, %v10469_v1  }
 0x27e   :  { %7342 = vmatprep.mubr.msk.f32.mxu0 %vm1013_vm14, %v3666_v51  ;;  %v10845_v38 = vpop.permute.xlu1 %3559  ;;  %v4476_v51 = vsel %vm4468_vm2, 1.0, %v12927_v53 }
 0x27f   :  { %13249 = vst [vmem:[#allocation182_spill] sm:$0xff] %v10845_v38  ;;  %7343 = vmatmul.mubr.msk.f32.gmra.mrb[8].mxu0 %vm1013_vm14, %v3667_v46  ;;  %v4486_v46 = vmul.f32 0.0, %v10861_v31  ;;  %v4487_v11 = vmul.f32 %v10861_v31, %v4476_v51  ;;  %v3572_v29 = vmul.f32 %v10538_v15, %v10845_v38  ;;  %v10882_v51 = vpop.permute.xlu0 %4019  ;;  %v3661_v38 = vmul.f32 %v10863_v54, %v9717_v56 }
 0x280   :  { %13255 = vst [vmem:[#allocation186_spill] sm:$0xff] %v10882_v51 }
 0x281   :  { %8362 = vset.pattern.permute.xlu1 %v13243_v39 }
 0x282   :  { %4591 = vperm.xlu1 %8362, %v10424_v32   ;;  %v10868_v32 = vpack.c.bf16 %v4487_v11, %v4486_v46 }
 0x283   :  { %v10857_v43 = vpop.permute.xlu1 %3599  ;;  %v10892_v35 = vpop.permute.xlu0 %4027 }
 0x284   :  { %13251 = vst [vmem:[#allocation140_spill] sm:$0xff] %v10857_v43  ;;  %13253 = vst [vmem:[#allocation184_spill] sm:$0xff] %v10868_v32  ;;  %v3612_v37 = vmul.f32 %v10524_v13, %v10857_v43  ;;  %7985 = vmatprep.subr.bf16.mxu0 %v10868_v32 }
 0x285   :  { %13257 = vst [vmem:[#allocation188_spill] sm:$0xff] %v10892_v35 }
 0x286   :  { %8363 = vset.pattern.permute.xlu1 %v13239_v21  ;;  %v3620_v46 = vadd.f32 %v3612_v37, %v3572_v29 }
 0x287   :  { %4511 = vperm.xlu1 %8363, %v10579_v59   ;;  %v10871_v20 = vpop.permute.xlu1 %3603  ;;  %v10901_v37 = vpop.permute.xlu0 %4035 }
 0x288   :  { %13254 = vst [vmem:[#allocation185_spill] sm:$0xff] %v10871_v20  ;;  %v3613_v33 = vmul.f32 %v10524_v13, %v10871_v20  ;;  %13259 = vst [vmem:[#allocation190_spill] sm:$0xff] %v10901_v37 }
 0x28a   :  { %v3621_v11 = vadd.f32 %v3613_v33, %v3573_v12  ;;  %v4047_v33 = vmul.f32 %v10538_v15, %v10882_v51  ;;  %v4488_v51 = vmul.f32 %v10861_v31, %v4477_v14 }
 0x28b   :  { %8364 = vset.pattern.permute.xlu1 %v13246_v36 }
 0x28c   :  { %4551 = vperm.xlu1 %8364, %v10579_v59   ;;  %v10886_v2 = vpop.permute.xlu1 %3647  ;;  %v3669_v20 = vadd.f32 %v3661_v38, %v3621_v11 }
 0x28d   :  { %13256 = vst [vmem:[#allocation187_spill] sm:$0xff] %v10886_v2  ;;  %v3660_v43 = vmul.f32 %v10886_v2, %v9717_v56  ;;  %v4480_v2 = vsel %vm4472_vm6, 1.0, %v12927_v53 }
 0x28f   :  { %v3668_v17 = vadd.f32 %v3660_v43, %v3620_v46 }
 0x290   :  { %4555 = vperm.xlu1 %8364, %v10660_v61  }
 0x291   :  { %7345 = vmatprep.mubr.msk.f32.mxu0 %vm1013_vm14, %v3668_v17  ;;  %v10911_v17 = vpop.permute.xlu0 %4043 }
 0x292   :  { %v10896_v29 = vpop.permute.xlu1 %4015  ;;  %7346 = vmatmul.mubr.msk.f32.gmra.mrb[10].mxu0 %vm1013_vm14, %v3669_v20 }
 0x293   :  { %13258 = vst [vmem:[#allocation189_spill] sm:$0xff] %v10896_v29  ;;  %v4046_v38 = vmul.f32 %v10538_v15, %v10896_v29  ;;  %v4479_v29 = vsel %vm4471_vm11, 1.0, %v12927_v53 }
 0x294   :  { %8365 = vset.pattern.permute.xlu1 %v13243_v39 }
 0x295   :  { %4599 = vperm.xlu1 %8365, %v10579_v59  }
 0x297   :  { %v10903_v12 = vpop.permute.xlu1 %4055 }
 0x298   :  { %13260 = vst [vmem:[#allocation191_spill] sm:$0xff] %v10903_v12  ;;  %v4086_v20 = vmul.f32 %v10524_v13, %v10903_v12  ;;  %v10931_v12 = vpop.permute.xlu0 %4107 }
 0x299   :  { %8366 = vset.pattern.permute.xlu1 %v13239_v21  ;;  %13263 = vst [vmem:[#allocation194_spill] sm:$0xff] %v10931_v12  ;;  %v4135_v60 = vmul.f32 %v10931_v12, %v9717_v56  ;;  %v4482_v12 = vsel %vm4474_vm10, 1.0, %v12927_v53 }
 0x29a   :  { %4519 = vperm.xlu1 %8366, %v10716_v30   ;;  %v4094_v46 = vadd.f32 %v4086_v20, %v4046_v38 }
 0x29b   :  { %v10907_v43 = vpop.permute.xlu1 %4059 }
 0x29c   :  { %13261 = vst [vmem:[#allocation192_spill] sm:$0xff] %v10907_v43  ;;  %v4087_v21 = vmul.f32 %v10524_v13, %v10907_v43  ;;  %v4489_v43 = vmul.f32 %v10861_v31, %v4478_v41  ;;  %v4481_v41 = vsel %vm4473_vm1, 1.0, %v12927_v53 }
 0x29d   :  { %v4492_v48 = vmul.f32 %v10861_v31, %v4481_v41 }
 0x29e   :  { %8367 = vset.pattern.permute.xlu1 %v13246_v36  ;;  %v4095_v11 = vadd.f32 %v4087_v21, %v4047_v33  ;;  %v10942_v20 = vpack.c.bf16 %v4489_v43, %v4488_v51  ;;  %v4490_v33 = vmul.f32 %v10861_v31, %v4479_v29  ;;  %v4491_v21 = vmul.f32 %v10861_v31, %v4480_v2 }
 0x29f   :  { %4559 = vperm.xlu1 %8367, %v10716_v30   ;;  %v4493_v2 = vmul.f32 %v10861_v31, %v4482_v12  ;;  %v4049_v31 = vmul.f32 %v10538_v15, %v10892_v35  ;;  %v13288_v35 = vld [vmem:[#allocation7_spill] sm:$0xff] }
 0x2a0   :  { %v4143_v38 = vadd.f32 %v4135_v60, %v4095_v11  ;;  %13264 = vst [vmem:[#allocation195_spill] sm:$0xff] %v10942_v20  ;;  %v10956_v42 = vpack.c.bf16 %v4491_v21, %v4490_v33 }
 0x2a1   :  { %v10927_v54 = vpop.permute.xlu1 %4103 }
 0x2a2   :  { %13262 = vst [vmem:[#allocation193_spill] sm:$0xff] %v10927_v54  ;;  %v4134_v36 = vmul.f32 %v10927_v54, %v9717_v56  ;;  %13266 = vst [vmem:[#allocation197_spill] sm:$0xff] %v10956_v42  ;;  %v13290_v54 = vld [vmem:[#allocation25_spill] sm:$0xff] }
 0x2a3   :  { %4563 = vperm.xlu1 %8367, %v10755_v24  }
 0x2a4   :  { %v4142_v8 = vadd.f32 %v4134_v36, %v4094_v46 }
 0x2a6   :  { %7392 = vmatprep.mubr.msk.f32.mxu0 %vm1013_vm14, %v4142_v8  ;;  %v10947_v14 = vpop.permute.xlu1 %4023  ;;  %v10985_v8 = vpop.permute.xlu0 %4115 }
 0x2a7   :  { %13265 = vst [vmem:[#allocation196_spill] sm:$0xff] %v10947_v14  ;;  %8369 = vset.pattern.permute.xlu1 %v13243_v39  ;;  %7393 = vmatmul.mubr.msk.f32.vlgmr.msra.gmra.mrb[4].mxu0 %vm1013_vm14, %v4143_v38  ;;  %v10964_v39 = vpack.c.bf16 %v4493_v2, %v4492_v48  ;;  %v4048_v43 = vmul.f32 %v10538_v15, %v10947_v14  ;;  %13271 = vst [vmem:[#allocation202_spill] sm:$0xff] %v10985_v8 }
 0x2a8   :  { %4607 = vperm.xlu1 %8369, %v10716_v30   ;;  %7987 = vmatpush3.bf16.msra.mxu0 %v10868_v32  ;;  %v4137_v33 = vmul.f32 %v10985_v8, %v9717_v56 }
 0x2a9   :  { %7989 = vmatprep.subr.bf16.mxu0 %v10942_v20  ;;  %13268 = vst [vmem:[#allocation199_spill] sm:$0xff] %v10964_v39 }
 0x2aa   :  { %v11009_v53 = vpop.permute.xlu0 %4123 }
 0x2ab   :  { %v10960_v51 = vpop.permute.xlu1 %4063  ;;  %13276 = vst [vmem:[#allocation207_spill] sm:$0xff] %v11009_v53 }
 0x2ac   :  { %13267 = vst [vmem:[#allocation198_spill] sm:$0xff] %v10960_v51  ;;  %7991 = vmatpush3.bf16.msra.mxu0 %v10942_v20  ;;  %v4088_v46 = vmul.f32 %v10524_v13, %v10960_v51  ;;  %v13287_v51 = vld [vmem:[#allocation6_spill] sm:$0xff] }
 0x2ad   :  { %7993 = vmatprep.subr.bf16.mxu0 %v10956_v42 }
 0x2ae   :  { %v4096_v11 = vadd.f32 %v4088_v46, %v4048_v43 }
 0x2af   :  { %v10966_v29 = vpop.permute.xlu1 %4067 }
 0x2b0   :  { %13269 = vst [vmem:[#allocation200_spill] sm:$0xff] %v10966_v29  ;;  %7995 = vmatpush3.bf16.msra.mxu0 %v10956_v42  ;;  %v4089_v12 = vmul.f32 %v10524_v13, %v10966_v29  ;;  %v4139_v42 = vmul.f32 %v11009_v53, %v9717_v56 }
 0x2b1   :  { %7998 = vmatprep.subr.msk.bf16.mxu0 %vm9402_vm7, %v10964_v39 }
 0x2b2   :  { %v4097_v36 = vadd.f32 %v4089_v12, %v4049_v31  ;;  %v4051_v12 = vmul.f32 %v10538_v15, %v10901_v37  ;;  %v13284_v37 = vld [vmem:[#allocation14_spill] sm:$0xff] }
 0x2b4   :  { %8001 = vmatpush3.bf16.msk.msra.mxu0 %vm9402_vm7, %v10964_v39  ;;  %v4145_v41 = vadd.f32 %v4137_v33, %v4097_v36 }
 0x2b5   :  { %v10983_v60 = vpop.permute.xlu1 %4111 }
 0x2b6   :  { %13270 = vst [vmem:[#allocation201_spill] sm:$0xff] %v10983_v60  ;;  %v4136_v38 = vmul.f32 %v10983_v60, %v9717_v56 }
 0x2b8   :  { %v4144_v21 = vadd.f32 %v4136_v38, %v4096_v11 }
 0x2ba   :  { %7395 = vmatprep.mubr.msk.f32.mxu0 %vm1013_vm14, %v4144_v21  ;;  %v10992_v48 = vpop.permute.xlu1 %4031 }
 0x2bb   :  { %13272 = vst [vmem:[#allocation203_spill] sm:$0xff] %v10992_v48  ;;  %7396 = vmatmul.mubr.msk.f32.gmra.mrb[6].mxu0 %vm1013_vm14, %v4145_v41  ;;  %v4050_v43 = vmul.f32 %v10538_v15, %v10992_v48 }
 0x2bf   :  { %v10995_v2 = vpop.permute.xlu1 %4071 }
 0x2c0   :  { %13273 = vst [vmem:[#allocation204_spill] sm:$0xff] %v10995_v2  ;;  %v4090_v46 = vmul.f32 %v10524_v13, %v10995_v2  ;;  %v13285_v2 = vld [vmem:[#allocation17_spill] sm:$0xff] }
 0x2c2   :  { %v4098_v33 = vadd.f32 %v4090_v46, %v4050_v43  ;;  %v11019_v43 = vpop.permute.xlu0 %4131 }
 0x2c3   :  { %v11001_v31 = vpop.permute.xlu1 %4075  ;;  %13277 = vst [vmem:[#allocation208_spill] sm:$0xff] %v11019_v43 }
 0x2c4   :  { %13274 = vst [vmem:[#allocation205_spill] sm:$0xff] %v11001_v31  ;;  %v4091_v11 = vmul.f32 %v10524_v13, %v11001_v31 }
 0x2c5   :  { %v557_v36 = vpop.f32.mrb[6].mxu1 }
 0x2c6   :  { %v6983_v38 = vpop.f32.mrb[7].mxu1  ;;  %v4099_v21 = vadd.f32 %v4091_v11, %v4051_v12  ;;  %v8481_v12 = vld [vmem:[%s12537_s4 + $0x1] sm:$0x1]  ;;  %v11028_v53 = vpop.permute.xlu0 %4499 }
 0x2c7   :  { %v558_v11 = vadd.f32 %v8481_v12, %v557_v36  ;;  %13279 = vst [vmem:[#allocation210_spill] sm:$0xff] %v11028_v53  ;;  %v13281_v36 = vld [vmem:[#allocation2_spill] sm:$0xff]  ;;  %v13282_v12 = vld [vmem:[#allocation3_spill] sm:$0xff] }
 0x2c8   :  { %v11007_v41 = vpop.permute.xlu1 %4119  ;;  %v4147_v32 = vadd.f32 %v4139_v42, %v4099_v21 }
 0x2c9   :  { %13275 = vst [vmem:[#allocation206_spill] sm:$0xff] %v11007_v41  ;;  %v4138_v39 = vmul.f32 %v11007_v41, %v9717_v56  ;;  %v561_v42 = vmax.f32 %v558_v11, 0.0  ;;  %v13283_v41 = vld [vmem:[#allocation4_spill] sm:$0xff] }
 0x2cb   :  { %v4146_v20 = vadd.f32 %v4138_v39, %v4098_v33  ;;  %v11042_v33 = vpop.permute.xlu0 %4507  ;;  %v11045_v21 = vrot.slane %v561_v42, %v13281_v36  ;;  %v13289_v36 = vld [vmem:[#allocation19_spill] sm:$0xff] }
 0x2cd   :  { %7398 = vmatprep.mubr.msk.f32.mxu0 %vm1013_vm14, %v4146_v20  ;;  %v11016_v8 = vpop.permute.xlu1 %4039  ;;  %v11033_v20 = vld [vmem:[%s12538_s1 + $0x2] ss:$0 sm:$0xff] }
 0x2ce   :  { %7399 = vmatmul.mubr.msk.f32.gmra.mrb[8].mxu0 %vm1013_vm14, %v4147_v32  ;;  %v11038_v32 = vld [vmem:[%s12538_s1 + $0x3] ss:$0 sm:$0xff]  ;;  %v1280_v11 = vmul.f32 %v11033_v20, %v13282_v12  ;;  %v1279_v48 = vmul.f32 %v11033_v20, %v13285_v2  ;;  %v1281_v14 = vmul.f32 %v11033_v20, %v13287_v51  ;;  %v1282_v12 = vmul.f32 %v11033_v20, %v13289_v36  ;;  %v13294_v51 = vld [vmem:[#allocation5_spill] sm:$0xff] }
 0x2cf   :  { %v1288_v31 = vmul.f32 %v11038_v32, %v13283_v41  ;;  %v1287_v60 = vmul.f32 %v11038_v32, %v13284_v37  ;;  %v1289_v42 = vmul.f32 %v11038_v32, %v13288_v35  ;;  %v1304_v41 = vmul.f32 %v13290_v54, %v11045_v21  ;;  %v13295_v35 = vld [vmem:[#allocation12_spill] sm:$0xff]  ;;  %v13296_v36 = vld [vmem:[#allocation21_spill] sm:$0xff]  ;;  %v11077_v54 = vpop.permute.xlu0 %4515 }
 0x2d0   :  { %v1290_v37 = vmul.f32 %v11038_v32, %v13291_v63  ;;  %v1283_v2 = vmul.f32 %v11033_v20, %v13292_v47  ;;  %v1291_v5 = vmul.f32 %v11038_v32, %v13293_v23  ;;  %v1303_v3 = vmul.f32 %v13294_v51, %v11045_v21  ;;  %v13297_v63 = vld [vmem:[#allocation9_spill] sm:$0xff] }
 0x2d1   :  { %v1296_v50 = vadd.f32 %v1288_v31, %v1280_v11  ;;  %v1292_v58 = vmul.f32 %v11038_v32, %v13295_v35  ;;  %v1284_v7 = vmul.f32 %v11033_v20, %v13296_v36  ;;  %v1295_v28 = vadd.f32 %v1287_v60, %v1279_v48 }
 0x2d2   :  { %v11021_v46 = vpop.permute.xlu1 %4079  ;;  %v1305_v34 = vmul.f32 %v13297_v63, %v11045_v21  ;;  %v1297_v47 = vadd.f32 %v1289_v42, %v1281_v14  ;;  %v1286_v23 = vmul.f32 %v11033_v20, %v13298_v18  ;;  %v1298_v31 = vadd.f32 %v1290_v37, %v1282_v12  ;;  %v13300_v18 = vld [vmem:[#allocation13_spill] sm:$0xff]  ;;  %v13303_v12 = vld [vmem:[#allocation18_spill] sm:$0xff] }
 0x2d3   :  { %v1312_v10 = vadd.f32 %v1304_v41, %v1296_v50  ;;  %v1299_v11 = vadd.f32 %v1291_v5, %v1283_v2  ;;  %v4053_v51 = vmul.f32 %v10538_v15, %v10911_v17  ;;  %v1311_v35 = vadd.f32 %v1303_v3, %v1295_v28  ;;  %v13301_v3 = vld [vmem:[#allocation15_spill] sm:$0xff]  ;;  %v11106_v37 = vpop.permute.xlu0 %4523 }
 0x2d4   :  { %v1300_v36 = vadd.f32 %v1292_v58, %v1284_v7  ;;  %v1306_v60 = vmul.f32 %v13299_v52, %v11045_v21  ;;  %v4052_v48 = vmul.f32 %v10538_v15, %v11016_v8  ;;  %v4092_v14 = vmul.f32 %v10524_v13, %v11021_v46  ;;  %v13302_v58 = vld [vmem:[#allocation16_spill] sm:$0xff] }
 0x2d5   :  { %v1307_v50 = vmul.f32 %v13300_v18, %v11045_v21  ;;  %v1313_v42 = vadd.f32 %v1305_v34, %v1297_v47  ;;  %7056 = vmatprep.mubr.msk.f32.mxu1 %vm1013_vm14, %v1311_v35  ;;  %v1285_v52 = vmul.f32 %v11033_v20, %v13301_v3  ;;  %v1293_v28 = vmul.f32 %v11038_v32, %v13302_v58  ;;  %v13304_v47 = vld [vmem:[#allocation92_spill] sm:$0xff]  ;;  %v13305_v58 = vld [vmem:[#allocation29_spill] sm:$0xff] }
 0x2d6   :  { %v11026_v38 = vpop.permute.xlu1 %4083  ;;  %v1294_v41 = vmul.f32 %v11038_v32, %v13303_v12  ;;  %7057 = vmatmul.mubr.msk.f32.vlgmr.msra.gmra.mrb[8].mxu1 %vm1013_vm14, %v1312_v10  ;;  %v4100_v34 = vadd.f32 %v4092_v14, %v4052_v48  ;;  %v4527_v63 = vmul.f32 %v10538_v15, %v11028_v53  ;;  %v4141_v3 = vmul.f32 %v11019_v43, %v9717_v56  ;;  %v13306_v14 = vld [vmem:[#allocation93_spill] sm:$0xff]  ;;  %v13309_v43 = vld [vmem:[#allocation24_spill] sm:$0xff] }
 0x2d7   :  { %13278 = vst [vmem:[#allocation209_spill] sm:$0xff] %v11026_v38  ;;  %v4093_v5 = vmul.f32 %v10524_v13, %v11026_v38  ;;  %7059 = vmatprep.mubr.msk.f32.mxu1 %vm1013_vm14, %v1313_v42  ;;  %7753 = vmatpush3.bf16.msra.mxu1 %v13304_v47  ;;  %v1308_v10 = vmul.f32 %v13305_v58, %v11045_v21  ;;  %v13308_v42 = vld [vmem:[#allocation20_spill] sm:$0xff] }
 0x2d8   :  { %v1314_v48 = vadd.f32 %v1306_v60, %v1298_v31  ;;  %7755 = vmatprep.subr.bf16.mxu1 %v13306_v14  ;;  %v1309_v47 = vmul.f32 %v13308_v42, %v11045_v21  ;;  %v812_v38 = vmul.f32 %v11038_v32, %v13309_v43  ;;  %v1301_v60 = vadd.f32 %v1293_v28, %v1285_v52  ;;  %v11140_v43 = vpop.permute.xlu0 %4587  ;;  %v13312_v28 = vld [vmem:[#allocation34_spill] sm:$0xff] }
 0x2d9   :  { %v4101_v35 = vadd.f32 %v4093_v5, %v4053_v51  ;;  %v1315_v51 = vadd.f32 %v1307_v50, %v1299_v11  ;;  %v1316_v58 = vadd.f32 %v1308_v10, %v1300_v36  ;;  %v1302_v36 = vadd.f32 %v1294_v41, %v1286_v23  ;;  %v13318_v23 = vld [vmem:[#allocation76_spill] sm:$0xff] }
 0x2da   :  { %7060 = vmatmul.mubr.msk.f32.gmra.mrb[10].mxu1 %vm1013_vm14, %v1314_v48  ;;  %v13311_v48 = vld [vmem:[#allocation74_spill] sm:$0xff]  ;;  %v1317_v42 = vadd.f32 %v1309_v47, %v1301_v60  ;;  %v13319_v60 = vld [vmem:[#allocation36_spill] sm:$0xff] }
 0x2db   :  { %v11040_v39 = vpop.permute.xlu1 %4127  ;;  %v4149_v31 = vadd.f32 %v4141_v3, %v4101_v35  ;;  %7062 = vmatprep.mubr.msk.f32.mxu1 %vm1013_vm14, %v1315_v51  ;;  %7757 = vmatpush3.bf16.msra.mxu1 %v13306_v14  ;;  %v801_v3 = vmul.f32 %v11033_v20, %v13312_v28  ;;  %v4615_v14 = vmul.f32 %v11140_v43, %v9717_v56  ;;  %v13314_v51 = vld [vmem:[#allocation26_spill] sm:$0xff] }
 0x2dc   :  { %13280 = vst [vmem:[#allocation211_spill] sm:$0xff] %v11040_v39  ;;  %v4140_v7 = vmul.f32 %v11040_v39, %v9717_v56  ;;  %v13307_v39 = vld [vmem:[#allocation22_spill] sm:$0xff]  ;;  %7759 = vmatprep.subr.bf16.mxu1 %v13311_v48 }
 0x2dd   :  { %v800_v53 = vmul.f32 %v11033_v20, %v13307_v39 }
 0x2de   :  { %v4148_v12 = vadd.f32 %v4140_v7, %v4100_v34  ;;  %v13310_v7 = vld [vmem:[#allocation32_spill] sm:$0xff]  ;;  %7063 = vmatmul.mubr.msk.f32.gmra.mrb[12].mxu1 %vm1013_vm14, %v1316_v58  ;;  %v13320_v58 = vld [vmem:[#allocation33_spill] sm:$0xff] }
 0x2df   :  { %v1310_v11 = vmul.f32 %v13310_v7, %v11045_v21  ;;  %v820_v10 = vadd.f32 %v812_v38, %v800_v53  ;;  %v13316_v7 = vld [vmem:[#allocation31_spill] sm:$0xff]  ;;  %7065 = vmatprep.mubr.msk.f32.mxu1 %vm1013_vm14, %v1317_v42  ;;  %7761 = vmatpush3.bf16.msra.mxu1 %v13311_v48  ;;  %v13322_v42 = vld [vmem:[#allocation37_spill] sm:$0xff] }
 0x2e0   :  { %v11055_v29 = vpop.permute.xlu1 %4495  ;;  %7401 = vmatprep.mubr.msk.f32.mxu0 %vm1013_vm14, %v4148_v12  ;;  %v814_v28 = vmul.f32 %v11038_v32, %v13316_v7  ;;  %7764 = vmatprep.subr.msk.bf16.mxu1 %vm9402_vm7, %v13318_v23  ;;  %v13321_v48 = vld [vmem:[#allocation35_spill] sm:$0xff] }
 0x2e1   :  { %13286 = vst [vmem:[#allocation2_spill] sm:$0xff] %v11055_v29  ;;  %v4526_v18 = vmul.f32 %v10538_v15, %v11055_v29  ;;  %v8528_v29 = vmov 91   ;;  %7402 = vmatmul.mubr.msk.f32.gmra.mrb[10].mxu0 %vm1013_vm14, %v4149_v31  ;;  %v13315_v31 = vld [vmem:[#allocation30_spill] sm:$0xff]  ;;  %v1318_v38 = vadd.f32 %v1310_v11, %v1302_v36  ;;  %v804_v36 = vmul.f32 %v11033_v20, %v13322_v42 }
 0x2e2   :  { %8370 = vset.pattern.permute.xlu1 %v8528_v29  ;;  %8371 = vset.pattern.permute.xlu0 %v8528_v29 }
 0x2e3   :  { %4948 = vperm.xlu1 %8370, %v10788_v27   ;;  %v13317_v27 = vld [vmem:[#allocation44_spill] sm:$0xff]  ;;  %7066 = vmatmul.mubr.msk.f32.gmra.mrb[14].mxu1 %vm1013_vm14, %v1318_v38 }
 0x2e4   :  { %v833_v53 = vmul.f32 %v11045_v21, %v13317_v27  ;;  %7767 = vmatpush3.bf16.msk.msra.mxu1 %vm9402_vm7, %v13318_v23  ;;  %v13328_v23 = vld [vmem:[#allocation41_spill] sm:$0xff] }
 0x2e5   :  { %v11083_v62 = vpop.permute.xlu1 %4535 }
 0x2e6   :  { %v4566_v5 = vmul.f32 %v10524_v13, %v11083_v62 }
 0x2e7   :  { %4952 = vperm.xlu1 %8370, %v10813_v19  }
 0x2e8   :  { %v4574_v50 = vadd.f32 %v4566_v5, %v4526_v18  ;;  %v13313_v18 = vld [vmem:[#allocation28_spill] sm:$0xff] }
 0x2e9   :  { %v11109_v2 = vpop.permute.xlu1 %4539  ;;  %v832_v12 = vmul.f32 %v11045_v21, %v13313_v18 }
 0x2ea   :  { %v4567_v39 = vmul.f32 %v10524_v13, %v11109_v2 }
 0x2eb   :  { %4960 = vperm.xlu1 %8370, %v10469_v1   ;;  %v13337_v1 = vld [vmem:[#allocation54_spill] sm:$0xff] }
 0x2ec   :  { %v4575_v35 = vadd.f32 %v4567_v39, %v4527_v63  ;;  %v813_v63 = vmul.f32 %v11038_v32, %v13314_v51  ;;  %v802_v39 = vmul.f32 %v11033_v20, %v13315_v31  ;;  %v13323_v51 = vld [vmem:[#allocation39_spill] sm:$0xff]  ;;  %v13324_v31 = vld [vmem:[#allocation46_spill] sm:$0xff] }
 0x2ee   :  { %v11138_v34 = vpop.permute.xlu1 %4583  ;;  %v4623_v47 = vadd.f32 %v4615_v14, %v4575_v35  ;;  %v834_v35 = vmul.f32 %v11045_v21, %v13321_v48  ;;  %v840_v14 = vadd.f32 %v832_v12, %v820_v10  ;;  %v821_v11 = vadd.f32 %v813_v63, %v801_v3  ;;  %v13325_v3 = vld [vmem:[#allocation69_spill] sm:$0xff]  ;;  %v13326_v63 = vld [vmem:[#allocation38_spill] sm:$0xff]  ;;  %v13330_v48 = vld [vmem:[#allocation47_spill] sm:$0xff] }
 0x2ef   :  { %v4614_v52 = vmul.f32 %v11138_v34, %v9717_v56  ;;  %v822_v18 = vadd.f32 %v814_v28, %v802_v39  ;;  %v835_v12 = vmul.f32 %v11045_v21, %v13324_v31  ;;  %7787 = vmatprep.subr.bf16.mxu1 %v13325_v3  ;;  %v805_v39 = vmul.f32 %v11033_v20, %v13326_v63  ;;  %v13327_v28 = vld [vmem:[#allocation43_spill] sm:$0xff] }
 0x2f0   :  { %7084 = vmatprep.mubr.msk.f32.mxu1 %vm1013_vm14, %v840_v14  ;;  %v841_v10 = vadd.f32 %v833_v53, %v821_v11  ;;  %v818_v19 = vmul.f32 %v11038_v32, %v13330_v48  ;;  %v13332_v14 = vld [vmem:[#allocation49_spill] sm:$0xff]  ;;  %v13334_v31 = vld [vmem:[#allocation87_spill] sm:$0xff]  ;;  %4964 = vperm.xlu1 %8370, %v10579_v59  }
 0x2f1   :  { %v4622_v5 = vadd.f32 %v4614_v52, %v4574_v50  ;;  %v803_v50 = vmul.f32 %v11033_v20, %v13319_v60  ;;  %v815_v52 = vmul.f32 %v11038_v32, %v13320_v58  ;;  %v842_v27 = vadd.f32 %v834_v35, %v822_v18  ;;  %v13329_v58 = vld [vmem:[#allocation45_spill] sm:$0xff]  ;;  %v13333_v18 = vld [vmem:[#allocation48_spill] sm:$0xff]  ;;  %v13339_v48 = vld [vmem:[#allocation51_spill] sm:$0xff] }
 0x2f2   :  { %v817_v60 = vmul.f32 %v11038_v32, %v13328_v23  ;;  %v806_v53 = vmul.f32 %v11033_v20, %v13329_v58  ;;  %7085 = vmatmul.mubr.msk.f32.vlgmr.msra.gmra.mrb[8].mxu1 %vm1013_vm14, %v841_v10  ;;  %v819_v11 = vmul.f32 %v11038_v32, %v13332_v14  ;;  %v837_v42 = vmul.f32 %v11045_v21, %v13333_v18  ;;  %v13335_v10 = vld [vmem:[#allocation50_spill] sm:$0xff]  ;;  %v13336_v58 = vld [vmem:[#allocation52_spill] sm:$0xff] }
 0x2f3   :  { %7448 = vmatprep.mubr.msk.f32.mxu0 %vm1013_vm14, %v4622_v5  ;;  %v11168_v41 = vpop.permute.xlu1 %4503  ;;  %v816_v5 = vmul.f32 %v11038_v32, %v13323_v51  ;;  %v823_v7 = vadd.f32 %v815_v52, %v803_v50  ;;  %v8482_v50 = vld [vmem:[%s12533_s5 + $0x10] sm:$0xff]  ;;  %v13331_v52 = vld [vmem:[#allocation42_spill] sm:$0xff]  ;;  %7087 = vmatprep.mubr.msk.f32.mxu1 %vm1013_vm14, %v842_v27  ;;  %v838_v63 = vmul.f32 %v11045_v21, %v13335_v10 }
 0x2f4   :  { %7449 = vmatmul.mubr.msk.f32.vlgmr.msra.gmra.mrb[4].mxu0 %vm1013_vm14, %v4623_v47  ;;  %v836_v47 = vmul.f32 %v11045_v21, %v13327_v28  ;;  %4956 = vperm.xlu0 %8371, %v8482_v50   ;;  %v807_v35 = vmul.f32 %v11033_v20, %v13331_v52  ;;  %v825_v27 = vadd.f32 %v817_v60, %v805_v39  ;;  %v13338_v60 = vld [vmem:[#allocation53_spill] sm:$0xff] }
 0x2f5   :  { %v824_v29 = vadd.f32 %v816_v5, %v804_v36  ;;  %7789 = vmatpush3.bf16.msra.mxu1 %v13325_v3  ;;  %v843_v51 = vadd.f32 %v835_v12, %v823_v7  ;;  %v4528_v36 = vmul.f32 %v10538_v15, %v11168_v41  ;;  %v826_v23 = vadd.f32 %v818_v19, %v806_v53  ;;  %v13340_v50 = vld [vmem:[#allocation85_spill] sm:$0xff] }
 0x2f6   :  { %7791 = vmatprep.subr.bf16.mxu1 %v13334_v31  ;;  %v1883_v12 = vmul.f32 %v11033_v20, %v13336_v58  ;;  %v1891_v7 = vmul.f32 %v11038_v32, %v13337_v1  ;;  %v1884_v53 = vmul.f32 %v11033_v20, %v13338_v60  ;;  %v839_v19 = vmul.f32 %v11045_v21, %v13339_v48 }
 0x2f7   :  { %v844_v28 = vadd.f32 %v836_v47, %v824_v29  ;;  %7088 = vmatmul.mubr.msk.f32.gmra.mrb[10].mxu1 %vm1013_vm14, %v843_v51  ;;  %v4529_v47 = vmul.f32 %v10538_v15, %v11042_v33  ;;  %v827_v52 = vadd.f32 %v819_v11, %v807_v35  ;;  %v13341_v15 = vld [vmem:[#allocation57_spill] sm:$0xff]  ;;  %v846_v14 = vadd.f32 %v838_v63, %v826_v23  ;;  %v13342_v51 = vld [vmem:[#allocation56_spill] sm:$0xff]  ;;  %v11258_v63 = vpop.permute.xlu0 %4595 }
 0x2f8   :  { %v11194_v38 = vpop.permute.xlu1 %4543  ;;  %4968 = vperm.xlu0 %8371, %v10660_v61   ;;  %v845_v61 = vadd.f32 %v837_v42, %v825_v27  ;;  %v1907_v29 = vmul.f32 %v13341_v15, %v11045_v21  ;;  %v1899_v59 = vadd.f32 %v1891_v7, %v1883_v12  ;;  %13345 = vst [vmem:[#allocation3_spill] sm:$0xff] %v11258_v63  ;;  %v13347_v23 = vld [vmem:[#allocation89_spill] sm:$0xff]  ;;  %v13352_v15 = vld [vmem:[#allocation68_spill] sm:$0xff] }
 0x2f9   :  { %v4568_v5 = vmul.f32 %v10524_v13, %v11194_v38  ;;  %7090 = vmatprep.mubr.msk.f32.mxu1 %vm1013_vm14, %v844_v28  ;;  %7793 = vmatpush3.bf16.msra.mxu1 %v13334_v31  ;;  %v13343_v31 = vld [vmem:[#allocation59_spill] sm:$0xff]  ;;  %v13344_v28 = vld [vmem:[#allocation61_spill] sm:$0xff]  ;;  %v847_v27 = vadd.f32 %v839_v19, %v827_v52  ;;  %v13351_v52 = vld [vmem:[#allocation66_spill] sm:$0xff] }
 0x2fa   :  { %7795 = vmatprep.subr.bf16.mxu1 %v13340_v50  ;;  %v1885_v10 = vmul.f32 %v11033_v20, %v13343_v31  ;;  %v1893_v58 = vmul.f32 %v11038_v32, %v13344_v28  ;;  %4972 = vperm.xlu1 %8370, %v10716_v30   ;;  %v13348_v12 = vld [vmem:[#allocation65_spill] sm:$0xff]  ;;  %v1915_v7 = vadd.f32 %v1907_v29, %v1899_v59  ;;  %v13350_v19 = vld [vmem:[#allocation63_spill] sm:$0xff]  ;;  %v13354_v31 = vld [vmem:[#allocation122_spill] sm:$0xff] }
 0x2fb   :  { %v4576_v18 = vadd.f32 %v4568_v5, %v4528_v36  ;;  %7091 = vmatmul.mubr.msk.f32.gmra.mrb[12].mxu1 %vm1013_vm14, %v845_v61  ;;  %v13346_v36 = vld [vmem:[#allocation62_spill] sm:$0xff]  ;;  %v1909_v1 = vmul.f32 %v13348_v12, %v11045_v21  ;;  %v1887_v30 = vmul.f32 %v11033_v20, %v13351_v52  ;;  %v13359_v12 = vld [vmem:[#allocation77_spill] sm:$0xff]  ;;  %v13363_v52 = vld [vmem:[#allocation60_spill] sm:$0xff] }
 0x2fc   :  { %v11222_v3 = vpop.permute.xlu1 %4547  ;;  %4976 = vperm.xlu0 %8371, %v10755_v24   ;;  %7093 = vmatprep.mubr.msk.f32.mxu1 %vm1013_vm14, %v846_v14  ;;  %v1908_v5 = vmul.f32 %v13346_v36, %v11045_v21  ;;  %v4617_v24 = vmul.f32 %v11258_v63, %v9717_v56  ;;  %v1901_v61 = vadd.f32 %v1893_v58, %v1885_v10  ;;  %v13355_v10 = vld [vmem:[#allocation71_spill] sm:$0xff]  ;;  %v13356_v59 = vld [vmem:[#allocation58_spill] sm:$0xff] }
 0x2fd   :  { %v4569_v39 = vmul.f32 %v10524_v13, %v11222_v3  ;;  %v1892_v13 = vmul.f32 %v11038_v32, %v13342_v51  ;;  %7797 = vmatpush3.bf16.msra.mxu1 %v13340_v50  ;;  %v1894_v50 = vmul.f32 %v11038_v32, %v13350_v19  ;;  %v1895_v14 = vmul.f32 %v11038_v32, %v13352_v15  ;;  %v13387_v63 = vld [vmem:[#allocation103_spill] sm:$0xff] }
 0x2fe   :  { %7800 = vmatprep.subr.msk.bf16.mxu1 %vm9402_vm7, %v13347_v23  ;;  %v1911_v28 = vmul.f32 %v13355_v10, %v11045_v21  ;;  %v1917_v58 = vadd.f32 %v1909_v1, %v1901_v61  ;;  %v13360_v1 = vld [vmem:[#allocation67_spill] sm:$0xff] }
 0x2ff   :  { %v4577_v35 = vadd.f32 %v4569_v39, %v4529_v47  ;;  %v13349_v39 = vld [vmem:[#allocation55_spill] sm:$0xff]  ;;  %v1900_v48 = vadd.f32 %v1892_v13, %v1884_v53  ;;  %7094 = vmatmul.mubr.msk.f32.gmra.mrb[14].mxu1 %vm1013_vm14, %v847_v27  ;;  %v13357_v27 = vld [vmem:[#allocation70_spill] sm:$0xff] }
 0x300   :  { %v1886_v60 = vmul.f32 %v11033_v20, %v13349_v39  ;;  %7140 = vmatprep.mubr.msk.f32.mxu1 %vm1013_vm14, %v1915_v7  ;;  %v1897_v7 = vmul.f32 %v11038_v32, %v13359_v12  ;;  %v13362_v61 = vld [vmem:[#allocation79_spill] sm:$0xff] }
 0x301   :  { %v11251_v42 = vpop.permute.xlu1 %4591  ;;  %7803 = vmatpush3.bf16.msk.msra.mxu1 %vm9402_vm7, %v13347_v23  ;;  %v4625_v53 = vadd.f32 %v4617_v24, %v4577_v35  ;;  %v1916_v13 = vadd.f32 %v1908_v5, %v1900_v48  ;;  %v1896_v35 = vmul.f32 %v11038_v32, %v13357_v27  ;;  %v1903_v5 = vadd.f32 %v1895_v14, %v1887_v30  ;;  %v13358_v23 = vld [vmem:[#allocation75_spill] sm:$0xff]  ;;  %v13364_v14 = vld [vmem:[#allocation78_spill] sm:$0xff] }
 0x302   :  { %v4616_v11 = vmul.f32 %v11251_v42, %v9717_v56  ;;  %7823 = vmatprep.subr.bf16.mxu1 %v13354_v31  ;;  %v1902_v36 = vadd.f32 %v1894_v50, %v1886_v60  ;;  %v1889_v24 = vmul.f32 %v11033_v20, %v13358_v23  ;;  %v13361_v60 = vld [vmem:[#allocation145_spill] sm:$0xff]  ;;  %v1913_v19 = vmul.f32 %v13362_v61, %v11045_v21 }
 0x303   :  { %v1919_v50 = vadd.f32 %v1911_v28, %v1903_v5  ;;  %v1890_v30 = vmul.f32 %v11033_v20, %v13363_v52  ;;  %v13367_v28 = vld [vmem:[#allocation105_spill] sm:$0xff] }
 0x304   :  { %v4624_v47 = vadd.f32 %v4616_v11, %v4576_v18  ;;  %v13353_v18 = vld [vmem:[#allocation64_spill] sm:$0xff]  ;;  %v1888_v11 = vmul.f32 %v11033_v20, %v13356_v59  ;;  %7141 = vmatmul.mubr.msk.f32.vlgmr.msra.gmra.mrb[8].mxu1 %vm1013_vm14, %v1916_v13  ;;  %v13365_v13 = vld [vmem:[#allocation81_spill] sm:$0xff] }
 0x305   :  { %v1910_v51 = vmul.f32 %v13353_v18, %v11045_v21  ;;  %7143 = vmatprep.mubr.msk.f32.mxu1 %vm1013_vm14, %v1917_v58  ;;  %7825 = vmatpush3.bf16.msra.mxu1 %v13354_v31  ;;  %v1905_v18 = vadd.f32 %v1897_v7, %v1889_v24  ;;  %v13366_v31 = vld [vmem:[#allocation82_spill] sm:$0xff]  ;;  %v1914_v58 = vmul.f32 %v13367_v28, %v11045_v21  ;;  %v13369_v24 = vld [vmem:[#allocation107_spill] sm:$0xff] }
 0x306   :  { %v11283_v29 = vpop.permute.xlu1 %4511  ;;  %7451 = vmatprep.mubr.msk.f32.mxu0 %vm1013_vm14, %v4624_v47  ;;  %v1912_v47 = vmul.f32 %v13360_v1, %v11045_v21  ;;  %7827 = vmatprep.subr.bf16.mxu1 %v13361_v60  ;;  %v1904_v15 = vadd.f32 %v1896_v35, %v1888_v11  ;;  %v2374_v10 = vmul.f32 %v11038_v32, %v13366_v31  ;;  %v13368_v11 = vld [vmem:[#allocation148_spill] sm:$0xff]  ;;  %v11334_v35 = vld [vmem:[%s12538_s1 + $0x1] ss:$0 sm:$0xff]  ;;  %v13373_v31 = vld [vmem:[#allocation95_spill] sm:$0xff] }
 0x307   :  { %7452 = vmatmul.mubr.msk.f32.gmra.mrb[6].mxu0 %vm1013_vm14, %v4625_v53  ;;  %v1918_v39 = vadd.f32 %v1910_v51, %v1902_v36  ;;  %v1898_v53 = vmul.f32 %v11038_v32, %v13364_v14  ;;  %v2366_v51 = vmul.f32 %v11033_v20, %v13365_v13  ;;  %v11327_v36 = vld [vmem:[%s12538_s1] ss:$0 sm:$0xff]  ;;  %v2367_v12 = vmul.f32 %v11033_v20, %v13369_v24 }
 0x308   :  { %v1920_v59 = vadd.f32 %v1912_v47, %v1904_v15  ;;  %v4530_v27 = vmul.f32 %v11327_v36, %v11283_v29  ;;  %v13370_v7 = vld [vmem:[#allocation90_spill] sm:$0xff]  ;;  %v1921_v47 = vadd.f32 %v1913_v19, %v1905_v18  ;;  %v2376_v28 = vmul.f32 %v11038_v32, %v13373_v31  ;;  %v13375_v18 = vld [vmem:[#allocation96_spill] sm:$0xff] }
 0x309   :  { %7144 = vmatmul.mubr.msk.f32.gmra.mrb[10].mxu1 %vm1013_vm14, %v1918_v39  ;;  %v2390_v1 = vmul.f32 %v13370_v7, %v11045_v21  ;;  %v1906_v39 = vadd.f32 %v1898_v53, %v1890_v30  ;;  %v2382_v15 = vadd.f32 %v2374_v10, %v2366_v51  ;;  %v13372_v14 = vld [vmem:[#allocation94_spill] sm:$0xff] }
 0x30a   :  { %7146 = vmatprep.mubr.msk.f32.mxu1 %vm1013_vm14, %v1919_v50  ;;  %7829 = vmatpush3.bf16.msra.mxu1 %v13361_v60  ;;  %v13371_v60 = vld [vmem:[#allocation86_spill] sm:$0xff]  ;;  %v4531_v50 = vmul.f32 %v11327_v36, %v11077_v54  ;;  %v2368_v13 = vmul.f32 %v11033_v20, %v13372_v14 }
 0x30b   :  { %v11306_v48 = vpop.permute.xlu1 %4551  ;;  %7831 = vmatprep.subr.bf16.mxu1 %v13368_v11  ;;  %v2375_v61 = vmul.f32 %v11038_v32, %v13371_v60  ;;  %v13374_v19 = vld [vmem:[#allocation118_spill] sm:$0xff]  ;;  %v1922_v53 = vadd.f32 %v1914_v58, %v1906_v39  ;;  %v2398_v60 = vadd.f32 %v2390_v1, %v2382_v15  ;;  %v11377_v1 = vpop.permute.xlu0 %4603 }
 0x30c   :  { %v4570_v5 = vmul.f32 %v11334_v35, %v11306_v48  ;;  %v2391_v30 = vmul.f32 %v13374_v19, %v11045_v21  ;;  %v13376_v51 = vld [vmem:[#allocation110_spill] sm:$0xff]  ;;  %13382 = vst [vmem:[#allocation14_spill] sm:$0xff] %v11377_v1 }
 0x30d   :  { %7147 = vmatmul.mubr.msk.f32.gmra.mrb[12].mxu1 %vm1013_vm14, %v1920_v59  ;;  %v2369_v10 = vmul.f32 %v11033_v20, %v13376_v51  ;;  %v13377_v24 = vld [vmem:[#allocation98_spill] sm:$0xff]  ;;  %v13381_v51 = vld [vmem:[#allocation101_spill] sm:$0xff] }
 0x30e   :  { %7149 = vmatprep.mubr.msk.f32.mxu1 %vm1013_vm14, %v1921_v47  ;;  %7833 = vmatpush3.bf16.msra.mxu1 %v13368_v11  ;;  %v4578_v59 = vadd.f32 %v4570_v5, %v4530_v27  ;;  %v2392_v7 = vmul.f32 %v13377_v24, %v11045_v21  ;;  %v2383_v47 = vadd.f32 %v2375_v61, %v2367_v12  ;;  %v13379_v11 = vld [vmem:[#allocation97_spill] sm:$0xff]  ;;  %v13380_v5 = vld [vmem:[#allocation100_spill] sm:$0xff]  ;;  %v13384_v15 = vld [vmem:[#allocation150_spill] sm:$0xff] }
 0x30f   :  { %v11338_v23 = vpop.permute.xlu1 %4555  ;;  %7836 = vmatprep.subr.msk.bf16.mxu1 %vm9402_vm7, %v13375_v18  ;;  %v2377_v31 = vmul.f32 %v11038_v32, %v13379_v11  ;;  %v2384_v27 = vadd.f32 %v2376_v28, %v2368_v13  ;;  %v2370_v19 = vmul.f32 %v11033_v20, %v13380_v5  ;;  %v2378_v24 = vmul.f32 %v11038_v32, %v13381_v51  ;;  %v13383_v61 = vld [vmem:[#allocation120_spill] sm:$0xff] }
 0x310   :  { %v4571_v52 = vmul.f32 %v11334_v35, %v11338_v23  ;;  %v4619_v12 = vmul.f32 %v11377_v1, %v9717_v56  ;;  %v13385_v28 = vld [vmem:[#allocation112_spill] sm:$0xff]  ;;  %v13388_v1 = vld [vmem:[#allocation106_spill] sm:$0xff] }
 0x311   :  { %7150 = vmatmul.mubr.msk.f32.gmra.mrb[14].mxu1 %vm1013_vm14, %v1922_v53  ;;  %v2371_v53 = vmul.f32 %v11033_v20, %v13385_v28  ;;  %v13386_v11 = vld [vmem:[#allocation104_spill] sm:$0xff]  ;;  %v2400_v51 = vadd.f32 %v2392_v7, %v2384_v27 }
 0x312   :  { %v4579_v58 = vadd.f32 %v4571_v52, %v4531_v50  ;;  %7839 = vmatpush3.bf16.msk.msra.mxu1 %vm9402_vm7, %v13375_v18  ;;  %7196 = vmatprep.mubr.msk.f32.mxu1 %vm1013_vm14, %v2398_v60  ;;  %v2393_v50 = vmul.f32 %v13383_v61, %v11045_v21  ;;  %v2399_v52 = vadd.f32 %v2391_v30, %v2383_v47 }
 0x313   :  { %7859 = vmatprep.subr.bf16.mxu1 %v13384_v15  ;;  %v2394_v5 = vmul.f32 %v13386_v11, %v11045_v21  ;;  %v2385_v18 = vadd.f32 %v2377_v31, %v2369_v10  ;;  %v2379_v60 = vmul.f32 %v11038_v32, %v13387_v63  ;;  %v2386_v47 = vadd.f32 %v2378_v24, %v2370_v19  ;;  %v13390_v10 = vld [vmem:[#allocation123_spill] sm:$0xff] }
 0x314   :  { %v11366_v14 = vpop.permute.xlu1 %4599  ;;  %v4627_v30 = vadd.f32 %v4619_v12, %v4579_v58  ;;  %v2395_v63 = vmul.f32 %v13390_v10, %v11045_v21  ;;  %v13391_v31 = vld [vmem:[#allocation99_spill] sm:$0xff]  ;;  %v13392_v58 = vld [vmem:[#allocation116_spill] sm:$0xff] }
 0x315   :  { %13378 = vst [vmem:[#allocation4_spill] sm:$0xff] %v11366_v14  ;;  %v4618_v39 = vmul.f32 %v11366_v14, %v9717_v56  ;;  %7197 = vmatmul.mubr.msk.f32.vlgmr.msra.gmra.mrb[8].mxu1 %vm1013_vm14, %v2399_v52  ;;  %v2401_v7 = vadd.f32 %v2393_v50, %v2385_v18  ;;  %v2373_v27 = vmul.f32 %v11033_v20, %v13392_v58  ;;  %v13393_v19 = vld [vmem:[#allocation111_spill] sm:$0xff]  ;;  %v13403_v14 = vld [vmem:[#allocation124_spill] sm:$0xff] }
 0x316   :  { %7199 = vmatprep.mubr.msk.f32.mxu1 %vm1013_vm14, %v2400_v51  ;;  %7861 = vmatpush3.bf16.msra.mxu1 %v13384_v15  ;;  %v2381_v24 = vmul.f32 %v11038_v32, %v13393_v19  ;;  %v2402_v52 = vadd.f32 %v2394_v5, %v2386_v47  ;;  %v13395_v15 = vld [vmem:[#allocation115_spill] sm:$0xff]  ;;  %v13396_v51 = vld [vmem:[#allocation117_spill] sm:$0xff] }
 0x317   :  { %v4626_v13 = vadd.f32 %v4618_v39, %v4578_v59  ;;  %v2372_v59 = vmul.f32 %v11033_v20, %v13388_v1  ;;  %v13389_v39 = vld [vmem:[#allocation108_spill] sm:$0xff]  ;;  %7863 = vmatprep.subr.bf16.mxu1 %v13391_v31  ;;  %v13394_v1 = vld [vmem:[#allocation113_spill] sm:$0xff]  ;;  %v2846_v11 = vmul.f32 %v11033_v20, %v13395_v15  ;;  %v2854_v50 = vmul.f32 %v11038_v32, %v13396_v51  ;;  %v13399_v47 = vld [vmem:[#allocation127_spill] sm:$0xff] }
 0x318   :  { %v2380_v28 = vmul.f32 %v11038_v32, %v13389_v39  ;;  %v2396_v12 = vmul.f32 %v13394_v1, %v11045_v21  ;;  %v2397_v58 = vmul.f32 %v13399_v47, %v11045_v21  ;;  %v13400_v1 = vld [vmem:[#allocation152_spill] sm:$0xff]  ;;  %v2389_v15 = vadd.f32 %v2381_v24, %v2373_v27  ;;  %v13401_v51 = vld [vmem:[#allocation119_spill] sm:$0xff] }
 0x319   :  { %7454 = vmatprep.mubr.msk.f32.mxu0 %vm1013_vm14, %v4626_v13  ;;  %v4520_v61 = vpop.permute.xlu1 %4519  ;;  %v2387_v13 = vadd.f32 %v2379_v60, %v2371_v53  ;;  %7200 = vmatmul.mubr.msk.f32.gmra.mrb[10].mxu1 %vm1013_vm14, %v2401_v7  ;;  %v13398_v53 = vld [vmem:[#allocation131_spill] sm:$0xff]  ;;  %v4777_v47 = vmul.f32 %v11033_v20, %v11106_v37 }
 0x31a   :  { %7455 = vmatmul.mubr.msk.f32.gmra.mrb[8].mxu0 %vm1013_vm14, %v4627_v30  ;;  %v4776_v18 = vmul.f32 %v11033_v20, %v4520_v61  ;;  %v13397_v30 = vld [vmem:[#allocation129_spill] sm:$0xff]  ;;  %v2388_v10 = vadd.f32 %v2380_v28, %v2372_v59  ;;  %7202 = vmatprep.mubr.msk.f32.mxu1 %vm1013_vm14, %v2402_v52  ;;  %v2849_v60 = vmul.f32 %v11033_v20, %v13398_v53 }
 0x31b   :  { %v2847_v39 = vmul.f32 %v11033_v20, %v13397_v30  ;;  %7865 = vmatpush3.bf16.msra.mxu1 %v13391_v31  ;;  %v2403_v19 = vadd.f32 %v2395_v63, %v2387_v13  ;;  %v2855_v59 = vmul.f32 %v11038_v32, %v13401_v51  ;;  %v13402_v28 = vld [vmem:[#allocation121_spill] sm:$0xff]  ;;  %v2862_v30 = vadd.f32 %v2854_v50, %v2846_v11  ;;  %v13405_v13 = vld [vmem:[#allocation126_spill] sm:$0xff] }
 0x31c   :  { %7867 = vmatprep.subr.bf16.mxu1 %v13400_v1  ;;  %v2870_v52 = vmul.f32 %v13402_v28, %v11045_v21  ;;  %v2404_v31 = vadd.f32 %v2396_v12, %v2388_v10  ;;  %v2848_v53 = vmul.f32 %v11033_v20, %v13403_v14  ;;  %v2856_v27 = vmul.f32 %v11038_v32, %v13405_v13  ;;  %v13406_v14 = vld [vmem:[#allocation138_spill] sm:$0xff]  ;;  %v13407_v51 = vld [vmem:[#allocation153_spill] sm:$0xff] }
 0x31d   :  { %7203 = vmatmul.mubr.msk.f32.gmra.mrb[12].mxu1 %vm1013_vm14, %v2403_v19  ;;  %v4532_v24 = vmul.f32 %v11327_v36, %v4520_v61  ;;  %v2871_v50 = vmul.f32 %v13406_v14, %v11045_v21  ;;  %v2405_v10 = vadd.f32 %v2397_v58, %v2389_v15  ;;  %v13408_v61 = vld [vmem:[#allocation130_spill] sm:$0xff]  ;;  %v13410_v58 = vld [vmem:[#allocation132_spill] sm:$0xff] }
 0x31e   :  { %v4560_v5 = vpop.permute.xlu1 %4559  ;;  %7205 = vmatprep.mubr.msk.f32.mxu1 %vm1013_vm14, %v2404_v31  ;;  %v2878_v28 = vadd.f32 %v2870_v52, %v2862_v30  ;;  %v13409_v31 = vld [vmem:[#allocation128_spill] sm:$0xff]  ;;  %v2850_v15 = vmul.f32 %v11033_v20, %v13410_v58  ;;  %v13411_v14 = vld [vmem:[#allocation134_spill] sm:$0xff] }
 0x31f   :  { %v4784_v7 = vmul.f32 %v11038_v32, %v4560_v5  ;;  %7869 = vmatpush3.bf16.msra.mxu1 %v13400_v1  ;;  %v4572_v12 = vmul.f32 %v11334_v35, %v4560_v5  ;;  %v4533_v1 = vmul.f32 %v11327_v36, %v11106_v37  ;;  %v2872_v5 = vmul.f32 %v13408_v61, %v11045_v21  ;;  %v13412_v36 = vld [vmem:[#allocation141_spill] sm:$0xff]  ;;  %v13418_v58 = vld [vmem:[#allocation142_spill] sm:$0xff] }
 0x320   :  { %7872 = vmatprep.subr.msk.bf16.mxu1 %vm9402_vm7, %v13407_v51  ;;  %v2857_v13 = vmul.f32 %v11038_v32, %v13409_v31  ;;  %v2873_v52 = vmul.f32 %v13412_v36, %v11045_v21 }
 0x321   :  { %v11437_v63 = vadd.f32 %v4784_v7, %v4776_v18  ;;  %v2863_v7 = vadd.f32 %v2855_v59, %v2847_v39  ;;  %7206 = vmatmul.mubr.msk.f32.gmra.mrb[14].mxu1 %vm1013_vm14, %v2405_v10  ;;  %v2864_v39 = vadd.f32 %v2856_v27, %v2848_v53  ;;  %v11465_v59 = vpop.permute.xlu0 %4611  ;;  %v4580_v37 = vadd.f32 %v4572_v12, %v4532_v24  ;;  %v13415_v27 = vld [vmem:[#allocation137_spill] sm:$0xff] }
 0x322   :  { %v4564_v11 = vpop.permute.xlu1 %4563  ;;  %7252 = vmatprep.mubr.msk.f32.mxu1 %vm1013_vm14, %v2878_v28  ;;  %v2865_v24 = vadd.f32 %v2857_v13, %v2849_v60  ;;  %v2876_v13 = vmul.f32 %v13207_v22, %v11045_v21  ;;  %v3334_v22 = vmul.f32 %v11038_v32, %v9967_v4 }
 0x323   :  { %13404 = vst [vmem:[#allocation17_spill] sm:$0xff] %v11437_v63  ;;  %v4573_v18 = vmul.f32 %v11334_v35, %v4564_v11  ;;  %v4785_v19 = vmul.f32 %v11038_v32, %v4564_v11  ;;  %v2858_v63 = vmul.f32 %v11038_v32, %v13411_v14  ;;  %7875 = vmatpush3.bf16.msk.msra.mxu1 %vm9402_vm7, %v13407_v51  ;;  %v13413_v11 = vld [vmem:[#allocation102_spill] sm:$0xff] }
 0x324   :  { %v2879_v30 = vadd.f32 %v2871_v50, %v2863_v7  ;;  %7895 = vmatprep.subr.bf16.mxu1 %v13413_v11  ;;  %v2880_v31 = vadd.f32 %v2872_v5, %v2864_v39  ;;  %v4621_v50 = vmul.f32 %v11465_v59, %v9717_v56  ;;  %v13416_v7 = vld [vmem:[#allocation135_spill] sm:$0xff]  ;;  %v2860_v14 = vmul.f32 %v11038_v32, %v13418_v58  ;;  %v13419_v39 = vld [vmem:[#allocation136_spill] sm:$0xff] }
 0x325   :  { %v11463_v35 = vadd.f32 %v4785_v19, %v4777_v47  ;;  %v4581_v61 = vadd.f32 %v4573_v18, %v4533_v1  ;;  %v13414_v47 = vld [vmem:[#allocation133_spill] sm:$0xff]  ;;  %v2874_v19 = vmul.f32 %v13415_v27, %v11045_v21  ;;  %v2866_v12 = vadd.f32 %v2858_v63, %v2850_v15  ;;  %v13417_v1 = vld [vmem:[#allocation139_spill] sm:$0xff] }
 0x326   :  { %v2851_v53 = vmul.f32 %v11033_v20, %v13414_v47  ;;  %v2859_v18 = vmul.f32 %v11038_v32, %v13416_v7  ;;  %7253 = vmatmul.mubr.msk.f32.vlgmr.msra.gmra.mrb[8].mxu1 %vm1013_vm14, %v2879_v30  ;;  %v2852_v28 = vmul.f32 %v11033_v20, %v13417_v1  ;;  %v2875_v63 = vmul.f32 %v13206_v49, %v11045_v21  ;;  %v13420_v47 = vld [vmem:[#allocation109_spill] sm:$0xff]  ;;  %v13422_v27 = vld [vmem:[#allocation143_spill] sm:$0xff] }
 0x327   :  { %v11474_v10 = vpop.permute.xlu1 %4607  ;;  %7255 = vmatprep.mubr.msk.f32.mxu1 %vm1013_vm14, %v2880_v31  ;;  %7897 = vmatpush3.bf16.msra.mxu1 %v13413_v11  ;;  %v4629_v5 = vadd.f32 %v4621_v50, %v4581_v61  ;;  %v2882_v15 = vadd.f32 %v2874_v19, %v2866_v12  ;;  %v2853_v36 = vmul.f32 %v11033_v20, %v13419_v39  ;;  %v13421_v11 = vld [vmem:[#allocation73_spill] sm:$0xff]  ;;  %v13425_v50 = vld [vmem:[#allocation144_spill] sm:$0xff] }
 0x328   :  { %v4620_v51 = vmul.f32 %v11474_v10, %v9717_v56  ;;  %v2881_v56 = vadd.f32 %v2873_v52, %v2865_v24  ;;  %7899 = vmatprep.subr.bf16.mxu1 %v10417_v25  ;;  %v2867_v30 = vadd.f32 %v2859_v18, %v2851_v53  ;;  %v2868_v49 = vadd.f32 %v2860_v14, %v2852_v28  ;;  %v13424_v12 = vld [vmem:[#allocation125_spill] sm:$0xff]  ;;  %v13426_v18 = vld [vmem:[#allocation146_spill] sm:$0xff] }
 0x329   :  { %v3326_v52 = vmul.f32 %v11033_v20, %v9902_v0  ;;  %v2877_v61 = vmul.f32 %v13421_v11, %v11045_v21  ;;  %v3350_v19 = vmul.f32 %v13422_v27, %v11045_v21  ;;  %v3335_v4 = vmul.f32 %v11038_v32, %v13424_v12  ;;  %v13433_v11 = vld [vmem:[#allocation83_spill] sm:$0xff] }
 0x32a   :  { %v4628_v60 = vadd.f32 %v4620_v51, %v4580_v37  ;;  %v2861_v37 = vmul.f32 %v11038_v32, %v13420_v47  ;;  %7256 = vmatmul.mubr.msk.f32.gmra.mrb[10].mxu1 %vm1013_vm14, %v2881_v56  ;;  %v2883_v53 = vadd.f32 %v2875_v63, %v2867_v30  ;;  %v2884_v31 = vadd.f32 %v2876_v13, %v2868_v49  ;;  %v13423_v51 = vld [vmem:[#allocation80_spill] sm:$0xff]  ;;  %v13427_v63 = vld [vmem:[#allocation147_spill] sm:$0xff]  ;;  %v13431_v49 = vld [vmem:[#allocation154_spill] sm:$0xff] }
 0x32b   :  { %7258 = vmatprep.mubr.msk.f32.mxu1 %vm1013_vm14, %v2882_v15  ;;  %7901 = vmatpush3.bf16.msra.mxu1 %v10417_v25  ;;  %v3327_v0 = vmul.f32 %v11033_v20, %v13423_v51  ;;  %v3342_v25 = vadd.f32 %v3334_v22, %v3326_v52  ;;  %v3328_v7 = vmul.f32 %v11033_v20, %v13425_v50  ;;  %v13432_v22 = vld [vmem:[#allocation155_spill] sm:$0xff]  ;;  %v13436_v51 = vld [vmem:[#allocation157_spill] sm:$0xff]  ;;  %v13438_v50 = vld [vmem:[#allocation72_spill] sm:$0xff] }
 0x32c   :  { %7457 = vmatprep.mubr.msk.f32.mxu0 %vm1013_vm14, %v4628_v60  ;;  %7903 = vmatprep.subr.bf16.mxu1 %v10419_v16  ;;  %v2869_v24 = vadd.f32 %v2861_v37, %v2853_v36  ;;  %v3336_v1 = vmul.f32 %v11038_v32, %v13426_v18  ;;  %v3351_v28 = vmul.f32 %v10329_v45, %v11045_v21  ;;  %v13429_v36 = vld [vmem:[#allocation91_spill] sm:$0xff] }
 0x32d   :  { %7458 = vmatmul.mubr.msk.f32.gmra.mrb[10].mxu0 %vm1013_vm14, %v4629_v5  ;;  %v3352_v14 = vmul.f32 %v10246_v55, %v11045_v21  ;;  %v3358_v60 = vadd.f32 %v3350_v19, %v3342_v25  ;;  %v3329_v56 = vmul.f32 %v11033_v20, %v13427_v63  ;;  %v3343_v5 = vadd.f32 %v3335_v4, %v3327_v0  ;;  %v13437_v12 = vld [vmem:[#allocation151_spill] sm:$0xff] }
 0x32e   :  { %7259 = vmatmul.mubr.msk.f32.gmra.mrb[12].mxu1 %vm1013_vm14, %v2883_v53  ;;  %v2885_v58 = vadd.f32 %v2877_v61, %v2869_v24  ;;  %v3337_v13 = vmul.f32 %v11038_v32, %v10206_v57  ;;  %v3330_v45 = vmul.f32 %v11033_v20, %v10287_v9  ;;  %v3338_v15 = vmul.f32 %v11038_v32, %v10335_v44  ;;  %v13428_v57 = vld [vmem:[#allocation114_spill] sm:$0xff]  ;;  %v13430_v9 = vld [vmem:[#allocation149_spill] sm:$0xff]  ;;  %v13434_v53 = vld [vmem:[#allocation40_spill] sm:$0xff] }
 0x32f   :  { %7261 = vmatprep.mubr.msk.f32.mxu1 %vm1013_vm14, %v2884_v31  ;;  %7905 = vmatpush3.bf16.msra.mxu1 %v10419_v16  ;;  %v3344_v16 = vadd.f32 %v3336_v1, %v3328_v7  ;;  %v3353_v55 = vmul.f32 %v10371_v6, %v11045_v21  ;;  %v3359_v39 = vadd.f32 %v3351_v28, %v3343_v5  ;;  %v13435_v31 = vld [vmem:[#allocation88_spill] sm:$0xff]  ;;  %v13442_v5 = vld [vmem:[#allocation159_spill] sm:$0xff] }
 0x330   :  { %7908 = vmatprep.subr.msk.bf16.mxu1 %vm9402_vm7, %v10504_v26  ;;  %v3354_v30 = vmul.f32 %v13429_v36, %v11045_v21  ;;  %v3331_v37 = vmul.f32 %v11033_v20, %v13430_v9  ;;  %v3345_v44 = vadd.f32 %v3337_v13, %v3329_v56  ;;  %v3339_v52 = vmul.f32 %v11038_v32, %v13431_v49  ;;  %v13439_v1 = vld [vmem:[#allocation160_spill] sm:$0xff]  ;;  %v13443_v13 = vld [vmem:[#allocation167_spill] sm:$0xff] }
 0x331   :  { %v3360_v47 = vadd.f32 %v3352_v14, %v3344_v16  ;;  %v3332_v6 = vmul.f32 %v11033_v20, %v13432_v22  ;;  %v3340_v61 = vmul.f32 %v11038_v32, %v13433_v11  ;;  %v3355_v27 = vmul.f32 %v13434_v53, %v11045_v21  ;;  %v13448_v49 = vld [vmem:[#allocation168_spill] sm:$0xff]  ;;  %v13449_v22 = vld [vmem:[#allocation162_spill] sm:$0xff] }
 0x332   :  { %7262 = vmatmul.mubr.msk.f32.gmra.mrb[14].mxu1 %vm1013_vm14, %v2885_v58  ;;  %v3361_v19 = vadd.f32 %v3353_v55, %v3345_v44  ;;  %v3356_v0 = vmul.f32 %v13436_v51, %v11045_v21  ;;  %v3333_v4 = vmul.f32 %v11033_v20, %v13437_v12  ;;  %v3347_v25 = vadd.f32 %v3339_v52, %v3331_v37  ;;  %v13440_v58 = vld [vmem:[#allocation163_spill] sm:$0xff]  ;;  %v13447_v37 = vld [vmem:[#allocation172_spill] sm:$0xff]  ;;  %v13451_v53 = vld [vmem:[#allocation158_spill] sm:$0xff] }
 0x333   :  { %7911 = vmatpush3.bf16.msk.msra.mxu1 %vm9402_vm7, %v10504_v26  ;;  %7308 = vmatprep.mubr.msk.f32.mxu1 %vm1013_vm14, %v3358_v60  ;;  %v3346_v26 = vadd.f32 %v3338_v15, %v3330_v45  ;;  %v3341_v7 = vmul.f32 %v11038_v32, %v13438_v50  ;;  %v3348_v18 = vadd.f32 %v3340_v61, %v3332_v6  ;;  %v13441_v60 = vld [vmem:[#allocation84_spill] sm:$0xff]  ;;  %v13450_v6 = vld [vmem:[#allocation175_spill] sm:$0xff] }
 0x334   :  { %7931 = vmatprep.subr.bf16.mxu1 %v13428_v57  ;;  %v3810_v28 = vmul.f32 %v11033_v20, %v13439_v1  ;;  %v3818_v14 = vmul.f32 %v11038_v32, %v13440_v58  ;;  %v3357_v63 = vmul.f32 %v13441_v60, %v11045_v21  ;;  %v3363_v56 = vadd.f32 %v3355_v27, %v3347_v25  ;;  %v13444_v15 = vld [vmem:[#allocation156_spill] sm:$0xff]  ;;  %v13458_v60 = vld [vmem:[#allocation161_spill] sm:$0xff] }
 0x335   :  { %v3362_v24 = vadd.f32 %v3354_v30, %v3346_v26  ;;  %v3834_v16 = vmul.f32 %v13443_v13, %v11045_v21  ;;  %v3364_v45 = vadd.f32 %v3356_v0, %v3348_v18  ;;  %v3811_v55 = vmul.f32 %v11033_v20, %v13444_v15  ;;  %v13455_v50 = vld [vmem:[#allocation176_spill] sm:$0xff] }
 0x336   :  { %7309 = vmatmul.mubr.msk.f32.vlgmr.msra.gmra.mrb[8].mxu1 %vm1013_vm14, %v3359_v39  ;;  %v3349_v39 = vadd.f32 %v3341_v7, %v3333_v4  ;;  %v3826_v30 = vadd.f32 %v3818_v14, %v3810_v28  ;;  %v3820_v44 = vmul.f32 %v11038_v32, %v13447_v37  ;;  %v3835_v52 = vmul.f32 %v13448_v49, %v11045_v21  ;;  %v13454_v4 = vld [vmem:[#allocation178_spill] sm:$0xff]  ;;  %v13456_v1 = vld [vmem:[#allocation164_spill] sm:$0xff] }
 0x337   :  { %7311 = vmatprep.mubr.msk.f32.mxu1 %vm1013_vm14, %v3360_v47  ;;  %7933 = vmatpush3.bf16.msra.mxu1 %v13428_v57  ;;  %v13445_v57 = vld [vmem:[#allocation166_spill] sm:$0xff]  ;;  %v3836_v11 = vmul.f32 %v13450_v6, %v11045_v21  ;;  %v3813_v27 = vmul.f32 %v11033_v20, %v13451_v53  ;;  %v3822_v25 = vmul.f32 %v11038_v32, %v13454_v4  ;;  %v13457_v28 = vld [vmem:[#allocation180_spill] sm:$0xff]  ;;  %v13468_v53 = vld [vmem:[#allocation191_spill] sm:$0xff] }
 0x338   :  { %7935 = vmatprep.subr.bf16.mxu1 %v13435_v31  ;;  %v3819_v36 = vmul.f32 %v11038_v32, %v13445_v57  ;;  %v13446_v47 = vld [vmem:[#allocation170_spill] sm:$0xff]  ;;  %v3365_v26 = vadd.f32 %v3357_v63, %v3349_v39  ;;  %v3842_v61 = vadd.f32 %v3834_v16, %v3826_v30  ;;  %v3837_v7 = vmul.f32 %v13455_v50, %v11045_v21  ;;  %v13462_v57 = vld [vmem:[#allocation181_spill] sm:$0xff] }
 0x339   :  { %v3812_v9 = vmul.f32 %v11033_v20, %v13446_v47  ;;  %v3838_v58 = vmul.f32 %v13457_v28, %v11045_v21  ;;  %v3815_v63 = vmul.f32 %v11033_v20, %v13458_v60  ;;  %v13463_v47 = vld [vmem:[#allocation169_spill] sm:$0xff] }
 0x33a   :  { %7312 = vmatmul.mubr.msk.f32.gmra.mrb[10].mxu1 %vm1013_vm14, %v3361_v19  ;;  %v3827_v19 = vadd.f32 %v3819_v36, %v3811_v55  ;;  %v13461_v55 = vld [vmem:[#allocation140_spill] sm:$0xff]  ;;  %v3839_v36 = vmul.f32 %v13462_v57, %v11045_v21 }
 0x33b   :  { %7314 = vmatprep.mubr.msk.f32.mxu1 %vm1013_vm14, %v3362_v24  ;;  %7937 = vmatpush3.bf16.msra.mxu1 %v13435_v31  ;;  %v13452_v31 = vld [vmem:[#allocation174_spill] sm:$0xff]  ;;  %v3828_v0 = vadd.f32 %v3820_v44, %v3812_v9  ;;  %v13453_v24 = vld [vmem:[#allocation177_spill] sm:$0xff]  ;;  %v3824_v39 = vmul.f32 %v11038_v32, %v13461_v55  ;;  %v13465_v44 = vld [vmem:[#allocation187_spill] sm:$0xff] }
 0x33c   :  { %7939 = vmatprep.subr.bf16.mxu1 %v13442_v5  ;;  %v3821_v51 = vmul.f32 %v11038_v32, %v13452_v31  ;;  %v3814_v12 = vmul.f32 %v11033_v20, %v13453_v24  ;;  %v3843_v18 = vadd.f32 %v3835_v52, %v3827_v19  ;;  %v13464_v9 = vld [vmem:[#allocation165_spill] sm:$0xff]  ;;  %v3840_v49 = vmul.f32 %v13465_v44, %v11045_v21  ;;  %v13469_v31 = vld [vmem:[#allocation183_spill] sm:$0xff] }
 0x33d   :  { %v3844_v14 = vadd.f32 %v3836_v11, %v3828_v0  ;;  %v3817_v37 = vmul.f32 %v11033_v20, %v13464_v9  ;;  %v13467_v11 = vld [vmem:[#allocation189_spill] sm:$0xff]  ;;  %v13470_v24 = vld [vmem:[#allocation171_spill] sm:$0xff] }
 0x33e   :  { %7315 = vmatmul.mubr.msk.f32.gmra.mrb[12].mxu1 %vm1013_vm14, %v3363_v56  ;;  %v3829_v56 = vadd.f32 %v3821_v51, %v3813_v27  ;;  %v3830_v16 = vadd.f32 %v3822_v25, %v3814_v12  ;;  %v4298_v27 = vmul.f32 %v11038_v32, %v13468_v53  ;;  %v3841_v51 = vmul.f32 %v13469_v31, %v11045_v21  ;;  %v13471_v12 = vld [vmem:[#allocation186_spill] sm:$0xff]  ;;  %v13472_v25 = vld [vmem:[#allocation193_spill] sm:$0xff] }
 0x33f   :  { %7317 = vmatprep.mubr.msk.f32.mxu1 %vm1013_vm14, %v3364_v45  ;;  %7941 = vmatpush3.bf16.msra.mxu1 %v13442_v5  ;;  %v13459_v5 = vld [vmem:[#allocation179_spill] sm:$0xff]  ;;  %v13460_v45 = vld [vmem:[#allocation182_spill] sm:$0xff]  ;;  %v4291_v4 = vmul.f32 %v11033_v20, %v13471_v12  ;;  %v4314_v50 = vmul.f32 %v13472_v25, %v11045_v21  ;;  %v13481_v9 = vld [vmem:[#allocation173_spill] sm:$0xff] }
 0x340   :  { %7944 = vmatprep.subr.msk.bf16.mxu1 %vm9402_vm7, %v13449_v22  ;;  %v3823_v13 = vmul.f32 %v11038_v32, %v13459_v5  ;;  %v3816_v15 = vmul.f32 %v11033_v20, %v13460_v45  ;;  %v3845_v30 = vadd.f32 %v3837_v7, %v3829_v56  ;;  %v3846_v52 = vadd.f32 %v3838_v58, %v3830_v16  ;;  %v13476_v5 = vld [vmem:[#allocation198_spill] sm:$0xff]  ;;  %v13477_v16 = vld [vmem:[#allocation200_spill] sm:$0xff] }
 0x341   :  { %v4301_v45 = vmul.f32 %v11038_v32, %v13477_v16  ;;  %v8486_v25 = vld [vmem:[%s12538_s1 + $0x3] ss:$0 sm:$0xff] }
 0x342   :  { %7318 = vmatmul.mubr.msk.f32.gmra.mrb[14].mxu1 %vm1013_vm14, %v3365_v26  ;;  %v3831_v26 = vadd.f32 %v3823_v13, %v3815_v63  ;;  %v3832_v19 = vadd.f32 %v3824_v39, %v3816_v15  ;;  %v13475_v63 = vld [vmem:[#allocation196_spill] sm:$0xff]  ;;  %v4300_v13 = vmul.f32 %v11038_v32, %v13476_v5  ;;  %v13478_v15 = vld [vmem:[#allocation203_spill] sm:$0xff]  ;;  %v13479_v39 = vld [vmem:[#allocation194_spill] sm:$0xff] }
 0x343   :  { %7947 = vmatpush3.bf16.msk.msra.mxu1 %vm9402_vm7, %v13449_v22  ;;  %7364 = vmatprep.mubr.msk.f32.mxu1 %vm1013_vm14, %v3842_v61  ;;  %v13466_v22 = vld [vmem:[#allocation185_spill] sm:$0xff]  ;;  %v4290_v61 = vmul.f32 %v11033_v20, %v13467_v11  ;;  %v4292_v56 = vmul.f32 %v11033_v20, %v13475_v63  ;;  %v4294_v55 = vmul.f32 %v11033_v20, %v13478_v15 }
 0x344   :  { %7967 = vmatprep.subr.bf16.mxu1 %v13456_v1  ;;  %v3825_v6 = vmul.f32 %v11038_v32, %v13466_v22  ;;  %v3847_v0 = vadd.f32 %v3839_v36, %v3831_v26  ;;  %v3848_v7 = vadd.f32 %v3840_v49, %v3832_v19  ;;  %v4315_v57 = vmul.f32 %v13479_v39, %v11045_v21  ;;  %v13480_v36 = vld [vmem:[#allocation204_spill] sm:$0xff]  ;;  %v13483_v26 = vld [vmem:[#allocation190_spill] sm:$0xff]  ;;  %v13484_v11 = vld [vmem:[#allocation205_spill] sm:$0xff] }
 0x345   :  { %v4306_v58 = vadd.f32 %v4298_v27, %v4290_v61  ;;  %v4295_v22 = vmul.f32 %v11033_v20, %v13483_v26  ;;  %v4303_v61 = vmul.f32 %v11038_v32, %v13484_v11  ;;  %v13485_v27 = vld [vmem:[#allocation202_spill] sm:$0xff]  ;;  %v4778_v63 = vmul.f32 %v8486_v25, %v11083_v62 }
 0x346   :  { %7365 = vmatmul.mubr.msk.f32.vlgmr.msra.gmra.mrb[8].mxu1 %vm1013_vm14, %v3843_v18  ;;  %v13473_v18 = vld [vmem:[#allocation188_spill] sm:$0xff]  ;;  %v3833_v28 = vadd.f32 %v3825_v6, %v3817_v37  ;;  %v13482_v37 = vld [vmem:[#allocation201_spill] sm:$0xff]  ;;  %v4308_v6 = vadd.f32 %v4300_v13, %v4292_v56  ;;  %v4317_v19 = vmul.f32 %v13485_v27, %v11045_v21  ;;  %v4779_v62 = vmul.f32 %v8486_v25, %v11109_v2 }
 0x347   :  { %7367 = vmatprep.mubr.msk.f32.mxu1 %vm1013_vm14, %v3844_v14  ;;  %7969 = vmatpush3.bf16.msra.mxu1 %v13456_v1  ;;  %v4293_v1 = vmul.f32 %v11033_v20, %v13473_v18  ;;  %v13474_v14 = vld [vmem:[#allocation192_spill] sm:$0xff]  ;;  %v4316_v44 = vmul.f32 %v13482_v37, %v11045_v21  ;;  %v4322_v49 = vadd.f32 %v4314_v50, %v4306_v58  ;;  %v13487_v20 = vld [vmem:[#allocation206_spill] sm:$0xff]  ;;  %v13489_v58 = vld [vmem:[#allocation207_spill] sm:$0xff] }
 0x348   :  { %7971 = vmatprep.subr.bf16.mxu1 %v13463_v47  ;;  %v4299_v60 = vmul.f32 %v11038_v32, %v13474_v14  ;;  %v4318_v12 = vmul.f32 %v13487_v20, %v11045_v21  ;;  %v4304_v50 = vmul.f32 %v8486_v25, %v11021_v46  ;;  %v4311_v18 = vadd.f32 %v4303_v61, %v4295_v22  ;;  %v13490_v14 = vld [vmem:[#allocation2_spill] sm:$0xff]  ;;  %v13491_v46 = vld [vmem:[#allocation195_spill] sm:$0xff] }
 0x349   :  { %v4309_v53 = vadd.f32 %v4301_v45, %v4293_v1  ;;  %v13488_v1 = vld [vmem:[#allocation209_spill] sm:$0xff]  ;;  %v13493_v45 = vld [vmem:[#allocation210_spill] sm:$0xff]  ;;  %v4780_v37 = vmul.f32 %v8486_v25, %v11194_v38  ;;  %v4781_v26 = vmul.f32 %v8486_v25, %v11222_v3  ;;  %v4796_v38 = vmul.f32 %v11251_v42, %v11045_v21 }
 0x34a   :  { %7368 = vmatmul.mubr.msk.f32.gmra.mrb[10].mxu1 %vm1013_vm14, %v3845_v30  ;;  %v4302_v30 = vmul.f32 %v11038_v32, %v13480_v36  ;;  %v8485_v32 = vld [vmem:[%s12538_s1 + $0x2] ss:$0 sm:$0xff]  ;;  %v4795_v61 = vmul.f32 %v11140_v43, %v11045_v21  ;;  %v4783_v42 = vmul.f32 %v8486_v25, %v11338_v23  ;;  %v13498_v43 = vld [vmem:[#allocation4_spill] sm:$0xff]  ;;  %v4800_v23 = vmul.f32 %v11474_v10, %v11045_v21 }
 0x34b   :  { %7370 = vmatprep.mubr.msk.f32.mxu1 %vm1013_vm14, %v3846_v52  ;;  %7973 = vmatpush3.bf16.msra.mxu1 %v13463_v47  ;;  %v3849_v47 = vadd.f32 %v3841_v51, %v3833_v28  ;;  %v4307_v52 = vadd.f32 %v4299_v60, %v4291_v4  ;;  %v4296_v4 = vmul.f32 %v8485_v32, %v11016_v8  ;;  %v13500_v20 = vld [vmem:[#allocation14_spill] sm:$0xff]  ;;  %v13502_v10 = vmov 0.0  }
 0x34c   :  { %7975 = vmatprep.subr.bf16.mxu1 %v13470_v24  ;;  %v4310_v51 = vadd.f32 %v4302_v30, %v4294_v55  ;;  %v4305_v28 = vmul.f32 %v8486_v25, %v13488_v1  ;;  %v4319_v8 = vmul.f32 %v13489_v58, %v11045_v21  ;;  %v4770_v60 = vmul.f32 %v8485_v32, %v13490_v14  ;;  %v13494_v30 = vld [vmem:[#allocation197_spill] sm:$0xff] }
 0x34d   :  { %v4323_v31 = vadd.f32 %v4315_v57, %v4307_v52  ;;  %v4325_v56 = vadd.f32 %v4317_v19, %v4309_v53  ;;  %v4312_v13 = vadd.f32 %v4304_v50, %v4296_v4  ;;  %v4771_v15 = vmul.f32 %v8485_v32, %v13493_v45  ;;  %v13501_v4 = vld [vmem:[#allocation17_spill] sm:$0xff] }
 0x34e   :  { %7371 = vmatmul.mubr.msk.f32.gmra.mrb[12].mxu1 %vm1013_vm14, %v3847_v0  ;;  %v13486_v0 = vld [vmem:[#allocation184_spill] sm:$0xff]  ;;  %v4326_v5 = vadd.f32 %v4318_v12, %v4310_v51  ;;  %v4786_v39 = vadd.f32 %v4778_v63, %v4770_v60  ;;  %v4794_v57 = vmul.f32 %v11138_v34, %v11045_v21  ;;  %v4327_v36 = vadd.f32 %v4319_v8, %v4311_v18  ;;  %v13499_v51 = vld [vmem:[#allocation3_spill] sm:$0xff] }
 0x34f   :  { %7373 = vmatprep.mubr.msk.f32.mxu1 %vm1013_vm14, %v3848_v7  ;;  %7977 = vmatpush3.bf16.msra.mxu1 %v13470_v24  ;;  %v4324_v24 = vadd.f32 %v4316_v44, %v4308_v6  ;;  %v4297_v7 = vmul.f32 %v8485_v32, %v10911_v17  ;;  %v13492_v17 = vld [vmem:[#allocation211_spill] sm:$0xff]  ;;  %v13495_v44 = vld [vmem:[#allocation208_spill] sm:$0xff]  ;;  %v4773_v52 = vmul.f32 %v8485_v32, %v11042_v33 }
 0x350   :  { %7980 = vmatprep.subr.msk.bf16.mxu1 %vm9402_vm7, %v13481_v9  ;;  %v4320_v16 = vmul.f32 %v13492_v17, %v11045_v21  ;;  %v4787_v2 = vadd.f32 %v4779_v62, %v4771_v15  ;;  %v4802_v34 = vadd.f32 %v4794_v57, %v4786_v39  ;;  %v13496_v6 = vld [vmem:[#allocation199_spill] sm:$0xff]  ;;  %v4774_v11 = vmul.f32 %v8485_v32, %v11283_v29 }
 0x351   :  { %v4313_v55 = vadd.f32 %v4305_v28, %v4297_v7  ;;  %v4782_v33 = vmul.f32 %v8486_v25, %v11306_v48  ;;  %v4775_v3 = vmul.f32 %v8485_v32, %v11077_v54  ;;  %v4789_v27 = vadd.f32 %v4781_v26, %v4773_v52 }
 0x352   :  { %7374 = vmatmul.mubr.msk.f32.gmra.mrb[14].mxu1 %vm1013_vm14, %v3849_v47  ;;  %v4328_v47 = vadd.f32 %v4320_v16, %v4312_v13  ;;  %v4803_v53 = vadd.f32 %v4795_v61, %v4787_v2  ;;  %v13497_v29 = vmov 0.0|0.0   ;;  %v4799_v12 = vmul.f32 %v13500_v20, %v11045_v21 }
 0x353   :  { %7983 = vmatpush3.bf16.msk.msra.mxu1 %vm9402_vm7, %v13481_v9  ;;  %7420 = vmatprep.mubr.msk.f32.mxu1 %vm1013_vm14, %v4322_v49  ;;  %v4772_v9 = vmul.f32 %v8485_v32, %v11168_v41  ;;  %v4321_v49 = vmul.f32 %v13495_v44, %v11045_v21  ;;  %v4790_v19 = vadd.f32 %v4782_v33, %v4774_v11 }
 0x354   :  { %8003 = vmatprep.subr.bf16.mxu1 %v13486_v0  ;;  %v4791_v40 = vadd.f32 %v4783_v42, %v4775_v3  ;;  %v4808_v25 = vadd.f32 %v4800_v23, %v13501_v4  ;;  %v4801_v50 = vmul.f32 %v11465_v59, %v11045_v21 }
 0x355   :  { %v4329_v22 = vadd.f32 %v4321_v49, %v4313_v55  ;;  %v4788_v41 = vadd.f32 %v4780_v37, %v4772_v9 }
 0x356   :  { %7421 = vmatmul.mubr.msk.f32.vlgmr.msra.gmra.mrb[8].mxu1 %vm1013_vm14, %v4323_v31  ;;  %v4798_v31 = vmul.f32 %v13498_v43, %v11045_v21  ;;  %v4807_v32 = vadd.f32 %v4799_v12, %v4791_v40  ;;  %v4809_v7 = vadd.f32 %v4801_v50, %v11463_v35 }
 0x357   :  { %7423 = vmatprep.mubr.msk.f32.mxu1 %vm1013_vm14, %v4324_v24  ;;  %8005 = vmatpush3.bf16.msra.mxu1 %v13486_v0  ;;  %v4804_v48 = vadd.f32 %v4796_v38, %v4788_v41  ;;  %v4797_v0 = vmul.f32 %v13499_v51, %v11045_v21 }
 0x358   :  { %8007 = vmatprep.subr.bf16.mxu1 %v13491_v46  ;;  %v4806_v24 = vadd.f32 %v4798_v31, %v4790_v19 }
 0x359   :  { %v4805_v54 = vadd.f32 %v4797_v0, %v4789_v27 }
 0x35a   :  { %7424 = vmatmul.mubr.msk.f32.gmra.mrb[10].mxu1 %vm1013_vm14, %v4325_v56 }
 0x35b   :  { %7426 = vmatprep.mubr.msk.f32.mxu1 %vm1013_vm14, %v4326_v5  ;;  %8009 = vmatpush3.bf16.msra.mxu1 %v13491_v46 }
 0x35c   :  { %8011 = vmatprep.subr.bf16.mxu1 %v13494_v30 }
 0x35e   :  { %7427 = vmatmul.mubr.msk.f32.gmra.mrb[12].mxu1 %vm1013_vm14, %v4327_v36 }
 0x35f   :  { %7429 = vmatprep.mubr.msk.f32.mxu1 %vm1013_vm14, %v4328_v47  ;;  %8013 = vmatpush3.bf16.msra.mxu1 %v13494_v30 }
 0x360   :  { %8016 = vmatprep.subr.msk.bf16.mxu1 %vm9402_vm7, %v13496_v6 }
 0x362   :  { %7430 = vmatmul.mubr.msk.f32.gmra.mrb[14].mxu1 %vm1013_vm14, %v4329_v22  ;;  %v11767_v18 = vpop.permute.xlu1 %4948 }
 0x363   :  { %8019 = vmatpush3.bf16.msk.msra.mxu1 %vm9402_vm7, %v13496_v6  ;;  %7476 = vmatprep.mubr.msk.f32.mxu1 %vm1013_vm14, %v4802_v34 }
 0x364   :  { %8036 = vmatprep.subr.bf16.mxu1 %v13497_v29 }
 0x366   :  { %7477 = vmatmul.mubr.msk.f32.vlgmr.msra.gmra.mrb[8].mxu1 %vm1013_vm14, %v4803_v53  ;;  %v11769_v1 = vpop.permute.xlu1 %4952 }
 0x367   :  { %7479 = vmatprep.mubr.msk.f32.mxu1 %vm1013_vm14, %v4804_v48 }
 0x36a   :  { %7480 = vmatmul.mubr.msk.f32.gmra.mrb[10].mxu1 %vm1013_vm14, %v4805_v54  ;;  %v4961_v46 = vpop.permute.xlu1 %4960 }
 0x36b   :  { %7482 = vmatprep.mubr.msk.f32.mxu1 %vm1013_vm14, %v4806_v24 }
 0x36e   :  { %7483 = vmatmul.mubr.msk.f32.gmra.mrb[12].mxu1 %vm1013_vm14, %v4807_v32 }
 0x36f   :  { %7485 = vmatprep.mubr.msk.f32.mxu1 %vm1013_vm14, %v4808_v25  ;;  %v4965_v47 = vpop.permute.xlu1 %4964 }
 0x372   :  { %7486 = vmatmul.mubr.msk.f32.gmra.mrb[14].mxu1 %vm1013_vm14, %v4809_v7 }
 0x373   :  { %7532 = vmatprep.mubr.msk.f32.mxu1 %vm8500_vm0, %v13502_v10  ;;  %v4957_v5 = vpop.permute.xlu0 %4956 }
 0x377   :  { %v4969_v30 = vpop.permute.xlu0 %4968 }
 0x379   :  { %v4973_v11 = vpop.permute.xlu1 %4972 }
 0x37b   :  { %v4977_v41 = vpop.permute.xlu0 %4976 }
 0x3c7   :  { %v7450_v28 = vpop.f32.mrb[4].mxu0 }
 0x3c8   :  { %v11772_v58 = vadd.f32 %v7450_v28, %v11769_v1  ;;  %v4723_v21 = vpop.f32.mrb[5].mxu0 }
 0x3c9   :  { %v11775_v59 = vadd.f32 %v11767_v18, %v4723_v21 }
 0x3ca   :  { %v4998_v35 = vsel %vm1013_vm14, %v11772_v58, 0.0  ;;  %v5028_v60 = vmul.f32 %v11772_v58, %v11772_v58 }
 0x3cb   :  { %4999 = vadd.xlane.f32.xlu0 %v4998_v35  ;;  %v4995_v8 = vsel %vm1013_vm14, %v11775_v59, 0.0  ;;  %v5027_v14 = vmul.f32 %v11775_v59, %v11775_v59 }
 0x3cc   :  { %4996 = vadd.xlane.f32.xlu1 %v4995_v8  ;;  %v5038_v56 = vsel %vm1013_vm14, %v5028_v60, 0.0 }
 0x3cd   :  { %v5035_v63 = vsel %vm1013_vm14, %v5027_v14, 0.0 }
 0x3cf   :  { %5036 = vadd.xlane.f32.xlu0 %v5035_v63 }
 0x3d0   :  { %5039 = vadd.xlane.f32.xlu1 %v5038_v56 }
 0x3da   :  { %v7453_v13 = vpop.f32.mrb[6].mxu0 }
 0x3db   :  { %v11787_v17 = vadd.f32 %v7453_v13, %v4961_v46  ;;  %v4733_v16 = vpop.f32.mrb[7].mxu0 }
 0x3dc   :  { %v11789_v45 = vadd.f32 %v4957_v5, %v4733_v16 }
 0x3dd   :  { %v5004_v15 = vsel %vm1013_vm14, %v11787_v17, 0.0  ;;  %v5030_v55 = vmul.f32 %v11787_v17, %v11787_v17 }
 0x3de   :  { %5005 = vadd.xlane.f32.xlu1 %v5004_v15  ;;  %v5001_v39 = vsel %vm1013_vm14, %v11789_v45, 0.0  ;;  %v5029_v62 = vmul.f32 %v11789_v45, %v11789_v45 }
 0x3df   :  { %5002 = vadd.xlane.f32.xlu0 %v5001_v39  ;;  %v5044_v57 = vsel %vm1013_vm14, %v5030_v55, 0.0 }
 0x3e0   :  { %v5041_v36 = vsel %vm1013_vm14, %v5029_v62, 0.0 }
 0x3e2   :  { %5045 = vadd.xlane.f32.xlu1 %v5044_v57 }
 0x3e3   :  { %5042 = vadd.xlane.f32.xlu0 %v5041_v36 }
 0x3ed   :  { %v7456_v9 = vpop.f32.mrb[8].mxu0 }
 0x3ee   :  { %v11801_v37 = vadd.f32 %v7456_v9, %v4969_v30  ;;  %v4743_v44 = vpop.f32.mrb[9].mxu0 }
 0x3ef   :  { %v11803_v49 = vadd.f32 %v4965_v47, %v4743_v44 }
 0x3f0   :  { %v5010_v52 = vsel %vm1013_vm14, %v11801_v37, 0.0  ;;  %v5032_v2 = vmul.f32 %v11801_v37, %v11801_v37 }
 0x3f1   :  { %5011 = vadd.xlane.f32.xlu1 %v5010_v52  ;;  %v5007_v34 = vsel %vm1013_vm14, %v11803_v49, 0.0  ;;  %v5031_v26 = vmul.f32 %v11803_v49, %v11803_v49 }
 0x3f2   :  { %5008 = vadd.xlane.f32.xlu0 %v5007_v34  ;;  %v5050_v22 = vsel %vm1013_vm14, %v5032_v2, 0.0  ;;  %v8529_v34 = vmov 92  }
 0x3f3   :  { %v5047_v6 = vsel %vm1013_vm14, %v5031_v26, 0.0  ;;  %8373 = vset.pattern.permute.xlu0 %v8529_v34  ;;  %8372 = vset.pattern.permute.xlu1 %v8529_v34 }
 0x3f5   :  { %5051 = vadd.xlane.f32.xlu1 %v5050_v22 }
 0x3f6   :  { %5048 = vadd.xlane.f32.xlu0 %v5047_v6 }
 0x400   :  { %v7459_v38 = vpop.f32.mrb[10].mxu0 }
 0x401   :  { %v11815_v33 = vadd.f32 %v7459_v38, %v4977_v41  ;;  %v4753_v61 = vpop.f32.mrb[11].mxu0 }
 0x402   :  { %v11817_v3 = vadd.f32 %v4973_v11, %v4753_v61 }
 0x403   :  { %v5016_v53 = vsel %vm1013_vm14, %v11815_v33, 0.0  ;;  %v5034_v27 = vmul.f32 %v11815_v33, %v11815_v33 }
 0x404   :  { %5017 = vadd.xlane.f32.xlu1 %v5016_v53  ;;  %v5013_v42 = vsel %vm1013_vm14, %v11817_v3, 0.0  ;;  %v5033_v48 = vmul.f32 %v11817_v3, %v11817_v3 }
 0x405   :  { %5014 = vadd.xlane.f32.xlu0 %v5013_v42  ;;  %v5056_v19 = vsel %vm1013_vm14, %v5034_v27, 0.0 }
 0x406   :  { %v5053_v43 = vsel %vm1013_vm14, %v5033_v48, 0.0 }
 0x408   :  { %5057 = vadd.xlane.f32.xlu1 %v5056_v19 }
 0x409   :  { %5054 = vadd.xlane.f32.xlu0 %v5053_v43 }
 0x439   :  { %v7478_v31 = vpop.f32.mrb[8].mxu1 }
 0x43a   :  { %v11830_v51 = vadd.f32 %v7478_v31, %v11769_v1  ;;  %v4900_v0 = vpop.f32.mrb[9].mxu1 }
 0x43b   :  { %v11833_v40 = vadd.f32 %v11767_v18, %v4900_v0 }
 0x43c   :  { %v5070_v54 = vsel %vm1013_vm14, %v11830_v51, 0.0  ;;  %v5100_v24 = vmul.f32 %v11830_v51, %v11830_v51 }
 0x43d   :  { %5071 = vadd.xlane.f32.xlu1 %v5070_v54  ;;  %v7481_v23 = vpop.f32.mrb[10].mxu1  ;;  %v5067_v20 = vsel %vm1013_vm14, %v11833_v40, 0.0  ;;  %v5099_v12 = vmul.f32 %v11833_v40, %v11833_v40 }
 0x43e   :  { %5068 = vadd.xlane.f32.xlu0 %v5067_v20  ;;  %v4910_v32 = vpop.f32.mrb[11].mxu1  ;;  %v11843_v4 = vadd.f32 %v7481_v23, %v4961_v46  ;;  %v5110_v25 = vsel %vm1013_vm14, %v5100_v24, 0.0 }
 0x43f   :  { %v11846_v50 = vadd.f32 %v4957_v5, %v4910_v32  ;;  %v5107_v18 = vsel %vm1013_vm14, %v5099_v12, 0.0 }
 0x440   :  { %v5076_v28 = vsel %vm1013_vm14, %v11843_v4, 0.0  ;;  %v5102_v21 = vmul.f32 %v11843_v4, %v11843_v4 }
 0x441   :  { %5111 = vadd.xlane.f32.xlu1 %v5110_v25  ;;  %v7484_v7 = vpop.f32.mrb[12].mxu1  ;;  %v5073_v8 = vsel %vm1013_vm14, %v11846_v50, 0.0  ;;  %v5101_v14 = vmul.f32 %v11846_v50, %v11846_v50 }
 0x442   :  { %5108 = vadd.xlane.f32.xlu0 %v5107_v18  ;;  %v4920_v1 = vpop.f32.mrb[13].mxu1  ;;  %v11857_v63 = vadd.f32 %v7484_v7, %v4969_v30  ;;  %v5116_v56 = vsel %vm1013_vm14, %v5102_v21, 0.0 }
 0x443   :  { %v11860_v46 = vadd.f32 %v4965_v47, %v4920_v1  ;;  %v5113_v5 = vsel %vm1013_vm14, %v5101_v14, 0.0 }
 0x444   :  { %v5082_v13 = vsel %vm1013_vm14, %v11857_v63, 0.0  ;;  %v5104_v16 = vmul.f32 %v11857_v63, %v11857_v63 }
 0x445   :  { %5077 = vadd.xlane.f32.xlu1 %v5076_v28  ;;  %v7487_v35 = vpop.f32.mrb[14].mxu1  ;;  %v5079_v15 = vsel %vm1013_vm14, %v11860_v46, 0.0  ;;  %v5103_v55 = vmul.f32 %v11860_v46, %v11860_v46 }
 0x446   :  { %5074 = vadd.xlane.f32.xlu0 %v5073_v8  ;;  %v4930_v60 = vpop.f32.mrb[15].mxu1  ;;  %v11871_v39 = vadd.f32 %v7487_v35, %v4977_v41  ;;  %v5122_v62 = vsel %vm1013_vm14, %v5104_v16, 0.0 }
 0x447   :  { %v11874_v57 = vadd.f32 %v4973_v11, %v4930_v60  ;;  %v5119_v36 = vsel %vm1013_vm14, %v5103_v55, 0.0 }
 0x448   :  { %v5088_v30 = vsel %vm1013_vm14, %v11871_v39, 0.0  ;;  %v5106_v47 = vmul.f32 %v11871_v39, %v11871_v39 }
 0x449   :  { %5117 = vadd.xlane.f32.xlu1 %v5116_v56  ;;  %v5085_v9 = vsel %vm1013_vm14, %v11874_v57, 0.0  ;;  %v5105_v44 = vmul.f32 %v11874_v57, %v11874_v57 }
 0x44a   :  { %5114 = vadd.xlane.f32.xlu0 %v5113_v5  ;;  %v5128_v52 = vsel %vm1013_vm14, %v5106_v47, 0.0 }
 0x44b   :  { %v5125_v2 = vsel %vm1013_vm14, %v5105_v44, 0.0 }
 0x44d   :  { %5083 = vadd.xlane.f32.xlu1 %v5082_v13 }
 0x44e   :  { %5080 = vadd.xlane.f32.xlu0 %v5079_v15 }
 0x451   :  { %5123 = vadd.xlane.f32.xlu1 %v5122_v62 }
 0x452   :  { %5120 = vadd.xlane.f32.xlu0 %v5119_v36 }
 0x455   :  { %5089 = vadd.xlane.f32.xlu1 %v5088_v30 }
 0x456   :  { %5086 = vadd.xlane.f32.xlu0 %v5085_v9 }
 0x458   :  { %v5000_v22 = vpop.xlane.xlu0 %4999 }
 0x459   :  { %5129 = vadd.xlane.f32.xlu1 %v5128_v52  ;;  %v4997_v26 = vpop.xlane.xlu1 %4996 }
 0x45a   :  { %5126 = vadd.xlane.f32.xlu0 %v5125_v2 }
 0x45c   :  { %v5037_v41 = vpop.xlane.xlu0 %5036 }
 0x45d   :  { %v5040_v6 = vpop.xlane.xlu1 %5039 }
 0x46b   :  { %v5006_v38 = vpop.xlane.xlu1 %5005 }
 0x46c   :  { %v5003_v11 = vpop.xlane.xlu0 %5002 }
 0x46f   :  { %v5046_v61 = vpop.xlane.xlu1 %5045 }
 0x470   :  { %v5043_v53 = vpop.xlane.xlu0 %5042 }
 0x47e   :  { %v5012_v27 = vpop.xlane.xlu1 %5011 }
 0x47f   :  { %v5009_v42 = vpop.xlane.xlu0 %5008 }
 0x482   :  { %v5052_v48 = vpop.xlane.xlu1 %5051 }
 0x483   :  { %v5049_v19 = vpop.xlane.xlu0 %5048 }
 0x491   :  { %v11889_v43 = vpop.xlane.xlu1 %5017 }
 0x492   :  { %v11891_v31 = vpop.xlane.xlu0 %5014 }
 0x495   :  { %v11893_v0 = vpop.xlane.xlu1 %5057 }
 0x496   :  { %v11895_v54 = vpop.xlane.xlu0 %5054 }
 0x4ca   :  { %v5072_v24 = vpop.xlane.xlu1 %5071 }
 0x4cb   :  { %v5092_v23 = vadd.f32 %v5072_v24, %v5000_v22  ;;  %v5069_v20 = vpop.xlane.xlu0 %5068 }
 0x4cc   :  { %v5091_v12 = vadd.f32 %v5069_v20, %v4997_v26 }
 0x4cd   :  { %v11897_v32 = vmul.f32 0.007936508, %v5092_v23 }
 0x4ce   :  { %v11899_v25 = vmul.f32 0.007936508, %v5091_v12  ;;  %v5112_v7 = vpop.xlane.xlu1 %5111 }
 0x4cf   :  { %v5132_v18 = vadd.f32 %v5112_v7, %v5040_v6  ;;  %v5109_v1 = vpop.xlane.xlu0 %5108  ;;  %v5156_v21 = vmul.f32 %v11897_v32, %v11897_v32 }
 0x4d0   :  { %v5131_v28 = vadd.f32 %v5109_v1, %v5037_v41  ;;  %v5155_v8 = vmul.f32 %v11899_v25, %v11899_v25 }
 0x4d1   :  { %v5148_v35 = vmul.f32 0.007936508, %v5132_v18 }
 0x4d2   :  { %v5147_v14 = vmul.f32 0.007936508, %v5131_v28  ;;  %v5078_v60 = vpop.xlane.xlu1 %5077 }
 0x4d3   :  { %v5164_v56 = vsub.f32 %v5148_v35, %v5156_v21  ;;  %v5094_v5 = vadd.f32 %v5078_v60, %v5006_v38  ;;  %v5075_v13 = vpop.xlane.xlu0 %5074 }
 0x4d4   :  { %v5163_v16 = vsub.f32 %v5147_v14, %v5155_v8  ;;  %v5093_v15 = vadd.f32 %v5075_v13, %v5003_v11 }
 0x4d5   :  { %v5172_v55 = vmax.f32 %v5164_v56, 0.0  ;;  %v11905_v62 = vmul.f32 0.007936508, %v5094_v5 }
 0x4d6   :  { %v5171_v36 = vmax.f32 %v5163_v16, 0.0  ;;  %v11907_v30 = vmul.f32 0.007936508, %v5093_v15  ;;  %v5118_v47 = vpop.xlane.xlu1 %5117 }
 0x4d7   :  { %v5180_v9 = vadd.f32 1e-05, %v5172_v55  ;;  %v5134_v44 = vadd.f32 %v5118_v47, %v5046_v61  ;;  %v5115_v52 = vpop.xlane.xlu0 %5114  ;;  %v5158_v22 = vmul.f32 %v11905_v62, %v11905_v62 }
 0x4d8   :  { %v5179_v2 = vadd.f32 1e-05, %v5171_v36  ;;  %v5133_v26 = vadd.f32 %v5115_v52, %v5043_v53  ;;  %v5157_v41 = vmul.f32 %v11907_v30, %v11907_v30 }
 0x4d9   :  { %8383 = vrsqrt.f32 %v5180_v9  ;;  %v5150_v6 = vmul.f32 0.007936508, %v5134_v44  ;;  %v11926_v9 = vld [vmem:[%s12533_s5 + $0x8] sm:$0xff] }
 0x4da   :  { %8385 = vrsqrt.f32 %v5179_v2  ;;  %v5149_v38 = vmul.f32 0.007936508, %v5133_v26  ;;  %v5084_v11 = vpop.xlane.xlu1 %5083  ;;  %v11932_v26 = vld [vmem:[%s12533_s5] sm:$0xff] }
 0x4db   :  { %v5166_v24 = vsub.f32 %v5150_v6, %v5158_v22  ;;  %v5096_v23 = vadd.f32 %v5084_v11, %v5012_v27  ;;  %v5081_v20 = vpop.xlane.xlu0 %5080 }
 0x4dc   :  { %v5165_v12 = vsub.f32 %v5149_v38, %v5157_v41  ;;  %v5095_v7 = vadd.f32 %v5081_v20, %v5009_v42 }
 0x4dd   :  { %v5174_v61 = vmax.f32 %v5166_v24, 0.0  ;;  %v11913_v18 = vmul.f32 0.007936508, %v5096_v23 }
 0x4de   :  { %v5173_v53 = vmax.f32 %v5165_v12, 0.0  ;;  %v11915_v1 = vmul.f32 0.007936508, %v5095_v7  ;;  %v5124_v28 = vpop.xlane.xlu1 %5123 }
 0x4df   :  { %v5182_v21 = vadd.f32 1e-05, %v5174_v61  ;;  %v5136_v35 = vadd.f32 %v5124_v28, %v5052_v48  ;;  %v5121_v8 = vpop.xlane.xlu0 %5120  ;;  %v5160_v56 = vmul.f32 %v11913_v18, %v11913_v18 }
 0x4e0   :  { %v5181_v14 = vadd.f32 1e-05, %v5173_v53  ;;  %v5135_v60 = vadd.f32 %v5121_v8, %v5049_v19  ;;  %v5159_v42 = vmul.f32 %v11915_v1, %v11915_v1 }
 0x4e1   :  { %8387 = vrsqrt.f32 %v5182_v21  ;;  %v5152_v27 = vmul.f32 0.007936508, %v5136_v35 }
 0x4e2   :  { %8389 = vrsqrt.f32 %v5181_v14  ;;  %v5151_v5 = vmul.f32 0.007936508, %v5135_v60  ;;  %v5090_v13 = vpop.xlane.xlu1 %5089  ;;  %v11950_v14 = vld [vmem:[%s12533_s5 + $0x10] sm:$0xff] }
 0x4e3   :  { %v8384_v16 = vpop.eup %8383  ;;  %v5168_v15 = vsub.f32 %v5152_v27, %v5160_v56  ;;  %v5098_v55 = vadd.f32 %v5090_v13, %v11889_v43  ;;  %v5087_v36 = vpop.xlane.xlu0 %5086 }
 0x4e4   :  { %v8386_v48 = vpop.eup %8385  ;;  %v5167_v47 = vsub.f32 %v5151_v5, %v5159_v42  ;;  %v5097_v19 = vadd.f32 %v5087_v36, %v11891_v31  ;;  %v5196_v44 = vmul.f32 %v11926_v9, %v8384_v16 }
 0x4e5   :  { %v5176_v52 = vmax.f32 %v5168_v15, 0.0  ;;  %v5146_v2 = vmul.f32 0.007936508, %v5098_v55  ;;  %v5195_v43 = vmul.f32 %v11932_v26, %v8386_v48  ;;  %v8491_v55 = vld [vmem:[%s12533_s5 + $0x28] sm:$0xff] }
 0x4e6   :  { %v5175_v22 = vmax.f32 %v5167_v47, 0.0  ;;  %v5145_v6 = vmul.f32 0.007936508, %v5097_v19  ;;  %v5130_v41 = vpop.xlane.xlu1 %5129  ;;  %v5204_v31 = vmul.f32 %v5196_v44, %v11897_v32 }
 0x4e7   :  { %v5184_v38 = vadd.f32 1e-05, %v5176_v52  ;;  %v5138_v11 = vadd.f32 %v5130_v41, %v11893_v0  ;;  %v5127_v24 = vpop.xlane.xlu0 %5126  ;;  %v5203_v23 = vmul.f32 %v5195_v43, %v11899_v25  ;;  %v5162_v7 = vmul.f32 %v5146_v2, %v5146_v2  ;;  %v11944_v25 = vld [vmem:[%s12533_s5 + $0x18] sm:$0xff] }
 0x4e8   :  { %v5183_v20 = vadd.f32 1e-05, %v5175_v22  ;;  %v5137_v12 = vadd.f32 %v5127_v24, %v11895_v54  ;;  %5221 = vrot.lane.b32.xlu1 %v5204_v31, %s8530_s8  ;;  %v5161_v53 = vmul.f32 %v5145_v6, %v5145_v6  ;;  %v8493_v22 = vld [vmem:[%s12533_s5 + $0x38] sm:$0xff]  ;;  %v11976_v31 = vld [vmem:[%s12533_s5 + $0x30] sm:$0xff] }
 0x4e9   :  { %8391 = vrsqrt.f32 %v5184_v38  ;;  %v5154_v61 = vmul.f32 0.007936508, %v5138_v11  ;;  %5219 = vrot.lane.b32.xlu0 %v5203_v23, %s8530_s8  ;;  %v8531_v11 = vmov 93  }
 0x4ea   :  { %8393 = vrsqrt.f32 %v5183_v20  ;;  %v5153_v32 = vmul.f32 0.007936508, %v5137_v12 }
 0x4eb   :  { %v8388_v28 = vpop.eup %8387  ;;  %v5170_v21 = vsub.f32 %v5154_v61, %v5162_v7 }
 0x4ec   :  { %v8390_v0 = vpop.eup %8389  ;;  %v5169_v35 = vsub.f32 %v5153_v32, %v5161_v53  ;;  %v5198_v54 = vmul.f32 %v11944_v25, %v8388_v28 }
 0x4ed   :  { %v5178_v8 = vmax.f32 %v5170_v21, 0.0  ;;  %v5197_v60 = vmul.f32 %v11950_v14, %v8390_v0 }
 0x4ee   :  { %v5177_v56 = vmax.f32 %v5169_v35, 0.0  ;;  %v5206_v27 = vmul.f32 %v5198_v54, %v11905_v62  ;;  %v11963_v62 = vld [vmem:[%s12533_s5 + $0x20] sm:$0xff] }
 0x4ef   :  { %v5186_v42 = vadd.f32 1e-05, %v5178_v8  ;;  %v5205_v5 = vmul.f32 %v5197_v60, %v11907_v30 }
 0x4f0   :  { %v5185_v13 = vadd.f32 1e-05, %v5177_v56  ;;  %5225 = vrot.lane.b32.xlu0 %v5206_v27, %s8530_s8 }
 0x4f1   :  { %8395 = vrsqrt.f32 %v5186_v42  ;;  %5223 = vrot.lane.b32.xlu1 %v5205_v5, %s8530_s8 }
 0x4f2   :  { %8397 = vrsqrt.f32 %v5185_v13 }
 0x4f3   :  { %v8392_v16 = vpop.eup %8391 }
 0x4f4   :  { %v8394_v15 = vpop.eup %8393  ;;  %v5200_v36 = vmul.f32 %v8491_v55, %v8392_v16 }
 0x4f5   :  { %v5199_v30 = vmul.f32 %v11963_v62, %v8394_v15 }
 0x4f6   :  { %v5208_v48 = vmul.f32 %v5200_v36, %v11913_v18 }
 0x4f7   :  { %v5207_v47 = vmul.f32 %v5199_v30, %v11915_v1 }
 0x4f8   :  { %5229 = vrot.lane.b32.xlu0 %v5208_v48, %s8530_s8 }
 0x4f9   :  { %5227 = vrot.lane.b32.xlu1 %v5207_v47, %s8530_s8 }
 0x4fb   :  { %v8396_v19 = vpop.eup %8395 }
 0x4fc   :  { %v8398_v52 = vpop.eup %8397  ;;  %v5202_v41 = vmul.f32 %v8493_v22, %v8396_v19 }
 0x4fd   :  { %v5201_v18 = vmul.f32 %v11976_v31, %v8398_v52 }
 0x4fe   :  { %v5210_v38 = vmul.f32 %v5202_v41, %v5146_v2 }
 0x4ff   :  { %v5209_v1 = vmul.f32 %v5201_v18, %v5145_v6 }
 0x500   :  { %5233 = vrot.lane.b32.xlu0 %v5210_v38, %s8530_s8 }
 0x501   :  { %5231 = vrot.lane.b32.xlu1 %v5209_v1, %s8530_s8 }
 0x504   :  { %5258 = vperm.xlu0 %8373, %v5196_v44  }
 0x505   :  { %5253 = vperm.xlu1 %8372, %v5195_v43  }
 0x508   :  { %5263 = vperm.xlu0 %8373, %v5197_v60  }
 0x509   :  { %5268 = vperm.xlu1 %8372, %v5198_v54  }
 0x50c   :  { %5278 = vperm.xlu0 %8373, %v5200_v36  }
 0x50d   :  { %5273 = vperm.xlu1 %8372, %v5199_v30  }
 0x510   :  { %8375 = vset.pattern.permute.xlu0 %v8531_v11 }
 0x511   :  { %8374 = vset.pattern.permute.xlu1 %v8531_v11 }
 0x55a   :  { %v5222_v24 = vpop.permute.xlu1 %5221 }
 0x55b   :  { %v5244_v23 = vsub.f32 %v11926_v9, %v5222_v24  ;;  %v5220_v20 = vpop.permute.xlu0 %5219 }
 0x55c   :  { %v5243_v2 = vsub.f32 %v11932_v26, %v5220_v20 }
 0x55d   :  { %5306 = vperm.xlu1 %8374, %v5244_v23  }
 0x561   :  { %5301 = vperm.xlu1 %8374, %v5243_v2  }
 0x562   :  { %v5226_v6 = vpop.permute.xlu0 %5225 }
 0x563   :  { %v5246_v12 = vsub.f32 %v11944_v25, %v5226_v6  ;;  %v5224_v44 = vpop.permute.xlu1 %5223 }
 0x564   :  { %v5245_v43 = vsub.f32 %v11950_v14, %v5224_v44 }
 0x565   :  { %5316 = vperm.xlu1 %8374, %v5246_v12  }
 0x566   :  { %5311 = vperm.xlu0 %8375, %v5245_v43  }
 0x569   :  { %8377 = vset.pattern.permute.xlu1 %v8529_v34 }
 0x56a   :  { %8376 = vset.pattern.permute.xlu0 %v8529_v34  ;;  %5288 = vperm.xlu1 %8377, %v5202_v41   ;;  %v5230_v7 = vpop.permute.xlu0 %5229 }
 0x56b   :  { %5283 = vperm.xlu0 %8376, %v5201_v18   ;;  %v5248_v61 = vsub.f32 %v8491_v55, %v5230_v7  ;;  %v5228_v53 = vpop.permute.xlu1 %5227 }
 0x56c   :  { %v5247_v32 = vsub.f32 %v11963_v62, %v5228_v53 }
 0x56e   :  { %8378 = vset.pattern.permute.xlu1 %v8531_v11 }
 0x56f   :  { %5326 = vperm.xlu1 %8378, %v5248_v61   ;;  %8379 = vset.pattern.permute.xlu0 %v8531_v11 }
 0x572   :  { %v5234_v28 = vpop.permute.xlu0 %5233 }
 0x573   :  { %v5232_v21 = vpop.permute.xlu1 %5231  ;;  %5321 = vperm.xlu1 %8378, %v5247_v32   ;;  %v5250_v35 = vsub.f32 %v8493_v22, %v5234_v28 }
 0x574   :  { %v5249_v0 = vsub.f32 %v11976_v31, %v5232_v21 }
 0x576   :  { %5331 = vperm.xlu0 %8379, %v5249_v0  }
 0x577   :  { %5336 = vperm.xlu1 %8378, %v5250_v35  }
 0x57a   :  { %5597 = vrot.lane.b32.xlu0 %v11926_v9, %s8532_s21 }
 0x57b   :  { %5595 = vrot.lane.b32.xlu1 %v11932_v26, %s8532_s21 }
 0x57e   :  { %5601 = vrot.lane.b32.xlu0 %v11944_v25, %s8532_s21 }
 0x57f   :  { %5599 = vrot.lane.b32.xlu1 %v11950_v14, %s8532_s21 }
 0x582   :  { %5605 = vrot.lane.b32.xlu0 %v8491_v55, %s8532_s21 }
 0x583   :  { %5603 = vrot.lane.b32.xlu1 %v11963_v62, %s8532_s21  ;;  %v5259_v8 = vpop.permute.xlu0 %5258 }
 0x584   :  { %v5254_v34 = vpop.permute.xlu1 %5253  ;;  %v5292_v56 = vmul.f32 %v5259_v8, %v11772_v58  ;;  %v5821_v27 = vmul.f32 %v5259_v8, %v11830_v51 }
 0x585   :  { %v5291_v55 = vmul.f32 %v5254_v34, %v11775_v59  ;;  %v5820_v36 = vmul.f32 %v5254_v34, %v11833_v40 }
 0x586   :  { %5609 = vrot.lane.b32.xlu0 %v8493_v22, %s8532_s21 }
 0x587   :  { %5607 = vrot.lane.b32.xlu1 %v11976_v31, %s8532_s21  ;;  %v5264_v19 = vpop.permute.xlu0 %5263 }
 0x588   :  { %v5269_v54 = vpop.permute.xlu1 %5268  ;;  %v5293_v28 = vmul.f32 %v5264_v19, %v11789_v45  ;;  %v5822_v34 = vmul.f32 %v5264_v19, %v11846_v50 }
 0x589   :  { %v5294_v24 = vmul.f32 %v5269_v54, %v11787_v17  ;;  %v5823_v23 = vmul.f32 %v5269_v54, %v11843_v4 }
 0x58b   :  { %v5279_v2 = vpop.permute.xlu0 %5278 }
 0x58c   :  { %v11995_v60 = vpop.permute.xlu1 %5273 }
 0x5dc   :  { %v5307_v42 = vpop.permute.xlu1 %5306 }
 0x5dd   :  { %v11999_v5 = vadd.f32 %v5307_v42, %v5292_v56  ;;  %v12001_v13 = vadd.f32 %v5821_v27, %v5307_v42 }
 0x5df   :  { %v12004_v16 = vmul.f32 0.70710677, %v11999_v5  ;;  %v12007_v15 = vmul.f32 0.70710677, %v12001_v13 }
 0x5e0   :  { %v5302_v30 = vpop.permute.xlu1 %5301 }
 0x5e1   :  { %v12012_v58 = vand.u32 2147483647, %v12004_v16  ;;  %v12015_v51 = vand.u32 2147483647, %v12007_v15  ;;  %v12017_v48 = vadd.f32 %v5302_v30, %v5291_v55  ;;  %v12019_v47 = vadd.f32 %v5820_v36, %v5302_v30 }
 0x5e2   :  { %vm5364_vm7 = vcmp.ge.f32.partialorder %v12004_v16, 0.0  ;;  %vm5853_vm14 = vcmp.ge.f32.partialorder %v12007_v15, 0.0 }
 0x5e3   :  { %v5388_v52 = vmul.f32 0.3275911, %v12012_v58  ;;  %v5877_v22 = vmul.f32 0.3275911, %v12015_v51  ;;  %v12024_v59 = vmul.f32 0.70710677, %v12017_v48 }
 0x5e4   :  { %v12027_v40 = vmul.f32 0.70710677, %v12019_v47  ;;  %v5317_v41 = vpop.permute.xlu1 %5316  ;;  %v12153_v15 = vmul.f32 0.5, %v12019_v47 }
 0x5e5   :  { %v5396_v18 = vadd.f32 1.0, %v5388_v52  ;;  %v5885_v38 = vadd.f32 1.0, %v5877_v22  ;;  %v12030_v1 = vand.u32 2147483647, %v12024_v59  ;;  %v12039_v12 = vadd.f32 %v5317_v41, %v5294_v24  ;;  %v5312_v32 = vpop.permute.xlu0 %5311 }
 0x5e6   :  { %v12033_v11 = vand.u32 2147483647, %v12027_v40  ;;  %v12043_v7 = vadd.f32 %v5823_v23, %v5317_v41  ;;  %v12063_v8 = vadd.f32 %v5312_v32, %v5293_v28  ;;  %v12070_v55 = vadd.f32 %v5822_v34, %v5312_v32 }
 0x5e7   :  { %8399 = vrcp.f32 %v5396_v18  ;;  %v5387_v20 = vmul.f32 0.3275911, %v12030_v1  ;;  %v12046_v53 = vmul.f32 0.70710677, %v12039_v12  ;;  %v12087_v24 = vmul.f32 %v5279_v2, %v11857_v63 }
 0x5e8   :  { %8401 = vrcp.f32 %v5885_v38  ;;  %v5876_v6 = vmul.f32 0.3275911, %v12033_v11  ;;  %13503 = vst [vmem:[#allocation6_spill] sm:$0xff] %v12043_v7  ;;  %v12049_v17 = vmul.f32 0.70710677, %v12043_v7  ;;  %13505 = vst [vmem:[#allocation19_spill] sm:$0xff] %v12070_v55  ;;  %v12084_v38 = vmul.f32 %v5279_v2, %v11801_v37 }
 0x5e9   :  { %v12041_v44 = vpop.permute.xlu1 %5288  ;;  %v5395_v43 = vadd.f32 1.0, %v5387_v20  ;;  %v12052_v4 = vand.u32 2147483647, %v12046_v53  ;;  %v12076_v50 = vmul.f32 0.70710677, %v12063_v8  ;;  %v5492_v28 = vsub.f32 0.0, %v12012_v58 }
 0x5ea   :  { %v5884_v61 = vadd.f32 1.0, %v5876_v6  ;;  %13504 = vst [vmem:[#allocation7_spill] sm:$0xff] %v12049_v17  ;;  %v12056_v21 = vand.u32 2147483647, %v12049_v17  ;;  %v12091_v20 = vmul.f32 0.70710677, %v12070_v55 }
 0x5eb   :  { %8403 = vrcp.f32 %v5395_v43  ;;  %v5390_v35 = vmul.f32 0.3275911, %v12052_v4  ;;  %v12079_v41 = vand.u32 2147483647, %v12076_v50  ;;  %v5500_v16 = vmul.f32 %v5492_v28, %v12012_v58 }
 0x5ec   :  { %8405 = vrcp.f32 %v5884_v61  ;;  %v5879_v54 = vmul.f32 0.3275911, %v12056_v21  ;;  %13506 = vst [vmem:[#allocation25_spill] sm:$0xff] %v12091_v20  ;;  %v12099_v61 = vmul.f32 %v11995_v60, %v11803_v49  ;;  %v12108_v49 = vmul.f32 0.5, %v11999_v5 }
 0x5ed   :  { %v5398_v27 = vadd.f32 1.0, %v5390_v35  ;;  %v5389_v63 = vmul.f32 0.3275911, %v12079_v41  ;;  %vm5363_vm8 = vcmp.ge.f32.partialorder %v12024_v59, 0.0  ;;  %v12150_v55 = vmul.f32 0.5, %v12017_v48 }
 0x5ee   :  { %v12058_v0 = vpop.permute.xlu1 %5326  ;;  %v5887_v52 = vadd.f32 1.0, %v5879_v54  ;;  %v5981_v54 = vsub.f32 0.0, %v12015_v51  ;;  %vm5852_vm15 = vcmp.ge.f32.partialorder %v12027_v40, 0.0  ;;  %v13508_v7 = vmov -1.0  }
 0x5ef   :  { %8407 = vrcp.f32 %v5398_v27  ;;  %v5494_v47 = vsub.f32 0.0, %v12052_v4  ;;  %v5983_v59 = vsub.f32 0.0, %v12056_v21  ;;  %vm5366_vm4 = vcmp.ge.f32.partialorder %v12046_v53, 0.0 }
 0x5f0   :  { %8409 = vrcp.f32 %v5887_v52  ;;  %vm5365_vm3 = vcmp.ge.f32.partialorder %v12076_v50, 0.0 }
 0x5f1   :  { %v12065_v56 = vpop.eup %8399 }
 0x5f2   :  { %v12067_v42 = vpop.eup %8401  ;;  %v5420_v45 = vmul.f32 1.0614054, %v12065_v56  ;;  %v12072_v36 = vpop.permute.xlu1 %5321 }
 0x5f3   :  { %v5909_v30 = vmul.f32 1.0614054, %v12067_v42  ;;  %v12244_v50 = vadd.f32 %v12072_v36, %v12099_v61 }
 0x5f4   :  { %v6415_v19 = vadd.f32 -1.4531521, %v5420_v45  ;;  %v5397_v45 = vadd.f32 1.0, %v5389_v63 }
 0x5f5   :  { %v6440_v22 = vadd.f32 -1.4531521, %v5909_v30  ;;  %v12081_v18 = vpop.eup %8403 }
 0x5f6   :  { %v5436_v23 = vmul.f32 %v12065_v56, %v6415_v19  ;;  %v12093_v6 = vpop.permute.xlu1 %5336  ;;  %v12095_v43 = vpop.eup %8405  ;;  %v5419_v37 = vmul.f32 1.0614054, %v12081_v18  ;;  %v12112_v19 = vand.u32 2147483647, %v12091_v20  ;;  %8411 = vrcp.f32 %v5397_v45 }
 0x5f7   :  { %v5925_v32 = vmul.f32 %v12067_v42, %v6440_v22  ;;  %v5908_v35 = vmul.f32 1.0614054, %v12095_v43  ;;  %v5989_v45 = vmul.f32 %v5981_v54, %v12015_v51  ;;  %v5980_v51 = vsub.f32 0.0, %v12033_v11 }
 0x5f8   :  { %v5444_v2 = vadd.f32 1.4214138, %v5436_v23  ;;  %v6414_v27 = vadd.f32 -1.4531521, %v5419_v37  ;;  %v12117_v23 = vmul.f32 0.5, %v12001_v13  ;;  %v12871_v13 = vmov -1.0  }
 0x5f9   :  { %v5933_v34 = vadd.f32 1.4214138, %v5925_v32  ;;  %v6439_v30 = vadd.f32 -1.4531521, %v5908_v35  ;;  %v5491_v32 = vsub.f32 0.0, %v12030_v1  ;;  %v12127_v63 = vpop.eup %8407  ;;  %v12130_v35 = vsel %vm5364_vm7, 1.0, %v12871_v13 }
 0x5fa   :  { %v12114_v22 = vpop.permute.xlu1 %5595  ;;  %v5435_v52 = vmul.f32 %v12081_v18, %v6414_v27  ;;  %v5452_v5 = vmul.f32 %v12065_v56, %v5444_v2  ;;  %v12136_v2 = vmul.f32 %v11995_v60, %v11860_v46  ;;  %v5422_v28 = vmul.f32 1.0614054, %v12127_v63 }
 0x5fb   :  { %13507 = vst [vmem:[#allocation8_spill] sm:$0xff] %v12114_v22  ;;  %7504 = vmatprep.mubr.msk.f32.mxu0 %vm251_vm5, %v12114_v22  ;;  %v5924_v37 = vmul.f32 %v12095_v43, %v6439_v30  ;;  %v5941_v27 = vmul.f32 %v12067_v42, %v5933_v34  ;;  %v5878_v30 = vmul.f32 0.3275911, %v12112_v19  ;;  %v12143_v29 = vsel %vm5853_vm14, 1.0, %v12871_v13  ;;  %v12155_v13 = vpop.eup %8409 }
 0x5fc   :  { %v5443_v10 = vadd.f32 1.4214138, %v5435_v52  ;;  %v6423_v54 = vadd.f32 -0.28449672, %v5452_v5  ;;  %v5509_v52 = vmul.f32 1.442695, %v5500_v16  ;;  %v5499_v46 = vmul.f32 %v5491_v32, %v12030_v1 }
 0x5fd   :  { %v5932_v58 = vadd.f32 1.4214138, %v5924_v37  ;;  %v6417_v60 = vadd.f32 -1.4531521, %v5422_v28  ;;  %v6448_v37 = vadd.f32 -0.28449672, %v5941_v27  ;;  %v5988_v48 = vmul.f32 %v5980_v51, %v12033_v11 }
 0x5fe   :  { %v5451_v34 = vmul.f32 %v12081_v18, %v5443_v10  ;;  %v5998_v22 = vmul.f32 1.442695, %v5989_v45  ;;  %v5886_v16 = vadd.f32 1.0, %v5878_v30  ;;  %v12163_v1 = vsel %vm5363_vm8, 1.0, %v13508_v7 }
 0x5ff   :  { %v5940_v10 = vmul.f32 %v12095_v43, %v5932_v58  ;;  %v5438_v5 = vmul.f32 %v12127_v63, %v6417_v60  ;;  %v5468_v27 = vmul.f32 %v12065_v56, %v6423_v54  ;;  %8413 = vpow2.f32 %v5509_v52 }
 0x600   :  { %v6422_v32 = vadd.f32 -0.28449672, %v5451_v34  ;;  %v5507_v45 = vmul.f32 1.442695, %v5499_v46  ;;  %v12168_v20 = vpop.eup %8411  ;;  %v5957_v58 = vmul.f32 %v12067_v42, %v6448_v37  ;;  %8415 = vpow2.f32 %v5998_v22 }
 0x601   :  { %v5446_v28 = vadd.f32 1.4214138, %v5438_v5  ;;  %v5911_v30 = vmul.f32 1.0614054, %v12155_v13  ;;  %v6447_v60 = vadd.f32 -0.28449672, %v5940_v10  ;;  %8417 = vrcp.f32 %v5886_v16 }
 0x602   :  { %v5421_v34 = vmul.f32 1.0614054, %v12168_v20  ;;  %v12176_v11 = vadd.f32 %v12058_v0, %v12084_v38  ;;  %v5467_v51 = vmul.f32 %v12081_v18, %v6422_v32  ;;  %v12182_v54 = vsel %vm5852_vm15, 1.0, %v13508_v7 }
 0x603   :  { %v5996_v22 = vmul.f32 1.442695, %v5988_v48  ;;  %v5502_v52 = vmul.f32 %v5494_v47, %v12052_v4  ;;  %v5476_v46 = vadd.f32 0.2548296, %v5468_v27  ;;  %8419 = vpow2.f32 %v5507_v45 }
 0x604   :  { %v5454_v37 = vmul.f32 %v12127_v63, %v5446_v28  ;;  %v6416_v10 = vadd.f32 -1.4531521, %v5421_v34  ;;  %v5965_v5 = vadd.f32 0.2548296, %v5957_v58  ;;  %v5991_v38 = vmul.f32 %v5983_v59, %v12056_v21 }
 0x605   :  { %v5493_v16 = vsub.f32 0.0, %v12079_v41  ;;  %v5956_v32 = vmul.f32 %v12095_v43, %v6447_v60  ;;  %v6442_v40 = vadd.f32 -1.4531521, %v5911_v30  ;;  %v12192_v48 = vmul.f32 0.70710677, %v12176_v11 }
 0x606   :  { %v5437_v17 = vmul.f32 %v12168_v20, %v6416_v10  ;;  %v5475_v4 = vadd.f32 0.2548296, %v5467_v51  ;;  %8421 = vpow2.f32 %v5996_v22  ;;  %v12195_v47 = vmul.f32 0.5, %v12039_v12 }
 0x607   :  { %v5513_v27 = vmul.f32 1.442695, %v5502_v52  ;;  %v5484_v53 = vmul.f32 %v12065_v56, %v5476_v46  ;;  %v12199_v21 = vsel %vm5366_vm4, 1.0, %v13508_v7  ;;  %v6425_v45 = vadd.f32 -0.28449672, %v5454_v37 }
 0x608   :  { %v12203_v28 = vmul.f32 %v12041_v44, %v11815_v33  ;;  %v5973_v58 = vmul.f32 %v12067_v42, %v5965_v5  ;;  %v6002_v30 = vmul.f32 1.442695, %v5991_v38  ;;  %v5445_v59 = vadd.f32 1.4214138, %v5437_v17 }
 0x609   :  { %v12208_v60 = vmul.f32 %v12041_v44, %v11871_v39  ;;  %v8414_v12 = vpop.eup %8413  ;;  %v5964_v34 = vadd.f32 0.2548296, %v5956_v32  ;;  %v5927_v56 = vmul.f32 %v12155_v13, %v6442_v40  ;;  %v5501_v51 = vmul.f32 %v5493_v16, %v12079_v41  ;;  %v5284_v40 = vpop.permute.xlu0 %5283 }
 0x60a   :  { %v12213_v22 = vand.u32 2147483647, %v12192_v48  ;;  %v8416_v52 = vpop.eup %8415  ;;  %v5483_v33 = vmul.f32 %v12081_v18, %v5475_v4  ;;  %8423 = vpow2.f32 %v5513_v27  ;;  %v5982_v17 = vsub.f32 0.0, %v12112_v19 }
 0x60b   :  { %v12218_v42 = vpop.eup %8417  ;;  %v5524_v39 = vmul.f32 %v8414_v12, %v5484_v53  ;;  %v5470_v44 = vmul.f32 %v12127_v63, %v6425_v45  ;;  %v12224_v41 = vadd.f32 %v12087_v24, %v12058_v0  ;;  %v6013_v37 = vmul.f32 %v8416_v52, %v5973_v58 }
 0x60c   :  { %v5392_v46 = vmul.f32 0.3275911, %v12213_v22  ;;  %8425 = vpow2.f32 %v6002_v30  ;;  %v12227_v18 = vmul.f32 0.5, %v12063_v8  ;;  %v5453_v10 = vmul.f32 %v12168_v20, %v5445_v59 }
 0x60d   :  { %v8420_v5 = vpop.eup %8419  ;;  %v5972_v38 = vmul.f32 %v12095_v43, %v5964_v34  ;;  %v5935_v16 = vadd.f32 1.4214138, %v5927_v56  ;;  %v5511_v32 = vmul.f32 1.442695, %v5501_v51  ;;  %v12234_v0 = vsel %vm5365_vm3, 1.0, %v13508_v7 }
 0x60e   :  { %v5400_v4 = vadd.f32 1.0, %v5392_v46  ;;  %v5523_v27 = vmul.f32 %v8420_v5, %v5483_v33  ;;  %v5910_v24 = vmul.f32 1.0614054, %v12218_v42  ;;  %v5990_v8 = vmul.f32 %v5982_v17, %v12112_v19 }
 0x60f   :  { %v5532_v53 = vsub.f32 1.0, %v5524_v39  ;;  %v5478_v45 = vadd.f32 0.2548296, %v5470_v44  ;;  %v12239_v58 = vmul.f32 0.70710677, %v12224_v41  ;;  %v6021_v30 = vsub.f32 1.0, %v6013_v37 }
 0x610   :  { %8427 = vrcp.f32 %v5400_v4  ;;  %v8422_v43 = vpop.eup %8421  ;;  %v6424_v59 = vadd.f32 -0.28449672, %v5453_v10  ;;  %v5297_v12 = vmul.f32 %v5284_v40, %v11817_v3  ;;  %v5943_v56 = vmul.f32 %v12155_v13, %v5935_v16 }
 0x611   :  { %v6012_v34 = vmul.f32 %v8422_v43, %v5972_v38  ;;  %8429 = vpow2.f32 %v5511_v32  ;;  %v12248_v19 = vand.u32 2147483647, %v12239_v58  ;;  %v5531_v51 = vsub.f32 1.0, %v5523_v27 }
 0x612   :  { %v6441_v52 = vadd.f32 -1.4531521, %v5910_v24  ;;  %v6000_v33 = vmul.f32 1.442695, %v5990_v8  ;;  %v5826_v17 = vmul.f32 %v5284_v40, %v11874_v57  ;;  %v5540_v39 = vmul.f32 %v5532_v53, %v12130_v35  ;;  %v5332_v57 = vpop.permute.xlu0 %5331 }
 0x613   :  { %v5486_v3 = vmul.f32 %v12127_v63, %v5478_v45  ;;  %v12254_v44 = vmul.f32 0.5, %v12176_v11  ;;  %v5881_v61 = vmul.f32 0.3275911, %v12248_v19  ;;  %v6029_v37 = vmul.f32 %v6021_v30, %v12143_v29 }
 0x614   :  { %v8424_v46 = vpop.eup %8423  ;;  %v5469_v10 = vmul.f32 %v12168_v20, %v6424_v59  ;;  %vm5368_vm2 = vcmp.ge.f32.partialorder %v12192_v48, 0.0  ;;  %v12261_v5 = vmul.f32 0.70710677, %v12244_v50  ;;  %v6020_v38 = vsub.f32 1.0, %v6012_v34 }
 0x615   :  { %v6450_v35 = vadd.f32 -0.28449672, %v5943_v56  ;;  %v5889_v16 = vadd.f32 1.0, %v5881_v61  ;;  %v12265_v63 = vadd.f32 %v12136_v2, %v12072_v36  ;;  %v5539_v32 = vmul.f32 %v5531_v51, %v12163_v1 }
 0x616   :  { %v12267_v11 = vpop.eup %8425  ;;  %v5926_v29 = vmul.f32 %v12218_v42, %v6441_v52  ;;  %8431 = vpow2.f32 %v6000_v33  ;;  %v5383_v40 = vand.u32 2147483647, %v12261_v5  ;;  %v5548_v4 = vadd.f32 1.0, %v5540_v39 }
 0x617   :  { %v5526_v27 = vmul.f32 %v8424_v46, %v5486_v3  ;;  %8433 = vrcp.f32 %v5889_v16  ;;  %v12272_v24 = vadd.f32 %v5332_v57, %v5297_v12  ;;  %v5477_v8 = vadd.f32 0.2548296, %v5469_v10 }
 0x618   :  { %v12277_v36 = vsel %vm5368_vm2, 1.0, %v13508_v7  ;;  %v5496_v2 = vsub.f32 0.0, %v12213_v22  ;;  %v5391_v53 = vmul.f32 0.3275911, %v5383_v40  ;;  %v6037_v45 = vadd.f32 1.0, %v6029_v37 }
 0x619   :  { %v6028_v43 = vmul.f32 %v6020_v38, %v12182_v54  ;;  %v5959_v30 = vmul.f32 %v12155_v13, %v6450_v35  ;;  %v12285_v59 = vmul.f32 0.70710677, %v12265_v63  ;;  %v5547_v12 = vadd.f32 1.0, %v5539_v32 }
 0x61a   :  { %v12280_v1 = vpop.eup %8427  ;;  %v5934_v34 = vadd.f32 1.4214138, %v5926_v29  ;;  %v5399_v48 = vadd.f32 1.0, %v5391_v53  ;;  %v12289_v52 = vmul.f32 %v5548_v4, %v12108_v49  ;;  %v5534_v33 = vsub.f32 1.0, %v5526_v27 }
 0x61b   :  { %v5424_v56 = vmul.f32 1.0614054, %v12280_v1  ;;  %v8430_v51 = vpop.eup %8429  ;;  %v12292_v39 = vand.u32 2147483647, %v12285_v59  ;;  %v12295_v54 = vmul.f32 0.70710677, %v12272_v24  ;;  %v5485_v3 = vmul.f32 %v12168_v20, %v5477_v8 }
 0x61c   :  { %v5504_v46 = vmul.f32 %v5496_v2, %v12213_v22  ;;  %8435 = vrcp.f32 %v5399_v48  ;;  %v12300_v37 = vmul.f32 %v6037_v45, %v12117_v23  ;;  %v12302_v10 = vadd.f32 0.2548296, %v5959_v30 }
 0x61d   :  { %v6419_v61 = vadd.f32 -1.4531521, %v5424_v56  ;;  %v5985_v49 = vsub.f32 0.0, %v12248_v19  ;;  %v5880_v38 = vmul.f32 0.3275911, %v12292_v39  ;;  %v12307_v35 = vmul.f32 %v5547_v12, %v12150_v55 }
 0x61e   :  { %v6036_v16 = vadd.f32 1.0, %v6028_v43  ;;  %v5942_v32 = vmul.f32 %v12218_v42, %v5934_v34  ;;  %v5542_v22 = vmul.f32 %v5534_v33, %v12199_v21  ;;  %v12313_v23 = vand.u32 2147483647, %v12295_v54 }
 0x61f   :  { %v5440_v20 = vmul.f32 %v12280_v1, %v6419_v61  ;;  %v5888_v29 = vadd.f32 1.0, %v5880_v38  ;;  %v12315_v4 = vadd.f32 %v5826_v17, %v5332_v57  ;;  %v5525_v8 = vmul.f32 %v8430_v51, %v5485_v3 }
 0x620   :  { %v12317_v27 = vpop.eup %8431  ;;  %v5517_v53 = vmul.f32 1.442695, %v5504_v46  ;;  %v12321_v55 = vadd.f32 %v12208_v60, %v12093_v6  ;;  %v5993_v43 = vmul.f32 %v5985_v49, %v12248_v19  ;;  %v5495_v21 = vsub.f32 0.0, %v5383_v40 }
 0x621   :  { %13509 = vst [vmem:[#allocation10_spill] sm:$0xff] %v12315_v4  ;;  %v5448_v2 = vadd.f32 1.4214138, %v5440_v20  ;;  %v12323_v45 = vpop.eup %8433  ;;  %8437 = vrcp.f32 %v5888_v29  ;;  %v5393_v30 = vmul.f32 0.3275911, %v12313_v23  ;;  %v12334_v34 = vadd.f32 %v12093_v6, %v12203_v28 }
 0x622   :  { %13510 = vst [vmem:[#allocation11_spill] sm:$0xff] %v12321_v55  ;;  %v5913_v57 = vmul.f32 1.0614054, %v12323_v45  ;;  %v12330_v12 = vmul.f32 0.70710677, %v12315_v4  ;;  %v5550_v60 = vadd.f32 1.0, %v5542_v22  ;;  %8439 = vpow2.f32 %v5517_v53 }
 0x623   :  { %v5456_v17 = vmul.f32 %v12280_v1, %v5448_v2  ;;  %v6449_v56 = vadd.f32 -0.28449672, %v5942_v32  ;;  %v12337_v48 = vmul.f32 0.5, %v12224_v41  ;;  %v5401_v19 = vadd.f32 1.0, %v5393_v30 }
 0x624   :  { %v5533_v51 = vsub.f32 1.0, %v5525_v8  ;;  %v6444_v3 = vadd.f32 -1.4531521, %v5913_v57  ;;  %v6006_v61 = vmul.f32 1.442695, %v5993_v43  ;;  %v5503_v46 = vmul.f32 %v5495_v21, %v5383_v40 }
 0x625   :  { %v6427_v33 = vadd.f32 -0.28449672, %v5456_v17  ;;  %8441 = vrcp.f32 %v5401_v19  ;;  %v12340_v49 = vand.u32 2147483647, %v12330_v12  ;;  %v5984_v41 = vsub.f32 0.0, %v12292_v39 }
 0x626   :  { %v12342_v38 = vpop.eup %8435  ;;  %v5929_v28 = vmul.f32 %v12323_v45, %v6444_v3  ;;  %v12348_v32 = vmul.f32 0.70710677, %v12334_v34  ;;  %v12351_v20 = vmul.f32 %v6036_v16, %v12153_v15  ;;  %v12356_v29 = vmul.f32 0.70710677, %v12321_v55 }
 0x627   :  { %v5472_v6 = vmul.f32 %v12280_v1, %v6427_v33  ;;  %v5423_v40 = vmul.f32 1.0614054, %v12342_v38  ;;  %v5882_v22 = vmul.f32 0.3275911, %v12340_v49  ;;  %v5958_v8 = vmul.f32 %v12218_v42, %v6449_v56 }
 0x628   :  { %vm5857_vm12 = vcmp.ge.f32.partialorder %v12239_v58, 0.0  ;;  %v5937_v53 = vadd.f32 1.4214138, %v5929_v28  ;;  %v5541_v43 = vmul.f32 %v5533_v51, %v12234_v0  ;;  %8443 = vpow2.f32 %v6006_v61 }
 0x629   :  { %v5480_v2 = vadd.f32 0.2548296, %v5472_v6  ;;  %v6418_v21 = vadd.f32 -1.4531521, %v5423_v40  ;;  %v5890_v30 = vadd.f32 1.0, %v5882_v22  ;;  %v5992_v17 = vmul.f32 %v5984_v41, %v12292_v39 }
 0x62a   :  { %v5945_v15 = vmul.f32 %v12323_v45, %v5937_v53  ;;  %v5515_v16 = vmul.f32 1.442695, %v5503_v46  ;;  %v12364_v57 = vand.u32 2147483647, %v12348_v32  ;;  %v5497_v33 = vsub.f32 0.0, %v12313_v23 }
 0x62b   :  { %v12366_v19 = vpop.eup %8437  ;;  %v5439_v56 = vmul.f32 %v12342_v38, %v6418_v21  ;;  %8445 = vrcp.f32 %v5890_v30  ;;  %v12371_v0 = vand.u32 2147483647, %v12356_v29  ;;  %v5488_v51 = vmul.f32 %v12280_v1, %v5480_v2 }
 0x62c   :  { %v6452_v3 = vadd.f32 -0.28449672, %v5945_v15  ;;  %v5912_v61 = vmul.f32 1.0614054, %v12366_v19  ;;  %v5394_v39 = vmul.f32 0.3275911, %v12364_v57  ;;  %v8440_v40 = vpop.eup %8439  ;;  %8447 = vpow2.f32 %v5515_v16 }
 0x62d   :  { %v5549_v46 = vadd.f32 1.0, %v5541_v43  ;;  %v12379_v6 = vsel %vm5857_vm12, 1.0, %v13508_v7  ;;  %v5447_v28 = vadd.f32 1.4214138, %v5439_v56  ;;  %v5883_v41 = vmul.f32 0.3275911, %v12371_v0 }
 0x62e   :  { %v5961_v22 = vmul.f32 %v12323_v45, %v6452_v3  ;;  %v6443_v53 = vadd.f32 -1.4531521, %v5912_v61  ;;  %v5402_v1 = vadd.f32 1.0, %v5394_v39  ;;  %v5558_v21 = vmul.f32 %v5550_v60, %v12195_v47 }
 0x62f   :  { %v12383_v2 = vpop.eup %8441  ;;  %v5455_v43 = vmul.f32 %v12342_v38, %v5447_v28  ;;  %v6004_v30 = vmul.f32 1.442695, %v5992_v17  ;;  %v5505_v58 = vmul.f32 %v5497_v33, %v12313_v23  ;;  %v5528_v15 = vmul.f32 %v8440_v40, %v5488_v51 }
 0x630   :  { %v5969_v55 = vadd.f32 0.2548296, %v5961_v22  ;;  %v5928_v56 = vmul.f32 %v12366_v19, %v6443_v53  ;;  %v5425_v4 = vmul.f32 1.0614054, %v12383_v2  ;;  %v5557_v3 = vmul.f32 %v5549_v46, %v12227_v18 }
 0x631   :  { %v6426_v16 = vadd.f32 -0.28449672, %v5455_v43  ;;  %8449 = vrcp.f32 %v5402_v1  ;;  %v5891_v61 = vadd.f32 1.0, %v5883_v41  ;;  %v12391_v39 = vadd.f32 0.2548296, %v5958_v8 }
 0x632   :  { %v5977_v47 = vmul.f32 %v12323_v45, %v5969_v55  ;;  %v5936_v60 = vadd.f32 1.4214138, %v5928_v56  ;;  %v6420_v28 = vadd.f32 -1.4531521, %v5425_v4  ;;  %v8444_v17 = vpop.eup %8443  ;;  %8451 = vpow2.f32 %v6004_v30 }
 0x633   :  { %v5471_v23 = vmul.f32 %v12342_v38, %v6426_v16  ;;  %v5519_v33 = vmul.f32 1.442695, %v5505_v58  ;;  %v8020_v51 = vpack.c.bf16 %v12289_v52, %v12307_v35  ;;  %v5536_v40 = vsub.f32 1.0, %v5528_v15 }
 0x634   :  { %v6017_v22 = vmul.f32 %v8444_v17, %v5977_v47  ;;  %v5944_v18 = vmul.f32 %v12366_v19, %v5936_v60  ;;  %v5441_v46 = vmul.f32 %v12383_v2, %v6420_v28  ;;  %8453 = vrcp.f32 %v5891_v61 }
 0x635   :  { %v12399_v8 = vpop.eup %8445  ;;  %v5479_v41 = vadd.f32 0.2548296, %v5471_v23  ;;  %8021 = vmatprep.subr.bf16.mxu0 %v8020_v51  ;;  %v8024_v4 = vpack.c.bf16 %v5558_v21, %v5557_v3  ;;  %v12403_v55 = vpack.c.bf16 %v12300_v37, %v12351_v20  ;;  %v5351_v45 = vmul.f32 0.5, %v12244_v50 }
 0x636   :  { %vm5367_vm9 = vcmp.ge.f32.partialorder %v12261_v5, 0.0  ;;  %v6451_v52 = vadd.f32 -0.28449672, %v5944_v18  ;;  %v5449_v35 = vadd.f32 1.4214138, %v5441_v46  ;;  %8023 = vmatpush3.bf16.msra.mxu0 %v8020_v51  ;;  %v5498_v43 = vsub.f32 0.0, %v12364_v57  ;;  %v8448_v30 = vpop.eup %8447 }
 0x637   :  { %v5487_v53 = vmul.f32 %v12342_v38, %v5479_v41  ;;  %v5914_v1 = vmul.f32 1.0614054, %v12399_v8  ;;  %8025 = vmatprep.subr.bf16.mxu0 %v8024_v4  ;;  %8455 = vpow2.f32 %v5519_v33  ;;  %v5986_v50 = vsub.f32 0.0, %v12340_v49 }
 0x638   :  { %v5960_v21 = vmul.f32 %v12366_v19, %v6451_v52  ;;  %v5457_v37 = vmul.f32 %v12383_v2, %v5449_v35  ;;  %v8534_v20 = vmov 94   ;;  %v5544_v58 = vmul.f32 %v5536_v40, %v12277_v36 }
 0x639   :  { %8380 = vset.pattern.permute.xlu1 %v8534_v20  ;;  %8381 = vset.pattern.permute.xlu0 %v8534_v20  ;;  %v6025_v15 = vsub.f32 1.0, %v6017_v22  ;;  %v5527_v38 = vmul.f32 %v8448_v30, %v5487_v53  ;;  %v6445_v56 = vadd.f32 -1.4531521, %v5914_v1  ;;  %v5375_v3 = vsel %vm5367_vm9, 1.0, %v13508_v7 }
 0x63a   :  { %5564 = vperm.xlu1 %8380, %v11932_v26   ;;  %5568 = vperm.xlu0 %8381, %v11926_v9   ;;  %vm5856_vm13 = vcmp.ge.f32.partialorder %v12285_v59, 0.0  ;;  %v5968_v16 = vadd.f32 0.2548296, %v5960_v21  ;;  %v6428_v61 = vadd.f32 -0.28449672, %v5457_v37  ;;  %v5506_v28 = vmul.f32 %v5498_v43, %v12364_v57 }
 0x63b   :  { %8027 = vmatpush3.bf16.msra.mxu0 %v8024_v4  ;;  %v12420_v47 = vpop.eup %8449  ;;  %v5535_v60 = vsub.f32 1.0, %v5527_v38  ;;  %v5930_v36 = vmul.f32 %v12399_v8, %v6445_v56  ;;  %v5987_v26 = vsub.f32 0.0, %v12371_v0  ;;  %v5994_v5 = vmul.f32 %v5986_v50, %v12340_v49 }
 0x63c   :  { %v5976_v9 = vmul.f32 %v12366_v19, %v5968_v16  ;;  %v5473_v17 = vmul.f32 %v12383_v2, %v6428_v61  ;;  %v5426_v23 = vmul.f32 1.0614054, %v12420_v47  ;;  %v8452_v33 = vpop.eup %8451  ;;  %v5552_v51 = vadd.f32 1.0, %v5544_v58 }
 0x63d   :  { %v6033_v40 = vmul.f32 %v6025_v15, %v12379_v6  ;;  %v5543_v22 = vmul.f32 %v5535_v60, %v5375_v3  ;;  %v5938_v18 = vadd.f32 1.4214138, %v5930_v36  ;;  %v5864_v57 = vsel %vm5856_vm13, 1.0, %v13508_v7 }
 0x63e   :  { %5572 = vperm.xlu1 %8380, %v11950_v14   ;;  %5580 = vperm.xlu0 %8381, %v11963_v62   ;;  %v6016_v19 = vmul.f32 %v8452_v33, %v5976_v9  ;;  %v5481_v46 = vadd.f32 0.2548296, %v5473_v17  ;;  %v6421_v41 = vadd.f32 -1.4531521, %v5426_v23  ;;  %v12435_v49 = vpop.eup %8453  ;;  %v5521_v35 = vmul.f32 1.442695, %v5506_v28 }
 0x63f   :  { %v5551_v4 = vadd.f32 1.0, %v5543_v22  ;;  %v5946_v52 = vmul.f32 %v12399_v8, %v5938_v18  ;;  %v5995_v6 = vmul.f32 %v5987_v26, %v12371_v0  ;;  %v5915_v1 = vmul.f32 1.0614054, %v12435_v49  ;;  %v8496_v9 = vld [vmem:[%s12533_s5 + $0x38] sm:$0xff]  ;;  %v13511_v33 = vld [vmem:[#allocation7_spill] sm:$0xff] }
 0x640   :  { %v6024_v53 = vsub.f32 1.0, %v6016_v19  ;;  %v5489_v14 = vmul.f32 %v12383_v2, %v5481_v46  ;;  %v5442_v62 = vmul.f32 %v12420_v47, %v6421_v41  ;;  %v5560_v59 = vmul.f32 %v5552_v51, %v12254_v44 }
 0x641   :  { %v6041_v43 = vadd.f32 1.0, %v6033_v40  ;;  %v5559_v30 = vmul.f32 %v5551_v4, %v5351_v45  ;;  %v6008_v21 = vmul.f32 1.442695, %v5994_v5  ;;  %v8456_v37 = vpop.eup %8455  ;;  %v6453_v20 = vadd.f32 -0.28449672, %v5946_v52 }
 0x642   :  { %5576 = vperm.xlu1 %8380, %v11944_v25   ;;  %5588 = vperm.xlu0 %8381, %v11976_v31   ;;  %v6032_v50 = vmul.f32 %v6024_v53, %v5864_v57  ;;  %v5450_v0 = vadd.f32 1.4214138, %v5442_v62  ;;  %v6446_v58 = vadd.f32 -1.4531521, %v5915_v1  ;;  %v5840_v2 = vmul.f32 0.5, %v12265_v63  ;;  %v8495_v63 = vld [vmem:[%s12533_s5 + $0x28] sm:$0xff] }
 0x643   :  { %8457 = vpow2.f32 %v5521_v35  ;;  %v6010_v15 = vmul.f32 1.442695, %v5995_v6  ;;  %v8028_v38 = vpack.c.bf16 %v5560_v59, %v5559_v30  ;;  %v5529_v3 = vmul.f32 %v8456_v37, %v5489_v14 }
 0x644   :  { %v6040_v56 = vadd.f32 1.0, %v6032_v50  ;;  %v5458_v44 = vmul.f32 %v12420_v47, %v5450_v0  ;;  %v5931_v45 = vmul.f32 %v12435_v49, %v6446_v58  ;;  %v5975_v25 = vmul.f32 %v12155_v13, %v12302_v10  ;;  %v5598_v58 = vpop.permute.xlu0 %5597 }
 0x645   :  { %v5974_v31 = vmul.f32 %v12218_v42, %v12391_v39  ;;  %v6049_v16 = vmul.f32 %v6041_v43, %v12337_v48  ;;  %8459 = vpow2.f32 %v6008_v21  ;;  %8029 = vmatprep.subr.bf16.mxu0 %v8028_v38  ;;  %v5962_v60 = vmul.f32 %v12399_v8, %v6453_v20 }
 0x646   :  { %5584 = vperm.xlu1 %8380, %v8495_v63   ;;  %v6048_v61 = vmul.f32 %v6040_v56, %v5840_v2  ;;  %v6429_v36 = vadd.f32 -0.28449672, %v5458_v44  ;;  %v5939_v28 = vadd.f32 1.4214138, %v5931_v45  ;;  %8031 = vmatpush3.bf16.msra.mxu0 %v8028_v38  ;;  %vm5369_vm11 = vcmp.ge.f32.partialorder %v12295_v54, 0.0  ;;  %v13513_v38 = vld [vmem:[#allocation6_spill] sm:$0xff]  ;;  %v5600_v45 = vpop.permute.xlu1 %5599 }
 0x647   :  { %8461 = vpow2.f32 %v6010_v15  ;;  %v5537_v13 = vsub.f32 1.0, %v5529_v3  ;;  %v6015_v39 = vmul.f32 %v12267_v11, %v5975_v25  ;;  %v6014_v26 = vmul.f32 %v12317_v27, %v5974_v31  ;;  %v13512_v27 = vld [vmem:[#allocation25_spill] sm:$0xff] }
 0x648   :  { %v5474_v42 = vmul.f32 %v12420_v47, %v6429_v36  ;;  %v5947_v10 = vmul.f32 %v12435_v49, %v5939_v28  ;;  %v12460_v48 = vpack.c.bf16 %v6049_v16, %v6048_v61  ;;  %v5970_v17 = vadd.f32 0.2548296, %v5962_v60  ;;  %v5602_v61 = vpop.permute.xlu0 %5601 }
 0x649   :  { %v5377_v23 = vsel %vm5369_vm11, 1.0, %v13508_v7  ;;  %vm5855_vm6 = vcmp.ge.f32.partialorder %v13511_v33, 0.0  ;;  %v6023_v18 = vsub.f32 1.0, %v6015_v39  ;;  %vm5854_vm1 = vcmp.ge.f32.partialorder %v13512_v27, 0.0 }
 0x64a   :  { %5592 = vperm.xlu1 %8380, %v8496_v9   ;;  %v5482_v5 = vadd.f32 0.2548296, %v5474_v42  ;;  %v6454_v54 = vadd.f32 -0.28449672, %v5947_v10  ;;  %v5545_v51 = vmul.f32 %v5537_v13, %v5377_v23  ;;  %v6022_v57 = vsub.f32 1.0, %v6014_v26  ;;  %v5604_v28 = vpop.permute.xlu1 %5603  ;;  %v13516_v42 = vld [vmem:[#allocation11_spill] sm:$0xff] }
 0x64b   :  { %v5978_v19 = vmul.f32 %v12399_v8, %v5970_v17  ;;  %vm5370_vm10 = vcmp.ge.f32.partialorder %v12348_v32, 0.0  ;;  %v5863_v52 = vsel %vm5855_vm6, 1.0, %v13508_v7  ;;  %v5862_v35 = vsel %vm5854_vm1, 1.0, %v13508_v7 }
 0x64c   :  { %v5490_v40 = vmul.f32 %v12420_v47, %v5482_v5  ;;  %v5963_v22 = vmul.f32 %v12435_v49, %v6454_v54  ;;  %v5553_v6 = vadd.f32 1.0, %v5545_v51  ;;  %v6031_v62 = vmul.f32 %v6023_v18, %v5863_v52  ;;  %v5606_v39 = vpop.permute.xlu0 %5605  ;;  %v13517_v54 = vld [vmem:[#allocation8_spill] sm:$0xff] }
 0x64d   :  { %v8458_v11 = vpop.eup %8457  ;;  %v6030_v1 = vmul.f32 %v6022_v57, %v5862_v35  ;;  %v5378_v59 = vsel %vm5370_vm10, 1.0, %v13508_v7  ;;  %v5353_v8 = vmul.f32 0.5, %v12272_v24  ;;  %v5354_v37 = vmul.f32 0.5, %v12334_v34  ;;  %v13514_v24 = vld [vmem:[#allocation19_spill] sm:$0xff] }
 0x64e   :  { %v5530_v46 = vmul.f32 %v8458_v11, %v5490_v40  ;;  %v5971_v41 = vadd.f32 0.2548296, %v5963_v22  ;;  %v6039_v20 = vadd.f32 1.0, %v6031_v62  ;;  %vm5858_vm7 = vcmp.ge.f32.partialorder %v12330_v12, 0.0  ;;  %v5608_v17 = vpop.permute.xlu1 %5607 }
 0x64f   :  { %v8460_v4 = vpop.eup %8459  ;;  %v5561_v21 = vmul.f32 %v5553_v6, %v5353_v8  ;;  %v6038_v0 = vadd.f32 1.0, %v6030_v1  ;;  %vm5859_vm14 = vcmp.ge.f32.partialorder %v12356_v29, 0.0  ;;  %v5839_v56 = vmul.f32 0.5, %v13513_v38 }
 0x650   :  { %v5538_v47 = vsub.f32 1.0, %v5530_v46  ;;  %v5979_v53 = vmul.f32 %v12435_v49, %v5971_v41  ;;  %v6018_v43 = vmul.f32 %v8460_v4, %v5978_v19  ;;  %v5838_v3 = vmul.f32 0.5, %v13514_v24  ;;  %v5610_v5 = vpop.permute.xlu0 %5609 }
 0x651   :  { %v8462_v14 = vpop.eup %8461  ;;  %v5866_v25 = vsel %vm5858_vm7, 1.0, %v13508_v7  ;;  %v5867_v34 = vsel %vm5859_vm14, 1.0, %v13508_v7  ;;  %v6047_v31 = vmul.f32 %v6039_v20, %v5839_v56  ;;  %v13515_v7 = vld [vmem:[#allocation10_spill] sm:$0xff]  ;;  %v5843_v10 = vmul.f32 0.5, %v13516_v42 }
 0x652   :  { %v5546_v32 = vmul.f32 %v5538_v47, %v5378_v59  ;;  %v6019_v30 = vmul.f32 %v8462_v14, %v5979_v53  ;;  %v6026_v49 = vsub.f32 1.0, %v6018_v43  ;;  %v6046_v16 = vmul.f32 %v6038_v0, %v5838_v3 }
 0x653   :  { %v5842_v13 = vmul.f32 0.5, %v13515_v7  ;;  %v8535_v23 = vmov 64   ;;  %v13518_v43 = vmov 0.0|0.0   ;;  %v13519_v7 = vmov 0.0  }
 0x654   :  { %v5554_v50 = vadd.f32 1.0, %v5546_v32  ;;  %v6027_v15 = vsub.f32 1.0, %v6019_v30  ;;  %v6034_v63 = vmul.f32 %v6026_v49, %v5866_v25  ;;  %v8052_v36 = vpack.c.bf16 %v6047_v31, %v6046_v16  ;;  %8382 = vset.pattern.permute.xlu0 %v8535_v23 }
 0x656   :  { %v5562_v2 = vmul.f32 %v5554_v50, %v5354_v37  ;;  %v6035_v12 = vmul.f32 %v6027_v15, %v5867_v34  ;;  %v6042_v29 = vadd.f32 1.0, %v6034_v63 }
 0x658   :  { %v8032_v44 = vpack.c.bf16 %v5562_v2, %v5561_v21  ;;  %v6043_v60 = vadd.f32 1.0, %v6035_v12  ;;  %v6050_v26 = vmul.f32 %v6042_v29, %v5842_v13 }
 0x65a   :  { %8033 = vmatprep.subr.bf16.mxu0 %v8032_v44  ;;  %v6051_v9 = vmul.f32 %v6043_v60, %v5843_v10 }
 0x65b   :  { %8035 = vmatpush3.bf16.msra.mxu0 %v8032_v44 }
 0x65c   :  { %8049 = vmatprep.subr.bf16.mxu0 %v12403_v55 }
 0x65e   :  { %7505 = vmatmul.mubr.msk.f32.vlgmr.msra.gmra.mrb[12].mxu0 %vm251_vm5, %v5598_v58 }
 0x65f   :  { %8051 = vmatpush3.bf16.msra.mxu0 %v12403_v55  ;;  %7507 = vmatprep.mubr.msk.f32.mxu0 %vm251_vm5, %v5600_v45  ;;  %v8060_v55 = vpack.c.bf16 %v6051_v9, %v6050_v26 }
 0x660   :  { %8053 = vmatprep.subr.bf16.mxu0 %v8052_v36 }
 0x662   :  { %7508 = vmatmul.mubr.msk.f32.gmra.mrb[14].mxu0 %vm251_vm5, %v5602_v61 }
 0x663   :  { %8055 = vmatpush3.bf16.msra.mxu0 %v8052_v36  ;;  %7510 = vmatprep.mubr.msk.f32.mxu0 %vm251_vm5, %v5604_v28 }
 0x664   :  { %8057 = vmatprep.subr.bf16.mxu0 %v12460_v48 }
 0x666   :  { %7511 = vmatmul.mubr.msk.f32.gmra.mrb[16].mxu0 %vm251_vm5, %v5606_v39 }
 0x667   :  { %8059 = vmatpush3.bf16.msra.mxu0 %v12460_v48  ;;  %7513 = vmatprep.mubr.msk.f32.mxu0 %vm251_vm5, %v5608_v17  ;;  %v12511_v48 = vld [vmem:[%s12539_s6] sm:$0x3] }
 0x668   :  { %8061 = vmatprep.subr.bf16.mxu0 %v8060_v55  ;;  %5742 = vperm.xlu0 %8382, %v12511_v48  }
 0x66a   :  { %7514 = vmatmul.mubr.msk.f32.gmra.mrb[18].mxu0 %vm251_vm5, %v5610_v5 }
 0x66b   :  { %8063 = vmatpush3.bf16.msra.mxu0 %v8060_v55  ;;  %7551 = vmatprep.mubr.msk.f32.mxu0 %vm251_vm5, %v13517_v54 }
 0x66e   :  { %7552 = vmatmul.mubr.msk.f32.vlgmr.msra.gmra.mrb[20].mxu0 %vm251_vm5, %v5598_v58 }
 0x66f   :  { %7554 = vmatprep.mubr.msk.f32.mxu0 %vm251_vm5, %v5600_v45 }
 0x672   :  { %7555 = vmatmul.mubr.msk.f32.gmra.mrb[22].mxu0 %vm251_vm5, %v5602_v61 }
 0x673   :  { %7557 = vmatprep.mubr.msk.f32.mxu0 %vm251_vm5, %v5604_v28 }
 0x676   :  { %7558 = vmatmul.mubr.msk.f32.gmra.mrb[24].mxu0 %vm251_vm5, %v5606_v39 }
 0x677   :  { %7560 = vmatprep.mubr.msk.f32.mxu0 %vm251_vm5, %v5608_v17 }
 0x67a   :  { %7561 = vmatmul.mubr.msk.f32.gmra.mrb[26].mxu0 %vm251_vm5, %v5610_v5 }
 0x6b9   :  { %v5565_v33 = vpop.permute.xlu1 %5564  ;;  %v5569_v40 = vpop.permute.xlu0 %5568 }
 0x6bd   :  { %v5573_v51 = vpop.permute.xlu1 %5572  ;;  %v5581_v53 = vpop.permute.xlu0 %5580 }
 0x6c1   :  { %v5577_v22 = vpop.permute.xlu1 %5576  ;;  %v5589_v0 = vpop.permute.xlu0 %5588 }
 0x6c5   :  { %v5585_v35 = vpop.permute.xlu1 %5584 }
 0x6c9   :  { %v5593_v37 = vpop.permute.xlu1 %5592 }
 0x731   :  { %v7506_v11 = vpop.f32.mrb[12].mxu0 }
 0x732   :  { %v5699_v18 = vadd.f32 %v7506_v11, %v5569_v40  ;;  %v5693_v27 = vpop.f32.mrb[13].mxu0 }
 0x733   :  { %v5694_v57 = vadd.f32 %v5693_v27, %v5565_v33 }
 0x734   :  { %v5733_v19 = vmax.f32 %v5699_v18, 0.0 }
 0x735   :  { %v5732_v46 = vmax.f32 %v5694_v57, 0.0  ;;  %v7509_v41 = vpop.f32.mrb[14].mxu0 }
 0x736   :  { %v5709_v4 = vadd.f32 %v7509_v41, %v5577_v22  ;;  %v5703_v52 = vpop.f32.mrb[15].mxu0 }
 0x737   :  { %v8037_v6 = vpack.c.bf16 %v5733_v19, %v5732_v46  ;;  %v5704_v47 = vadd.f32 %v5703_v52, %v5573_v51 }
 0x738   :  { %v5735_v14 = vmax.f32 %v5709_v4, 0.0 }
 0x739   :  { %v5734_v62 = vmax.f32 %v5704_v47, 0.0  ;;  %v7512_v1 = vpop.f32.mrb[16].mxu0  ;;  %8038 = vmatpush3.bf16.msra.mxu1 %v8037_v6 }
 0x73a   :  { %v5719_v59 = vadd.f32 %v7512_v1, %v5585_v35  ;;  %v5713_v8 = vpop.f32.mrb[17].mxu0  ;;  %8039 = vmatprep.subr.bf16.mxu1 %v13518_v43 }
 0x73b   :  { %v8040_v32 = vpack.c.bf16 %v5735_v14, %v5734_v62  ;;  %v5714_v30 = vadd.f32 %v5713_v8, %v5581_v53 }
 0x73c   :  { %v5737_v21 = vmax.f32 %v5719_v59, 0.0 }
 0x73d   :  { %v5736_v50 = vmax.f32 %v5714_v30, 0.0  ;;  %v7515_v20 = vpop.f32.mrb[18].mxu0  ;;  %8041 = vmatpush3.bf16.msra.mxu1 %v8040_v32 }
 0x73e   :  { %v5729_v58 = vadd.f32 %v7515_v20, %v5593_v37  ;;  %v5723_v49 = vpop.f32.mrb[19].mxu0  ;;  %8042 = vmatprep.subr.bf16.mxu1 %v13518_v43 }
 0x73f   :  { %v8043_v2 = vpack.c.bf16 %v5737_v21, %v5736_v50  ;;  %v5724_v15 = vadd.f32 %v5723_v49, %v5589_v0 }
 0x740   :  { %v5739_v38 = vmax.f32 %v5729_v58, 0.0 }
 0x741   :  { %v5738_v56 = vmax.f32 %v5724_v15, 0.0  ;;  %8044 = vmatpush3.bf16.msra.mxu1 %v8043_v2  ;;  %v7553_v24 = vpop.f32.mrb[20].mxu0 }
 0x742   :  { %v6124_v3 = vadd.f32 %v7553_v24, %v5569_v40  ;;  %v6118_v44 = vpop.f32.mrb[21].mxu0  ;;  %8045 = vmatprep.subr.bf16.mxu1 %v13518_v43 }
 0x743   :  { %v8046_v45 = vpack.c.bf16 %v5739_v38, %v5738_v56  ;;  %v6119_v25 = vadd.f32 %v6118_v44, %v5565_v33 }
 0x744   :  { %v6158_v34 = vmax.f32 %v6124_v3, 0.0 }
 0x745   :  { %v6157_v31 = vmax.f32 %v6119_v25, 0.0  ;;  %8047 = vmatpush3.bf16.msra.mxu1 %v8046_v45  ;;  %v7556_v16 = vpop.f32.mrb[22].mxu0 }
 0x746   :  { %v6134_v63 = vadd.f32 %v7556_v16, %v5577_v22  ;;  %v6128_v12 = vpop.f32.mrb[23].mxu0  ;;  %8064 = vmatprep.subr.bf16.mxu1 %v13518_v43  ;;  %v5743_v22 = vpop.permute.xlu0 %5742 }
 0x747   :  { %v8065_v61 = vpack.c.bf16 %v6158_v34, %v6157_v31  ;;  %v6129_v29 = vadd.f32 %v6128_v12, %v5573_v51 }
 0x748   :  { %v6160_v60 = vmax.f32 %v6134_v63, 0.0  ;;  %7533 = vmatmul.mubr.msk.f32.vlgmr.msra.gmra.mrb[16].mxu1 %vm251_vm5, %v12511_v48 }
 0x749   :  { %v6159_v36 = vmax.f32 %v6129_v29, 0.0  ;;  %v7559_v28 = vpop.f32.mrb[24].mxu0  ;;  %8066 = vmatpush3.bf16.msra.mxu1 %v8065_v61  ;;  %7579 = vmatprep.mubr.msk.f32.mxu1 %vm8500_vm0, %v13519_v7  ;;  %vm5818_vm0 = vcmask 508928  }
 0x74a   :  { %v6144_v13 = vadd.f32 %v7559_v28, %v5585_v35  ;;  %v6138_v42 = vpop.f32.mrb[25].mxu0  ;;  %8067 = vmatprep.subr.bf16.mxu1 %v13518_v43 }
 0x74b   :  { %v8068_v10 = vpack.c.bf16 %v6160_v60, %v6159_v36  ;;  %v6139_v39 = vadd.f32 %v6138_v42, %v5581_v53 }
 0x74c   :  { %v6162_v26 = vmax.f32 %v6144_v13, 0.0 }
 0x74d   :  { %v6161_v9 = vmax.f32 %v6139_v39, 0.0  ;;  %v7562_v17 = vpop.f32.mrb[26].mxu0  ;;  %8069 = vmatpush3.bf16.msra.mxu1 %v8068_v10 }
 0x74e   :  { %v6154_v55 = vadd.f32 %v7562_v17, %v5593_v37  ;;  %v6148_v5 = vpop.f32.mrb[27].mxu0  ;;  %8070 = vmatprep.subr.bf16.mxu1 %v13518_v43 }
 0x74f   :  { %v8071_v54 = vpack.c.bf16 %v6162_v26, %v6161_v9  ;;  %v6149_v23 = vadd.f32 %v6148_v5, %v5589_v0 }
 0x750   :  { %v6164_v33 = vmax.f32 %v6154_v55, 0.0 }
 0x751   :  { %v6163_v51 = vmax.f32 %v6149_v23, 0.0  ;;  %8072 = vmatpush3.bf16.msra.mxu1 %v8071_v54 }
 0x752   :  { %8073 = vmatprep.subr.bf16.mxu1 %v13518_v43 }
 0x753   :  { %v8074_v40 = vpack.c.bf16 %v6164_v33, %v6163_v51 }
 0x755   :  { %8075 = vmatpush3.bf16.msra.mxu1 %v8074_v40 }
 0x758   :  { %7580 = vmatmul.mubr.msk.f32.vlgmr.msra.gmra.mrb[18].mxu1 %vm251_vm5, %v12511_v48 }
 0x81b   :  { %v5813_v11 = vpop.f32.mrb[16].mxu1 }
 0x81c   :  { %v7534_v18 = vpop.f32.mrb[17].mxu1  ;;  %v5814_v27 = vadd.f32 %v5813_v11, %v5743_v22 }
 0x81e   :  { %v5817_v57 = vmax.f32 %v5814_v27, 0.0 }
 0x820   :  { %5819 = vst.msk [vmem:[%s12540_s7] sm:$0x3] %vm5818_vm0, %v5817_v57 }
 0x82b   :  { %v6231_v19 = vpop.f32.mrb[18].mxu1 }
 0x82c   :  { %v6232_v46 = vadd.f32 %v6231_v19, %v5743_v22  ;;  %v7581_v41 = vpop.f32.mrb[19].mxu1 }
 0x82e   :  { %v6235_v4 = vmax.f32 %v6232_v46, 0.0 }
 0x830   :  { %6236 = vst.msk [vmem:[%s12540_s7 + $0x2] sm:$0x3] %vm5818_vm0, %v6235_v4 }

</bundles_post_ra>
